<compile_context>
chip_gen: v6e
topology: v6e:2x2x1
jax: 0.10.0
libtpu: 0.0.40
codegen_flags: <defaults>
</compile_context>

<pallas_src>
import functools

import jax
import jax.numpy as jnp
from jax import lax
from jax.experimental import pallas as pl
from jax.experimental.pallas import tpu as pltpu


# ---------------------------------------------------------------------------
# Fused Pallas kernel: conv3x3+ReLU -> conv3x3+ReLU over pre-padded inputs
# ---------------------------------------------------------------------------
def _unet_up_kernel(up_ref, lf_ref, w1a_ref, w1b_ref, b1_ref, w2_ref, b2_ref,
                    o_ref, mbuf, *, H, W):
    """All refs use a flat 'pitched' spatial layout: flat = y*(W+2) + x, where
    (y, x) indexes the zero-padded (H+2, W+2) image (plus one spare row).

    up_ref : ((H+3)*(W+2), c_up)  bf16  upsampled 1x1-conv output, zero halo
    lf_ref : ((H+3)*(W+2), c_lf)  bf16  skip feature, zero halo
    w1a/w1b: (3, 3, c_up|c_lf, c_out) bf16  conv1 weight split by input group
    w2     : (3, 3, c_out, c_out)     bf16  conv2 weight
    b1/b2  : (1, c_out) f32
    o_ref  : (H*(W+2), c_out) f32   pitched output slab (junk cols stripped
                                    by the wrapper)
    mbuf   : ((H+3)*(W+2), c_out) bf16 VMEM zero-halo buffer (conv1 -> conv2)
    """
    P = W + 2                      # row pitch of the padded layout
    L = H * P                      # pitched output-slab length
    c_out = o_ref.shape[-1]
    T = mbuf.shape[0]

    # Re-zero only the tiny halo strips the per-step store below never touches
    # (top halo row + left halo of row 1, and the bottom halo / spare rows).
    mbuf[0:P + 1, :] = jnp.zeros((P + 1, c_out), mbuf.dtype)
    mbuf[P + 1 + L:T, :] = jnp.zeros((T - (P + 1 + L), c_out), mbuf.dtype)

    # Valid-column mask of the pitched slab (columns W, W+1 of each row = junk).
    row = lax.broadcasted_iota(jnp.int32, (L, c_out), 0)
    valid = (row % P) < W

    def conv3x3(readers):
        """Sum of 9 tap matmuls; every tap read is a contiguous static slice."""
        acc = None
        for dy in range(3):
            for dx in range(3):
                off = dy * P + dx
                for read, w_ref in readers:
                    d = jnp.dot(read(off), w_ref[dy, dx],
                                preferred_element_type=jnp.float32)
                    acc = d if acc is None else acc + d
        return acc

    # ---- conv1: taps read straight from the padded input blocks -----------
    acc = conv3x3([(lambda off: up_ref[off:off + L, :], w1a_ref),
                   (lambda off: lf_ref[off:off + L, :], w1b_ref)])
    h1 = jnp.where(valid, jnp.maximum(acc + b1_ref[...], 0.0), 0.0)
    # One dense contiguous store: the masked junk columns land exactly on
    # mbuf's interleaved halo columns (which must be zero).
    mbuf[P + 1:P + 1 + L, :] = h1.astype(mbuf.dtype)

    # ---- conv2: same tap pattern over mbuf ---------------------------------
    acc = conv3x3([(lambda off: mbuf[off:off + L, :], w2_ref)])
    # Junk output columns stay unmasked (finite) — the wrapper slices them off.
    o_ref[...] = jnp.maximum(acc + b2_ref[...], 0.0).astype(o_ref.dtype)


# ---------------------------------------------------------------------------
# UpsamplingBilinear2d(scale_factor=2) == Upsample(bilinear, align_corners=True)
# as separable interpolation matrices; padded variants carry the conv zero halo.
# ---------------------------------------------------------------------------
def _bilinear_matrix(n_out, n_in):
    if n_in == 1:
        return jnp.ones((n_out, 1), jnp.float32)
    r = jnp.arange(n_out, dtype=jnp.float32)
    src = r * (n_in - 1) / (n_out - 1)                 # align_corners=True
    lo = jnp.clip(jnp.floor(src).astype(jnp.int32), 0, n_in - 2)
    frac = src - lo.astype(jnp.float32)
    rows = jnp.arange(n_out)
    mat = jnp.zeros((n_out, n_in), jnp.float32)
    mat = mat.at[rows, lo].add(1.0 - frac)
    mat = mat.at[rows, lo + 1].add(frac)
    return mat


def _padded_interp(n_out, n_in, pad_before, pad_after):
    core = _bilinear_matrix(n_out, n_in)
    full = jnp.zeros((pad_before + n_out + pad_after, n_in), jnp.float32)
    return full.at[pad_before:pad_before + n_out].set(core)


# ---------------------------------------------------------------------------
# Pallas-backed forward and pure-JAX reference
# ---------------------------------------------------------------------------
def unet_up_forward(high_nchw, low_nchw, params, *, out_size):
    """unetUp.forward (is_deconv=False, n_concat=2), Pallas-backed."""
    N, c_in, H0, W0 = high_nchw.shape
    _, c_lf, Hl, Wl = low_nchw.shape
    H, W = 2 * H0, 2 * W0
    P = W + 2                      # pitch: W + left/right conv halo
    L3 = (H + 3) * P               # 1 top halo + H + 1 bottom halo + 1 spare row
    L = H * P
    # TODO(synk): F.pad branch for a larger skip feature (c > 0) not implemented.
    assert (Hl, Wl) == (H, W)
    assert out_size + c_lf == c_in, "cat([up, skip]) must match conv1 in_size"

    # ---- up path (plain-JAX glue on the SMALL tensor): 1x1 conv first (it
    # commutes with the spatial-only bilinear upsample), then upsample with
    # interpolation matrices that already contain the zero conv halo.
    hf = jnp.transpose(high_nchw, (0, 2, 3, 1))                    # (N,H0,W0,c_in)
    small = jnp.einsum('nhwc,cd->nhwd', hf, params['w_up']) + params['b_up']
    R = _padded_interp(H, H0, 1, 2)                                # (H+3, H0)
    S = _padded_interp(W, W0, 1, 1)                                # (W+2, W0)
    up = jnp.einsum('rh,nhwc->nrwc', R, small)
    up = jnp.einsum('sw,nrwc->nrsc', S, up)                        # (N,H+3,W+2,out)
    up_flat = up.astype(jnp.bfloat16).reshape(N, L3, out_size)

    # ---- skip path: NHWC + the same zero halo / pitch, flattened ----------
    lf = jnp.transpose(low_nchw, (0, 2, 3, 1))
    lf = jnp.pad(lf, ((0, 0), (1, 2), (1, 1), (0, 0)))
    lf_flat = lf.astype(jnp.bfloat16).reshape(N, L3, c_lf)

    # ---- weights: split conv1 by input group so the concat never exists ----
    w1 = params['w1'].astype(jnp.bfloat16)                         # (3,3,c_in,out)
    w1a, w1b = w1[:, :, :out_size, :], w1[:, :, out_size:, :]
    w2 = params['w2'].astype(jnp.bfloat16)
    b1 = params['b1'].reshape(1, out_size)
    b2 = params['b2'].reshape(1, out_size)

    flops = 2 * N * L * 9 * (c_in * out_size + out_size * out_size)
    bytes_accessed = (N * L3 * c_in * 2                            # bf16 inputs
                      + 9 * (c_in + out_size) * out_size * 2       # bf16 weights
                      + 2 * out_size * 4                           # f32 biases
                      + N * L * out_size * 4)                      # f32 output

    kernel = functools.partial(_unet_up_kernel, H=H, W=W)
    vmem = pltpu.MemorySpace.VMEM
    out = pl.pallas_call(
        kernel,
        out_shape=jax.ShapeDtypeStruct((N, L, out_size), jnp.float32),
        grid=(N,),
        in_specs=[
            pl.BlockSpec((None, L3, out_size), lambda n: (n, 0, 0)),  # up path
            pl.BlockSpec((None, L3, c_lf), lambda n: (n, 0, 0)),      # skip
            pl.BlockSpec(memory_space=vmem),                          # w1a
            pl.BlockSpec(memory_space=vmem),                          # w1b
            pl.BlockSpec(memory_space=vmem),                          # b1
            pl.BlockSpec(memory_space=vmem),                          # w2
            pl.BlockSpec(memory_space=vmem),                          # b2
        ],
        out_specs=pl.BlockSpec((None, L, out_size), lambda n: (n, 0, 0)),
        scratch_shapes=[pltpu.VMEM((L3, out_size), jnp.bfloat16)],
        compiler_params=pltpu.CompilerParams(
            dimension_semantics=("parallel",),
            vmem_limit_bytes=48 * 1024 * 1024),
        cost_estimate=pl.CostEstimate(flops=flops, transcendentals=0,
                                      bytes_accessed=bytes_accessed),
    )(up_flat, lf_flat, w1a, w1b, b1, w2, b2)

    # Strip the 2 pitch columns and return NCHW (one fused XLA pass).
    out = out.reshape(N, H, P, out_size)[:, :, :W, :]
    return jnp.transpose(out, (0, 3, 1, 2))


def unet_up_reference(high_nchw, low_nchw, params):
    """Pure-JAX f32 reference matching the PyTorch module (module op order)."""
    _, _, H0, W0 = high_nchw.shape
    H, W = 2 * H0, 2 * W0
    hf = jnp.transpose(high_nchw, (0, 2, 3, 1))
    lf = jnp.transpose(low_nchw, (0, 2, 3, 1))
    up = jnp.einsum('rh,nhwc->nrwc', _bilinear_matrix(H, H0), hf)
    up = jnp.einsum('sw,nrwc->nrsc', _bilinear_matrix(W, W0), up)
    up = jnp.einsum('nhwc,cd->nhwd', up, params['w_up']) + params['b_up']
    x = jnp.concatenate([up, lf], axis=-1)

    def conv_relu(a, w, b):
        y = lax.conv_general_dilated(a, w, (1, 1), 'SAME',
                                     dimension_numbers=('NHWC', 'HWIO', 'NHWC'))
        return jax.nn.relu(y + b)

    y = conv_relu(x, params['w1'], params['b1'])
    y = conv_relu(y, params['w2'], params['b2'])
    return jnp.transpose(y, (0, 3, 1, 2))


def init_params(key, in_size, out_size):
    ks = jax.random.split(key, 6)

    def rnd(k, shape):
        return 0.1 * jax.random.normal(k, shape, jnp.float32)

    return dict(
        w_up=rnd(ks[0], (in_size, out_size)),        # 1x1 conv, (Cin, Cout)
        b_up=rnd(ks[1], (out_size,)),
        w1=rnd(ks[2], (3, 3, in_size, out_size)),    # HWIO
        b1=rnd(ks[3], (out_size,)),
        w2=rnd(ks[4], (3, 3, out_size, out_size)),   # HWIO
        b2=rnd(ks[5], (out_size,)),
    )


if __name__ == "__main__":
    in_size, out_size = 32, 16        # unetUp(in_size=32, out_size=16, is_deconv=False)
    N, H0, W0 = 2, 8, 8               # high feature is half resolution
    c_skip = in_size - out_size       # so cat([up, skip]) has in_size channels

    key = jax.random.PRNGKey(0)
    k_hi, k_lo, k_p = jax.random.split(key, 3)
    high_feature = jax.random.normal(k_hi, (N, in_size, H0, W0), jnp.float32)
    low_feature = jax.random.normal(k_lo, (N, c_skip, 2 * H0, 2 * W0), jnp.float32)
    params = init_params(k_p, in_size, out_size)

    fwd = jax.jit(functools.partial(unet_up_forward, out_size=out_size))
    out = jax.block_until_ready(fwd(high_feature, low_feature, params))
    ref = jax.block_until_ready(unet_up_reference(high_feature, low_feature, params))

    assert out.shape == (N, out_size, 2 * H0, 2 * W0)
    max_err = float(jnp.max(jnp.abs(out - ref)))
    assert jnp.allclose(out, ref, atol=5e-2, rtol=5e-2), f"max |err| = {max_err}"
    print("KERNEL_OK")
</pallas_src>

<mosaic_0001>
module attributes {stable_mosaic.version = 11 : i64} {
  func.func private @main(%arg0: i32) attributes {dimension_semantics = [#tpu.dimension_semantics<core_parallel>], iteration_bounds = array<i64: 2>, tpu.core_type = #tpu.core_type<sc_scalar_subcore>, window_params = []} {
    return
  }
}

module attributes {stable_mosaic.version = 11 : i64} {
  func.func private @main(%arg0: i32) attributes {dimension_semantics = [#tpu.dimension_semantics<core_parallel>], iteration_bounds = array<i64: 2>, tpu.core_type = #tpu.core_type<sc_scalar_subcore>, window_params = []} {
    return
  }
}

module attributes {stable_mosaic.version = 11 : i64} {
  func.func @_unet_up_kernel(%arg0: i32, %arg1: memref<1x342x16xbf16, #tpu.memory_space<vmem>>, %arg2: memref<1x342x16xbf16, #tpu.memory_space<vmem>>, %arg3: memref<3x3x16x16xbf16, #tpu.memory_space<vmem>>, %arg4: memref<3x3x16x16xbf16, #tpu.memory_space<vmem>>, %arg5: memref<1x16xf32, #tpu.memory_space<vmem>>, %arg6: memref<3x3x16x16xbf16, #tpu.memory_space<vmem>>, %arg7: memref<1x16xf32, #tpu.memory_space<vmem>>, %arg8: memref<1x288x16xf32, #tpu.memory_space<vmem>>, %arg9: memref<342x16xbf16, #tpu.memory_space<vmem>>) attributes {dimension_semantics = [#tpu.dimension_semantics<parallel>], iteration_bounds = array<i64: 2>, scalar_prefetch = 0 : i64, scratch_operands = 1 : i64, tpu.core_type = #tpu.core_type<tc>, window_params = [{transform_indices = @transform_0, window_bounds = array<i64: 1, 342, 16>}, {transform_indices = @transform_1, window_bounds = array<i64: 1, 342, 16>}, {pipeline_mode = #tpu.pipeline_mode<synchronous>, transform_indices = @transform_2, window_bounds = array<i64: 3, 3, 16, 16>}, {pipeline_mode = #tpu.pipeline_mode<synchronous>, transform_indices = @transform_3, window_bounds = array<i64: 3, 3, 16, 16>}, {pipeline_mode = #tpu.pipeline_mode<synchronous>, transform_indices = @transform_4, window_bounds = array<i64: 1, 16>}, {pipeline_mode = #tpu.pipeline_mode<synchronous>, transform_indices = @transform_5, window_bounds = array<i64: 3, 3, 16, 16>}, {pipeline_mode = #tpu.pipeline_mode<synchronous>, transform_indices = @transform_6, window_bounds = array<i64: 1, 16>}, {transform_indices = @transform_7, window_bounds = array<i64: 1, 288, 16>}]} {
    %cst = arith.constant 0.000000e+00 : bf16
    %0 = vector.broadcast %cst : bf16 to vector<19x16xbf16>
    %c0 = arith.constant 0 : index
    %c0_0 = arith.constant 0 : index
    %1 = vector.load %arg9[%c0, %c0_0] : memref<342x16xbf16, #tpu.memory_space<vmem>>, vector<19x16xbf16>
    tpu.vector_store %arg9[%c0, %c0_0], %0 {strides = array<i32>} : memref<342x16xbf16, #tpu.memory_space<vmem>>, vector<19x16xbf16>,
    %cst_1 = arith.constant 0.000000e+00 : bf16
    %2 = vector.broadcast %cst_1 : bf16 to vector<35x16xbf16>
    %c307 = arith.constant 307 : index
    %c0_2 = arith.constant 0 : index
    %3 = vector.load %arg9[%c307, %c0_2] : memref<342x16xbf16, #tpu.memory_space<vmem>>, vector<35x16xbf16>
    tpu.vector_store %arg9[%c307, %c0_2], %2 {strides = array<i32>} : memref<342x16xbf16, #tpu.memory_space<vmem>>, vector<35x16xbf16>,
    %4 = tpu.iota {dimensions = array<i32: 0>} : vector<288x16xi32>
    %c18_i32 = arith.constant 18 : i32
    %c0_i32 = arith.constant 0 : i32
    %5 = arith.cmpi eq, %c18_i32, %c0_i32 : i32
    %c1_i32 = arith.constant 1 : i32
    %6 = arith.select %5, %c1_i32, %c18_i32 : i32
    %7 = vector.broadcast %6 : i32 to vector<288x16xi32>
    %8 = arith.remsi %4, %7 : vector<288x16xi32>
    %c0_i32_3 = arith.constant 0 : i32
    %9 = vector.broadcast %c0_i32_3 : i32 to vector<288x16xi32>
    %10 = arith.cmpi ne, %8, %9 : vector<288x16xi32>
    %c0_i32_4 = arith.constant 0 : i32
    %11 = vector.broadcast %c0_i32_4 : i32 to vector<288x16xi32>
    %12 = arith.cmpi slt, %8, %11 : vector<288x16xi32>
    %c0_i32_5 = arith.constant 0 : i32
    %13 = arith.cmpi slt, %6, %c0_i32_5 : i32
    %14 = vector.broadcast %13 : i1 to vector<288x16xi1>
    %15 = vector.broadcast %14 : vector<288x16xi1> to vector<288x16xi1>
    %16 = arith.xori %12, %15 : vector<288x16xi1>
    %17 = arith.andi %16, %10 : vector<288x16xi1>
    %18 = vector.broadcast %6 : i32 to vector<288x16xi32>
    %19 = arith.addi %8, %18 : vector<288x16xi32>
    %20 = arith.select %17, %19, %8 : vector<288x16xi1>, vector<288x16xi32>
    %c16_i32 = arith.constant 16 : i32
    %21 = vector.broadcast %c16_i32 : i32 to vector<288x16xi32>
    %22 = arith.cmpi slt, %20, %21 : vector<288x16xi32>
    %c0_6 = arith.constant 0 : index
    %c0_7 = arith.constant 0 : index
    %c0_8 = arith.constant 0 : index
    %23 = vector.load %arg1[%c0_6, %c0_7, %c0_8] : memref<1x342x16xbf16, #tpu.memory_space<vmem>>, vector<1x288x16xbf16>
    %24 = vector.shape_cast %23 : vector<1x288x16xbf16> to vector<288x16xbf16>
    %c0_9 = arith.constant 0 : index
    %c0_10 = arith.constant 0 : index
    %c0_11 = arith.constant 0 : index
    %c0_12 = arith.constant 0 : index
    %25 = vector.load %arg3[%c0_9, %c0_10, %c0_11, %c0_12] : memref<3x3x16x16xbf16, #tpu.memory_space<vmem>>, vector<1x1x16x16xbf16>
    %26 = vector.shape_cast %25 : vector<1x1x16x16xbf16> to vector<16x16xbf16>
    %cst_13 = arith.constant dense<0.000000e+00> : vector<288x16xf32>
    %27 = tpu.matmul %24, %26, %cst_13 {dimension_numbers = #tpu.dot_dimension_numbers<[1], [0], [0], [1], [0, 0, 1, 1], [], []>} : vector<288x16xbf16>, vector<16x16xbf16>, vector<288x16xf32> -> vector<288x16xf32>
    %c0_14 = arith.constant 0 : index
    %c0_15 = arith.constant 0 : index
    %c0_16 = arith.constant 0 : index
    %28 = vector.load %arg2[%c0_14, %c0_15, %c0_16] : memref<1x342x16xbf16, #tpu.memory_space<vmem>>, vector<1x288x16xbf16>
    %29 = vector.shape_cast %28 : vector<1x288x16xbf16> to vector<288x16xbf16>
    %c0_17 = arith.constant 0 : index
    %c0_18 = arith.constant 0 : index
    %c0_19 = arith.constant 0 : index
    %c0_20 = arith.constant 0 : index
    %30 = vector.load %arg4[%c0_17, %c0_18, %c0_19, %c0_20] : memref<3x3x16x16xbf16, #tpu.memory_space<vmem>>, vector<1x1x16x16xbf16>
    %31 = vector.shape_cast %30 : vector<1x1x16x16xbf16> to vector<16x16xbf16>
    %cst_21 = arith.constant dense<0.000000e+00> : vector<288x16xf32>
    %32 = tpu.matmul %29, %31, %cst_21 {dimension_numbers = #tpu.dot_dimension_numbers<[1], [0], [0], [1], [0, 0, 1, 1], [], []>} : vector<288x16xbf16>, vector<16x16xbf16>, vector<288x16xf32> -> vector<288x16xf32>
    %33 = arith.addf %27, %32 : vector<288x16xf32>
    %c0_22 = arith.constant 0 : index
    %c1 = arith.constant 1 : index
    %c0_23 = arith.constant 0 : index
    %34 = vector.load %arg1[%c0_22, %c1, %c0_23] : memref<1x342x16xbf16, #tpu.memory_space<vmem>>, vector<1x288x16xbf16>
    %35 = vector.shape_cast %34 : vector<1x288x16xbf16> to vector<288x16xbf16>
    %c0_24 = arith.constant 0 : index
    %c1_25 = arith.constant 1 : index
    %c0_26 = arith.constant 0 : index
    %c0_27 = arith.constant 0 : index
    %36 = vector.load %arg3[%c0_24, %c1_25, %c0_26, %c0_27] : memref<3x3x16x16xbf16, #tpu.memory_space<vmem>>, vector<1x1x16x16xbf16>
    %37 = vector.shape_cast %36 : vector<1x1x16x16xbf16> to vector<16x16xbf16>
    %cst_28 = arith.constant dense<0.000000e+00> : vector<288x16xf32>
    %38 = tpu.matmul %35, %37, %cst_28 {dimension_numbers = #tpu.dot_dimension_numbers<[1], [0], [0], [1], [0, 0, 1, 1], [], []>} : vector<288x16xbf16>, vector<16x16xbf16>, vector<288x16xf32> -> vector<288x16xf32>
    %39 = arith.addf %33, %38 : vector<288x16xf32>
    %c0_29 = arith.constant 0 : index
    %c1_30 = arith.constant 1 : index
    %c0_31 = arith.constant 0 : index
    %40 = vector.load %arg2[%c0_29, %c1_30, %c0_31] : memref<1x342x16xbf16, #tpu.memory_space<vmem>>, vector<1x288x16xbf16>
    %41 = vector.shape_cast %40 : vector<1x288x16xbf16> to vector<288x16xbf16>
    %c0_32 = arith.constant 0 : index
    %c1_33 = arith.constant 1 : index
    %c0_34 = arith.constant 0 : index
    %c0_35 = arith.constant 0 : index
    %42 = vector.load %arg4[%c0_32, %c1_33, %c0_34, %c0_35] : memref<3x3x16x16xbf16, #tpu.memory_space<vmem>>, vector<1x1x16x16xbf16>
    %43 = vector.shape_cast %42 : vector<1x1x16x16xbf16> to vector<16x16xbf16>
    %cst_36 = arith.constant dense<0.000000e+00> : vector<288x16xf32>
    %44 = tpu.matmul %41, %43, %cst_36 {dimension_numbers = #tpu.dot_dimension_numbers<[1], [0], [0], [1], [0, 0, 1, 1], [], []>} : vector<288x16xbf16>, vector<16x16xbf16>, vector<288x16xf32> -> vector<288x16xf32>
    %45 = arith.addf %39, %44 : vector<288x16xf32>
    %c0_37 = arith.constant 0 : index
    %c2 = arith.constant 2 : index
    %c0_38 = arith.constant 0 : index
    %46 = vector.load %arg1[%c0_37, %c2, %c0_38] : memref<1x342x16xbf16, #tpu.memory_space<vmem>>, vector<1x288x16xbf16>
    %47 = vector.shape_cast %46 : vector<1x288x16xbf16> to vector<288x16xbf16>
    %c0_39 = arith.constant 0 : index
    %c2_40 = arith.constant 2 : index
    %c0_41 = arith.constant 0 : index
    %c0_42 = arith.constant 0 : index
    %48 = vector.load %arg3[%c0_39, %c2_40, %c0_41, %c0_42] : memref<3x3x16x16xbf16, #tpu.memory_space<vmem>>, vector<1x1x16x16xbf16>
    %49 = vector.shape_cast %48 : vector<1x1x16x16xbf16> to vector<16x16xbf16>
    %cst_43 = arith.constant dense<0.000000e+00> : vector<288x16xf32>
    %50 = tpu.matmul %47, %49, %cst_43 {dimension_numbers = #tpu.dot_dimension_numbers<[1], [0], [0], [1], [0, 0, 1, 1], [], []>} : vector<288x16xbf16>, vector<16x16xbf16>, vector<288x16xf32> -> vector<288x16xf32>
    %51 = arith.addf %45, %50 : vector<288x16xf32>
    %c0_44 = arith.constant 0 : index
    %c2_45 = arith.constant 2 : index
    %c0_46 = arith.constant 0 : index
    %52 = vector.load %arg2[%c0_44, %c2_45, %c0_46] : memref<1x342x16xbf16, #tpu.memory_space<vmem>>, vector<1x288x16xbf16>
    %53 = vector.shape_cast %52 : vector<1x288x16xbf16> to vector<288x16xbf16>
    %c0_47 = arith.constant 0 : index
    %c2_48 = arith.constant 2 : index
    %c0_49 = arith.constant 0 : index
    %c0_50 = arith.constant 0 : index
    %54 = vector.load %arg4[%c0_47, %c2_48, %c0_49, %c0_50] : memref<3x3x16x16xbf16, #tpu.memory_space<vmem>>, vector<1x1x16x16xbf16>
    %55 = vector.shape_cast %54 : vector<1x1x16x16xbf16> to vector<16x16xbf16>
    %cst_51 = arith.constant dense<0.000000e+00> : vector<288x16xf32>
    %56 = tpu.matmul %53, %55, %cst_51 {dimension_numbers = #tpu.dot_dimension_numbers<[1], [0], [0], [1], [0, 0, 1, 1], [], []>} : vector<288x16xbf16>, vector<16x16xbf16>, vector<288x16xf32> -> vector<288x16xf32>
    %57 = arith.addf %51, %56 : vector<288x16xf32>
    %c0_52 = arith.constant 0 : index
    %c18 = arith.constant 18 : index
    %c0_53 = arith.constant 0 : index
    %58 = vector.load %arg1[%c0_52, %c18, %c0_53] : memref<1x342x16xbf16, #tpu.memory_space<vmem>>, vector<1x288x16xbf16>
    %59 = vector.shape_cast %58 : vector<1x288x16xbf16> to vector<288x16xbf16>
    %c1_54 = arith.constant 1 : index
    %c0_55 = arith.constant 0 : index
    %c0_56 = arith.constant 0 : index
    %c0_57 = arith.constant 0 : index
    %60 = vector.load %arg3[%c1_54, %c0_55, %c0_56, %c0_57] : memref<3x3x16x16xbf16, #tpu.memory_space<vmem>>, vector<1x1x16x16xbf16>
    %61 = vector.shape_cast %60 : vector<1x1x16x16xbf16> to vector<16x16xbf16>
    %cst_58 = arith.constant dense<0.000000e+00> : vector<288x16xf32>
    %62 = tpu.matmul %59, %61, %cst_58 {dimension_numbers = #tpu.dot_dimension_numbers<[1], [0], [0], [1], [0, 0, 1, 1], [], []>} : vector<288x16xbf16>, vector<16x16xbf16>, vector<288x16xf32> -> vector<288x16xf32>
    %63 = arith.addf %57, %62 : vector<288x16xf32>
    %c0_59 = arith.constant 0 : index
    %c18_60 = arith.constant 18 : index
    %c0_61 = arith.constant 0 : index
    %64 = vector.load %arg2[%c0_59, %c18_60, %c0_61] : memref<1x342x16xbf16, #tpu.memory_space<vmem>>, vector<1x288x16xbf16>
    %65 = vector.shape_cast %64 : vector<1x288x16xbf16> to vector<288x16xbf16>
    %c1_62 = arith.constant 1 : index
    %c0_63 = arith.constant 0 : index
    %c0_64 = arith.constant 0 : index
    %c0_65 = arith.constant 0 : index
    %66 = vector.load %arg4[%c1_62, %c0_63, %c0_64, %c0_65] : memref<3x3x16x16xbf16, #tpu.memory_space<vmem>>, vector<1x1x16x16xbf16>
    %67 = vector.shape_cast %66 : vector<1x1x16x16xbf16> to vector<16x16xbf16>
    %cst_66 = arith.constant dense<0.000000e+00> : vector<288x16xf32>
    %68 = tpu.matmul %65, %67, %cst_66 {dimension_numbers = #tpu.dot_dimension_numbers<[1], [0], [0], [1], [0, 0, 1, 1], [], []>} : vector<288x16xbf16>, vector<16x16xbf16>, vector<288x16xf32> -> vector<288x16xf32>
    %69 = arith.addf %63, %68 : vector<288x16xf32>
    %c0_67 = arith.constant 0 : index
    %c19 = arith.constant 19 : index
    %c0_68 = arith.constant 0 : index
    %70 = vector.load %arg1[%c0_67, %c19, %c0_68] : memref<1x342x16xbf16, #tpu.memory_space<vmem>>, vector<1x288x16xbf16>
    %71 = vector.shape_cast %70 : vector<1x288x16xbf16> to vector<288x16xbf16>
    %c1_69 = arith.constant 1 : index
    %c1_70 = arith.constant 1 : index
    %c0_71 = arith.constant 0 : index
    %c0_72 = arith.constant 0 : index
    %72 = vector.load %arg3[%c1_69, %c1_70, %c0_71, %c0_72] : memref<3x3x16x16xbf16, #tpu.memory_space<vmem>>, vector<1x1x16x16xbf16>
    %73 = vector.shape_cast %72 : vector<1x1x16x16xbf16> to vector<16x16xbf16>
    %cst_73 = arith.constant dense<0.000000e+00> : vector<288x16xf32>
    %74 = tpu.matmul %71, %73, %cst_73 {dimension_numbers = #tpu.dot_dimension_numbers<[1], [0], [0], [1], [0, 0, 1, 1], [], []>} : vector<288x16xbf16>, vector<16x16xbf16>, vector<288x16xf32> -> vector<288x16xf32>
    %75 = arith.addf %69, %74 : vector<288x16xf32>
    %c0_74 = arith.constant 0 : index
    %c19_75 = arith.constant 19 : index
    %c0_76 = arith.constant 0 : index
    %76 = vector.load %arg2[%c0_74, %c19_75, %c0_76] : memref<1x342x16xbf16, #tpu.memory_space<vmem>>, vector<1x288x16xbf16>
    %77 = vector.shape_cast %76 : vector<1x288x16xbf16> to vector<288x16xbf16>
    %c1_77 = arith.constant 1 : index
    %c1_78 = arith.constant 1 : index
    %c0_79 = arith.constant 0 : index
    %c0_80 = arith.constant 0 : index
    %78 = vector.load %arg4[%c1_77, %c1_78, %c0_79, %c0_80] : memref<3x3x16x16xbf16, #tpu.memory_space<vmem>>, vector<1x1x16x16xbf16>
    %79 = vector.shape_cast %78 : vector<1x1x16x16xbf16> to vector<16x16xbf16>
    %cst_81 = arith.constant dense<0.000000e+00> : vector<288x16xf32>
    %80 = tpu.matmul %77, %79, %cst_81 {dimension_numbers = #tpu.dot_dimension_numbers<[1], [0], [0], [1], [0, 0, 1, 1], [], []>} : vector<288x16xbf16>, vector<16x16xbf16>, vector<288x16xf32> -> vector<288x16xf32>
    %81 = arith.addf %75, %80 : vector<288x16xf32>
    %c0_82 = arith.constant 0 : index
    %c20 = arith.constant 20 : index
    %c0_83 = arith.constant 0 : index
    %82 = vector.load %arg1[%c0_82, %c20, %c0_83] : memref<1x342x16xbf16, #tpu.memory_space<vmem>>, vector<1x288x16xbf16>
    %83 = vector.shape_cast %82 : vector<1x288x16xbf16> to vector<288x16xbf16>
    %c1_84 = arith.constant 1 : index
    %c2_85 = arith.constant 2 : index
    %c0_86 = arith.constant 0 : index
    %c0_87 = arith.constant 0 : index
    %84 = vector.load %arg3[%c1_84, %c2_85, %c0_86, %c0_87] : memref<3x3x16x16xbf16, #tpu.memory_space<vmem>>, vector<1x1x16x16xbf16>
    %85 = vector.shape_cast %84 : vector<1x1x16x16xbf16> to vector<16x16xbf16>
    %cst_88 = arith.constant dense<0.000000e+00> : vector<288x16xf32>
    %86 = tpu.matmul %83, %85, %cst_88 {dimension_numbers = #tpu.dot_dimension_numbers<[1], [0], [0], [1], [0, 0, 1, 1], [], []>} : vector<288x16xbf16>, vector<16x16xbf16>, vector<288x16xf32> -> vector<288x16xf32>
    %87 = arith.addf %81, %86 : vector<288x16xf32>
    %c0_89 = arith.constant 0 : index
    %c20_90 = arith.constant 20 : index
    %c0_91 = arith.constant 0 : index
    %88 = vector.load %arg2[%c0_89, %c20_90, %c0_91] : memref<1x342x16xbf16, #tpu.memory_space<vmem>>, vector<1x288x16xbf16>
    %89 = vector.shape_cast %88 : vector<1x288x16xbf16> to vector<288x16xbf16>
    %c1_92 = arith.constant 1 : index
    %c2_93 = arith.constant 2 : index
    %c0_94 = arith.constant 0 : index
    %c0_95 = arith.constant 0 : index
    %90 = vector.load %arg4[%c1_92, %c2_93, %c0_94, %c0_95] : memref<3x3x16x16xbf16, #tpu.memory_space<vmem>>, vector<1x1x16x16xbf16>
    %91 = vector.shape_cast %90 : vector<1x1x16x16xbf16> to vector<16x16xbf16>
    %cst_96 = arith.constant dense<0.000000e+00> : vector<288x16xf32>
    %92 = tpu.matmul %89, %91, %cst_96 {dimension_numbers = #tpu.dot_dimension_numbers<[1], [0], [0], [1], [0, 0, 1, 1], [], []>} : vector<288x16xbf16>, vector<16x16xbf16>, vector<288x16xf32> -> vector<288x16xf32>
    %93 = arith.addf %87, %92 : vector<288x16xf32>
    %c0_97 = arith.constant 0 : index
    %c36 = arith.constant 36 : index
    %c0_98 = arith.constant 0 : index
    %94 = vector.load %arg1[%c0_97, %c36, %c0_98] : memref<1x342x16xbf16, #tpu.memory_space<vmem>>, vector<1x288x16xbf16>
    %95 = vector.shape_cast %94 : vector<1x288x16xbf16> to vector<288x16xbf16>
    %c2_99 = arith.constant 2 : index
    %c0_100 = arith.constant 0 : index
    %c0_101 = arith.constant 0 : index
    %c0_102 = arith.constant 0 : index
    %96 = vector.load %arg3[%c2_99, %c0_100, %c0_101, %c0_102] : memref<3x3x16x16xbf16, #tpu.memory_space<vmem>>, vector<1x1x16x16xbf16>
    %97 = vector.shape_cast %96 : vector<1x1x16x16xbf16> to vector<16x16xbf16>
    %cst_103 = arith.constant dense<0.000000e+00> : vector<288x16xf32>
    %98 = tpu.matmul %95, %97, %cst_103 {dimension_numbers = #tpu.dot_dimension_numbers<[1], [0], [0], [1], [0, 0, 1, 1], [], []>} : vector<288x16xbf16>, vector<16x16xbf16>, vector<288x16xf32> -> vector<288x16xf32>
    %99 = arith.addf %93, %98 : vector<288x16xf32>
    %c0_104 = arith.constant 0 : index
    %c36_105 = arith.constant 36 : index
    %c0_106 = arith.constant 0 : index
    %100 = vector.load %arg2[%c0_104, %c36_105, %c0_106] : memref<1x342x16xbf16, #tpu.memory_space<vmem>>, vector<1x288x16xbf16>
    %101 = vector.shape_cast %100 : vector<1x288x16xbf16> to vector<288x16xbf16>
    %c2_107 = arith.constant 2 : index
    %c0_108 = arith.constant 0 : index
    %c0_109 = arith.constant 0 : index
    %c0_110 = arith.constant 0 : index
    %102 = vector.load %arg4[%c2_107, %c0_108, %c0_109, %c0_110] : memref<3x3x16x16xbf16, #tpu.memory_space<vmem>>, vector<1x1x16x16xbf16>
    %103 = vector.shape_cast %102 : vector<1x1x16x16xbf16> to vector<16x16xbf16>
    %cst_111 = arith.constant dense<0.000000e+00> : vector<288x16xf32>
    %104 = tpu.matmul %101, %103, %cst_111 {dimension_numbers = #tpu.dot_dimension_numbers<[1], [0], [0], [1], [0, 0, 1, 1], [], []>} : vector<288x16xbf16>, vector<16x16xbf16>, vector<288x16xf32> -> vector<288x16xf32>
    %105 = arith.addf %99, %104 : vector<288x16xf32>
    %c0_112 = arith.constant 0 : index
    %c37 = arith.constant 37 : index
    %c0_113 = arith.constant 0 : index
    %106 = vector.load %arg1[%c0_112, %c37, %c0_113] : memref<1x342x16xbf16, #tpu.memory_space<vmem>>, vector<1x288x16xbf16>
    %107 = vector.shape_cast %106 : vector<1x288x16xbf16> to vector<288x16xbf16>
    %c2_114 = arith.constant 2 : index
    %c1_115 = arith.constant 1 : index
    %c0_116 = arith.constant 0 : index
    %c0_117 = arith.constant 0 : index
    %108 = vector.load %arg3[%c2_114, %c1_115, %c0_116, %c0_117] : memref<3x3x16x16xbf16, #tpu.memory_space<vmem>>, vector<1x1x16x16xbf16>
    %109 = vector.shape_cast %108 : vector<1x1x16x16xbf16> to vector<16x16xbf16>
    %cst_118 = arith.constant dense<0.000000e+00> : vector<288x16xf32>
    %110 = tpu.matmul %107, %109, %cst_118 {dimension_numbers = #tpu.dot_dimension_numbers<[1], [0], [0], [1], [0, 0, 1, 1], [], []>} : vector<288x16xbf16>, vector<16x16xbf16>, vector<288x16xf32> -> vector<288x16xf32>
    %111 = arith.addf %105, %110 : vector<288x16xf32>
    %c0_119 = arith.constant 0 : index
    %c37_120 = arith.constant 37 : index
    %c0_121 = arith.constant 0 : index
    %112 = vector.load %arg2[%c0_119, %c37_120, %c0_121] : memref<1x342x16xbf16, #tpu.memory_space<vmem>>, vector<1x288x16xbf16>
    %113 = vector.shape_cast %112 : vector<1x288x16xbf16> to vector<288x16xbf16>
    %c2_122 = arith.constant 2 : index
    %c1_123 = arith.constant 1 : index
    %c0_124 = arith.constant 0 : index
    %c0_125 = arith.constant 0 : index
    %114 = vector.load %arg4[%c2_122, %c1_123, %c0_124, %c0_125] : memref<3x3x16x16xbf16, #tpu.memory_space<vmem>>, vector<1x1x16x16xbf16>
    %115 = vector.shape_cast %114 : vector<1x1x16x16xbf16> to vector<16x16xbf16>
    %cst_126 = arith.constant dense<0.000000e+00> : vector<288x16xf32>
    %116 = tpu.matmul %113, %115, %cst_126 {dimension_numbers = #tpu.dot_dimension_numbers<[1], [0], [0], [1], [0, 0, 1, 1], [], []>} : vector<288x16xbf16>, vector<16x16xbf16>, vector<288x16xf32> -> vector<288x16xf32>
    %117 = arith.addf %111, %116 : vector<288x16xf32>
    %c0_127 = arith.constant 0 : index
    %c38 = arith.constant 38 : index
    %c0_128 = arith.constant 0 : index
    %118 = vector.load %arg1[%c0_127, %c38, %c0_128] : memref<1x342x16xbf16, #tpu.memory_space<vmem>>, vector<1x288x16xbf16>
    %119 = vector.shape_cast %118 : vector<1x288x16xbf16> to vector<288x16xbf16>
    %c2_129 = arith.constant 2 : index
    %c2_130 = arith.constant 2 : index
    %c0_131 = arith.constant 0 : index
    %c0_132 = arith.constant 0 : index
    %120 = vector.load %arg3[%c2_129, %c2_130, %c0_131, %c0_132] : memref<3x3x16x16xbf16, #tpu.memory_space<vmem>>, vector<1x1x16x16xbf16>
    %121 = vector.shape_cast %120 : vector<1x1x16x16xbf16> to vector<16x16xbf16>
    %cst_133 = arith.constant dense<0.000000e+00> : vector<288x16xf32>
    %122 = tpu.matmul %119, %121, %cst_133 {dimension_numbers = #tpu.dot_dimension_numbers<[1], [0], [0], [1], [0, 0, 1, 1], [], []>} : vector<288x16xbf16>, vector<16x16xbf16>, vector<288x16xf32> -> vector<288x16xf32>
    %123 = arith.addf %117, %122 : vector<288x16xf32>
    %c0_134 = arith.constant 0 : index
    %c38_135 = arith.constant 38 : index
    %c0_136 = arith.constant 0 : index
    %124 = vector.load %arg2[%c0_134, %c38_135, %c0_136] : memref<1x342x16xbf16, #tpu.memory_space<vmem>>, vector<1x288x16xbf16>
    %125 = vector.shape_cast %124 : vector<1x288x16xbf16> to vector<288x16xbf16>
    %c2_137 = arith.constant 2 : index
    %c2_138 = arith.constant 2 : index
    %c0_139 = arith.constant 0 : index
    %c0_140 = arith.constant 0 : index
    %126 = vector.load %arg4[%c2_137, %c2_138, %c0_139, %c0_140] : memref<3x3x16x16xbf16, #tpu.memory_space<vmem>>, vector<1x1x16x16xbf16>
    %127 = vector.shape_cast %126 : vector<1x1x16x16xbf16> to vector<16x16xbf16>
    %cst_141 = arith.constant dense<0.000000e+00> : vector<288x16xf32>
    %128 = tpu.matmul %125, %127, %cst_141 {dimension_numbers = #tpu.dot_dimension_numbers<[1], [0], [0], [1], [0, 0, 1, 1], [], []>} : vector<288x16xbf16>, vector<16x16xbf16>, vector<288x16xf32> -> vector<288x16xf32>
    %129 = arith.addf %123, %128 : vector<288x16xf32>
    %c0_142 = arith.constant 0 : index
    %c0_143 = arith.constant 0 : index
    %130 = vector.load %arg5[%c0_142, %c0_143] : memref<1x16xf32, #tpu.memory_space<vmem>>, vector<1x16xf32>
    %131 = vector.broadcast %130 : vector<1x16xf32> to vector<288x16xf32>
    %132 = arith.addf %129, %131 : vector<288x16xf32>
    %cst_144 = arith.constant 0.000000e+00 : f32
    %133 = vector.broadcast %cst_144 : f32 to vector<288x16xf32>
    %134 = arith.maximumf %132, %133 : vector<288x16xf32>
    %cst_145 = arith.constant 0.000000e+00 : f32
    %135 = vector.broadcast %cst_145 : f32 to vector<288x16xf32>
    %136 = arith.select %22, %134, %135 : vector<288x16xi1>, vector<288x16xf32>
    %137 = arith.truncf %136 : vector<288x16xf32> to vector<288x16xbf16>
    %c19_146 = arith.constant 19 : index
    %c0_147 = arith.constant 0 : index
    %138 = vector.load %arg9[%c19_146, %c0_147] : memref<342x16xbf16, #tpu.memory_space<vmem>>, vector<288x16xbf16>
    tpu.vector_store %arg9[%c19_146, %c0_147], %137 {strides = array<i32>} : memref<342x16xbf16, #tpu.memory_space<vmem>>, vector<288x16xbf16>,
    %c0_148 = arith.constant 0 : index
    %c0_149 = arith.constant 0 : index
    %139 = vector.load %arg9[%c0_148, %c0_149] : memref<342x16xbf16, #tpu.memory_space<vmem>>, vector<288x16xbf16>
    %c0_150 = arith.constant 0 : index
    %c0_151 = arith.constant 0 : index
    %c0_152 = arith.constant 0 : index
    %c0_153 = arith.constant 0 : index
    %140 = vector.load %arg6[%c0_150, %c0_151, %c0_152, %c0_153] : memref<3x3x16x16xbf16, #tpu.memory_space<vmem>>, vector<1x1x16x16xbf16>
    %141 = vector.shape_cast %140 : vector<1x1x16x16xbf16> to vector<16x16xbf16>
    %cst_154 = arith.constant dense<0.000000e+00> : vector<288x16xf32>
    %142 = tpu.matmul %139, %141, %cst_154 {dimension_numbers = #tpu.dot_dimension_numbers<[1], [0], [0], [1], [0, 0, 1, 1], [], []>} : vector<288x16xbf16>, vector<16x16xbf16>, vector<288x16xf32> -> vector<288x16xf32>
    %c1_155 = arith.constant 1 : index
    %c0_156 = arith.constant 0 : index
    %143 = vector.load %arg9[%c1_155, %c0_156] : memref<342x16xbf16, #tpu.memory_space<vmem>>, vector<288x16xbf16>
    %c0_157 = arith.constant 0 : index
    %c1_158 = arith.constant 1 : index
    %c0_159 = arith.constant 0 : index
    %c0_160 = arith.constant 0 : index
    %144 = vector.load %arg6[%c0_157, %c1_158, %c0_159, %c0_160] : memref<3x3x16x16xbf16, #tpu.memory_space<vmem>>, vector<1x1x16x16xbf16>
    %145 = vector.shape_cast %144 : vector<1x1x16x16xbf16> to vector<16x16xbf16>
    %cst_161 = arith.constant dense<0.000000e+00> : vector<288x16xf32>
    %146 = tpu.matmul %143, %145, %cst_161 {dimension_numbers = #tpu.dot_dimension_numbers<[1], [0], [0], [1], [0, 0, 1, 1], [], []>} : vector<288x16xbf16>, vector<16x16xbf16>, vector<288x16xf32> -> vector<288x16xf32>
    %147 = arith.addf %142, %146 : vector<288x16xf32>
    %c2_162 = arith.constant 2 : index
    %c0_163 = arith.constant 0 : index
    %148 = vector.load %arg9[%c2_162, %c0_163] : memref<342x16xbf16, #tpu.memory_space<vmem>>, vector<288x16xbf16>
    %c0_164 = arith.constant 0 : index
    %c2_165 = arith.constant 2 : index
    %c0_166 = arith.constant 0 : index
    %c0_167 = arith.constant 0 : index
    %149 = vector.load %arg6[%c0_164, %c2_165, %c0_166, %c0_167] : memref<3x3x16x16xbf16, #tpu.memory_space<vmem>>, vector<1x1x16x16xbf16>
    %150 = vector.shape_cast %149 : vector<1x1x16x16xbf16> to vector<16x16xbf16>
    %cst_168 = arith.constant dense<0.000000e+00> : vector<288x16xf32>
    %151 = tpu.matmul %148, %150, %cst_168 {dimension_numbers = #tpu.dot_dimension_numbers<[1], [0], [0], [1], [0, 0, 1, 1], [], []>} : vector<288x16xbf16>, vector<16x16xbf16>, vector<288x16xf32> -> vector<288x16xf32>
    %152 = arith.addf %147, %151 : vector<288x16xf32>
    %c18_169 = arith.constant 18 : index
    %c0_170 = arith.constant 0 : index
    %153 = vector.load %arg9[%c18_169, %c0_170] : memref<342x16xbf16, #tpu.memory_space<vmem>>, vector<288x16xbf16>
    %c1_171 = arith.constant 1 : index
    %c0_172 = arith.constant 0 : index
    %c0_173 = arith.constant 0 : index
    %c0_174 = arith.constant 0 : index
    %154 = vector.load %arg6[%c1_171, %c0_172, %c0_173, %c0_174] : memref<3x3x16x16xbf16, #tpu.memory_space<vmem>>, vector<1x1x16x16xbf16>
    %155 = vector.shape_cast %154 : vector<1x1x16x16xbf16> to vector<16x16xbf16>
    %cst_175 = arith.constant dense<0.000000e+00> : vector<288x16xf32>
    %156 = tpu.matmul %153, %155, %cst_175 {dimension_numbers = #tpu.dot_dimension_numbers<[1], [0], [0], [1], [0, 0, 1, 1], [], []>} : vector<288x16xbf16>, vector<16x16xbf16>, vector<288x16xf32> -> vector<288x16xf32>
    %157 = arith.addf %152, %156 : vector<288x16xf32>
    %c19_176 = arith.constant 19 : index
    %c0_177 = arith.constant 0 : index
    %158 = vector.load %arg9[%c19_176, %c0_177] : memref<342x16xbf16, #tpu.memory_space<vmem>>, vector<288x16xbf16>
    %c1_178 = arith.constant 1 : index
    %c1_179 = arith.constant 1 : index
    %c0_180 = arith.constant 0 : index
    %c0_181 = arith.constant 0 : index
    %159 = vector.load %arg6[%c1_178, %c1_179, %c0_180, %c0_181] : memref<3x3x16x16xbf16, #tpu.memory_space<vmem>>, vector<1x1x16x16xbf16>
    %160 = vector.shape_cast %159 : vector<1x1x16x16xbf16> to vector<16x16xbf16>
    %cst_182 = arith.constant dense<0.000000e+00> : vector<288x16xf32>
    %161 = tpu.matmul %158, %160, %cst_182 {dimension_numbers = #tpu.dot_dimension_numbers<[1], [0], [0], [1], [0, 0, 1, 1], [], []>} : vector<288x16xbf16>, vector<16x16xbf16>, vector<288x16xf32> -> vector<288x16xf32>
    %162 = arith.addf %157, %161 : vector<288x16xf32>
    %c20_183 = arith.constant 20 : index
    %c0_184 = arith.constant 0 : index
    %163 = vector.load %arg9[%c20_183, %c0_184] : memref<342x16xbf16, #tpu.memory_space<vmem>>, vector<288x16xbf16>
    %c1_185 = arith.constant 1 : index
    %c2_186 = arith.constant 2 : index
    %c0_187 = arith.constant 0 : index
    %c0_188 = arith.constant 0 : index
    %164 = vector.load %arg6[%c1_185, %c2_186, %c0_187, %c0_188] : memref<3x3x16x16xbf16, #tpu.memory_space<vmem>>, vector<1x1x16x16xbf16>
    %165 = vector.shape_cast %164 : vector<1x1x16x16xbf16> to vector<16x16xbf16>
    %cst_189 = arith.constant dense<0.000000e+00> : vector<288x16xf32>
    %166 = tpu.matmul %163, %165, %cst_189 {dimension_numbers = #tpu.dot_dimension_numbers<[1], [0], [0], [1], [0, 0, 1, 1], [], []>} : vector<288x16xbf16>, vector<16x16xbf16>, vector<288x16xf32> -> vector<288x16xf32>
    %167 = arith.addf %162, %166 : vector<288x16xf32>
    %c36_190 = arith.constant 36 : index
    %c0_191 = arith.constant 0 : index
    %168 = vector.load %arg9[%c36_190, %c0_191] : memref<342x16xbf16, #tpu.memory_space<vmem>>, vector<288x16xbf16>
    %c2_192 = arith.constant 2 : index
    %c0_193 = arith.constant 0 : index
    %c0_194 = arith.constant 0 : index
    %c0_195 = arith.constant 0 : index
    %169 = vector.load %arg6[%c2_192, %c0_193, %c0_194, %c0_195] : memref<3x3x16x16xbf16, #tpu.memory_space<vmem>>, vector<1x1x16x16xbf16>
    %170 = vector.shape_cast %169 : vector<1x1x16x16xbf16> to vector<16x16xbf16>
    %cst_196 = arith.constant dense<0.000000e+00> : vector<288x16xf32>
    %171 = tpu.matmul %168, %170, %cst_196 {dimension_numbers = #tpu.dot_dimension_numbers<[1], [0], [0], [1], [0, 0, 1, 1], [], []>} : vector<288x16xbf16>, vector<16x16xbf16>, vector<288x16xf32> -> vector<288x16xf32>
    %172 = arith.addf %167, %171 : vector<288x16xf32>
    %c37_197 = arith.constant 37 : index
    %c0_198 = arith.constant 0 : index
    %173 = vector.load %arg9[%c37_197, %c0_198] : memref<342x16xbf16, #tpu.memory_space<vmem>>, vector<288x16xbf16>
    %c2_199 = arith.constant 2 : index
    %c1_200 = arith.constant 1 : index
    %c0_201 = arith.constant 0 : index
    %c0_202 = arith.constant 0 : index
    %174 = vector.load %arg6[%c2_199, %c1_200, %c0_201, %c0_202] : memref<3x3x16x16xbf16, #tpu.memory_space<vmem>>, vector<1x1x16x16xbf16>
    %175 = vector.shape_cast %174 : vector<1x1x16x16xbf16> to vector<16x16xbf16>
    %cst_203 = arith.constant dense<0.000000e+00> : vector<288x16xf32>
    %176 = tpu.matmul %173, %175, %cst_203 {dimension_numbers = #tpu.dot_dimension_numbers<[1], [0], [0], [1], [0, 0, 1, 1], [], []>} : vector<288x16xbf16>, vector<16x16xbf16>, vector<288x16xf32> -> vector<288x16xf32>
    %177 = arith.addf %172, %176 : vector<288x16xf32>
    %c38_204 = arith.constant 38 : index
    %c0_205 = arith.constant 0 : index
    %178 = vector.load %arg9[%c38_204, %c0_205] : memref<342x16xbf16, #tpu.memory_space<vmem>>, vector<288x16xbf16>
    %c2_206 = arith.constant 2 : index
    %c2_207 = arith.constant 2 : index
    %c0_208 = arith.constant 0 : index
    %c0_209 = arith.constant 0 : index
    %179 = vector.load %arg6[%c2_206, %c2_207, %c0_208, %c0_209] : memref<3x3x16x16xbf16, #tpu.memory_space<vmem>>, vector<1x1x16x16xbf16>
    %180 = vector.shape_cast %179 : vector<1x1x16x16xbf16> to vector<16x16xbf16>
    %cst_210 = arith.constant dense<0.000000e+00> : vector<288x16xf32>
    %181 = tpu.matmul %178, %180, %cst_210 {dimension_numbers = #tpu.dot_dimension_numbers<[1], [0], [0], [1], [0, 0, 1, 1], [], []>} : vector<288x16xbf16>, vector<16x16xbf16>, vector<288x16xf32> -> vector<288x16xf32>
    %182 = arith.addf %177, %181 : vector<288x16xf32>
    %c0_211 = arith.constant 0 : index
    %c0_212 = arith.constant 0 : index
    %183 = vector.load %arg7[%c0_211, %c0_212] : memref<1x16xf32, #tpu.memory_space<vmem>>, vector<1x16xf32>
    %184 = vector.broadcast %183 : vector<1x16xf32> to vector<288x16xf32>
    %185 = arith.addf %182, %184 : vector<288x16xf32>
    %cst_213 = arith.constant 0.000000e+00 : f32
    %186 = vector.broadcast %cst_213 : f32 to vector<288x16xf32>
    %187 = arith.maximumf %185, %186 : vector<288x16xf32>
    %c0_214 = arith.constant 0 : index
    %c0_215 = arith.constant 0 : index
    %c0_216 = arith.constant 0 : index
    %188 = vector.load %arg8[%c0_214, %c0_215, %c0_216] : memref<1x288x16xf32, #tpu.memory_space<vmem>>, vector<1x288x16xf32>
    %189 = vector.shape_cast %188 : vector<1x288x16xf32> to vector<288x16xf32>
    %190 = vector.shape_cast %187 : vector<288x16xf32> to vector<1x288x16xf32>
    tpu.vector_store %arg8[%c0_214, %c0_215, %c0_216], %190 {strides = array<i32>} : memref<1x288x16xf32, #tpu.memory_space<vmem>>, vector<1x288x16xf32>,
    return
  }
  func.func @transform_0(%arg0: i32) -> (i32, i32, i32) {
    %c0_i32 = arith.constant 0 : i32
    %c0_i32_0 = arith.constant 0 : i32
    %c0_i32_1 = arith.constant 0 : i32
    return %arg0, %c0_i32, %c0_i32_0 : i32, i32, i32
  }
  func.func @transform_1(%arg0: i32) -> (i32, i32, i32) {
    %c0_i32 = arith.constant 0 : i32
    %c0_i32_0 = arith.constant 0 : i32
    %c0_i32_1 = arith.constant 0 : i32
    return %arg0, %c0_i32, %c0_i32_0 : i32, i32, i32
  }
  func.func @transform_2(%arg0: i32) -> (i32, i32, i32, i32) {
    %c0_i32 = arith.constant 0 : i32
    %c0_i32_0 = arith.constant 0 : i32
    %c0_i32_1 = arith.constant 0 : i32
    %c0_i32_2 = arith.constant 0 : i32
    %c0_i32_3 = arith.constant 0 : i32
    return %c0_i32, %c0_i32_0, %c0_i32_1, %c0_i32_2 : i32, i32, i32, i32
  }
  func.func @transform_3(%arg0: i32) -> (i32, i32, i32, i32) {
    %c0_i32 = arith.constant 0 : i32
    %c0_i32_0 = arith.constant 0 : i32
    %c0_i32_1 = arith.constant 0 : i32
    %c0_i32_2 = arith.constant 0 : i32
    %c0_i32_3 = arith.constant 0 : i32
    return %c0_i32, %c0_i32_0, %c0_i32_1, %c0_i32_2 : i32, i32, i32, i32
  }
  func.func @transform_4(%arg0: i32) -> (i32, i32) {
    %c0_i32 = arith.constant 0 : i32
    %c0_i32_0 = arith.constant 0 : i32
    %c0_i32_1 = arith.constant 0 : i32
    return %c0_i32, %c0_i32_0 : i32, i32
  }
  func.func @transform_5(%arg0: i32) -> (i32, i32, i32, i32) {
    %c0_i32 = arith.constant 0 : i32
    %c0_i32_0 = arith.constant 0 : i32
    %c0_i32_1 = arith.constant 0 : i32
    %c0_i32_2 = arith.constant 0 : i32
    %c0_i32_3 = arith.constant 0 : i32
    return %c0_i32, %c0_i32_0, %c0_i32_1, %c0_i32_2 : i32, i32, i32, i32
  }
  func.func @transform_6(%arg0: i32) -> (i32, i32) {
    %c0_i32 = arith.constant 0 : i32
    %c0_i32_0 = arith.constant 0 : i32
    %c0_i32_1 = arith.constant 0 : i32
    return %c0_i32, %c0_i32_0 : i32, i32
  }
  func.func @transform_7(%arg0: i32) -> (i32, i32, i32) {
    %c0_i32 = arith.constant 0 : i32
    %c0_i32_0 = arith.constant 0 : i32
    %c0_i32_1 = arith.constant 0 : i32
    return %arg0, %c0_i32, %c0_i32_0 : i32, i32, i32
  }
}

</mosaic_0001>

<bundles_post_ra>
// kernel: unet_up_forward.1
= control target key start
LH: loop header
LB: loop body
LE: loop exit
PB: predicated region body
PF: predicated region fallthrough
CT: control target
= control target key end

     0   :  { %s15478_s24 = smov 0   ;;  %s21673_s0 = inlined_call_operand.vmem [shape: bf16[2,342,16], index: 0, kind: input, shape index: {}]   ;;  %s21674_s1 = inlined_call_operand.vmem [shape: bf16[2,342,16], index: 1, kind: input, shape index: {}]   ;;  %s21675_s2 = inlined_call_operand.vmem [shape: bf16[3,3,16,16], index: 2, kind: input, shape index: {}]   ;;  %s21676_s3 = inlined_call_operand.vmem [shape: bf16[3,3,16,16], index: 3, kind: input, shape index: {}]   ;;  %s21677_s4 = inlined_call_operand.vmem [shape: f32[1,16], index: 4, kind: input, shape index: {}]   ;;  %s21678_s5 = inlined_call_operand.vmem [shape: bf16[3,3,16,16], index: 5, kind: input, shape index: {}]   ;;  %s21679_s6 = inlined_call_operand.vmem [shape: f32[1,16], index: 6, kind: input, shape index: {}]   ;;  %s21680_s7 = inlined_call_operand.vmem [shape: f32[2,288,16], index: 7, kind: output, shape index: {}]  }
   0x1 LB: > { %s12608_s25 = sadd.s32 4294967295, %s15435_s24   ;;  %p12612_p0 = scmp.ge.s32.totalorder %s15435_s24, 1  ;;  %s15435_s24 = sphi %s15478_s24, %s17_s24  }
   0x2   : > { %p247_p1 = scmp.lt.s32.totalorder %s15435_s24, 3 }
   0x4   : > { %p248_p2 = pnand %p12612_p0, %p247_p1 }
   0x6   : > { %251 = sbr.rel (%p248_p2) target bundleno = 1529 (0x5f9), region = 48 }
   0xb   : > { %v15099_v0 = vld [vmem:[%s21676_s3] sm:$0xff]   ;;  %p284_p3 = scmp.lt.s32.totalorder %s12608_s25, 1  ;;  %v15122_v2 = vld [vmem:[%s21675_s2 + $0x8] sm:$0xff]   ;;  %vm21764_vm0 = vcmask 130048   ;;  %v15517_v7 = vld [vmem:[%s21675_s2 + $0x10] sm:$0xff]   ;;  %vm21759_vm2 = vcmask 1046528  }
   0xc   : > { %v15102_v1 = vld [vmem:[%s21675_s2] sm:$0xff]   ;;  %15014 = vmatprep.subr.bf16.mxu1 %v15099_v0  ;;  %13988 = vmatprep.subr.bf16.mxu0 %v15099_v0  ;;  %v15510_v5 = vld [vmem:[%s21676_s3 + $0x8] sm:$0xff]   ;;  %vm21760_vm1 = vsmask.f32 7424  ;;  %v15586_v43 = vld [vmem:[%s21676_s3 + $0x10] sm:$0xff]   ;;  %vm21751_vm4 = vcmask 1045504  }
   0xd   : > { %s22946_s25 = smov (!%p284_p3, %s12608_s25), 1  ;;  %15015 = vmatpush3.bf16.msra.mxu1 %v15099_v0  ;;  %13989 = vmatpush3.bf16.msra.mxu0 %v15099_v0  ;;  %vm21750_vm3 = vsmask.f32 6400  ;;  %vm21747_vm5 = vsmask.f32 5376  ;;  %vm21748_vm6 = vcmask 1044480  }
   0xe   : > { %s15016_s9 = smul.u32 172, %s22946_s25  ;;  %14026 = vmatprep.subr.bf16.mxu1 %v15102_v1  ;;  %14064 = vmatprep.subr.bf16.mxu0 %v15122_v2  ;;  %vm303_vm7 = vcmask 123904   ;;  %vm21761_vm8 = vsmask.f32 1280  ;;  %vm309_vm10 = vcmask 125953  }
   0xf   : > { %vm17953_vm9 = vmand %vm303_vm7, %vm21761_vm8  ;;  %vm310_vm11 = vsmask.f32 7942 }
  0x10   : > { %s15503_s12 = scalar_lea.vmem %s21674_s1, %s15016_s9  ;;  %s15543_s19 = scalar_lea.vmem %s21673_s0, %s15016_s9  ;;  %vm18007_vm12 = vmand %vm309_vm10, %vm310_vm11 }
  0x11   : > { %v15100_v3 = vld [vmem:[%s15503_s12] sm:$0xff]   ;;  %v15101_v4 = vld [vmem:[%s15503_s12 + $0x50] sm:$0xff]   ;;  %v15103_v6 = vld [vmem:[%s15503_s12 + $0x8] sm:$0xff]   ;;  %s15017_s9 = smul.u32 288, %s22946_s25 }
  0x12   : > { %13990 = vmatprep.mubr.msk.bf16.mxu0 %vm21764_vm0, %v15100_v3  ;;  %14010 = vmatprep.mubr.msk.bf16.mxu1 %vm21764_vm0, %v15101_v4  ;;  %v15104_v8 = vld [vmem:[%s15503_s12 + $0x58] sm:$0xff]   ;;  %v15105_v9 = vld [vmem:[%s15503_s12 + $0x10] sm:$0xff]   ;;  %v15106_v10 = vld [vmem:[%s15503_s12 + $0x60] sm:$0xff]  }
  0x13   : > { %13991 = vmatmul.mubr.msk.bf16.vlgmr.msra.gmra.mxu0 %vm21764_vm0, %v15103_v6  ;;  %14011 = vmatmul.mubr.msk.bf16.vlgmr.msra.gmra.mxu1 %vm21764_vm0, %v15104_v8  ;;  %v15107_v11 = vld [vmem:[%s15503_s12 + $0x18] sm:$0xff]   ;;  %v15108_v12 = vld [vmem:[%s15503_s12 + $0x68] sm:$0xff]   ;;  %v15109_v13 = vld [vmem:[%s15503_s12 + $0x20] sm:$0xff]   ;;  %s21490_s14 = scalar_lea.vmem %s21680_s7, %s15017_s9 }
  0x14   : > { %14065 = vmatpush3.bf16.msra.mxu0 %v15122_v2  ;;  %14027 = vmatpush3.bf16.msra.mxu1 %v15102_v1  ;;  %v15110_v14 = vld [vmem:[%s15503_s12 + $0x70] sm:$0xff]   ;;  %v15111_v15 = vld [vmem:[%s15503_s12 + $0x28] sm:$0xff]   ;;  %v15112_v16 = vld [vmem:[%s15503_s12 + $0x78] sm:$0xff]  }
  0x15   : > { %13994 = vmatprep.mubr.msk.bf16.mxu0 %vm21764_vm0, %v15105_v9  ;;  %14014 = vmatprep.mubr.msk.bf16.mxu1 %vm21764_vm0, %v15106_v10  ;;  %v15113_v17 = vld [vmem:[%s15503_s12 + $0x30] sm:$0xff]   ;;  %v15114_v18 = vld [vmem:[%s15503_s12 + $0x80] sm:$0xff]   ;;  %v15558_v22 = vld [vmem:[%s15543_s19 + $0x8] sm:$0xff]  }
  0x16   : > { %14102 = vmatprep.subr.bf16.mxu1 %v15510_v5  ;;  %14140 = vmatprep.subr.bf16.mxu0 %v15517_v7  ;;  %v1700_v19 = vld [vmem:[%s15543_s19] sm:$0xf]  ;;  %v15553_v20 = vld [vmem:[%s15543_s19 + $0x4] sm:$0xf]  ;;  %v15115_v23 = vld [vmem:[%s15503_s12 + $0x38] sm:$0xff]   ;;  %v1842_v30 = vshll.u32 %v15558_v22, 16 }
  0x17   : > { %v12692_v21 = vcombine.low %v1700_v19, %v15553_v20  ;;  %v15116_v24 = vld [vmem:[%s15503_s12 + $0x88] sm:$0xff]   ;;  %v15117_v26 = vld [vmem:[%s15503_s12 + $0x40] sm:$0xff]   ;;  %v15567_v31 = vld [vmem:[%s15543_s19 + $0x10] sm:$0xff]   ;;  %v1846_v39 = vshrl.u32 %v15558_v22, 16  ;;  %v2818_v50 = vrot.slane %v15558_v22, 1 }
  0x18   : > { %v15118_v27 = vld [vmem:[%s15543_s19] sm:$0xff]   ;;  %v1844_v33 = vrot.slane %v1842_v30, 1  ;;  %v15573_v34 = vld [vmem:[%s15543_s19 + $0x18] sm:$0xff]   ;;  %v15120_v35 = vld [vmem:[%s15503_s12 + $0x48] sm:$0xff]   ;;  %v1850_v37 = vshll.u32 %v15567_v31, 16  ;;  %v1854_v41 = vshrl.u32 %v15567_v31, 16 }
  0x19   : > { %v1837_v25 = vshll.u32 %v12692_v21, 16  ;;  %v1835_v28 = vshrl.u32 %v12692_v21, 16  ;;  %v15121_v36 = vld [vmem:[%s15543_s19 + $0x8] sm:$0xff]   ;;  %v15123_v38 = vld [vmem:[%s15543_s19 + $0x10] sm:$0xff]   ;;  %v1858_v42 = vshll.u32 %v15573_v34, 16  ;;  %v15590_v45 = vld [vmem:[%s15543_s19 + $0x20] sm:$0xff]  }
  0x1a   : > { %v1852_v44 = vrot.slane %v1850_v37, 1  ;;  %v1848_v46 = vor.u32 %v1846_v39, %v1844_v33  ;;  %v15597_v49 = vld [vmem:[%s15543_s19 + $0x28] sm:$0xff]   ;;  %v15126_v51 = vld [vmem:[%s15543_s19 + $0x18] sm:$0xff]   ;;  %v1866_v52 = vshll.u32 %v15590_v45, 16  ;;  %v1862_v54 = vshrl.u32 %v15573_v34, 16  ;;  %v15128_v56 = vld [vmem:[%s15543_s19 + $0x20] sm:$0xff]  }
  0x1b   : > { %13995 = vmatmul.mubr.msk.bf16.gmra.mxu0 %vm21764_vm0, %v15107_v11  ;;  %14015 = vmatmul.mubr.msk.bf16.gmra.mxu1 %vm21764_vm0, %v15108_v12  ;;  %v1839_v29 = vrot.slane %v1837_v25, 1  ;;  %v1860_v48 = vrot.slane %v1858_v42, 1  ;;  %v2820_v55 = vrot.slane %v15567_v31, 1  ;;  %v1870_v58 = vshrl.u32 %v15590_v45, 16  ;;  %v15611_v60 = vld [vmem:[%s15543_s19 + $0x30] sm:$0xff]   ;;  %v15622_v0 = vld [vmem:[%s15543_s19 + $0x38] sm:$0xff]  }
  0x1c   : > { %13998 = vmatprep.mubr.msk.bf16.mxu0 %vm21764_vm0, %v15109_v13  ;;  %14018 = vmatprep.mubr.msk.bf16.mxu1 %vm21764_vm0, %v15110_v14  ;;  %v1856_v47 = vor.u32 %v1854_v41, %v1852_v44  ;;  %v1853_v53 = vsel %vm21760_vm1, %v1848_v46, %v1852_v44  ;;  %v1874_v59 = vshll.u32 %v15597_v49, 16  ;;  %v1868_v62 = vrot.slane %v1866_v52, 1  ;;  %v15130_v3 = vld [vmem:[%s15543_s19 + $0x28] sm:$0xff]   ;;  %v15132_v6 = vld [vmem:[%s15543_s19 + $0x30] sm:$0xff]   ;;  %v15134_v21 = vld [vmem:[%s15543_s19 + $0x38] sm:$0xff]  }
  0x1d   : > { %v1840_v32 = vor.u32 %v1839_v29, %v1835_v28  ;;  %v15616_v61 = vsel %vm21759_vm2, %v2818_v50, %v2820_v55  ;;  %v1864_v63 = vor.u32 %v1862_v54, %v1860_v48  ;;  %v1882_v4 = vshll.u32 %v15611_v60, 16  ;;  %v15136_v25 = vld [vmem:[%s15543_s19 + $0x40] sm:$0xff]   ;;  %v15658_v30 = vld [vmem:[%s15543_s19 + $0x50] sm:$0xff]  }
  0x1e   : > { %v1861_v57 = vsel %vm21760_vm1, %v1856_v47, %v1860_v48  ;;  %v1872_v1 = vor.u32 %v1870_v58, %v1868_v62  ;;  %v1876_v2 = vrot.slane %v1874_v59, 1  ;;  %v1878_v8 = vshrl.u32 %v15597_v49, 16  ;;  %v2809_v37 = vld [vmem:[%s15543_s19] sm:$0xe]  ;;  %v15140_v39 = vld [vmem:[%s15543_s19 + $0x50] sm:$0xff]  }
  0x1f   : > { %v1845_v40 = vsel %vm21760_vm1, %v1840_v32, %v1844_v33  ;;  %v1886_v9 = vshrl.u32 %v15611_v60, 16  ;;  %v1890_v10 = vshll.u32 %v15622_v0, 16  ;;  %v1884_v12 = vrot.slane %v1882_v4, 1  ;;  %v15677_v47 = vld [vmem:[%s15543_s19 + $0x60] sm:$0xff]  }
  0x20   : > { %v1877_v11 = vsel %vm21760_vm1, %v1872_v1, %v1876_v2  ;;  %v2822_v13 = vrot.slane %v15573_v34, 1  ;;  %v1880_v14 = vor.u32 %v1878_v8, %v1876_v2  ;;  %v15664_v34 = vld [vmem:[%s15543_s19 + $0x58] sm:$0xff]   ;;  %v12772_v41 = vcombine.low %v2809_v37, %v15553_v20 }
  0x21   : > { %v1918_v44 = vshrl.u32 %v15658_v30, 16  ;;  %v1922_v46 = vshll.u32 %v15664_v34, 16  ;;  %v1930_v58 = vshll.u32 %v15677_v47, 16  ;;  %v2826_v22 = vrot.slane %v15597_v49, 1  ;;  %v15712_v49 = vld [vmem:[%s15543_s19 + $0x78] sm:$0xff]  }
  0x22   : > { %v2817_v48 = vrot.slane %v12772_v41, 1  ;;  %v2828_v2 = vrot.slane %v15611_v60, 1  ;;  %v2838_v37 = vrot.slane %v15664_v34, 1 }
  0x23   : > { %13999 = vmatmul.mubr.msk.bf16.gmra.mxu0 %vm21764_vm0, %v15111_v15  ;;  %14019 = vmatmul.mubr.msk.bf16.gmra.mxu1 %vm21764_vm0, %v15112_v16  ;;  %v1888_v15 = vor.u32 %v1886_v9, %v1884_v12  ;;  %v1892_v16 = vrot.slane %v1890_v10, 1  ;;  %v2830_v9 = vrot.slane %v15622_v0, 1 }
  0x24   : > { %14002 = vmatprep.mubr.msk.bf16.mxu0 %vm21764_vm0, %v15113_v17  ;;  %14022 = vmatprep.mubr.msk.bf16.mxu1 %vm21764_vm0, %v15114_v18  ;;  %v15643_v17 = vld [vmem:[%s15543_s19 + $0x48] sm:$0xff]   ;;  %v15646_v18 = vsel %vm21759_vm2, %v2820_v55, %v2822_v13  ;;  %v15685_v52 = vsel %vm21759_vm2, %v2817_v48, %v2818_v50  ;;  %v1924_v55 = vrot.slane %v1922_v46, 1  ;;  %v15144_v50 = vld [vmem:[%s15543_s19 + $0x60] sm:$0xff]   ;;  %v15715_v8 = vsel %vm21759_vm2, %v2826_v22, %v2828_v2 }
  0x25   : > { %v1906_v28 = vshll.u32 %v15643_v17, 16  ;;  %v2840_v46 = vrot.slane %v15677_v47, 1 }
  0x27   : > { %v1908_v33 = vrot.slane %v1906_v28, 1 }
  0x2b   : > { %14003 = vmatmul.mubr.msk.bf16.gmra.mxu0 %vm21764_vm0, %v15115_v23  ;;  %14023 = vmatmul.mubr.msk.bf16.gmra.mxu1 %vm21764_vm0, %v15116_v24  ;;  %v1885_v23 = vsel %vm21760_vm1, %v1880_v14, %v1884_v12  ;;  %v1894_v24 = vshrl.u32 %v15622_v0, 16  ;;  %v15725_v12 = vsel %vm21759_vm2, %v2828_v2, %v2830_v9 }
  0x2c   : > { %14006 = vmatprep.mubr.msk.bf16.mxu0 %vm21764_vm0, %v15117_v26  ;;  %14028 = vmatprep.mubr.msk.bf16.mxu1 %vm21764_vm0, %v15118_v27  ;;  %v1893_v26 = vsel %vm21760_vm1, %v1888_v15, %v1892_v16  ;;  %v1954_v15 = vshll.u32 %v15712_v49, 16 }
  0x2d   : > { %v1896_v31 = vor.u32 %v1894_v24, %v1892_v16  ;;  %v2834_v16 = vrot.slane %v15643_v17, 1 }
  0x33   : > { %14007 = vmatmul.mubr.msk.bf16.gmra.mxu0 %vm21764_vm0, %v15120_v35  ;;  %14029 = vmatmul.mubr.msk.bf16.vlgmr.msra.gmra.mxu1 %vm21764_vm0, %v15121_v36  ;;  %v15138_v35 = vld [vmem:[%s15543_s19 + $0x48] sm:$0xff]   ;;  %v1914_v36 = vshll.u32 %v15658_v30, 16 }
  0x34   : > { %14066 = vmatprep.mubr.msk.bf16.mxu0 %vm21764_vm0, %v1845_v40  ;;  %14103 = vmatpush3.bf16.msra.mxu1 %v15510_v5  ;;  %v1869_v5 = vsel %vm21760_vm1, %v1864_v63, %v1868_v62  ;;  %v1910_v40 = vshrl.u32 %v15643_v17, 16  ;;  %v1926_v62 = vshrl.u32 %v15664_v34, 16  ;;  %v1934_v63 = vshrl.u32 %v15677_v47, 16 }
  0x35   : > { %14032 = vmatprep.mubr.msk.bf16.mxu1 %vm21764_vm0, %v15123_v38  ;;  %14178 = vmatprep.subr.bf16.mxu1 %v15586_v43  ;;  %v15785_v47 = vsel %vm21759_vm2, %v2838_v37, %v2840_v46 }
  0x36   : > { %v1912_v20 = vor.u32 %v1910_v40, %v1908_v33  ;;  %v1928_v60 = vor.u32 %v1926_v62, %v1924_v55  ;;  %v1958_v40 = vshrl.u32 %v15712_v49, 16 }
  0x3b   : > { %14067 = vmatmul.mubr.msk.bf16.vlgmr.msra.gmra.mxu0 %vm21764_vm0, %v1853_v53  ;;  %14033 = vmatmul.mubr.msk.bf16.gmra.mxu1 %vm21764_vm0, %v15126_v51  ;;  %v1916_v51 = vrot.slane %v1914_v36, 1  ;;  %v2824_v53 = vrot.slane %v15590_v45, 1  ;;  %v15762_v36 = vld [vmem:[%s15503_s12 + $0x8] sm:$0xff]  }
  0x3c   : > { %14070 = vmatprep.mubr.msk.bf16.mxu0 %vm21764_vm0, %v1861_v57  ;;  %14036 = vmatprep.mubr.msk.bf16.mxu1 %vm21764_vm0, %v15128_v56  ;;  %v15690_v56 = vld [vmem:[%s15543_s19 + $0x68] sm:$0xff]   ;;  %v15142_v57 = vld [vmem:[%s15543_s19 + $0x58] sm:$0xff]  }
  0x3d   : > { %14141 = vmatpush3.bf16.msra.mxu0 %v15517_v7  ;;  %v15636_v7 = vld [vmem:[%s15543_s19 + $0x40] sm:$0xff]   ;;  %v1920_v54 = vor.u32 %v1918_v44, %v1916_v51  ;;  %v15695_v59 = vsel %vm21759_vm2, %v2822_v13, %v2824_v53  ;;  %v1917_v45 = vsel %vm21760_vm1, %v1912_v20, %v1916_v51  ;;  %v15703_v1 = vsel %vm21759_vm2, %v2824_v53, %v2826_v22 }
  0x3e   : > { %v1898_v19 = vshll.u32 %v15636_v7, 16  ;;  %v1902_v27 = vshrl.u32 %v15636_v7, 16  ;;  %v1938_v4 = vshll.u32 %v15690_v56, 16  ;;  %v2832_v13 = vrot.slane %v15636_v7, 1 }
  0x3f   : > { %v1942_v17 = vshrl.u32 %v15690_v56, 16  ;;  %v2842_v20 = vrot.slane %v15690_v56, 1 }
  0x40   : > { %v1900_v29 = vrot.slane %v1898_v19, 1  ;;  %v1940_v0 = vrot.slane %v1938_v4, 1  ;;  %v15146_v19 = vld [vmem:[%s15543_s19 + $0x68] sm:$0xff]   ;;  %v15738_v24 = vsel %vm21759_vm2, %v2830_v9, %v2832_v13  ;;  %v15745_v7 = vsel %vm21759_vm2, %v2832_v13, %v2834_v16  ;;  %v15804_v13 = vld [vmem:[%s15503_s12 + $0x10] sm:$0xff]  }
  0x41   : > { %v15790_v22 = vsel %vm21759_vm2, %v2840_v46, %v2842_v20  ;;  %v2408_v46 = vshrl.u32 %v15804_v13, 16 }
  0x42   : > { %v1904_v32 = vor.u32 %v1902_v27, %v1900_v29  ;;  %v1901_v38 = vsel %vm21760_vm1, %v1896_v31, %v1900_v29  ;;  %v2836_v27 = vrot.slane %v15658_v30, 1  ;;  %v1944_v34 = vor.u32 %v1942_v17, %v1940_v0 }
  0x43   : > { %14071 = vmatmul.mubr.msk.bf16.gmra.mxu0 %vm21764_vm0, %v1869_v5  ;;  %14037 = vmatmul.mubr.msk.bf16.gmra.mxu1 %vm21764_vm0, %v15130_v3  ;;  %v1925_v3 = vsel %vm21760_vm1, %v1920_v54, %v1924_v55  ;;  %v15709_v5 = vld [vmem:[%s15543_s19 + $0x70] sm:$0xff]   ;;  %v2396_v54 = vshll.u32 %v15762_v36, 16  ;;  %v2400_v55 = vshrl.u32 %v15762_v36, 16 }
  0x44   : > { %14074 = vmatprep.mubr.msk.bf16.mxu0 %vm21764_vm0, %v1877_v11  ;;  %14040 = vmatprep.mubr.msk.bf16.mxu1 %vm21764_vm0, %v15132_v6  ;;  %v1909_v42 = vsel %vm21760_vm1, %v1904_v32, %v1908_v33  ;;  %v1932_v6 = vrot.slane %v1930_v58, 1  ;;  %v15722_v11 = vld [vmem:[%s15543_s19 + $0x80] sm:$0xff]   ;;  %v1946_v14 = vshll.u32 %v15709_v5, 16  ;;  %v1950_v29 = vshrl.u32 %v15709_v5, 16  ;;  %v15755_v32 = vld [vmem:[%s21675_s2 + $0x18] sm:$0xff]  }
  0x45   : > { %v1962_v31 = vshll.u32 %v15722_v11, 16  ;;  %v15765_v30 = vsel %vm21759_vm2, %v2834_v16, %v2836_v27  ;;  %14216 = vmatprep.subr.bf16.mxu0 %v15755_v32  ;;  %v1966_v41 = vshrl.u32 %v15722_v11, 16  ;;  %v15774_v44 = vsel %vm21759_vm2, %v2836_v27, %v2838_v37  ;;  %v15161_v58 = vld [vmem:[%s15543_s19 + $0x90] ss:$0 sps:$4 sm:$0x11]   ;;  %v15823_v27 = vld [vmem:[%s15503_s12 + $0x28] sm:$0xff]  }
  0x46   : > { %v1936_v10 = vor.u32 %v1934_v63, %v1932_v6  ;;  %v1933_v28 = vsel %vm21760_vm1, %v1928_v60, %v1932_v6  ;;  %v2844_v56 = vrot.slane %v15709_v5, 1  ;;  %v3127_v63 = vld [vmem:[%s15503_s12] sm:$0xe]  ;;  %v2846_v6 = vrot.slane %v15712_v49, 1  ;;  %v15836_v37 = vld [vmem:[%s15503_s12 + $0x30] sm:$0xff]  }
  0x47   : > { %v1964_v51 = vrot.slane %v1962_v31, 1  ;;  %v3137_v31 = vrot.slane %v15804_v13, 1 }
  0x48   : > { %v1941_v33 = vsel %vm21760_vm1, %v1936_v10, %v1940_v0  ;;  %v15799_v4 = vsel %vm21759_vm2, %v2842_v20, %v2844_v56  ;;  %v2398_v10 = vrot.slane %v2396_v54, 1  ;;  %v15807_v0 = vld [vmem:[%s15503_s12 + $0x18] sm:$0xff]  }
  0x49   : > { %v2412_v20 = vshll.u32 %v15807_v0, 16 }
  0x4b   : > { %14075 = vmatmul.mubr.msk.bf16.gmra.mxu0 %vm21764_vm0, %v1885_v23  ;;  %14041 = vmatmul.mubr.msk.bf16.gmra.mxu1 %vm21764_vm0, %v15134_v21  ;;  %v2255_v21 = vld [vmem:[%s15503_s12] sm:$0xf]  ;;  %v15735_v23 = vld [vmem:[%s15503_s12 + $0x4] sm:$0xf] }
  0x4c   : > { %14078 = vmatprep.mubr.msk.bf16.mxu0 %vm21764_vm0, %v1893_v26  ;;  %14044 = vmatprep.mubr.msk.bf16.mxu1 %vm21764_vm0, %v15136_v25  ;;  %v15148_v25 = vld [vmem:[%s15543_s19 + $0x70] sm:$0xff]   ;;  %v15742_v26 = vld [vmem:[%s15543_s19 + $0x88] sm:$0xff]   ;;  %v12794_v49 = vcombine.low %v3127_v63, %v15735_v23 }
  0x4d   : > { %v2850_v16 = vrot.slane %v15742_v26, 1 }
  0x53   : > { %14079 = vmatmul.mubr.msk.bf16.gmra.mxu0 %vm21764_vm0, %v1901_v38  ;;  %14045 = vmatmul.mubr.msk.bf16.gmra.mxu1 %vm21764_vm0, %v15138_v35  ;;  %v15759_v35 = vcombine.low %v2255_v21, %v15735_v23  ;;  %v1948_v38 = vrot.slane %v1946_v14, 1  ;;  %v15810_v14 = vsel %vm21759_vm2, %v2844_v56, %v2846_v6  ;;  %v3135_v21 = vrot.slane %v15762_v36, 1 }
  0x54   : > { %14082 = vmatprep.mubr.msk.bf16.mxu0 %vm21764_vm0, %v1909_v42  ;;  %14048 = vmatprep.mubr.msk.bf16.mxu1 %vm21764_vm0, %v15140_v39  ;;  %v1956_v39 = vrot.slane %v1954_v15, 1  ;;  %v1970_v42 = vshll.u32 %v15742_v26, 16  ;;  %v2848_v15 = vrot.slane %v15722_v11, 1 }
  0x55   : > { %v1952_v48 = vor.u32 %v1950_v29, %v1948_v38  ;;  %v2391_v53 = vshll.u32 %v15759_v35, 16  ;;  %v1949_v2 = vsel %vm21760_vm1, %v1944_v34, %v1948_v38  ;;  %v1968_v29 = vor.u32 %v1966_v41, %v1964_v51  ;;  %v15849_v34 = vld [vmem:[%s15503_s12 + $0x38] sm:$0xff]  }
  0x56   : > { %v1972_v62 = vrot.slane %v1970_v42, 1  ;;  %v1960_v60 = vor.u32 %v1958_v40, %v1956_v39  ;;  %v15826_v11 = vsel %vm21759_vm2, %v2846_v6, %v2848_v15  ;;  %v15829_v23 = vsel %vm21759_vm2, %v2848_v15, %v2850_v16  ;;  %v15154_v42 = vld [vmem:[%s15543_s19 + $0x88] sm:$0xff]   ;;  %v15873_v6 = vld [vmem:[%s15503_s12 + $0x50] sm:$0xff]  }
  0x57   : > { %v1957_v9 = vsel %vm21760_vm1, %v1952_v48, %v1956_v39  ;;  %v2393_v5 = vrot.slane %v2391_v53, 1  ;;  %v2404_v41 = vshll.u32 %v15804_v13, 16  ;;  %v15852_v48 = vsel %vm21759_vm2, %v3135_v21, %v3137_v31  ;;  %v15859_v53 = vld [vmem:[%s15503_s12 + $0x40] sm:$0xff]   ;;  %v15883_v13 = vld [vmem:[%s15503_s12 + $0x58] sm:$0xff]  }
  0x58   : > { %v1965_v17 = vsel %vm21760_vm1, %v1960_v60, %v1964_v51  ;;  %v1973_v56 = vsel %vm21760_vm1, %v1968_v29, %v1972_v62  ;;  %v3147_v63 = vrot.slane %v15849_v34, 1 }
  0x5b   : > { %14083 = vmatmul.mubr.msk.bf16.gmra.mxu0 %vm21764_vm0, %v1917_v45  ;;  %14049 = vmatmul.mubr.msk.bf16.gmra.mxu1 %vm21764_vm0, %v15142_v57  ;;  %v15150_v57 = vld [vmem:[%s15543_s19 + $0x78] sm:$0xff]   ;;  %v1974_v45 = vshrl.u32 %v15742_v26, 16  ;;  %v3134_v26 = vrot.slane %v12794_v49, 1  ;;  %v2406_v49 = vrot.slane %v2404_v41, 1 }
  0x5c   : > { %14086 = vmatprep.mubr.msk.bf16.mxu0 %vm21764_vm0, %v1925_v3  ;;  %14052 = vmatprep.mubr.msk.bf16.mxu1 %vm21764_vm0, %v15144_v50  ;;  %v15152_v50 = vld [vmem:[%s15543_s19 + $0x80] sm:$0xff]   ;;  %v2389_v3 = vshrl.u32 %v15759_v35, 16 }
  0x5d   : > { %v15839_v38 = vsel %vm21759_vm2, %v3134_v26, %v3135_v21  ;;  %v2414_v26 = vrot.slane %v2412_v20, 1 }
  0x5e   : > { %v2394_v35 = vor.u32 %v2393_v5, %v2389_v3  ;;  %v1976_v5 = vor.u32 %v1974_v45, %v1972_v62  ;;  %v3153_v62 = vrot.slane %v15873_v6, 1  ;;  %v2402_v45 = vor.u32 %v2400_v55, %v2398_v10 }
  0x63   : > { %14087 = vmatmul.mubr.msk.bf16.gmra.mxu0 %vm21764_vm0, %v1933_v28  ;;  %14053 = vmatmul.mubr.msk.bf16.gmra.mxu1 %vm21764_vm0, %v15146_v19  ;;  %v1978_v19 = vshll.u32 %v15161_v58, 16  ;;  %v2852_v28 = vrot.slane %v15161_v58, 1  ;;  %v3145_v58 = vrot.slane %v15836_v37, 1 }
  0x64   : > { %14090 = vmatprep.mubr.msk.bf16.mxu0 %vm21764_vm0, %v1941_v33  ;;  %14056 = vmatprep.mubr.msk.bf16.mxu1 %vm21764_vm0, %v15148_v25  ;;  %v15820_v25 = vld [vmem:[%s15503_s12 + $0x20] sm:$0xff]   ;;  %v3139_v33 = vrot.slane %v15807_v0, 1 }
  0x65   : > { %v15842_v39 = vsel %vm21759_vm2, %v2850_v16, %v2852_v28  ;;  %v3141_v40 = vrot.slane %v15820_v25, 1  ;;  %v1980_v3 = vrot.slane %v1978_v19, 1  ;;  %v15886_v15 = vsel %vm21759_vm2, %v3145_v58, %v3147_v63  ;;  %v15898_v28 = vld [vmem:[%s15503_s12 + $0x60] sm:$0xff]  }
  0x66   : > { %v15855_v51 = vsel %vm21759_vm2, %v3137_v31, %v3139_v33  ;;  %v3149_v16 = vrot.slane %v15859_v53, 1  ;;  %v2420_v19 = vshll.u32 %v15820_v25, 16  ;;  %v3155_v31 = vrot.slane %v15883_v13, 1 }
  0x67   : > { %v15862_v54 = vsel %vm21759_vm2, %v3139_v33, %v3141_v40  ;;  %v2410_v33 = vor.u32 %v2408_v46, %v2406_v49  ;;  %v3157_v20 = vrot.slane %v15898_v28, 1 }
  0x68   : > { %v15904_v29 = vsel %vm21759_vm2, %v3147_v63, %v3149_v16  ;;  %v15922_v41 = vsel %vm21759_vm2, %v3153_v62, %v3155_v31  ;;  %v2422_v46 = vrot.slane %v2420_v19, 1  ;;  %v15930_v63 = vld [vmem:[%s15503_s12 + $0x80] sm:$0xff]  }
  0x6b   : > { %14091 = vmatmul.mubr.msk.bf16.gmra.mxu0 %vm21764_vm0, %v1949_v2  ;;  %14057 = vmatmul.mubr.msk.bf16.gmra.mxu1 %vm21764_vm0, %v15150_v57  ;;  %v3143_v57 = vrot.slane %v15823_v27, 1  ;;  %v2399_v2 = vsel %vm21760_vm1, %v2394_v35, %v2398_v10  ;;  %v2416_v35 = vshrl.u32 %v15807_v0, 16  ;;  %v1981_v10 = vsel %vm21760_vm1, %v1976_v5, %v1980_v3 }
  0x6c   : > { %14094 = vmatprep.mubr.msk.bf16.mxu0 %vm21764_vm0, %v1957_v9  ;;  %14060 = vmatprep.mubr.msk.bf16.mxu1 %vm21764_vm0, %v15152_v50  ;;  %v15868_v50 = vld [vmem:[%s15503_s12 + $0x48] sm:$0xff]   ;;  %v2424_v0 = vshrl.u32 %v15820_v25, 16  ;;  %v2415_v5 = vsel %vm21760_vm1, %v2410_v33, %v2414_v26  ;;  %v15941_v25 = vld [vmem:[%s21676_s3 + $0x18] sm:$0xff]   ;;  %v15961_v33 = vld [vmem:[%s15503_s12 + $0x90] ss:$0 sps:$4 sm:$0x11]  }
  0x6d   : > { %v15876_v9 = vsel %vm21759_vm2, %v3141_v40, %v3143_v57  ;;  %v15879_v60 = vsel %vm21759_vm2, %v3143_v57, %v3145_v58  ;;  %v3151_v21 = vrot.slane %v15868_v50, 1  ;;  %v15909_v40 = vld [vmem:[%s15503_s12 + $0x70] sm:$0xff]  }
  0x6e   : > { %v3161_v58 = vrot.slane %v15909_v40, 1 }
  0x6f   : > { %v15912_v36 = vsel %vm21759_vm2, %v3149_v16, %v3151_v21  ;;  %v15915_v55 = vsel %vm21759_vm2, %v3151_v21, %v3153_v62  ;;  %v2428_v16 = vshll.u32 %v15823_v27, 16  ;;  %v2436_v21 = vshll.u32 %v15836_v37, 16 }
  0x73   : > { %14095 = vmatmul.mubr.msk.bf16.gmra.mxu0 %vm21764_vm0, %v1965_v17  ;;  %14061 = vmatmul.mubr.msk.bf16.gmra.mxu1 %vm21764_vm0, %v15154_v42  ;;  %v15901_v17 = vld [vmem:[%s15503_s12 + $0x68] sm:$0xff]   ;;  %v15919_v42 = vld [vmem:[%s15503_s12 + $0x78] sm:$0xff]  }
  0x74   : > { %14098 = vmatprep.mubr.msk.bf16.mxu0 %vm21764_vm0, %v1973_v56  ;;  %14104 = vmatprep.mubr.msk.bf16.mxu1 %vm21764_vm0, %v2399_v2  ;;  %v3159_v57 = vrot.slane %v15901_v17, 1  ;;  %v2407_v56 = vsel %vm21760_vm1, %v2402_v45, %v2406_v49  ;;  %v15933_v2 = vsel %vm21759_vm2, %v3155_v31, %v3157_v20  ;;  %v3163_v3 = vrot.slane %v15919_v42, 1 }
  0x75   : > { %v3165_v45 = vrot.slane %v15930_v63, 1  ;;  %v2418_v31 = vor.u32 %v2416_v35, %v2414_v26  ;;  %v2438_v35 = vrot.slane %v2436_v21, 1 }
  0x76   : > { %v15944_v49 = vsel %vm21759_vm2, %v3157_v20, %v3159_v57  ;;  %v15947_v19 = vsel %vm21759_vm2, %v3159_v57, %v3161_v58  ;;  %v15952_v62 = vsel %vm21759_vm2, %v3161_v58, %v3163_v3  ;;  %v2426_v20 = vor.u32 %v2424_v0, %v2422_v46  ;;  %v15967_v58 = vld [vmem:[%s15503_s12 + $0x88] sm:$0xff]  }
  0x77   : > { %v2430_v57 = vrot.slane %v2428_v16, 1  ;;  %v2423_v26 = vsel %vm21760_vm1, %v2418_v31, %v2422_v46 }
  0x79   : > { %v2431_v0 = vsel %vm21760_vm1, %v2426_v20, %v2430_v57  ;;  %v2456_v20 = vshrl.u32 %v15859_v53, 16 }
  0x7b   : > { %14099 = vmatmul.mubr.msk.bf16.gmra.mxu0 %vm21764_vm0, %v1981_v10  ;;  %14105 = vmatmul.mubr.msk.bf16.vlgmr.msra.gmra.mxu1 %vm21764_vm0, %v2407_v56  ;;  %v15964_v10 = vsel %vm21759_vm2, %v3163_v3, %v3165_v45  ;;  %v2432_v56 = vshrl.u32 %v15823_v27, 16  ;;  %v3169_v3 = vrot.slane %v15961_v33, 1 }
  0x7c   : > { %14142 = vmatprep.mubr.msk.bf16.mxu0 %vm21764_vm0, %v15685_v52  ;;  %14179 = vmatpush3.bf16.msra.mxu1 %v15586_v43  ;;  %v2440_v52 = vshrl.u32 %v15836_v37, 16  ;;  %v2444_v43 = vshll.u32 %v15849_v34, 16 }
  0x7d   : > { %14108 = vmatprep.mubr.msk.bf16.mxu1 %vm21764_vm0, %v2415_v5  ;;  %14254 = vmatprep.subr.bf16.mxu1 %v15941_v25  ;;  %v3167_v5 = vrot.slane %v15967_v58, 1  ;;  %v2434_v37 = vor.u32 %v2432_v56, %v2430_v57 }
  0x7e   : > { %v2442_v46 = vor.u32 %v2440_v52, %v2438_v35  ;;  %v2446_v21 = vrot.slane %v2444_v43, 1  ;;  %v2468_v52 = vshll.u32 %v15873_v6, 16 }
  0x7f   : > { %v15978_v16 = vsel %vm21759_vm2, %v3165_v45, %v3167_v5  ;;  %v15983_v27 = vsel %vm21759_vm2, %v3167_v5, %v3169_v3  ;;  %v2452_v45 = vshll.u32 %v15859_v53, 16  ;;  %v2439_v31 = vsel %vm21760_vm1, %v2434_v37, %v2438_v35 }
  0x80   : > { %v2460_v5 = vshll.u32 %v15868_v50, 16  ;;  %v2447_v57 = vsel %vm21760_vm1, %v2442_v46, %v2446_v21  ;;  %v2476_v35 = vshll.u32 %v15883_v13, 16  ;;  %v2484_v46 = vshll.u32 %v15898_v28, 16 }
  0x82   : > { %v2462_v56 = vrot.slane %v2460_v5, 1  ;;  %v2500_v5 = vshll.u32 %v15909_v40, 16 }
  0x83   : > { %14143 = vmatmul.mubr.msk.bf16.vlgmr.msra.gmra.mxu0 %vm21764_vm0, %v15616_v61  ;;  %14109 = vmatmul.mubr.msk.bf16.gmra.mxu1 %vm21764_vm0, %v2423_v26  ;;  %v2448_v61 = vshrl.u32 %v15849_v34, 16  ;;  %v2464_v26 = vshrl.u32 %v15868_v50, 16  ;;  %v2478_v50 = vrot.slane %v2476_v35, 1 }
  0x84   : > { %14146 = vmatprep.mubr.msk.bf16.mxu0 %vm21764_vm0, %v15646_v18  ;;  %14112 = vmatprep.mubr.msk.bf16.mxu1 %vm21764_vm0, %v2431_v0  ;;  %v15998_v18 = vld [vmem:[%s21675_s2 + $0x20] sm:$0xff]  }
  0x85   : > { %14217 = vmatpush3.bf16.msra.mxu0 %v15755_v32  ;;  %v2454_v32 = vrot.slane %v2452_v45, 1  ;;  %v2450_v34 = vor.u32 %v2448_v61, %v2446_v21  ;;  %v2466_v0 = vor.u32 %v2464_v26, %v2462_v56  ;;  %v2488_v45 = vshrl.u32 %v15898_v28, 16 }
  0x86   : > { %14292 = vmatprep.subr.bf16.mxu0 %v15998_v18  ;;  %v2496_v28 = vshrl.u32 %v15901_v17, 16  ;;  %v2520_v26 = vshrl.u32 %v15930_v63, 16 }
  0x87   : > { %v2458_v53 = vor.u32 %v2456_v20, %v2454_v32  ;;  %v2455_v43 = vsel %vm21760_vm1, %v2450_v34, %v2454_v32  ;;  %v2504_v32 = vshrl.u32 %v15909_v40, 16  ;;  %v2512_v40 = vshrl.u32 %v15919_v42, 16 }
  0x89   : > { %v2463_v3 = vsel %vm21760_vm1, %v2458_v53, %v2462_v56 }
  0x8b   : > { %14147 = vmatmul.mubr.msk.bf16.gmra.mxu0 %vm21764_vm0, %v15695_v59  ;;  %14113 = vmatmul.mubr.msk.bf16.gmra.mxu1 %vm21764_vm0, %v2439_v31  ;;  %v2472_v59 = vshrl.u32 %v15873_v6, 16  ;;  %v2480_v6 = vshrl.u32 %v15883_v13, 16 }
  0x8c   : > { %14150 = vmatprep.mubr.msk.bf16.mxu0 %vm21764_vm0, %v15703_v1  ;;  %14116 = vmatprep.mubr.msk.bf16.mxu1 %vm21764_vm0, %v2447_v57  ;;  %v2470_v1 = vrot.slane %v2468_v52, 1  ;;  %v2516_v52 = vshll.u32 %v15930_v63, 16 }
  0x8d   : > { %v2482_v13 = vor.u32 %v2480_v6, %v2478_v50 }
  0x8e   : > { %v2474_v37 = vor.u32 %v2472_v59, %v2470_v1  ;;  %v2471_v21 = vsel %vm21760_vm1, %v2466_v0, %v2470_v1  ;;  %v2528_v1 = vshrl.u32 %v15967_v58, 16 }
  0x90   : > { %v2479_v31 = vsel %vm21760_vm1, %v2474_v37, %v2478_v50  ;;  %v3444_v50 = vld [vmem:[%s15543_s19 + $0x8] sm:$0xe] }
  0x93   : > { %14151 = vmatmul.mubr.msk.bf16.gmra.mxu0 %vm21764_vm0, %v15715_v8  ;;  %14117 = vmatmul.mubr.msk.bf16.gmra.mxu1 %vm21764_vm0, %v2455_v43  ;;  %v2492_v8 = vshll.u32 %v15901_v17, 16 }
  0x94   : > { %14154 = vmatprep.mubr.msk.bf16.mxu0 %vm21764_vm0, %v15725_v12  ;;  %14120 = vmatprep.mubr.msk.bf16.mxu1 %vm21764_vm0, %v2463_v3  ;;  %v2486_v12 = vrot.slane %v2484_v46, 1  ;;  %v16072_v46 = vld [vmem:[%s15543_s19 + $0x10] sm:$0xff]  }
  0x95   : > { %v2494_v20 = vrot.slane %v2492_v8, 1  ;;  %v16093_v8 = vld [vmem:[%s21676_s3 + $0x20] sm:$0xff]  }
  0x96   : > { %v2490_v61 = vor.u32 %v2488_v45, %v2486_v12  ;;  %v2487_v57 = vsel %vm21760_vm1, %v2482_v13, %v2486_v12  ;;  %v16087_v45 = vld [vmem:[%s15543_s19 + $0x20] sm:$0xff]   ;;  %v16112_v12 = vld [vmem:[%s15543_s19 + $0x30] sm:$0xff]  }
  0x97   : > { %v2498_v17 = vor.u32 %v2496_v28, %v2494_v20  ;;  %v16129_v28 = vld [vmem:[%s15543_s19 + $0x40] sm:$0xff]  }
  0x98   : > { %v2495_v34 = vsel %vm21760_vm1, %v2490_v61, %v2494_v20  ;;  %v16125_v61 = vld [vmem:[%s15543_s19 + $0x38] sm:$0xff]  }
  0x9b   : > { %14155 = vmatmul.mubr.msk.bf16.gmra.mxu0 %vm21764_vm0, %v15738_v24  ;;  %14121 = vmatmul.mubr.msk.bf16.gmra.mxu1 %vm21764_vm0, %v2471_v21  ;;  %v2508_v24 = vshll.u32 %v15919_v42, 16  ;;  %v16084_v21 = vld [vmem:[%s15543_s19 + $0x18] sm:$0xff]  }
  0x9c   : > { %14158 = vmatprep.mubr.msk.bf16.mxu0 %vm21764_vm0, %v15745_v7  ;;  %14124 = vmatprep.mubr.msk.bf16.mxu1 %vm21764_vm0, %v2479_v31  ;;  %v2502_v7 = vrot.slane %v2500_v5, 1  ;;  %v16108_v31 = vld [vmem:[%s15543_s19 + $0x28] sm:$0xff]  }
  0x9d   : > { %v2510_v56 = vrot.slane %v2508_v24, 1 }
  0x9e   : > { %v2506_v53 = vor.u32 %v2504_v32, %v2502_v7  ;;  %v2503_v43 = vsel %vm21760_vm1, %v2498_v17, %v2502_v7  ;;  %v3590_v32 = vrot.slane %v16129_v28, 1 }
  0x9f   : > { %v2514_v42 = vor.u32 %v2512_v40, %v2510_v56  ;;  %v16165_v40 = vld [vmem:[%s15543_s19 + $0x50] sm:$0xff]  }
  0xa0   : > { %v2511_v59 = vsel %vm21760_vm1, %v2506_v53, %v2510_v56 }
  0xa3   : > { %14159 = vmatmul.mubr.msk.bf16.gmra.mxu0 %vm21764_vm0, %v15765_v30  ;;  %14125 = vmatmul.mubr.msk.bf16.gmra.mxu1 %vm21764_vm0, %v2487_v57  ;;  %v2524_v30 = vshll.u32 %v15967_v58, 16  ;;  %v3445_v58 = vld [vmem:[%s15543_s19 + $0xc] sm:$0xf] }
  0xa4   : > { %14162 = vmatprep.mubr.msk.bf16.mxu0 %vm21764_vm0, %v15774_v44  ;;  %14128 = vmatprep.mubr.msk.bf16.mxu1 %vm21764_vm0, %v2495_v34  ;;  %v2518_v44 = vrot.slane %v2516_v52, 1  ;;  %v16069_v6 = vcombine.low %v3444_v50, %v3445_v58 }
  0xa5   : > { %v2526_v63 = vrot.slane %v2524_v30, 1 }
  0xa6   : > { %v2522_v35 = vor.u32 %v2520_v26, %v2518_v44  ;;  %v2519_v3 = vsel %vm21760_vm1, %v2514_v42, %v2518_v44 }
  0xa8   : > { %v2527_v0 = vsel %vm21760_vm1, %v2522_v35, %v2526_v63 }
  0xab   : > { %14163 = vmatmul.mubr.msk.bf16.gmra.mxu0 %vm21764_vm0, %v15785_v47  ;;  %14129 = vmatmul.mubr.msk.bf16.gmra.mxu1 %vm21764_vm0, %v2503_v43  ;;  %v2532_v47 = vshll.u32 %v15961_v33, 16 }
  0xac   : > { %14166 = vmatprep.mubr.msk.bf16.mxu0 %vm21764_vm0, %v15790_v22  ;;  %14132 = vmatprep.mubr.msk.bf16.mxu1 %vm21764_vm0, %v2511_v59  ;;  %v2530_v22 = vor.u32 %v2528_v1, %v2526_v63  ;;  %v3594_v59 = vrot.slane %v16165_v40, 1 }
  0xad   : > { %v2534_v37 = vrot.slane %v2532_v47, 1  ;;  %v16197_v47 = vld [vmem:[%s15543_s19 + $0x60] sm:$0xff]  }
  0xae   : > { %v3598_v58 = vrot.slane %v16197_v47, 1 }
  0xaf   : > { %v2535_v33 = vsel %vm21760_vm1, %v2530_v22, %v2534_v37 }
  0xb3   : > { %14167 = vmatmul.mubr.msk.bf16.gmra.mxu0 %vm21764_vm0, %v15799_v4  ;;  %14133 = vmatmul.mubr.msk.bf16.gmra.mxu1 %vm21764_vm0, %v2519_v3  ;;  %v3577_v4 = vrot.slane %v16069_v6, 1 }
  0xb4   : > { %14170 = vmatprep.mubr.msk.bf16.mxu0 %vm21764_vm0, %v15810_v14  ;;  %14136 = vmatprep.mubr.msk.bf16.mxu1 %vm21764_vm0, %v2527_v0  ;;  %v3578_v14 = vrot.slane %v16072_v46, 1 }
  0xbb   : > { %14171 = vmatmul.mubr.msk.bf16.gmra.mxu0 %vm21764_vm0, %v15826_v11  ;;  %14137 = vmatmul.mubr.msk.bf16.gmra.mxu1 %vm21764_vm0, %v2535_v33  ;;  %v3579_v11 = vsel %vm21759_vm2, %v3577_v4, %v3578_v14 }
  0xbc   : > { %14174 = vmatprep.mubr.msk.bf16.mxu0 %vm21764_vm0, %v15829_v23  ;;  %14180 = vmatprep.mubr.msk.bf16.mxu1 %vm21764_vm0, %v15839_v38  ;;  %v3580_v23 = vrot.slane %v16084_v21, 1  ;;  %v3582_v38 = vrot.slane %v16087_v45, 1 }
  0xc3   : > { %14175 = vmatmul.mubr.msk.bf16.gmra.mxu0 %vm21764_vm0, %v15842_v39  ;;  %14181 = vmatmul.mubr.msk.bf16.vlgmr.msra.gmra.mxu1 %vm21764_vm0, %v15852_v48  ;;  %v3581_v39 = vsel %vm21759_vm2, %v3578_v14, %v3580_v23  ;;  %v3583_v48 = vsel %vm21759_vm2, %v3580_v23, %v3582_v38 }
  0xc4   : > { %14218 = vmatprep.mubr.msk.bf16.mxu0 %vm21764_vm0, %v3579_v11  ;;  %14255 = vmatpush3.bf16.msra.mxu1 %v15941_v25  ;;  %v3586_v25 = vrot.slane %v16112_v12, 1 }
  0xc5   : > { %14184 = vmatprep.mubr.msk.bf16.mxu1 %vm21764_vm0, %v15855_v51  ;;  %14330 = vmatprep.subr.bf16.mxu1 %v16093_v8  ;;  %v3584_v51 = vrot.slane %v16108_v31, 1 }
  0xc7   : > { %v3585_v13 = vsel %vm21759_vm2, %v3582_v38, %v3584_v51  ;;  %v3587_v20 = vsel %vm21759_vm2, %v3584_v51, %v3586_v25 }
  0xcb   : > { %14219 = vmatmul.mubr.msk.bf16.vlgmr.msra.gmra.mxu0 %vm21764_vm0, %v3581_v39  ;;  %14185 = vmatmul.mubr.msk.bf16.gmra.mxu1 %vm21764_vm0, %v15862_v54  ;;  %v16134_v54 = vld [vmem:[%s21675_s2 + $0x28] sm:$0xff]   ;;  %v16229_v39 = vld [vmem:[%s15543_s19 + $0x70] sm:$0xff]  }
  0xcc   : > { %14222 = vmatprep.mubr.msk.bf16.mxu0 %vm21764_vm0, %v3583_v48  ;;  %14188 = vmatprep.mubr.msk.bf16.mxu1 %vm21764_vm0, %v15876_v9  ;;  %21882 = vst [vmem:[#allocation8_spill] sm:$0xff] %v16229_v39 }
  0xcd   : > { %14293 = vmatpush3.bf16.msra.mxu0 %v15998_v18  ;;  %v3588_v18 = vrot.slane %v16125_v61, 1 }
  0xce   : > { %14368 = vmatprep.subr.bf16.mxu0 %v16134_v54 }
  0xcf   : > { %v3589_v17 = vsel %vm21759_vm2, %v3586_v25, %v3588_v18  ;;  %v3591_v56 = vsel %vm21759_vm2, %v3588_v18, %v3590_v32 }
  0xd3   : > { %v16136_v5 = vpop.f32.mrf.mxu0  ;;  %14223 = vmatmul.mubr.msk.bf16.gmra.mxu0 %vm21764_vm0, %v3585_v13  ;;  %v16140_v9 = vpop.f32.mrf.mxu1  ;;  %14189 = vmatmul.mubr.msk.bf16.gmra.mxu1 %vm21764_vm0, %v15879_v60  ;;  %v16159_v60 = vld [vmem:[%s15543_s19 + $0x48] sm:$0xff]  }
  0xd4   : > { %14226 = vmatprep.mubr.msk.bf16.mxu0 %vm21764_vm0, %v3587_v20  ;;  %14192 = vmatprep.mubr.msk.bf16.mxu1 %vm21764_vm0, %v15886_v15  ;;  %v3592_v26 = vrot.slane %v16159_v60, 1  ;;  %v3602_v20 = vrot.slane %v16229_v39, 1  ;;  %v16333_v39 = vld [vmem:[%s15503_s12 + $0x20] sm:$0xff]  }
  0xd5   : > { %v16146_v57 = vpop.f32.mrf.mxu0  ;;  %v16151_v24 = vpop.f32.mrf.mxu1 }
  0xd6   : > { %v3593_v63 = vsel %vm21759_vm2, %v3590_v32, %v3592_v26  ;;  %v3595_v1 = vsel %vm21759_vm2, %v3592_v26, %v3594_v59 }
  0xd7   : > { %v16153_v34 = vpop.f32.mrf.mxu0  ;;  %v16155_v7 = vpop.f32.mrf.mxu1 }
  0xd9   : > { %v16161_v53 = vpop.f32.mrf.mxu0  ;;  %v16167_v15 = vpop.f32.mrf.mxu1 }
  0xdb   : > { %v16169_v52 = vpop.f32.mrf.mxu0  ;;  %14227 = vmatmul.mubr.msk.bf16.gmra.mxu0 %vm21764_vm0, %v3589_v17  ;;  %v16172_v43 = vpop.f32.mrf.mxu1  ;;  %14193 = vmatmul.mubr.msk.bf16.gmra.mxu1 %vm21764_vm0, %v15904_v29  ;;  %v16191_v29 = vld [vmem:[%s15543_s19 + $0x58] sm:$0xff]  }
  0xdc   : > { %14230 = vmatprep.mubr.msk.bf16.mxu0 %vm21764_vm0, %v3591_v56  ;;  %14196 = vmatprep.mubr.msk.bf16.mxu1 %vm21764_vm0, %v15912_v36  ;;  %v3596_v37 = vrot.slane %v16191_v29, 1 }
  0xdd   : > { %v16178_v30 = vpop.f32.mrf.mxu0  ;;  %v16183_v44 = vpop.f32.mrf.mxu1 }
  0xde   : > { %v3597_v11 = vsel %vm21759_vm2, %v3594_v59, %v3596_v37  ;;  %v3599_v38 = vsel %vm21759_vm2, %v3596_v37, %v3598_v58 }
  0xdf   : > { %v16185_v42 = vpop.f32.mrf.mxu0  ;;  %v16187_v35 = vpop.f32.mrf.mxu1 }
  0xe0   : > { %21877 = vst [vmem:[#allocation3_spill] sm:$0xff] %v16187_v35 }
  0xe1   : > { %v16193_v3 = vpop.f32.mrf.mxu0  ;;  %v16199_v36 = vpop.f32.mrf.mxu1 }
  0xe2   : > { %21878 = vst [vmem:[#allocation4_spill] sm:$0xff] %v16199_v36 }
  0xe3   : > { %v16201_v0 = vpop.f32.mrf.mxu0  ;;  %14231 = vmatmul.mubr.msk.bf16.gmra.mxu0 %vm21764_vm0, %v3593_v63  ;;  %v16204_v22 = vpop.f32.mrf.mxu1  ;;  %14197 = vmatmul.mubr.msk.bf16.gmra.mxu1 %vm21764_vm0, %v15915_v55  ;;  %v16223_v55 = vld [vmem:[%s15543_s19 + $0x68] sm:$0xff]   ;;  %v16261_v63 = vld [vmem:[%s15543_s19 + $0x80] sm:$0xff]  }
  0xe4   : > { %21879 = vst [vmem:[#allocation5_spill] sm:$0xff] %v16204_v22  ;;  %14234 = vmatprep.mubr.msk.bf16.mxu0 %vm21764_vm0, %v3595_v1  ;;  %14200 = vmatprep.mubr.msk.bf16.mxu1 %vm21764_vm0, %v15922_v41  ;;  %v3600_v25 = vrot.slane %v16223_v55, 1  ;;  %21888 = vst [vmem:[#allocation14_spill] sm:$0xff] %v16261_v63 }
  0xe5   : > { %v16210_v50 = vpop.f32.mrf.mxu0  ;;  %v16215_v33 = vpop.f32.mrf.mxu1 }
  0xe6   : > { %21880 = vst [vmem:[#allocation6_spill] sm:$0xff] %v16215_v33  ;;  %v3601_v56 = vsel %vm21759_vm2, %v3598_v58, %v3600_v25  ;;  %v3603_v59 = vsel %vm21759_vm2, %v3600_v25, %v3602_v20  ;;  %v3606_v25 = vrot.slane %v16261_v63, 1 }
  0xe7   : > { %v16217_v4 = vpop.f32.mrf.mxu0  ;;  %v16219_v14 = vpop.f32.mrf.mxu1 }
  0xe8   : > { %21881 = vst [vmem:[#allocation7_spill] sm:$0xff] %v16219_v14  ;;  %v16292_v14 = vld [vmem:[%s15543_s19 + $0x90] sm:$0xff]  }
  0xe9   : > { %v16225_v23 = vpop.f32.mrf.mxu0  ;;  %v16231_v41 = vpop.f32.mrf.mxu1  ;;  %21891 = vst [vmem:[#allocation17_spill] sm:$0xff] %v16292_v14 }
  0xea   : > { %21883 = vst [vmem:[#allocation9_spill] sm:$0xff] %v16231_v41  ;;  %v16285_v41 = vld [vmem:[%s15543_s19 + $0x88] sm:$0xff]  }
  0xeb   : > { %v16233_v48 = vpop.f32.mrf.mxu0  ;;  %14235 = vmatmul.mubr.msk.bf16.gmra.mxu0 %vm21764_vm0, %v3597_v11  ;;  %v16236_v51 = vpop.f32.mrf.mxu1  ;;  %14201 = vmatmul.mubr.msk.bf16.gmra.mxu1 %vm21764_vm0, %v15933_v2  ;;  %v16255_v2 = vld [vmem:[%s15543_s19 + $0x78] sm:$0xff]   ;;  %21890 = vst [vmem:[#allocation16_spill] sm:$0xff] %v16285_v41 }
  0xec   : > { %21884 = vst [vmem:[#allocation10_spill] sm:$0xff] %v16236_v51  ;;  %14238 = vmatprep.mubr.msk.bf16.mxu0 %vm21764_vm0, %v3599_v38  ;;  %14204 = vmatprep.mubr.msk.bf16.mxu1 %vm21764_vm0, %v15944_v49  ;;  %21887 = vst [vmem:[#allocation13_spill] sm:$0xff] %v16255_v2  ;;  %v3604_v58 = vrot.slane %v16255_v2, 1 }
  0xed   : > { %v16242_v13 = vpop.f32.mrf.mxu0  ;;  %v16247_v18 = vpop.f32.mrf.mxu1 }
  0xee   : > { %21885 = vst [vmem:[#allocation11_spill] sm:$0xff] %v16247_v18  ;;  %v3605_v51 = vsel %vm21759_vm2, %v3602_v20, %v3604_v58 }
  0xef   : > { %v16249_v32 = vpop.f32.mrf.mxu0  ;;  %v16251_v17 = vpop.f32.mrf.mxu1 }
  0xf0   : > { %21886 = vst [vmem:[#allocation12_spill] sm:$0xff] %v16251_v17 }
  0xf1   : > { %v16257_v26 = vpop.f32.mrf.mxu0  ;;  %v16263_v49 = vpop.f32.mrf.mxu1 }
  0xf2   : > { %21889 = vst [vmem:[#allocation15_spill] sm:$0xff] %v16263_v49 }
  0xf3   : > { %v16265_v1 = vpop.f32.mrf.mxu0  ;;  %14239 = vmatmul.mubr.msk.bf16.gmra.mxu0 %vm21764_vm0, %v3601_v56  ;;  %v14030_v37 = vpop.f32.mrf.mxu1  ;;  %14205 = vmatmul.mubr.msk.bf16.gmra.mxu1 %vm21764_vm0, %v15947_v19  ;;  %v3887_v19 = vld [vmem:[%s15503_s12 + $0x8] sm:$0xe] }
  0xf4   : > { %14242 = vmatprep.mubr.msk.bf16.mxu0 %vm21764_vm0, %v3603_v59  ;;  %v1566_v11 = vadd.f32 %v14030_v37, %v16136_v5  ;;  %14208 = vmatprep.mubr.msk.bf16.mxu1 %vm21764_vm0, %v15952_v62  ;;  %v3888_v59 = vld [vmem:[%s15503_s12 + $0xc] sm:$0xf]  ;;  %v3607_v62 = vsel %vm21759_vm2, %v3604_v58, %v3606_v25  ;;  %v4342_v58 = vshll.u32 %v16069_v6, 16 }
  0xf5   : > { %v16273_v38 = vpop.f32.mrf.mxu0  ;;  %v1557_v56 = vpop.f32.mrf.mxu1  ;;  %v16294_v33 = vcombine.low %v3887_v19, %v3888_v59 }
  0xf6   : > { %v1558_v49 = vadd.f32 %v1557_v56, %v16146_v57  ;;  %v16297_v57 = vld [vmem:[%s15503_s12 + $0x10] sm:$0xff]   ;;  %v4344_v2 = vrot.slane %v4342_v58, 2 }
  0xf7   : > { %v16279_v17 = vpop.f32.mrf.mxu0  ;;  %v14031_v18 = vpop.f32.mrf.mxu1  ;;  %21892 = vst [vmem:[#allocation18_spill] sm:$0xff] %v16294_v33  ;;  %21893 = vst [vmem:[#allocation19_spill] sm:$0xff] %v16297_v57  ;;  %v4020_v59 = vrot.slane %v16294_v33, 1 }
  0xf8   : > { %v1569_v5 = vadd.f32 %v14031_v18, %v16153_v34  ;;  %v3608_v34 = vrot.slane %v16285_v41, 1  ;;  %v4339_v18 = vshrl.u32 %v16069_v6, 16 }
  0xf9   : > { %v16288_v37 = vpop.f32.mrf.mxu0  ;;  %v1560_v63 = vpop.f32.mrf.mxu1 }
  0xfa   : > { %v1561_v56 = vadd.f32 %v1560_v63, %v16161_v53  ;;  %v3609_v41 = vsel %vm21759_vm2, %v3606_v25, %v3608_v34 }
  0xfb   : > { %v14068_v22 = vpop.f32.mrf.mxu0  ;;  %14243 = vmatmul.mubr.msk.bf16.gmra.mxu0 %vm21764_vm0, %v3605_v51  ;;  %v14034_v20 = vpop.f32.mrf.mxu1  ;;  %14209 = vmatmul.mubr.msk.bf16.gmra.mxu1 %vm21764_vm0, %v15964_v10  ;;  %v4347_v10 = vshrl.u32 %v16072_v46, 16  ;;  %v4350_v51 = vshll.u32 %v16072_v46, 16  ;;  %v4341_v46 = vrot.slane %v4339_v18, 1 }
  0xfc   : > { %v16301_v36 = vadd.f32 %v14068_v22, %v1566_v11  ;;  %14246 = vmatprep.mubr.msk.bf16.mxu0 %vm21764_vm0, %v3607_v62  ;;  %v1582_v53 = vadd.f32 %v14034_v20, %v16169_v52  ;;  %14212 = vmatprep.mubr.msk.bf16.mxu1 %vm21764_vm0, %v15978_v16  ;;  %v3610_v22 = vrot.slane %v16292_v14, 1  ;;  %v4021_v62 = vrot.slane %v16297_v57, 1  ;;  %v15205_v20 = vld [vmem:[%s15543_s19 + $0x98] ss:$0 sps:$4 sm:$0x11]  }
  0xfd   : > { %v2076_v63 = vpop.f32.mrf.mxu0  ;;  %v1573_v11 = vpop.f32.mrf.mxu1  ;;  %v4349_v57 = vrot.slane %v4347_v10, 1  ;;  %v4352_v33 = vrot.slane %v4350_v51, 2  ;;  %v3612_v25 = vrot.slane %v15205_v20, 1 }
  0xfe   : > { %21894 = vst [vmem:[#allocation20_spill] sm:$0xff] %v16301_v36  ;;  %v16315_v19 = vadd.f32 %v2076_v63, %v1558_v49  ;;  %v1574_v6 = vadd.f32 %v1573_v11, %v16178_v30  ;;  %v16322_v36 = vld [vmem:[%s15503_s12 + $0x18] sm:$0xff]   ;;  %v4022_v35 = vsel %vm21759_vm2, %v4020_v59, %v4021_v62  ;;  %v4368_v59 = vshll.u32 %v16087_v45, 16 }
  0xff   : > { %v14069_v52 = vpop.f32.mrf.mxu0  ;;  %v14035_v16 = vpop.f32.mrf.mxu1  ;;  %v4353_v51 = vor.u32 %v4352_v33, %v4349_v57 }
 0x100   : > { %21895 = vst [vmem:[#allocation21_spill] sm:$0xff] %v16315_v19  ;;  %v16324_v14 = vadd.f32 %v14069_v52, %v1569_v5  ;;  %v1585_v49 = vadd.f32 %v14035_v16, %v16185_v42  ;;  %v3611_v19 = vsel %vm21759_vm2, %v3608_v34, %v3610_v22  ;;  %v4023_v42 = vrot.slane %v16322_v36, 1 }
 0x101   : > { %v2079_v63 = vpop.f32.mrf.mxu0  ;;  %v1576_v30 = vpop.f32.mrf.mxu1  ;;  %v4356_v34 = vshrl.u32 %v16084_v21, 16 }
 0x102   : > { %v16329_v11 = vadd.f32 %v2079_v63, %v1561_v56  ;;  %v1577_v5 = vadd.f32 %v1576_v30, %v16193_v3  ;;  %v4345_v56 = vor.u32 %v4344_v2, %v4341_v46  ;;  %v4359_v3 = vshll.u32 %v16084_v21, 16 }
 0x103   : > { %v14072_v52 = vpop.f32.mrf.mxu0  ;;  %14247 = vmatmul.mubr.msk.bf16.gmra.mxu0 %vm21764_vm0, %v3609_v41  ;;  %v14038_v18 = vpop.f32.mrf.mxu1  ;;  %14213 = vmatmul.mubr.msk.bf16.gmra.mxu1 %vm21764_vm0, %v15983_v27  ;;  %v4025_v2 = vrot.slane %v16333_v39, 1  ;;  %v3613_v21 = vsel %vm21759_vm2, %v3610_v22, %v3612_v25  ;;  %v4024_v57 = vsel %vm21759_vm2, %v4021_v62, %v4023_v42  ;;  %v16366_v25 = vld [vmem:[%s15503_s12 + $0x30] sm:$0xff]   ;;  %v16371_v62 = vld [vmem:[%s21676_s3 + $0x28] sm:$0xff]  }
 0x104   : > { %v16338_v58 = vadd.f32 %v14072_v52, %v1582_v53  ;;  %14250 = vmatprep.mubr.msk.bf16.mxu0 %vm21764_vm0, %v3611_v19  ;;  %v1598_v10 = vadd.f32 %v14038_v18, %v16201_v0  ;;  %14256 = vmatprep.mubr.msk.bf16.mxu1 %vm21764_vm0, %v4022_v35  ;;  %v4365_v53 = vshrl.u32 %v16087_v45, 16  ;;  %v16355_v0 = vld [vmem:[%s15503_s12 + $0x28] sm:$0xff]   ;;  %v4358_v45 = vrot.slane %v4356_v34, 1 }
 0x105   : > { %v2092_v41 = vpop.f32.mrf.mxu0  ;;  %v1589_v20 = vpop.f32.mrf.mxu1  ;;  %v4361_v46 = vrot.slane %v4359_v3, 2  ;;  %v4354_v30 = vsel %vm21750_vm3, %v4345_v56, %v4353_v51  ;;  %v4026_v22 = vsel %vm21759_vm2, %v4023_v42, %v4025_v2  ;;  %v4027_v56 = vrot.slane %v16355_v0, 1 }
 0x106   : > { %v16349_v27 = vadd.f32 %v2092_v41, %v1574_v6  ;;  %v1590_v19 = vadd.f32 %v1589_v20, %v16210_v50  ;;  %v4367_v52 = vrot.slane %v4365_v53, 1  ;;  %v4370_v50 = vrot.slane %v4368_v59, 2 }
 0x107   : > { %v14073_v16 = vpop.f32.mrf.mxu0  ;;  %v14039_v35 = vpop.f32.mrf.mxu1  ;;  %v4374_v42 = vshrl.u32 %v16108_v31, 16  ;;  %v4377_v53 = vshll.u32 %v16108_v31, 16 }
 0x108   : > { %v16357_v33 = vadd.f32 %v14073_v16, %v1585_v49  ;;  %v1601_v6 = vadd.f32 %v14039_v35, %v16217_v4  ;;  %v4371_v20 = vor.u32 %v4370_v50, %v4367_v52  ;;  %v4386_v16 = vshll.u32 %v16112_v12, 16 }
 0x109   : > { %v2095_v63 = vpop.f32.mrf.mxu0  ;;  %v1592_v18 = vpop.f32.mrf.mxu1 }
 0x10a   : > { %v16362_v41 = vadd.f32 %v2095_v63, %v1577_v5  ;;  %v1593_v49 = vadd.f32 %v1592_v18, %v16225_v23  ;;  %v4362_v5 = vor.u32 %v4361_v46, %v4358_v45  ;;  %v16394_v45 = vld [vmem:[%s15503_s12 + $0x38] sm:$0xff]  }
 0x10b   : > { %v14076_v4 = vpop.f32.mrf.mxu0  ;;  %14251 = vmatmul.mubr.msk.bf16.gmra.mxu0 %vm21764_vm0, %v3613_v21  ;;  %v14042_v34 = vpop.f32.mrf.mxu1  ;;  %14257 = vmatmul.mubr.msk.bf16.vlgmr.msra.gmra.mxu1 %vm21764_vm0, %v4024_v57  ;;  %v4029_v57 = vrot.slane %v16366_v25, 1 }
 0x10c   : > { %v16376_v3 = vadd.f32 %v14076_v4, %v1598_v10  ;;  %14294 = vmatprep.mubr.msk.bf16.mxu0 %vm21764_vm0, %v4354_v30  ;;  %v1614_v23 = vadd.f32 %v14042_v34, %v16233_v48  ;;  %14331 = vmatpush3.bf16.msra.mxu1 %v16093_v8  ;;  %v4383_v10 = vshrl.u32 %v16112_v12, 16  ;;  %v4028_v8 = vsel %vm21759_vm2, %v4025_v2, %v4027_v56 }
 0x10d   : > { %v2108_v59 = vpop.f32.mrf.mxu0  ;;  %14260 = vmatprep.mubr.msk.bf16.mxu1 %vm21764_vm0, %v4026_v22  ;;  %v1605_v21 = vpop.f32.mrf.mxu1  ;;  %14406 = vmatprep.subr.bf16.mxu1 %v16371_v62  ;;  %v4363_v12 = vsel %vm21750_vm3, %v4353_v51, %v4362_v5  ;;  %v4376_v30 = vrot.slane %v4374_v42, 1  ;;  %v4372_v18 = vsel %vm21750_vm3, %v4362_v5, %v4371_v20  ;;  %v4030_v2 = vsel %vm21759_vm2, %v4027_v56, %v4029_v57 }
 0x10e   : > { %v16387_v35 = vadd.f32 %v2108_v59, %v1590_v19  ;;  %v1606_v31 = vadd.f32 %v1605_v21, %v16242_v13  ;;  %v4379_v19 = vrot.slane %v4377_v53, 2  ;;  %v4385_v22 = vrot.slane %v4383_v10, 1  ;;  %v16405_v59 = vld [vmem:[%s15503_s12 + $0x40] sm:$0xff]  }
 0x10f   : > { %v14077_v48 = vpop.f32.mrf.mxu0  ;;  %v14043_v46 = vpop.f32.mrf.mxu1  ;;  %v4388_v13 = vrot.slane %v4386_v16, 2  ;;  %v4031_v51 = vrot.slane %v16394_v45, 1  ;;  %v4392_v5 = vshrl.u32 %v16125_v61, 16  ;;  %v4395_v56 = vshll.u32 %v16125_v61, 16 }
 0x110   : > { %v16396_v63 = vadd.f32 %v14077_v48, %v1601_v6  ;;  %v1617_v52 = vadd.f32 %v14043_v46, %v16249_v32  ;;  %v4401_v16 = vshrl.u32 %v16129_v28, 16  ;;  %v4033_v46 = vrot.slane %v16405_v59, 1 }
 0x111   : > { %v2111_v50 = vpop.f32.mrf.mxu0  ;;  %v1608_v4 = vpop.f32.mrf.mxu1  ;;  %v4389_v10 = vor.u32 %v4388_v13, %v4385_v22  ;;  %v16432_v13 = vld [vmem:[%s15503_s12 + $0x48] sm:$0xff]  }
 0x112   : > { %v16401_v34 = vadd.f32 %v2111_v50, %v1593_v49  ;;  %v1609_v6 = vadd.f32 %v1608_v4, %v16257_v26  ;;  %v4380_v49 = vor.u32 %v4379_v19, %v4376_v30  ;;  %v4403_v4 = vrot.slane %v4401_v16, 1 }
 0x113   : > { %v14080_v21 = vpop.f32.mrf.mxu0  ;;  %14295 = vmatmul.mubr.msk.bf16.vlgmr.msra.gmra.mxu0 %vm21764_vm0, %v4363_v12  ;;  %v14046_v32 = vpop.f32.mrf.mxu1  ;;  %14261 = vmatmul.mubr.msk.bf16.gmra.mxu1 %vm21764_vm0, %v4028_v8 }
 0x114   : > { %v16410_v42 = vadd.f32 %v14080_v21, %v1614_v23  ;;  %14298 = vmatprep.mubr.msk.bf16.mxu0 %vm21764_vm0, %v4372_v18  ;;  %v1630_v53 = vadd.f32 %v14046_v32, %v16265_v1  ;;  %14264 = vmatprep.mubr.msk.bf16.mxu1 %vm21764_vm0, %v4030_v2  ;;  %v4404_v23 = vshll.u32 %v16129_v28, 16  ;;  %v4032_v1 = vsel %vm21759_vm2, %v4029_v57, %v4031_v51  ;;  %v16437_v57 = vld [vmem:[%s21675_s2 + $0x30] sm:$0xff]  }
 0x115   : > { %v2124_v26 = vpop.f32.mrf.mxu0  ;;  %14369 = vmatpush3.bf16.msra.mxu0 %v16134_v54  ;;  %v1621_v48 = vpop.f32.mrf.mxu1  ;;  %v4381_v50 = vsel %vm21750_vm3, %v4371_v20, %v4380_v49  ;;  %v4394_v28 = vrot.slane %v4392_v5, 1  ;;  %v4397_v18 = vrot.slane %v4395_v56, 2  ;;  %v4034_v20 = vsel %vm21759_vm2, %v4031_v51, %v4033_v46  ;;  %v16443_v21 = vld [vmem:[%s15503_s12 + $0x50] sm:$0xff]  }
 0x116   : > { %v16421_v8 = vadd.f32 %v2124_v26, %v1606_v31  ;;  %v1622_v61 = vadd.f32 %v1621_v48, %v16273_v38  ;;  %v4390_v31 = vsel %vm21750_vm3, %v4380_v49, %v4389_v10  ;;  %v4406_v38 = vrot.slane %v4404_v23, 2  ;;  %14444 = vmatprep.subr.bf16.mxu0 %v16437_v57 }
 0x117   : > { %v14081_v12 = vpop.f32.mrf.mxu0  ;;  %v14047_v30 = vpop.f32.mrf.mxu1  ;;  %v4410_v56 = vshrl.u32 %v16159_v60, 16  ;;  %v4413_v51 = vshll.u32 %v16159_v60, 16  ;;  %v4419_v23 = vshrl.u32 %v16165_v40, 16 }
 0x118   : > { %v16426_v19 = vadd.f32 %v14081_v12, %v1617_v52  ;;  %v1633_v54 = vadd.f32 %v14047_v30, %v16279_v17  ;;  %v4407_v16 = vor.u32 %v4406_v38, %v4403_v4 }
 0x119   : > { %v2127_v22 = vpop.f32.mrf.mxu0  ;;  %v1624_v52 = vpop.f32.mrf.mxu1 }
 0x11a   : > { %v16439_v2 = vadd.f32 %v2127_v22, %v1609_v6  ;;  %v1625_v17 = vadd.f32 %v1624_v52, %v16288_v37  ;;  %v4398_v6 = vor.u32 %v4397_v18, %v4394_v28  ;;  %v4035_v37 = vrot.slane %v16432_v13, 1 }
 0x11b   : > { %v14084_v32 = vpop.f32.mrf.mxu0  ;;  %14299 = vmatmul.mubr.msk.bf16.gmra.mxu0 %vm21764_vm0, %v4381_v50  ;;  %v14050_v49 = vpop.f32.mrf.mxu1  ;;  %14265 = vmatmul.mubr.msk.bf16.gmra.mxu1 %vm21764_vm0, %v4032_v1  ;;  %v4037_v1 = vrot.slane %v16443_v21, 1  ;;  %v4412_v18 = vrot.slane %v4410_v56, 1  ;;  %v4415_v22 = vrot.slane %v4413_v51, 2 }
 0x11c   : > { %v16448_v5 = vadd.f32 %v14084_v32, %v1630_v53  ;;  %14302 = vmatprep.mubr.msk.bf16.mxu0 %vm21764_vm0, %v4390_v31  ;;  %14268 = vmatprep.mubr.msk.bf16.mxu1 %vm21764_vm0, %v4034_v20  ;;  %v4422_v53 = vshll.u32 %v16165_v40, 16  ;;  %v4399_v28 = vsel %vm21750_vm3, %v4389_v10, %v4398_v6  ;;  %v4036_v4 = vsel %vm21759_vm2, %v4033_v46, %v4035_v37  ;;  %v16467_v40 = vld [vmem:[%s15503_s12 + $0x58] sm:$0xff]  }
 0x11d   : > { %v2140_v26 = vpop.f32.mrf.mxu0  ;;  %v1637_v48 = vpop.f32.mrf.mxu1  ;;  %v4408_v38 = vsel %vm21750_vm3, %v4398_v6, %v4407_v16  ;;  %21896 = vst [vmem:[#allocation22_spill] sm:$0xff] %v16467_v40  ;;  %v1646_v20 = vadd.f32 %v14050_v49, %v16140_v9  ;;  %v4428_v46 = vshrl.u32 %v16191_v29, 16  ;;  %v4431_v6 = vshll.u32 %v16191_v29, 16 }
 0x11e   : > { %v16458_v12 = vadd.f32 %v2140_v26, %v1622_v61  ;;  %v4421_v61 = vrot.slane %v4419_v23, 1  ;;  %v4424_v52 = vrot.slane %v4422_v53, 2  ;;  %v1638_v56 = vadd.f32 %v1637_v48, %v16151_v24 }
 0x11f   : > { %v14085_v30 = vpop.f32.mrf.mxu0  ;;  %v14051_v50 = vpop.f32.mrf.mxu1  ;;  %v4416_v9 = vor.u32 %v4415_v22, %v4412_v18  ;;  %v4039_v49 = vrot.slane %v16467_v40, 1  ;;  %v4437_v53 = vshrl.u32 %v16197_v47, 16  ;;  %v4440_v29 = vshll.u32 %v16197_v47, 16 }
 0x120   : > { %v16461_v60 = vadd.f32 %v14085_v30, %v1633_v54  ;;  %v4038_v54 = vsel %vm21759_vm2, %v4035_v37, %v4037_v1  ;;  %v16474_v30 = vld [vmem:[%s15503_s12 + $0x60] sm:$0xff]   ;;  %v4425_v37 = vor.u32 %v4424_v52, %v4421_v61  ;;  %v1649_v24 = vadd.f32 %v14051_v50, %v16155_v7  ;;  %v16499_v50 = vld [vmem:[%s15503_s12 + $0x68] sm:$0xff]  }
 0x121   : > { %v2143_v31 = vpop.f32.mrf.mxu0  ;;  %v1640_v32 = vpop.f32.mrf.mxu1  ;;  %21897 = vst [vmem:[#allocation23_spill] sm:$0xff] %v16474_v30  ;;  %v4430_v18 = vrot.slane %v4428_v46, 1  ;;  %v4433_v22 = vrot.slane %v4431_v6, 2  ;;  %v4417_v52 = vsel %vm21750_vm3, %v4407_v16, %v4416_v9  ;;  %v4040_v47 = vsel %vm21759_vm2, %v4037_v1, %v4039_v49  ;;  %21901 = vst [vmem:[#allocation27_spill] sm:$0xff] %v16499_v50 }
 0x122   : > { %v16470_v26 = vadd.f32 %v2143_v31, %v1625_v17  ;;  %v4041_v31 = vrot.slane %v16474_v30, 1  ;;  %v4426_v7 = vsel %vm21750_vm3, %v4416_v9, %v4425_v37  ;;  %v21935_v30 = vld [vmem:[#allocation15_spill] sm:$0xff] }
 0x123   : > { %v14088_v10 = vpop.f32.mrf.mxu0  ;;  %14303 = vmatmul.mubr.msk.bf16.gmra.mxu0 %vm21764_vm0, %v4399_v28  ;;  %v14054_v51 = vpop.f32.mrf.mxu1  ;;  %14269 = vmatmul.mubr.msk.bf16.gmra.mxu1 %vm21764_vm0, %v4036_v4  ;;  %v4434_v16 = vor.u32 %v4433_v22, %v4430_v18  ;;  %v21905_v18 = vld [vmem:[#allocation8_spill] sm:$0xff] }
 0x124   : > { %v16480_v23 = vadd.f32 %v14088_v10, %v1646_v20  ;;  %14306 = vmatprep.mubr.msk.bf16.mxu0 %vm21764_vm0, %v4408_v38  ;;  %14272 = vmatprep.mubr.msk.bf16.mxu1 %vm21764_vm0, %v4038_v54  ;;  %v1641_v38 = vadd.f32 %v1640_v32, %v16167_v15  ;;  %v4439_v10 = vrot.slane %v4437_v53, 1  ;;  %v1662_v46 = vadd.f32 %v14054_v51, %v16172_v43  ;;  %v16506_v32 = vld [vmem:[%s15503_s12 + $0x70] sm:$0xff]  }
 0x125   : > { %v2156_v17 = vpop.f32.mrf.mxu0  ;;  %v1653_v48 = vpop.f32.mrf.mxu1  ;;  %v4042_v15 = vsel %vm21759_vm2, %v4039_v49, %v4041_v31  ;;  %21903 = vst [vmem:[#allocation29_spill] sm:$0xff] %v16506_v32  ;;  %v4446_v43 = vshrl.u32 %v16223_v55, 16  ;;  %v4449_v51 = vshll.u32 %v16223_v55, 16  ;;  %v4043_v53 = vrot.slane %v16499_v50, 1 }
 0x126   : > { %21898 = vst [vmem:[#allocation24_spill] sm:$0xff] %v16480_v23  ;;  %v16489_v28 = vadd.f32 %v2156_v17, %v1638_v56  ;;  %v4442_v56 = vrot.slane %v4440_v29, 2  ;;  %v1654_v1 = vadd.f32 %v1653_v48, %v16183_v44  ;;  %v4455_v22 = vshrl.u32 %v21905_v18, 16  ;;  %v21906_v48 = vld [vmem:[#allocation3_spill] sm:$0xff] }
 0x127   : > { %v14089_v4 = vpop.f32.mrf.mxu0  ;;  %v14055_v20 = vpop.f32.mrf.mxu1  ;;  %v4458_v44 = vshll.u32 %v21905_v18, 16  ;;  %v4435_v55 = vsel %vm21750_vm3, %v4425_v37, %v4434_v16 }
 0x128   : > { %21899 = vst [vmem:[#allocation25_spill] sm:$0xff] %v16489_v28  ;;  %v16493_v61 = vadd.f32 %v14089_v4, %v1649_v24  ;;  %v4443_v29 = vor.u32 %v4442_v56, %v4439_v10  ;;  %v21909_v10 = vld [vmem:[#allocation4_spill] sm:$0xff]  ;;  %v4457_v37 = vrot.slane %v4455_v22, 1 }
 0x129   : > { %v2159_v54 = vpop.f32.mrf.mxu0  ;;  %v1656_v17 = vpop.f32.mrf.mxu1  ;;  %v4460_v50 = vrot.slane %v4458_v44, 2 }
 0x12a   : > { %21900 = vst [vmem:[#allocation26_spill] sm:$0xff] %v16493_v61  ;;  %v16502_v6 = vadd.f32 %v2159_v54, %v1641_v38  ;;  %v1665_v38 = vadd.f32 %v14055_v20, %v21906_v48  ;;  %v1657_v56 = vadd.f32 %v1656_v17, %v21909_v10  ;;  %v4448_v20 = vrot.slane %v4446_v43, 1  ;;  %v16543_v43 = vld [vmem:[%s15503_s12 + $0x88] sm:$0xff]  }
 0x12b   : > { %v14092_v24 = vpop.f32.mrf.mxu0  ;;  %14307 = vmatmul.mubr.msk.bf16.gmra.mxu0 %vm21764_vm0, %v4417_v52  ;;  %v14058_v9 = vpop.f32.mrf.mxu1  ;;  %14273 = vmatmul.mubr.msk.bf16.gmra.mxu1 %vm21764_vm0, %v4040_v47  ;;  %v4045_v47 = vrot.slane %v16506_v32, 1  ;;  %v4451_v48 = vrot.slane %v4449_v51, 2  ;;  %v16533_v32 = vld [vmem:[%s15503_s12 + $0x78] sm:$0xff]   ;;  %21915 = vst [vmem:[#allocation31_spill] sm:$0xff] %v16543_v43 }
 0x12c   : > { %21902 = vst [vmem:[#allocation28_spill] sm:$0xff] %v16502_v6  ;;  %v16510_v4 = vadd.f32 %v14092_v24, %v1662_v46  ;;  %14310 = vmatprep.mubr.msk.bf16.mxu0 %vm21764_vm0, %v4426_v7  ;;  %14276 = vmatprep.mubr.msk.bf16.mxu1 %vm21764_vm0, %v4042_v15  ;;  %v21908_v46 = vld [vmem:[#allocation13_spill] sm:$0xff] }
 0x12d   : > { %v2172_v49 = vpop.f32.mrf.mxu0  ;;  %v1669_v52 = vpop.f32.mrf.mxu1  ;;  %v4464_v15 = vshrl.u32 %v21908_v46, 16  ;;  %v4467_v24 = vshll.u32 %v21908_v46, 16  ;;  %21911 = vst [vmem:[#allocation13_spill] sm:$0xff] %v16533_v32  ;;  %v21912_v6 = vld [vmem:[#allocation5_spill] sm:$0xff]  ;;  %v4046_v17 = vsel %vm21759_vm2, %v4043_v53, %v4045_v47 }
 0x12e   : > { %21904 = vst [vmem:[#allocation30_spill] sm:$0xff] %v16510_v4  ;;  %v16521_v54 = vadd.f32 %v2172_v49, %v1654_v1  ;;  %v4044_v49 = vsel %vm21759_vm2, %v4041_v31, %v4043_v53  ;;  %v1678_v46 = vadd.f32 %v14058_v9, %v21912_v6  ;;  %v4452_v6 = vor.u32 %v4451_v48, %v4448_v20 }
 0x12f   : > { %v14093_v7 = vpop.f32.mrf.mxu0  ;;  %v14059_v18 = vpop.f32.mrf.mxu1  ;;  %v4466_v31 = vrot.slane %v4464_v15, 1  ;;  %v4047_v53 = vrot.slane %v16533_v32, 1 }
 0x130   : > { %21907 = vst [vmem:[#allocation8_spill] sm:$0xff] %v16521_v54  ;;  %v16528_v4 = vadd.f32 %v14093_v7, %v1665_v38  ;;  %v4444_v54 = vsel %vm21750_vm3, %v4434_v16, %v4443_v29  ;;  %v16540_v38 = vld [vmem:[%s15503_s12 + $0x80] sm:$0xff]   ;;  %v4469_v16 = vrot.slane %v4467_v24, 2 }
 0x131   : > { %v2175_v1 = vpop.f32.mrf.mxu0  ;;  %v1672_v61 = vpop.f32.mrf.mxu1  ;;  %21914 = vst [vmem:[#allocation5_spill] sm:$0xff] %v16540_v38  ;;  %v21916_v7 = vld [vmem:[#allocation6_spill] sm:$0xff] }
 0x132   : > { %21910 = vst [vmem:[#allocation3_spill] sm:$0xff] %v16528_v4  ;;  %v16536_v28 = vadd.f32 %v2175_v1, %v1657_v56  ;;  %v1670_v10 = vadd.f32 %v1669_v52, %v21916_v7  ;;  %v4461_v56 = vor.u32 %v4460_v50, %v4457_v37  ;;  %v21919_v52 = vld [vmem:[#allocation7_spill] sm:$0xff]  ;;  %v4470_v48 = vor.u32 %v4469_v16, %v4466_v31 }
 0x133   : > { %v14096_v51 = vpop.f32.mrf.mxu0  ;;  %14311 = vmatmul.mubr.msk.bf16.gmra.mxu0 %vm21764_vm0, %v4435_v55  ;;  %v14062_v22 = vpop.f32.mrf.mxu1  ;;  %14277 = vmatmul.mubr.msk.bf16.gmra.mxu1 %vm21764_vm0, %v4044_v49  ;;  %v21918_v55 = vld [vmem:[#allocation14_spill] sm:$0xff]  ;;  %v1681_v1 = vadd.f32 %v14059_v18, %v21919_v52  ;;  %v4049_v49 = vrot.slane %v16540_v38, 1  ;;  %v16561_v7 = vld [vmem:[%s15503_s12 + $0x90] sm:$0xff]  }
 0x134   : > { %21913 = vst [vmem:[#allocation4_spill] sm:$0xff] %v16536_v28  ;;  %v16547_v44 = vadd.f32 %v14096_v51, %v1678_v46  ;;  %14314 = vmatprep.mubr.msk.bf16.mxu0 %vm21764_vm0, %v4444_v54  ;;  %14280 = vmatprep.mubr.msk.bf16.mxu1 %vm21764_vm0, %v4046_v17  ;;  %v4473_v15 = vshrl.u32 %v21918_v55, 16  ;;  %v4476_v24 = vshll.u32 %v21918_v55, 16  ;;  %v4051_v54 = vrot.slane %v16543_v43, 1  ;;  %v21921_v17 = vld [vmem:[#allocation9_spill] sm:$0xff]  ;;  %v21923_v43 = vld [vmem:[#allocation10_spill] sm:$0xff] }
 0x135   : > { %v2188_v9 = vpop.f32.mrf.mxu0  ;;  %v1685_v46 = vpop.f32.mrf.mxu1  ;;  %v1673_v32 = vadd.f32 %v1672_v61, %v21921_v17  ;;  %v4453_v55 = vsel %vm21750_vm3, %v4443_v29, %v4452_v6  ;;  %v1694_v38 = vadd.f32 %v14062_v22, %v21923_v43  ;;  %v4050_v61 = vsel %vm21759_vm2, %v4047_v53, %v4049_v49  ;;  %v16578_v17 = vld [vmem:[%s15503_s12 + $0x98] ss:$0 sps:$4 sm:$0x11]   ;;  %v21926_v22 = vld [vmem:[#allocation11_spill] sm:$0xff]  ;;  %v21934_v28 = vld [vmem:[#allocation21_spill] sm:$0xff] }
 0x136   : > { %21917 = vst [vmem:[#allocation6_spill] sm:$0xff] %v16547_v44  ;;  %v16556_v51 = vadd.f32 %v2188_v9, %v1670_v10  ;;  %v4048_v10 = vsel %vm21759_vm2, %v4045_v47, %v4047_v53  ;;  %v4462_v9 = vsel %vm21750_vm3, %v4452_v6, %v4461_v56  ;;  %v4475_v52 = vrot.slane %v4473_v15, 1  ;;  %v21925_v6 = vld [vmem:[#allocation16_spill] sm:$0xff] }
 0x137   : > { %v14097_v20 = vpop.f32.mrf.mxu0  ;;  %v14063_v50 = vpop.f32.mrf.mxu1  ;;  %v4471_v29 = vsel %vm21750_vm3, %v4461_v56, %v4470_v48  ;;  %v4482_v15 = vshrl.u32 %v21925_v6, 16  ;;  %v4485_v43 = vshll.u32 %v21925_v6, 16  ;;  %v4055_v4 = vrot.slane %v16578_v17, 1 }
 0x138   : > { %21920 = vst [vmem:[#allocation14_spill] sm:$0xff] %v16556_v51  ;;  %v16564_v37 = vadd.f32 %v14097_v20, %v1681_v1  ;;  %v4478_v51 = vrot.slane %v4476_v24, 2  ;;  %v4052_v1 = vsel %vm21759_vm2, %v4049_v49, %v4051_v54  ;;  %v21928_v49 = vld [vmem:[#allocation17_spill] sm:$0xff] }
 0x139   : > { %v2191_v18 = vpop.f32.mrf.mxu0  ;;  %v1688_v31 = vpop.f32.mrf.mxu1  ;;  %v4494_v56 = vshll.u32 %v21928_v49, 16 }
 0x13a   : > { %21922 = vst [vmem:[#allocation7_spill] sm:$0xff] %v16564_v37  ;;  %v16570_v16 = vadd.f32 %v2191_v18, %v1673_v32  ;;  %v1686_v32 = vadd.f32 %v1685_v46, %v21926_v22  ;;  %v21929_v18 = vld [vmem:[#allocation20_spill] sm:$0xff]  ;;  %v4479_v6 = vor.u32 %v4478_v51, %v4475_v52  ;;  %v21930_v37 = vld [vmem:[#allocation18_spill] sm:$0xff]  ;;  %v4487_v51 = vrot.slane %v4485_v43, 2 }
 0x13b   : > { %v14100_v20 = vpop.f32.mrf.mxu0  ;;  %14315 = vmatmul.mubr.msk.bf16.gmra.mxu0 %vm21764_vm0, %v4453_v55  ;;  %v14106_v53 = vpop.f32.mrf.mxu1  ;;  %14281 = vmatmul.mubr.msk.bf16.gmra.mxu1 %vm21764_vm0, %v4048_v10  ;;  %v4491_v55 = vshrl.u32 %v21928_v49, 16  ;;  %v4789_v46 = vshrl.u32 %v21930_v37, 16  ;;  %v16601_v52 = vld [vmem:[%s15543_s19 + $0x98] ss:$0 sps:$4 sm:$0x33]  }
 0x13c   : > { %21924 = vst [vmem:[#allocation9_spill] sm:$0xff] %v16570_v16  ;;  %v16583_v24 = vadd.f32 %v14100_v20, %v1694_v38  ;;  %14318 = vmatprep.mubr.msk.bf16.mxu0 %vm21764_vm0, %v4462_v9  ;;  %v2775_v47 = vadd.f32 %v14106_v53, %v21929_v18  ;;  %14284 = vmatprep.mubr.msk.bf16.mxu1 %vm21764_vm0, %v4050_v61  ;;  %v4792_v38 = vshll.u32 %v21930_v37, 16  ;;  %v21931_v20 = vld [vmem:[#allocation12_spill] sm:$0xff]  ;;  %v4484_v61 = vrot.slane %v4482_v15, 1 }
 0x13d   : > { %v2204_v16 = vpop.f32.mrf.mxu0  ;;  %v1697_v22 = vadd.f32 %v14063_v50, %v21931_v20  ;;  %v2630_v9 = vpop.f32.mrf.mxu1  ;;  %v1689_v37 = vadd.f32 %v1688_v31, %v21935_v30  ;;  %v4480_v17 = vsel %vm21750_vm3, %v4470_v48, %v4479_v6  ;;  %v4791_v15 = vrot.slane %v4789_v46, 1 }
 0x13e   : > { %21927 = vst [vmem:[#allocation10_spill] sm:$0xff] %v16583_v24  ;;  %v16594_v10 = vadd.f32 %v2204_v16, %v1686_v32  ;;  %v21933_v24 = vld [vmem:[#allocation19_spill] sm:$0xff]  ;;  %v2773_v53 = vadd.f32 %v2630_v9, %v21934_v28  ;;  %v4493_v16 = vrot.slane %v4491_v55, 1  ;;  %v4496_v32 = vrot.slane %v4494_v56, 2 }
 0x13f   : > { %v4797_v44 = vshrl.u32 %v21933_v24, 16  ;;  %v4800_v49 = vshll.u32 %v21933_v24, 16  ;;  %v14101_v18 = vpop.f32.mrf.mxu0  ;;  %v14107_v50 = vpop.f32.mrf.mxu1  ;;  %v21936_v24 = vrot.slane %v16561_v7, 1  ;;  %v4794_v23 = vrot.slane %v4792_v38, 2 }
 0x140   : > { %21932 = vst [vmem:[#allocation16_spill] sm:$0xff] %v16594_v10  ;;  %v16604_v40 = vadd.f32 %v14101_v18, %v1697_v22  ;;  %v2776_v20 = vadd.f32 %v14107_v50, %v16324_v14  ;;  %v4488_v14 = vor.u32 %v4487_v51, %v4484_v61  ;;  %v4500_v56 = vshrl.u32 %v16601_v52, 16 }
 0x141   : > { %v2207_v10 = vpop.f32.mrf.mxu0  ;;  %v4054_v28 = vsel %vm21759_vm2, %v4051_v54, %v21936_v24  ;;  %v2633_v9 = vpop.f32.mrf.mxu1  ;;  %v4799_v30 = vrot.slane %v4797_v44, 1  ;;  %v4802_v31 = vrot.slane %v4800_v49, 2  ;;  %v4503_v18 = vshll.u32 %v16601_v52, 16 }
 0x142   : > { %v16611_v43 = vadd.f32 %v2207_v10, %v1689_v37  ;;  %v2774_v22 = vadd.f32 %v2633_v9, %v16329_v11  ;;  %v4497_v44 = vor.u32 %v4496_v32, %v4493_v16  ;;  %v4806_v48 = vshrl.u32 %v16322_v36, 16 }
 0x143   : > { %v14144_v55 = vpop.f32.mrf.mxu0  ;;  %14319 = vmatmul.mubr.msk.bf16.gmra.mxu0 %vm21764_vm0, %v4471_v29  ;;  %v14110_v54 = vpop.f32.mrf.mxu1  ;;  %14285 = vmatmul.mubr.msk.bf16.gmra.mxu1 %vm21764_vm0, %v4052_v1  ;;  %v4809_v11 = vshll.u32 %v16322_v36, 16  ;;  %v4815_v38 = vshrl.u32 %v16333_v39, 16  ;;  %v21937_v1 = vmov %v21936_v24  ;;  %v4795_v51 = vor.u32 %v4794_v23, %v4791_v15  ;;  %v5231_v36 = vld [vmem:[%s15543_s19 + $0x8] sm:$0xc] }
 0x144   : > { %v16617_v50 = vadd.f32 %v14144_v55, %v2775_v47  ;;  %14322 = vmatprep.mubr.msk.bf16.mxu0 %vm21764_vm0, %v4480_v17  ;;  %v2779_v29 = vadd.f32 %v14110_v54, %v16338_v58  ;;  %14288 = vmatprep.mubr.msk.bf16.mxu1 %vm21764_vm0, %v4054_v28  ;;  %v4818_v47 = vshll.u32 %v16333_v39, 16  ;;  %v4056_v61 = vsel %vm21759_vm2, %v21937_v1, %v4055_v4  ;;  %v15348_v1 = vld [vmem:[%s15543_s19 + $0x10] sm:$0xff]  }
 0x145   : > { %v2948_v46 = vpop.f32.mrf.mxu0  ;;  %v2646_v10 = vpop.f32.mrf.mxu1  ;;  %v4803_v37 = vor.u32 %v4802_v31, %v4799_v30  ;;  %v4489_v32 = vsel %vm21750_vm3, %v4479_v6, %v4488_v14  ;;  %v4502_v24 = vrot.slane %v4500_v56, 1  ;;  %v4505_v28 = vrot.slane %v4503_v18, 2  ;;  %v15347_v31 = vld [vmem:[%s15543_s19 + $0xc] sm:$0xf] }
 0x146   : > { %v16627_v49 = vadd.f32 %v2948_v46, %v2773_v53  ;;  %v2777_v58 = vadd.f32 %v2646_v10, %v16349_v27  ;;  %v4498_v53 = vsel %vm21750_vm3, %v4488_v14, %v4497_v44  ;;  %v4808_v9 = vrot.slane %v4806_v48, 1 }
 0x147   : > { %v14145_v16 = vpop.f32.mrf.mxu0  ;;  %v14111_v17 = vpop.f32.mrf.mxu1  ;;  %v4811_v55 = vrot.slane %v4809_v11, 2  ;;  %v4817_v15 = vrot.slane %v4815_v38, 1  ;;  %v4820_v30 = vrot.slane %v4818_v47, 2  ;;  %v12940_v54 = vcombine.low %v5231_v36, %v15347_v31 }
 0x148   : > { %v16635_v39 = vadd.f32 %v14145_v16, %v2776_v20  ;;  %v2780_v4 = vadd.f32 %v14111_v17, %v16357_v33  ;;  %v4804_v6 = vsel %vm21750_vm3, %v4795_v51, %v4803_v37  ;;  %v4506_v14 = vor.u32 %v4505_v28, %v4502_v24 }
 0x149   : > { %v2951_v23 = vpop.f32.mrf.mxu0  ;;  %v2649_v27 = vpop.f32.mrf.mxu1  ;;  %v4812_v33 = vor.u32 %v4811_v55, %v4808_v9  ;;  %v4827_v11 = vshll.u32 %v16355_v0, 16  ;;  %v4821_v47 = vor.u32 %v4820_v30, %v4817_v15  ;;  %v5239_v10 = vrot.slane %v12940_v54, 2 }
 0x14a   : > { %v16640_v46 = vadd.f32 %v2951_v23, %v2774_v22  ;;  %v2778_v56 = vadd.f32 %v2649_v27, %v16362_v41  ;;  %v4824_v22 = vshrl.u32 %v16355_v0, 16  ;;  %v5240_v51 = vrot.slane %v15348_v1, 2 }
 0x14b   : > { %v14148_v20 = vpop.f32.mrf.mxu0  ;;  %14323 = vmatmul.mubr.msk.bf16.gmra.mxu0 %vm21764_vm0, %v4489_v32  ;;  %v14114_v18 = vpop.f32.mrf.mxu1  ;;  %14289 = vmatmul.mubr.msk.bf16.gmra.mxu1 %vm21764_vm0, %v4056_v61  ;;  %v4833_v61 = vshrl.u32 %v16366_v25, 16  ;;  %v4836_v16 = vshll.u32 %v16366_v25, 16  ;;  %v4507_v28 = vsel %vm21750_vm3, %v4497_v44, %v4506_v14  ;;  %v16671_v44 = vld [vmem:[%s21676_s3 + $0x30] sm:$0xff]   ;;  %v4854_v1 = vshll.u32 %v16405_v59, 16 }
 0x14c   : > { %v16645_v48 = vadd.f32 %v14148_v20, %v2779_v29  ;;  %14326 = vmatprep.mubr.msk.bf16.mxu0 %vm21764_vm0, %v4498_v53  ;;  %v2783_v38 = vadd.f32 %v14114_v18, %v16376_v3  ;;  %14332 = vmatprep.mubr.msk.bf16.mxu1 %vm21764_vm0, %v4804_v6  ;;  %v4826_v17 = vrot.slane %v4824_v22, 1  ;;  %v4829_v53 = vrot.slane %v4827_v11, 2  ;;  %v15349_v6 = vld [vmem:[%s15543_s19 + $0x18] sm:$0xff]  }
 0x14d   : > { %v2964_v41 = vpop.f32.mrf.mxu0  ;;  %v2662_v29 = vpop.f32.mrf.mxu1  ;;  %v5241_v23 = vsel %vm21751_vm4, %v5239_v10, %v5240_v51  ;;  %v4835_v30 = vrot.slane %v4833_v61, 1  ;;  %v4845_v22 = vshll.u32 %v16394_v45, 16  ;;  %v4851_v10 = vshrl.u32 %v16405_v59, 16 }
 0x14e   : > { %v16654_v36 = vadd.f32 %v2964_v41, %v2777_v58  ;;  %v2781_v32 = vadd.f32 %v2662_v29, %v16387_v35  ;;  %v4813_v58 = vsel %vm21750_vm3, %v4803_v37, %v4812_v33  ;;  %v4822_v35 = vsel %vm21750_vm3, %v4812_v33, %v4821_v47 }
 0x14f   : > { %v14149_v0 = vpop.f32.mrf.mxu0  ;;  %v14115_v24 = vpop.f32.mrf.mxu1  ;;  %v4830_v27 = vor.u32 %v4829_v53, %v4826_v17  ;;  %v4842_v33 = vshrl.u32 %v16394_v45, 16  ;;  %v4847_v59 = vrot.slane %v4845_v22, 2 }
 0x150   : > { %v16659_v3 = vadd.f32 %v14149_v0, %v2780_v4  ;;  %v2784_v9 = vadd.f32 %v14115_v24, %v16396_v63  ;;  %v4838_v4 = vrot.slane %v4836_v16, 2 }
 0x151   : > { %v2967_v55 = vpop.f32.mrf.mxu0  ;;  %v2665_v15 = vpop.f32.mrf.mxu1  ;;  %v4831_v16 = vsel %vm21750_vm3, %v4821_v47, %v4830_v27 }
 0x152   : > { %v16665_v25 = vadd.f32 %v2967_v55, %v2778_v56  ;;  %v2782_v63 = vadd.f32 %v2665_v15, %v16401_v34  ;;  %v5242_v56 = vrot.slane %v15349_v6, 2  ;;  %v15350_v34 = vld [vmem:[%s15543_s19 + $0x20] sm:$0xff]   ;;  %v4839_v41 = vor.u32 %v4838_v4, %v4835_v30 }
 0x153   : > { %v14152_v31 = vpop.f32.mrf.mxu0  ;;  %14327 = vmatmul.mubr.msk.bf16.gmra.mxu0 %vm21764_vm0, %v4507_v28  ;;  %v14118_v37 = vpop.f32.mrf.mxu1  ;;  %14333 = vmatmul.mubr.msk.bf16.vlgmr.msra.gmra.mxu1 %vm21764_vm0, %v4813_v58  ;;  %v5244_v18 = vrot.slane %v15350_v34, 2  ;;  %v4844_v28 = vrot.slane %v4842_v33, 1  ;;  %v4853_v55 = vrot.slane %v4851_v10, 1  ;;  %v4863_v30 = vshll.u32 %v16432_v13, 16 }
 0x154   : > { %v16675_v54 = vadd.f32 %v14152_v31, %v2783_v38  ;;  %14370 = vmatprep.mubr.msk.bf16.mxu0 %vm21764_vm0, %v5241_v23  ;;  %v2787_v20 = vadd.f32 %v14118_v37, %v16410_v42  ;;  %14407 = vmatpush3.bf16.msra.mxu1 %v16371_v62  ;;  %v5243_v45 = vsel %vm21751_vm4, %v5240_v51, %v5242_v56  ;;  %v15351_v23 = vld [vmem:[%s15543_s19 + $0x28] sm:$0xff]   ;;  %v15352_v31 = vld [vmem:[%s15543_s19 + $0x30] sm:$0xff]  }
 0x155   : > { %v2980_v14 = vpop.f32.mrf.mxu0  ;;  %14336 = vmatprep.mubr.msk.bf16.mxu1 %vm21764_vm0, %v4822_v35  ;;  %v2678_v11 = vpop.f32.mrf.mxu1  ;;  %14482 = vmatprep.subr.bf16.mxu1 %v16671_v44  ;;  %v5245_v24 = vsel %vm21751_vm4, %v5242_v56, %v5244_v18  ;;  %v5246_v15 = vrot.slane %v15351_v23, 2  ;;  %v4860_v35 = vshrl.u32 %v16432_v13, 16  ;;  %v5248_v37 = vrot.slane %v15352_v31, 2 }
 0x156   : > { %v16686_v38 = vadd.f32 %v2980_v14, %v2781_v32  ;;  %v2785_v62 = vadd.f32 %v2678_v11, %v16421_v8  ;;  %v4840_v8 = vsel %vm21750_vm3, %v4830_v27, %v4839_v41  ;;  %v4872_v14 = vshll.u32 %v16443_v21, 16 }
 0x157   : > { %v14153_v42 = vpop.f32.mrf.mxu0  ;;  %v14119_v29 = vpop.f32.mrf.mxu1  ;;  %v5247_v22 = vsel %vm21751_vm4, %v5244_v18, %v5246_v15  ;;  %v4862_v11 = vrot.slane %v4860_v35, 1  ;;  %v4865_v10 = vrot.slane %v4863_v30, 2  ;;  %v21940_v30 = vld [vmem:[#allocation23_spill] sm:$0xff] }
 0x158   : > { %v16692_v61 = vadd.f32 %v14153_v42, %v2784_v9  ;;  %v2788_v32 = vadd.f32 %v14119_v29, %v16426_v19  ;;  %v4856_v9 = vrot.slane %v4854_v1, 2  ;;  %v5249_v42 = vsel %vm21751_vm4, %v5246_v15, %v5248_v37 }
 0x159   : > { %v2983_v0 = vpop.f32.mrf.mxu0  ;;  %v2681_v17 = vpop.f32.mrf.mxu1 }
 0x15a   : > { %v16698_v53 = vadd.f32 %v2983_v0, %v2782_v63  ;;  %v2786_v47 = vadd.f32 %v2681_v17, %v16439_v2  ;;  %v4848_v2 = vor.u32 %v4847_v59, %v4844_v28  ;;  %v4857_v56 = vor.u32 %v4856_v9, %v4853_v55  ;;  %v15353_v28 = vld [vmem:[%s15543_s19 + $0x38] sm:$0xff]  }
 0x15b   : > { %v14156_v58 = vpop.f32.mrf.mxu0  ;;  %14371 = vmatmul.mubr.msk.bf16.vlgmr.msra.gmra.mxu0 %vm21764_vm0, %v5243_v45  ;;  %v14122_v19 = vpop.f32.mrf.mxu1  ;;  %14337 = vmatmul.mubr.msk.bf16.gmra.mxu1 %vm21764_vm0, %v4831_v16  ;;  %v4874_v45 = vrot.slane %v4872_v14, 2  ;;  %v5250_v59 = vrot.slane %v15353_v28, 2  ;;  %v21938_v17 = vld [vmem:[#allocation24_spill] sm:$0xff]  ;;  %v15355_v28 = vld [vmem:[%s15543_s19 + $0x48] sm:$0xff]  }
 0x15c   : > { %v16703_v51 = vadd.f32 %v14156_v58, %v2787_v20  ;;  %14374 = vmatprep.mubr.msk.bf16.mxu0 %vm21764_vm0, %v5245_v24  ;;  %v2791_v4 = vadd.f32 %v14122_v19, %v16448_v5  ;;  %14340 = vmatprep.mubr.msk.bf16.mxu1 %vm21764_vm0, %v4840_v8  ;;  %v4869_v20 = vshrl.u32 %v16443_v21, 16  ;;  %v16728_v21 = vld [vmem:[%s21675_s2 + $0x38] sm:$0xff]   ;;  %v4858_v18 = vsel %vm21750_vm3, %v4848_v2, %v4857_v56 }
 0x15d   : > { %v2996_v63 = vpop.f32.mrf.mxu0  ;;  %14445 = vmatpush3.bf16.msra.mxu0 %v16437_v57  ;;  %v2694_v27 = vpop.f32.mrf.mxu1  ;;  %v4866_v24 = vor.u32 %v4865_v10, %v4862_v11 }
 0x15e   : > { %v16714_v6 = vadd.f32 %v2996_v63, %v2785_v62  ;;  %v2789_v13 = vadd.f32 %v2694_v27, %v16458_v12  ;;  %v4849_v62 = vsel %vm21750_vm3, %v4839_v41, %v4848_v2  ;;  %v4871_v16 = vrot.slane %v4869_v20, 1  ;;  %14520 = vmatprep.subr.bf16.mxu0 %v16728_v21  ;;  %v21941_v2 = vld [vmem:[#allocation25_spill] sm:$0xff] }
 0x15f   : > { %v14157_v34 = vpop.f32.mrf.mxu0  ;;  %v14123_v5 = vpop.f32.mrf.mxu1  ;;  %v4890_v63 = vshll.u32 %v21940_v30, 16 }
 0x160   : > { %v16719_v33 = vadd.f32 %v14157_v34, %v2788_v32  ;;  %v2792_v57 = vadd.f32 %v14123_v5, %v16461_v60  ;;  %v4875_v35 = vor.u32 %v4874_v45, %v4871_v16  ;;  %v4867_v34 = vsel %vm21750_vm3, %v4857_v56, %v4866_v24  ;;  %v21943_v45 = vld [vmem:[#allocation28_spill] sm:$0xff] }
 0x161   : > { %v2999_v1 = vpop.f32.mrf.mxu0  ;;  %v2697_v12 = vpop.f32.mrf.mxu1  ;;  %v5251_v5 = vsel %vm21751_vm4, %v5248_v37, %v5250_v59 }
 0x162   : > { %v16730_v29 = vadd.f32 %v2999_v1, %v2786_v47  ;;  %v2790_v60 = vadd.f32 %v2697_v12, %v16470_v26  ;;  %v15354_v26 = vld [vmem:[%s15543_s19 + $0x40] sm:$0xff]  }
 0x163   : > { %v14160_v32 = vpop.f32.mrf.mxu0  ;;  %14375 = vmatmul.mubr.msk.bf16.gmra.mxu0 %vm21764_vm0, %v5247_v22  ;;  %v14126_v41 = vpop.f32.mrf.mxu1  ;;  %14341 = vmatmul.mubr.msk.bf16.gmra.mxu1 %vm21764_vm0, %v4849_v62  ;;  %v5252_v9 = vrot.slane %v15354_v26, 2  ;;  %v21939_v47 = vld [vmem:[#allocation22_spill] sm:$0xff] }
 0x164   : > { %v16736_v0 = vadd.f32 %v14160_v32, %v2791_v4  ;;  %14378 = vmatprep.mubr.msk.bf16.mxu0 %vm21764_vm0, %v5249_v42  ;;  %v2795_v8 = vadd.f32 %v14126_v41, %v21938_v17  ;;  %14344 = vmatprep.mubr.msk.bf16.mxu1 %vm21764_vm0, %v4858_v18  ;;  %v4878_v58 = vshrl.u32 %v21939_v47, 16  ;;  %v4881_v19 = vshll.u32 %v21939_v47, 16  ;;  %v21942_v22 = vld [vmem:[#allocation26_spill] sm:$0xff] }
 0x165   : > { %v3012_v55 = vpop.f32.mrf.mxu0  ;;  %v2710_v23 = vpop.f32.mrf.mxu1  ;;  %v4887_v4 = vshrl.u32 %v21940_v30, 16  ;;  %v4876_v18 = vsel %vm21750_vm3, %v4866_v24, %v4875_v35 }
 0x166   : > { %v16746_v15 = vadd.f32 %v3012_v55, %v2789_v13  ;;  %v2793_v31 = vadd.f32 %v2710_v23, %v21941_v2  ;;  %v5253_v13 = vsel %vm21751_vm4, %v5250_v59, %v5252_v9  ;;  %v4880_v1 = vrot.slane %v4878_v58, 1  ;;  %v21944_v59 = vld [vmem:[#allocation27_spill] sm:$0xff]  ;;  %v21945_v55 = vld [vmem:[#allocation30_spill] sm:$0xff] }
 0x167   : > { %v14161_v27 = vpop.f32.mrf.mxu0  ;;  %v14127_v20 = vpop.f32.mrf.mxu1  ;;  %v4883_v62 = vrot.slane %v4881_v19, 2  ;;  %v4889_v16 = vrot.slane %v4887_v4, 1  ;;  %v4896_v17 = vshrl.u32 %v21944_v59, 16  ;;  %v4899_v24 = vshll.u32 %v21944_v59, 16  ;;  %v15356_v19 = vld [vmem:[%s15543_s19 + $0x50] sm:$0xff]  }
 0x168   : > { %v16751_v14 = vadd.f32 %v14161_v27, %v2792_v57  ;;  %v2796_v11 = vadd.f32 %v14127_v20, %v21942_v22  ;;  %v4892_v57 = vrot.slane %v4890_v63, 2  ;;  %v5256_v23 = vrot.slane %v15356_v19, 2  ;;  %v21946_v63 = vld [vmem:[#allocation29_spill] sm:$0xff]  ;;  %v21947_v20 = vld [vmem:[#allocation8_spill] sm:$0xff] }
 0x169   : > { %v3015_v10 = vpop.f32.mrf.mxu0  ;;  %v2713_v42 = vpop.f32.mrf.mxu1  ;;  %v4884_v58 = vor.u32 %v4883_v62, %v4880_v1  ;;  %v4905_v2 = vshrl.u32 %v21946_v63, 16  ;;  %v4908_v27 = vshll.u32 %v21946_v63, 16  ;;  %v4901_v1 = vrot.slane %v4899_v24, 2  ;;  %v21948_v62 = vld [vmem:[#allocation3_spill] sm:$0xff]  ;;  %v21949_v59 = vld [vmem:[#allocation4_spill] sm:$0xff] }
 0x16a   : > { %v16757_v12 = vadd.f32 %v3015_v10, %v2790_v60  ;;  %v2794_v56 = vadd.f32 %v2713_v42, %v21943_v45  ;;  %v5254_v60 = vrot.slane %v15355_v28, 2  ;;  %v4893_v4 = vor.u32 %v4892_v57, %v4889_v16 }
 0x16b   : > { %v14164_v32 = vpop.f32.mrf.mxu0  ;;  %14379 = vmatmul.mubr.msk.bf16.gmra.mxu0 %vm21764_vm0, %v5251_v5  ;;  %v14130_v37 = vpop.f32.mrf.mxu1  ;;  %14345 = vmatmul.mubr.msk.bf16.gmra.mxu1 %vm21764_vm0, %v4867_v34  ;;  %v4898_v42 = vrot.slane %v4896_v17, 1  ;;  %v4910_v28 = vrot.slane %v4908_v27, 2 }
 0x16c   : > { %v16762_v41 = vadd.f32 %v14164_v32, %v2795_v8  ;;  %14382 = vmatprep.mubr.msk.bf16.mxu0 %vm21764_vm0, %v5253_v13  ;;  %v2799_v26 = vadd.f32 %v14130_v37, %v21945_v55  ;;  %14348 = vmatprep.mubr.msk.bf16.mxu1 %vm21764_vm0, %v4876_v18  ;;  %v5255_v13 = vsel %vm21751_vm4, %v5252_v9, %v5254_v60 }
 0x16d   : > { %v3028_v47 = vpop.f32.mrf.mxu0  ;;  %v2726_v8 = vpop.f32.mrf.mxu1  ;;  %v5257_v16 = vsel %vm21751_vm4, %v5254_v60, %v5256_v23  ;;  %v4894_v37 = vsel %vm21750_vm3, %v4884_v58, %v4893_v4 }
 0x16e   : > { %v16772_v30 = vadd.f32 %v3028_v47, %v2793_v31  ;;  %v2797_v34 = vadd.f32 %v2726_v8, %v21947_v20  ;;  %v4885_v31 = vsel %vm21750_vm3, %v4875_v35, %v4884_v58  ;;  %v4902_v35 = vor.u32 %v4901_v1, %v4898_v42  ;;  %v21950_v47 = vld [vmem:[#allocation6_spill] sm:$0xff] }
 0x16f   : > { %v14165_v5 = vpop.f32.mrf.mxu0  ;;  %v14131_v22 = vpop.f32.mrf.mxu1  ;;  %v15358_v8 = vld [vmem:[%s15543_s19 + $0x60] sm:$0xff]  }
 0x170   : > { %v16777_v10 = vadd.f32 %v14165_v5, %v2796_v11  ;;  %v2800_v18 = vadd.f32 %v14131_v22, %v21948_v62  ;;  %v4907_v11 = vrot.slane %v4905_v2, 1  ;;  %v5260_v63 = vrot.slane %v15358_v8, 2  ;;  %v21951_v2 = vld [vmem:[#allocation13_spill] sm:$0xff]  ;;  %v21953_v1 = vld [vmem:[#allocation14_spill] sm:$0xff] }
 0x171   : > { %v3031_v45 = vpop.f32.mrf.mxu0  ;;  %v2729_v57 = vpop.f32.mrf.mxu1  ;;  %v4914_v27 = vshrl.u32 %v21951_v2, 16  ;;  %v4917_v20 = vshll.u32 %v21951_v2, 16 }
 0x172   : > { %v16783_v32 = vadd.f32 %v3031_v45, %v2794_v56  ;;  %v2798_v9 = vadd.f32 %v2729_v57, %v21949_v59  ;;  %v15357_v56 = vld [vmem:[%s15543_s19 + $0x58] sm:$0xff]   ;;  %v4911_v22 = vor.u32 %v4910_v28, %v4907_v11 }
 0x173   : > { %v14168_v17 = vpop.f32.mrf.mxu0  ;;  %14383 = vmatmul.mubr.msk.bf16.gmra.mxu0 %vm21764_vm0, %v5255_v13  ;;  %v14134_v24 = vpop.f32.mrf.mxu1  ;;  %14349 = vmatmul.mubr.msk.bf16.gmra.mxu1 %vm21764_vm0, %v4885_v31  ;;  %v5258_v60 = vrot.slane %v15357_v56, 2  ;;  %v21952_v13 = vld [vmem:[#allocation5_spill] sm:$0xff]  ;;  %v4916_v11 = vrot.slane %v4914_v27, 1  ;;  %v4919_v28 = vrot.slane %v4917_v20, 2  ;;  %v21956_v27 = vld [vmem:[#allocation31_spill] sm:$0xff] }
 0x174   : > { %v16788_v55 = vadd.f32 %v14168_v17, %v2799_v26  ;;  %14386 = vmatprep.mubr.msk.bf16.mxu0 %vm21764_vm0, %v5257_v16  ;;  %v2803_v58 = vadd.f32 %v14134_v24, %v21950_v47  ;;  %14352 = vmatprep.mubr.msk.bf16.mxu1 %vm21764_vm0, %v4894_v37  ;;  %v4923_v62 = vshrl.u32 %v21952_v13, 16  ;;  %v4926_v42 = vshll.u32 %v21952_v13, 16  ;;  %v21954_v17 = vld [vmem:[#allocation7_spill] sm:$0xff] }
 0x175   : > { %v3044_v19 = vpop.f32.mrf.mxu0  ;;  %v2742_v26 = vpop.f32.mrf.mxu1  ;;  %v4903_v37 = vsel %vm21750_vm3, %v4893_v4, %v4902_v35  ;;  %v5259_v59 = vsel %vm21751_vm4, %v5256_v23, %v5258_v60  ;;  %v4912_v8 = vsel %vm21750_vm3, %v4902_v35, %v4911_v22  ;;  %v4932_v20 = vshrl.u32 %v21956_v27, 16 }
 0x176   : > { %v16798_v5 = vadd.f32 %v3044_v19, %v2797_v34  ;;  %v2801_v45 = vadd.f32 %v2742_v26, %v21953_v1  ;;  %v5261_v34 = vsel %vm21751_vm4, %v5258_v60, %v5260_v63  ;;  %v4925_v2 = vrot.slane %v4923_v62, 1  ;;  %v21955_v26 = vld [vmem:[#allocation9_spill] sm:$0xff]  ;;  %v15359_v60 = vld [vmem:[%s15543_s19 + $0x68] sm:$0xff]  }
 0x177   : > { %v14169_v31 = vpop.f32.mrf.mxu0  ;;  %v14135_v16 = vpop.f32.mrf.mxu1  ;;  %v4935_v35 = vshll.u32 %v21956_v27, 16  ;;  %v21957_v62 = vld [vmem:[#allocation10_spill] sm:$0xff] }
 0x178   : > { %v16803_v57 = vadd.f32 %v14169_v31, %v2800_v18  ;;  %v2804_v24 = vadd.f32 %v14135_v16, %v21954_v17  ;;  %v4928_v18 = vrot.slane %v4926_v42, 2  ;;  %v4920_v16 = vor.u32 %v4919_v28, %v4916_v11 }
 0x179   : > { %v3047_v56 = vpop.f32.mrf.mxu0  ;;  %v2745_v47 = vpop.f32.mrf.mxu1  ;;  %v4934_v11 = vrot.slane %v4932_v20, 1  ;;  %v4937_v28 = vrot.slane %v4935_v35, 2 }
 0x17a   : > { %v16809_v19 = vadd.f32 %v3047_v56, %v2798_v9  ;;  %v2802_v4 = vadd.f32 %v2745_v47, %v21955_v26  ;;  %v5262_v9 = vrot.slane %v15359_v60, 2  ;;  %v4944_v47 = vshll.u32 %v16561_v7, 16  ;;  %v21958_v26 = vld [vmem:[#allocation16_spill] sm:$0xff] }
 0x17b   : > { %v14172_v13 = vpop.f32.mrf.mxu0  ;;  %14387 = vmatmul.mubr.msk.bf16.gmra.mxu0 %vm21764_vm0, %v5259_v59  ;;  %v14138_v23 = vpop.f32.mrf.mxu1  ;;  %14353 = vmatmul.mubr.msk.bf16.gmra.mxu1 %vm21764_vm0, %v4903_v37  ;;  %v15360_v59 = vld [vmem:[%s15543_s19 + $0x70] sm:$0xff]   ;;  %v4929_v37 = vor.u32 %v4928_v18, %v4925_v2  ;;  %v16836_v18 = vld [vmem:[%s15503_s12 + $0x98] ss:$0 sps:$4 sm:$0x33]  }
 0x17c   : > { %v16814_v1 = vadd.f32 %v14172_v13, %v2803_v58  ;;  %14390 = vmatprep.mubr.msk.bf16.mxu0 %vm21764_vm0, %v5261_v34  ;;  %v2807_v42 = vadd.f32 %v14138_v23, %v21957_v62  ;;  %14356 = vmatprep.mubr.msk.bf16.mxu1 %vm21764_vm0, %v4912_v8  ;;  %v5264_v17 = vrot.slane %v15360_v59, 2  ;;  %v4941_v34 = vshrl.u32 %v16561_v7, 16 }
 0x17d   : > { %v3060_v31 = vpop.f32.mrf.mxu0  ;;  %v2758_v58 = vpop.f32.mrf.mxu1  ;;  %v5263_v8 = vsel %vm21751_vm4, %v5260_v63, %v5262_v9  ;;  %v4946_v63 = vrot.slane %v4944_v47, 2 }
 0x17e   : > { %v16824_v56 = vadd.f32 %v3060_v31, %v2801_v45  ;;  %v2805_v13 = vadd.f32 %v2758_v58, %v21958_v26  ;;  %v4921_v45 = vsel %vm21750_vm3, %v4911_v22, %v4920_v16  ;;  %v5265_v2 = vsel %vm21751_vm4, %v5262_v9, %v5264_v17  ;;  %v15361_v9 = vld [vmem:[%s15543_s19 + $0x78] sm:$0xff]  }
 0x17f   : > { %v14173_v60 = vpop.f32.mrf.mxu0  ;;  %v14139_v27 = vpop.f32.mrf.mxu1  ;;  %v4943_v58 = vrot.slane %v4941_v34, 1  ;;  %v5266_v26 = vrot.slane %v15361_v9, 2 }
 0x180   : > { %v16829_v23 = vadd.f32 %v14173_v60, %v2804_v24  ;;  %v2808_v62 = vadd.f32 %v14139_v27, %v16604_v40  ;;  %v4930_v24 = vsel %vm21750_vm3, %v4920_v16, %v4929_v37  ;;  %v4950_v60 = vshrl.u32 %v16836_v18, 16 }
 0x181   : > { %v3063_v59 = vpop.f32.mrf.mxu0  ;;  %v2761_v7 = vpop.f32.mrf.mxu1 }
 0x182   : > { %v16838_v31 = vadd.f32 %v3063_v59, %v2802_v4  ;;  %v2806_v20 = vadd.f32 %v2761_v7, %v16611_v43  ;;  %v4938_v4 = vor.u32 %v4937_v28, %v4934_v11  ;;  %v15362_v43 = vld [vmem:[%s15543_s19 + $0x80] sm:$0xff]   ;;  %v4947_v59 = vor.u32 %v4946_v63, %v4943_v58 }
 0x183   : > { %v14176_v35 = vpop.f32.mrf.mxu0  ;;  %14391 = vmatmul.mubr.msk.bf16.gmra.mxu0 %vm21764_vm0, %v5263_v8  ;;  %v14182_v22 = vpop.f32.mrf.mxu1  ;;  %14357 = vmatmul.mubr.msk.bf16.gmra.mxu1 %vm21764_vm0, %v4921_v45  ;;  %v5268_v47 = vrot.slane %v15362_v43, 2  ;;  %v5549_v45 = vld [vmem:[%s15503_s12 + $0x8] sm:$0xc]  ;;  %v4952_v9 = vrot.slane %v4950_v60, 1 }
 0x184   : > { %v16843_v40 = vadd.f32 %v14176_v35, %v2807_v42  ;;  %14394 = vmatprep.mubr.msk.bf16.mxu0 %vm21764_vm0, %v5265_v2  ;;  %v3410_v16 = vadd.f32 %v14182_v22, %v16617_v50  ;;  %14360 = vmatprep.mubr.msk.bf16.mxu1 %vm21764_vm0, %v4930_v24  ;;  %v4953_v42 = vshll.u32 %v16836_v18, 16  ;;  %v4939_v7 = vsel %vm21750_vm3, %v4929_v37, %v4938_v4 }
 0x185   : > { %v3076_v34 = vpop.f32.mrf.mxu0  ;;  %v3265_v8 = vpop.f32.mrf.mxu1  ;;  %v5267_v24 = vsel %vm21751_vm4, %v5264_v17, %v5266_v26 }
 0x186   : > { %v16853_v27 = vadd.f32 %v3076_v34, %v2805_v13  ;;  %v3408_v11 = vadd.f32 %v3265_v8, %v16627_v49  ;;  %v5269_v13 = vsel %vm21751_vm4, %v5266_v26, %v5268_v47  ;;  %v4955_v58 = vrot.slane %v4953_v42, 2  ;;  %v15365_v42 = vld [vmem:[%s15543_s19 + $0x90] sm:$0xff]  }
 0x187   : > { %v14177_v28 = vpop.f32.mrf.mxu0  ;;  %v14183_v50 = vpop.f32.mrf.mxu1  ;;  %v4948_v34 = vsel %vm21750_vm3, %v4938_v4, %v4947_v59 }
 0x188   : > { %v16857_v2 = vadd.f32 %v14177_v28, %v2808_v62  ;;  %v3411_v35 = vadd.f32 %v14183_v50, %v16635_v39  ;;  %v15363_v62 = vld [vmem:[%s15503_s12 + $0xc] sm:$0xf]  ;;  %v5272_v28 = vrot.slane %v15365_v42, 2 }
 0x189   : > { %v3079_v22 = vpop.f32.mrf.mxu0  ;;  %v3268_v49 = vpop.f32.mrf.mxu1  ;;  %v12962_v43 = vcombine.low %v5549_v45, %v15363_v62 }
 0x18a   : > { %v16863_v63 = vadd.f32 %v3079_v22, %v2806_v20  ;;  %v3409_v37 = vadd.f32 %v3268_v49, %v16640_v46  ;;  %v15364_v20 = vld [vmem:[%s15543_s19 + $0x88] sm:$0xff]   ;;  %v4956_v46 = vor.u32 %v4955_v58, %v4952_v9  ;;  %v5866_v22 = vld [vmem:[%s15543_s19 + $0x10] sm:$0xc]  ;;  %v5867_v49 = vld [vmem:[%s15543_s19 + $0x14] sm:$0xf] }
 0x18b   : > { %v14220_v8 = vpop.f32.mrf.mxu0  ;;  %14395 = vmatmul.mubr.msk.bf16.gmra.mxu0 %vm21764_vm0, %v5267_v24  ;;  %v14186_v39 = vpop.f32.mrf.mxu1  ;;  %14361 = vmatmul.mubr.msk.bf16.gmra.mxu1 %vm21764_vm0, %v4939_v7  ;;  %v5270_v4 = vrot.slane %v15364_v20, 2  ;;  %v15366_v24 = vld [vmem:[%s15503_s12 + $0x10] sm:$0xff]   ;;  %v16892_v20 = vld [vmem:[%s15543_s19 + $0x18] sm:$0xff]  }
 0x18c   : > { %v16869_v17 = vadd.f32 %v14220_v8, %v3410_v16  ;;  %14398 = vmatprep.mubr.msk.bf16.mxu0 %vm21764_vm0, %v5269_v13  ;;  %v3414_v26 = vadd.f32 %v14186_v39, %v16645_v48  ;;  %14364 = vmatprep.mubr.msk.bf16.mxu1 %vm21764_vm0, %v4948_v34  ;;  %v5556_v16 = vrot.slane %v12962_v43, 2  ;;  %v5557_v7 = vrot.slane %v15366_v24, 2 }
 0x18d   : > { %v3708_v60 = vpop.f32.mrf.mxu0  ;;  %v3281_v45 = vpop.f32.mrf.mxu1  ;;  %v5271_v34 = vsel %vm21751_vm4, %v5268_v47, %v5270_v4  ;;  %v5273_v39 = vsel %vm21751_vm4, %v5270_v4, %v5272_v28  ;;  %v16889_v43 = vcombine.low %v5866_v22, %v5867_v49  ;;  %v5274_v4 = vrot.slane %v16601_v52, 2  ;;  %v15368_v49 = vld [vmem:[%s15503_s12 + $0x20] sm:$0xff]  }
 0x18e   : > { %v16877_v50 = vadd.f32 %v3708_v60, %v3408_v11  ;;  %v3412_v13 = vadd.f32 %v3281_v45, %v16654_v36  ;;  %v4957_v11 = vsel %vm21750_vm3, %v4947_v59, %v4956_v46 }
 0x18f   : > { %v14221_v62 = vpop.f32.mrf.mxu0  ;;  %v14187_v8 = vpop.f32.mrf.mxu1 }
 0x190   : > { %v16883_v48 = vadd.f32 %v14221_v62, %v3411_v35  ;;  %v3415_v9 = vadd.f32 %v14187_v8, %v16659_v3  ;;  %v5558_v35 = vsel %vm21751_vm4, %v5556_v16, %v5557_v7  ;;  %v5999_v16 = vrot.slane %v16889_v43, 2 }
 0x191   : > { %v3711_v58 = vpop.f32.mrf.mxu0  ;;  %v3284_v60 = vpop.f32.mrf.mxu1  ;;  %v5561_v62 = vrot.slane %v15368_v49, 2 }
 0x192   : > { %v16894_v36 = vadd.f32 %v3711_v58, %v3409_v37  ;;  %v3413_v42 = vadd.f32 %v3284_v60, %v16665_v25  ;;  %v15367_v25 = vld [vmem:[%s15503_s12 + $0x18] sm:$0xff]   ;;  %v5275_v58 = vsel %vm21751_vm4, %v5272_v28, %v5274_v4 }
 0x193   : > { %v14224_v47 = vpop.f32.mrf.mxu0  ;;  %14399 = vmatmul.mubr.msk.bf16.gmra.mxu0 %vm21764_vm0, %v5271_v34  ;;  %v14190_v3 = vpop.f32.mrf.mxu1  ;;  %14365 = vmatmul.mubr.msk.bf16.gmra.mxu1 %vm21764_vm0, %v4957_v11  ;;  %v5559_v45 = vrot.slane %v15367_v25, 2  ;;  %v16917_v11 = vld [vmem:[%s15543_s19 + $0x20] sm:$0xff]   ;;  %v16931_v28 = vld [vmem:[%s21676_s3 + $0x38] sm:$0xff]  }
 0x194   : > { %v16899_v59 = vadd.f32 %v14224_v47, %v3414_v26  ;;  %14402 = vmatprep.mubr.msk.bf16.mxu0 %vm21764_vm0, %v5273_v39  ;;  %v3418_v37 = vadd.f32 %v14190_v3, %v16675_v54  ;;  %14408 = vmatprep.mubr.msk.bf16.mxu1 %vm21764_vm0, %v5558_v35  ;;  %v6000_v26 = vrot.slane %v16892_v20, 2  ;;  %v16923_v47 = vld [vmem:[%s15543_s19 + $0x28] sm:$0xff]  }
 0x195   : > { %v3724_v46 = vpop.f32.mrf.mxu0  ;;  %v3297_v24 = vpop.f32.mrf.mxu1  ;;  %v5560_v35 = vsel %vm21751_vm4, %v5557_v7, %v5559_v45 }
 0x196   : > { %v16909_v22 = vadd.f32 %v3724_v46, %v3412_v13  ;;  %v3416_v52 = vadd.f32 %v3297_v24, %v16686_v38  ;;  %v6001_v13 = vsel %vm21751_vm4, %v5999_v16, %v6000_v26  ;;  %v6004_v24 = vrot.slane %v16923_v47, 2 }
 0x197   : > { %v14225_v8 = vpop.f32.mrf.mxu0  ;;  %v14191_v54 = vpop.f32.mrf.mxu1 }
 0x198   : > { %v16913_v34 = vadd.f32 %v14225_v8, %v3415_v9  ;;  %v3419_v39 = vadd.f32 %v14191_v54, %v16692_v61  ;;  %v5562_v9 = vsel %vm21751_vm4, %v5559_v45, %v5561_v62  ;;  %v15370_v8 = vld [vmem:[%s15503_s12 + $0x30] sm:$0xff]  }
 0x199   : > { %v3727_v60 = vpop.f32.mrf.mxu0  ;;  %v3300_v3 = vpop.f32.mrf.mxu1  ;;  %v5565_v54 = vrot.slane %v15370_v8, 2 }
 0x19a   : > { %v16925_v38 = vadd.f32 %v3727_v60, %v3413_v42  ;;  %v3417_v61 = vadd.f32 %v3300_v3, %v16698_v53  ;;  %v6002_v42 = vrot.slane %v16917_v11, 2  ;;  %v15369_v53 = vld [vmem:[%s15503_s12 + $0x28] sm:$0xff]  }
 0x19b   : > { %v14228_v4 = vpop.f32.mrf.mxu0  ;;  %14403 = vmatmul.mubr.msk.bf16.gmra.mxu0 %vm21764_vm0, %v5275_v58  ;;  %v14194_v7 = vpop.f32.mrf.mxu1  ;;  %14409 = vmatmul.mubr.msk.bf16.vlgmr.msra.gmra.mxu1 %vm21764_vm0, %v5560_v35  ;;  %v5563_v16 = vrot.slane %v15369_v53, 2 }
 0x19c   : > { %v16935_v46 = vadd.f32 %v14228_v4, %v3418_v37  ;;  %14446 = vmatprep.mubr.msk.bf16.mxu0 %vm21764_vm0, %v6001_v13  ;;  %v3422_v25 = vadd.f32 %v14194_v7, %v16703_v51  ;;  %14483 = vmatpush3.bf16.msra.mxu1 %v16671_v44  ;;  %v6003_v35 = vsel %vm21751_vm4, %v6000_v26, %v6002_v42  ;;  %v16954_v13 = vld [vmem:[%s15543_s19 + $0x30] sm:$0xff]   ;;  %v16960_v7 = vld [vmem:[%s15543_s19 + $0x38] sm:$0xff]  }
 0x19d   : > { %v3740_v45 = vpop.f32.mrf.mxu0  ;;  %14412 = vmatprep.mubr.msk.bf16.mxu1 %vm21764_vm0, %v5562_v9  ;;  %v3313_v37 = vpop.f32.mrf.mxu1  ;;  %14558 = vmatprep.subr.bf16.mxu1 %v16931_v28  ;;  %v6005_v4 = vsel %vm21751_vm4, %v6002_v42, %v6004_v24  ;;  %v6008_v8 = vrot.slane %v16960_v7, 2 }
 0x19e   : > { %v16945_v49 = vadd.f32 %v3740_v45, %v3416_v52  ;;  %v3420_v51 = vadd.f32 %v3313_v37, %v16714_v6  ;;  %v5564_v52 = vsel %vm21751_vm4, %v5561_v62, %v5563_v16  ;;  %v6006_v62 = vrot.slane %v16954_v13, 2 }
 0x19f   : > { %v14229_v58 = vpop.f32.mrf.mxu0  ;;  %v14195_v44 = vpop.f32.mrf.mxu1 }
 0x1a0   : > { %v16950_v60 = vadd.f32 %v14229_v58, %v3419_v39  ;;  %v3423_v3 = vadd.f32 %v14195_v44, %v16719_v33  ;;  %v5566_v39 = vsel %vm21751_vm4, %v5563_v16, %v5565_v54  ;;  %v15372_v44 = vld [vmem:[%s15503_s12 + $0x40] sm:$0xff]  }
 0x1a1   : > { %v3743_v9 = vpop.f32.mrf.mxu0  ;;  %v3316_v45 = vpop.f32.mrf.mxu1 }
 0x1a2   : > { %v16962_v6 = vadd.f32 %v3743_v9, %v3417_v61  ;;  %v3421_v53 = vadd.f32 %v3316_v45, %v16730_v29  ;;  %v15371_v29 = vld [vmem:[%s15503_s12 + $0x38] sm:$0xff]   ;;  %v6007_v45 = vsel %vm21751_vm4, %v6004_v24, %v6006_v62 }
 0x1a3   : > { %v14232_v26 = vpop.f32.mrf.mxu0  ;;  %14447 = vmatmul.mubr.msk.bf16.vlgmr.msra.gmra.mxu0 %vm21764_vm0, %v6003_v35  ;;  %v14198_v33 = vpop.f32.mrf.mxu1  ;;  %14413 = vmatmul.mubr.msk.bf16.gmra.mxu1 %vm21764_vm0, %v5564_v52  ;;  %v5567_v16 = vrot.slane %v15371_v29, 2  ;;  %v5569_v35 = vrot.slane %v15372_v44, 2 }
 0x1a4   : > { %v16967_v37 = vadd.f32 %v14232_v26, %v3422_v25  ;;  %14450 = vmatprep.mubr.msk.bf16.mxu0 %vm21764_vm0, %v6005_v4  ;;  %v3426_v61 = vadd.f32 %v14198_v33, %v16736_v0  ;;  %14416 = vmatprep.mubr.msk.bf16.mxu1 %vm21764_vm0, %v5566_v39  ;;  %v16985_v39 = vld [vmem:[%s15543_s19 + $0x40] sm:$0xff]  }
 0x1a5   : > { %v3756_v42 = vpop.f32.mrf.mxu0  ;;  %14521 = vmatpush3.bf16.msra.mxu0 %v16728_v21  ;;  %v3329_v25 = vpop.f32.mrf.mxu1  ;;  %v5568_v21 = vsel %vm21751_vm4, %v5565_v54, %v5567_v16  ;;  %v5570_v24 = vsel %vm21751_vm4, %v5567_v16, %v5569_v35 }
 0x1a6   : > { %v16977_v58 = vadd.f32 %v3756_v42, %v3420_v51  ;;  %v3424_v9 = vadd.f32 %v3329_v25, %v16746_v15  ;;  %v6009_v51 = vsel %vm21751_vm4, %v6006_v62, %v6008_v8  ;;  %v16991_v42 = vld [vmem:[%s15543_s19 + $0x48] sm:$0xff]   ;;  %v16996_v15 = vld [vmem:[%s21675_s2 + $0x40] sm:$0xff]  }
 0x1a7   : > { %v14233_v52 = vpop.f32.mrf.mxu0  ;;  %v14199_v0 = vpop.f32.mrf.mxu1  ;;  %21959 = vst [vmem:[#allocation11_spill] sm:$0xff] %v16991_v42  ;;  %21960 = vst [vmem:[#allocation17_spill] sm:$0xff] %v16996_v15  ;;  %14596 = vmatprep.subr.bf16.mxu0 %v16996_v15 }
 0x1a8   : > { %v16981_v4 = vadd.f32 %v14233_v52, %v3423_v3  ;;  %v3427_v26 = vadd.f32 %v14199_v0, %v16751_v14  ;;  %v6012_v0 = vrot.slane %v16991_v42, 2 }
 0x1a9   : > { %v3759_v33 = vpop.f32.mrf.mxu0  ;;  %v3332_v3 = vpop.f32.mrf.mxu1 }
 0x1aa   : > { %v16998_v29 = vadd.f32 %v3759_v33, %v3421_v53  ;;  %v3425_v14 = vadd.f32 %v3332_v3, %v16757_v12  ;;  %v6010_v53 = vrot.slane %v16985_v39, 2  ;;  %v15373_v12 = vld [vmem:[%s15503_s12 + $0x48] sm:$0xff]   ;;  %v15374_v33 = vld [vmem:[%s15503_s12 + $0x50] sm:$0xff]  }
 0x1ab   : > { %v14236_v25 = vpop.f32.mrf.mxu0  ;;  %14451 = vmatmul.mubr.msk.bf16.gmra.mxu0 %vm21764_vm0, %v6007_v45  ;;  %v14202_v54 = vpop.f32.mrf.mxu1  ;;  %14417 = vmatmul.mubr.msk.bf16.gmra.mxu1 %vm21764_vm0, %v5568_v21  ;;  %v5571_v52 = vrot.slane %v15373_v12, 2  ;;  %v5573_v21 = vrot.slane %v15374_v33, 2 }
 0x1ac   : > { %v17004_v62 = vadd.f32 %v14236_v25, %v3426_v61  ;;  %14454 = vmatprep.mubr.msk.bf16.mxu0 %vm21764_vm0, %v6009_v51  ;;  %v3430_v16 = vadd.f32 %v14202_v54, %v16762_v41  ;;  %14420 = vmatprep.mubr.msk.bf16.mxu1 %vm21764_vm0, %v5570_v24  ;;  %v6011_v41 = vsel %vm21751_vm4, %v6008_v8, %v6010_v53  ;;  %v17021_v54 = vld [vmem:[%s15543_s19 + $0x50] sm:$0xff]  }
 0x1ad   : > { %v3772_v44 = vpop.f32.mrf.mxu0  ;;  %v3345_v45 = vpop.f32.mrf.mxu1  ;;  %v5572_v42 = vsel %vm21751_vm4, %v5569_v35, %v5571_v52  ;;  %v6014_v35 = vrot.slane %v17021_v54, 2 }
 0x1ae   : > { %v17013_v61 = vadd.f32 %v3772_v44, %v3424_v9  ;;  %v3428_v51 = vadd.f32 %v3345_v45, %v16772_v30  ;;  %v6013_v9 = vsel %vm21751_vm4, %v6010_v53, %v6012_v0  ;;  %v17027_v44 = vld [vmem:[%s15543_s19 + $0x58] sm:$0xff]  }
 0x1af   : > { %v14237_v3 = vpop.f32.mrf.mxu0  ;;  %v14203_v25 = vpop.f32.mrf.mxu1  ;;  %21961 = vst [vmem:[#allocation20_spill] sm:$0xff] %v17027_v44 }
 0x1b0   : > { %v17017_v15 = vadd.f32 %v14237_v3, %v3427_v26  ;;  %v3431_v24 = vadd.f32 %v14203_v25, %v16777_v10  ;;  %v5574_v26 = vsel %vm21751_vm4, %v5571_v52, %v5573_v21  ;;  %v6016_v25 = vrot.slane %v17027_v44, 2 }
 0x1b1   : > { %v3775_v12 = vpop.f32.mrf.mxu0  ;;  %v3348_v33 = vpop.f32.mrf.mxu1 }
 0x1b2   : > { %v17029_v30 = vadd.f32 %v3775_v12, %v3425_v14  ;;  %v3429_v45 = vadd.f32 %v3348_v33, %v16783_v32  ;;  %v15375_v32 = vld [vmem:[%s15503_s12 + $0x58] sm:$0xff]   ;;  %v15376_v12 = vld [vmem:[%s15503_s12 + $0x60] sm:$0xff]  }
 0x1b3   : > { %v14240_v8 = vpop.f32.mrf.mxu0  ;;  %14455 = vmatmul.mubr.msk.bf16.gmra.mxu0 %vm21764_vm0, %v6011_v41  ;;  %v14206_v10 = vpop.f32.mrf.mxu1  ;;  %14421 = vmatmul.mubr.msk.bf16.gmra.mxu1 %vm21764_vm0, %v5572_v42  ;;  %v5575_v52 = vrot.slane %v15375_v32, 2  ;;  %v5577_v42 = vrot.slane %v15376_v12, 2 }
 0x1b4   : > { %v17034_v3 = vadd.f32 %v14240_v8, %v3430_v16  ;;  %14458 = vmatprep.mubr.msk.bf16.mxu0 %vm21764_vm0, %v6013_v9  ;;  %v3434_v14 = vadd.f32 %v14206_v10, %v16788_v55  ;;  %14424 = vmatprep.mubr.msk.bf16.mxu1 %vm21764_vm0, %v5574_v26  ;;  %v6015_v55 = vsel %vm21751_vm4, %v6012_v0, %v6014_v35  ;;  %v17051_v10 = vld [vmem:[%s15543_s19 + $0x60] sm:$0xff]  }
 0x1b5   : > { %v3788_v53 = vpop.f32.mrf.mxu0  ;;  %v3361_v41 = vpop.f32.mrf.mxu1  ;;  %v5576_v44 = vsel %vm21751_vm4, %v5573_v21, %v5575_v52  ;;  %v6018_v21 = vrot.slane %v17051_v10, 2 }
 0x1b6   : > { %21962 = vst [vmem:[#allocation18_spill] sm:$0xff] %v17034_v3  ;;  %v17043_v16 = vadd.f32 %v3788_v53, %v3428_v51  ;;  %v3432_v9 = vadd.f32 %v3361_v41, %v16798_v5  ;;  %v6017_v51 = vsel %vm21751_vm4, %v6014_v35, %v6016_v25  ;;  %v17057_v53 = vld [vmem:[%s15543_s19 + $0x68] sm:$0xff]  }
 0x1b7   : > { %v14241_v33 = vpop.f32.mrf.mxu0  ;;  %v14207_v8 = vpop.f32.mrf.mxu1  ;;  %21963 = vst [vmem:[#allocation12_spill] sm:$0xff] %v17057_v53 }
 0x1b8   : > { %v17047_v3 = vadd.f32 %v14241_v33, %v3431_v24  ;;  %v3435_v26 = vadd.f32 %v14207_v8, %v16803_v57  ;;  %v5578_v24 = vsel %vm21751_vm4, %v5575_v52, %v5577_v42  ;;  %v6020_v8 = vrot.slane %v17057_v53, 2 }
 0x1b9   : > { %v3791_v32 = vpop.f32.mrf.mxu0  ;;  %v3364_v12 = vpop.f32.mrf.mxu1 }
 0x1ba   : > { %v17059_v5 = vadd.f32 %v3791_v32, %v3429_v45  ;;  %v3433_v41 = vadd.f32 %v3364_v12, %v16809_v19  ;;  %v15377_v19 = vld [vmem:[%s15503_s12 + $0x68] sm:$0xff]   ;;  %v15378_v32 = vld [vmem:[%s15503_s12 + $0x70] sm:$0xff]  }
 0x1bb   : > { %v14244_v0 = vpop.f32.mrf.mxu0  ;;  %14459 = vmatmul.mubr.msk.bf16.gmra.mxu0 %vm21764_vm0, %v6015_v55  ;;  %v14210_v57 = vpop.f32.mrf.mxu1  ;;  %14425 = vmatmul.mubr.msk.bf16.gmra.mxu1 %vm21764_vm0, %v5576_v44  ;;  %v5579_v52 = vrot.slane %v15377_v19, 2  ;;  %v5581_v44 = vrot.slane %v15378_v32, 2 }
 0x1bc   : > { %v17064_v33 = vadd.f32 %v14244_v0, %v3434_v14  ;;  %14462 = vmatprep.mubr.msk.bf16.mxu0 %vm21764_vm0, %v6017_v51  ;;  %v3438_v45 = vadd.f32 %v14210_v57, %v16814_v1  ;;  %14428 = vmatprep.mubr.msk.bf16.mxu1 %vm21764_vm0, %v5578_v24  ;;  %v6019_v1 = vsel %vm21751_vm4, %v6016_v25, %v6018_v21  ;;  %v17081_v57 = vld [vmem:[%s15543_s19 + $0x70] sm:$0xff]  }
 0x1bd   : > { %v3804_v35 = vpop.f32.mrf.mxu0  ;;  %v3377_v55 = vpop.f32.mrf.mxu1  ;;  %v5580_v53 = vsel %vm21751_vm4, %v5577_v42, %v5579_v52  ;;  %v6022_v42 = vrot.slane %v17081_v57, 2 }
 0x1be   : > { %21964 = vst [vmem:[#allocation19_spill] sm:$0xff] %v17064_v33  ;;  %v17073_v14 = vadd.f32 %v3804_v35, %v3432_v9  ;;  %v3436_v51 = vadd.f32 %v3377_v55, %v16824_v56  ;;  %v6021_v9 = vsel %vm21751_vm4, %v6018_v21, %v6020_v8  ;;  %v17087_v35 = vld [vmem:[%s15543_s19 + $0x78] sm:$0xff]  }
 0x1bf   : > { %v14245_v12 = vpop.f32.mrf.mxu0  ;;  %v14211_v0 = vpop.f32.mrf.mxu1  ;;  %21965 = vst [vmem:[#allocation21_spill] sm:$0xff] %v17087_v35 }
 0x1c0   : > { %v17077_v33 = vadd.f32 %v14245_v12, %v3435_v26  ;;  %v3439_v24 = vadd.f32 %v14211_v0, %v16829_v23  ;;  %v5582_v26 = vsel %vm21751_vm4, %v5579_v52, %v5581_v44  ;;  %v6024_v0 = vrot.slane %v17087_v35, 2 }
 0x1c1   : > { %v3807_v19 = vpop.f32.mrf.mxu0  ;;  %v3380_v32 = vpop.f32.mrf.mxu1 }
 0x1c2   : > { %v17089_v56 = vadd.f32 %v3807_v19, %v3433_v41  ;;  %v3437_v55 = vadd.f32 %v3380_v32, %v16838_v31  ;;  %v15379_v31 = vld [vmem:[%s15503_s12 + $0x78] sm:$0xff]   ;;  %v15380_v19 = vld [vmem:[%s15503_s12 + $0x80] sm:$0xff]  }
 0x1c3   : > { %v14248_v25 = vpop.f32.mrf.mxu0  ;;  %14463 = vmatmul.mubr.msk.bf16.gmra.mxu0 %vm21764_vm0, %v6019_v1  ;;  %v14214_v23 = vpop.f32.mrf.mxu1  ;;  %14429 = vmatmul.mubr.msk.bf16.gmra.mxu1 %vm21764_vm0, %v5580_v53  ;;  %v5583_v52 = vrot.slane %v15379_v31, 2  ;;  %v5585_v53 = vrot.slane %v15380_v19, 2 }
 0x1c4   : > { %v17094_v12 = vadd.f32 %v14248_v25, %v3438_v45  ;;  %14466 = vmatprep.mubr.msk.bf16.mxu0 %vm21764_vm0, %v6021_v9  ;;  %v3442_v41 = vadd.f32 %v14214_v23, %v16843_v40  ;;  %14432 = vmatprep.mubr.msk.bf16.mxu1 %vm21764_vm0, %v5582_v26  ;;  %v6023_v40 = vsel %vm21751_vm4, %v6020_v8, %v6022_v42  ;;  %v17111_v23 = vld [vmem:[%s15543_s19 + $0x80] sm:$0xff]  }
 0x1c5   : > { %v3820_v21 = vpop.f32.mrf.mxu0  ;;  %v3393_v1 = vpop.f32.mrf.mxu1  ;;  %21967 = vst [vmem:[#allocation24_spill] sm:$0xff] %v17111_v23  ;;  %v5584_v35 = vsel %vm21751_vm4, %v5581_v44, %v5583_v52  ;;  %v6026_v44 = vrot.slane %v17111_v23, 2 }
 0x1c6   : > { %21966 = vst [vmem:[#allocation15_spill] sm:$0xff] %v17094_v12  ;;  %v17103_v45 = vadd.f32 %v3820_v21, %v3436_v51  ;;  %v3440_v9 = vadd.f32 %v3393_v1, %v16853_v27  ;;  %v6025_v51 = vsel %vm21751_vm4, %v6022_v42, %v6024_v0  ;;  %v17117_v21 = vld [vmem:[%s15543_s19 + $0x88] sm:$0xff]  }
 0x1c7   : > { %v14249_v32 = vpop.f32.mrf.mxu0  ;;  %v14215_v25 = vpop.f32.mrf.mxu1  ;;  %21968 = vst [vmem:[#allocation22_spill] sm:$0xff] %v17117_v21 }
 0x1c8   : > { %v17107_v12 = vadd.f32 %v14249_v32, %v3439_v24  ;;  %v3443_v26 = vadd.f32 %v14215_v25, %v16857_v2  ;;  %v5586_v24 = vsel %vm21751_vm4, %v5583_v52, %v5585_v53 }
 0x1c9   : > { %v3823_v31 = vpop.f32.mrf.mxu0  ;;  %v3396_v19 = vpop.f32.mrf.mxu1 }
 0x1ca   : > { %v17119_v27 = vadd.f32 %v3823_v31, %v3437_v55  ;;  %v3441_v1 = vadd.f32 %v3396_v19, %v16863_v63  ;;  %v15381_v63 = vld [vmem:[%s15503_s12 + $0x88] sm:$0xff]  }
 0x1cb   : > { %v14252_v8 = vpop.f32.mrf.mxu0  ;;  %14467 = vmatmul.mubr.msk.bf16.gmra.mxu0 %vm21764_vm0, %v6023_v40  ;;  %v14258_v32 = vpop.f32.mrf.mxu1  ;;  %14433 = vmatmul.mubr.msk.bf16.gmra.mxu1 %vm21764_vm0, %v5584_v35  ;;  %v5587_v52 = vrot.slane %v15381_v63, 2  ;;  %v15382_v35 = vld [vmem:[%s15503_s12 + $0x90] sm:$0xff]  }
 0x1cc   : > { %v17124_v2 = vadd.f32 %v14252_v8, %v3442_v41  ;;  %14470 = vmatprep.mubr.msk.bf16.mxu0 %vm21764_vm0, %v6025_v51  ;;  %v4296_v55 = vadd.f32 %v14258_v32, %v16869_v17  ;;  %14436 = vmatprep.mubr.msk.bf16.mxu1 %vm21764_vm0, %v5586_v24  ;;  %v6028_v41 = vrot.slane %v17117_v21, 2  ;;  %v5589_v31 = vrot.slane %v15382_v35, 2  ;;  %v6309_v8 = vld [vmem:[%s15503_s12 + $0x10] sm:$0xc]  ;;  %v6310_v17 = vld [vmem:[%s15503_s12 + $0x14] sm:$0xf] }
 0x1cd   : > { %v3836_v42 = vpop.f32.mrf.mxu0  ;;  %v4151_v40 = vpop.f32.mrf.mxu1  ;;  %v6027_v24 = vsel %vm21751_vm4, %v6024_v0, %v6026_v44  ;;  %v17143_v63 = vld [vmem:[%s15543_s19 + $0x90] sm:$0xff]   ;;  %v17149_v21 = vld [vmem:[%s15543_s19 + $0x98] sm:$0xff]  }
 0x1ce   : > { %21969 = vst [vmem:[#allocation23_spill] sm:$0xff] %v17124_v2  ;;  %v17133_v25 = vadd.f32 %v3836_v42, %v3440_v9  ;;  %v4294_v51 = vadd.f32 %v4151_v40, %v16877_v50  ;;  %21972 = vst [vmem:[#allocation28_spill] sm:$0xff] %v17143_v63  ;;  %v6029_v35 = vsel %vm21751_vm4, %v6026_v44, %v6028_v41  ;;  %v6761_v44 = vshrl.u32 %v16889_v43, 16 }
 0x1cf   : > { %v14253_v19 = vpop.f32.mrf.mxu0  ;;  %v14259_v2 = vpop.f32.mrf.mxu1  ;;  %21973 = vst [vmem:[#allocation27_spill] sm:$0xff] %v17149_v21 }
 0x1d0   : > { %21970 = vst [vmem:[#allocation25_spill] sm:$0xff] %v17133_v25  ;;  %v17139_v32 = vadd.f32 %v14253_v19, %v3443_v26  ;;  %v4297_v9 = vadd.f32 %v14259_v2, %v16883_v48  ;;  %v5588_v25 = vsel %vm21751_vm4, %v5585_v53, %v5587_v52  ;;  %v5590_v26 = vsel %vm21751_vm4, %v5587_v52, %v5589_v31 }
 0x1d1   : > { %v3839_v42 = vpop.f32.mrf.mxu0  ;;  %v4154_v40 = vpop.f32.mrf.mxu1  ;;  %v17154_v19 = vcombine.low %v6309_v8, %v6310_v17  ;;  %v5591_v48 = vrot.slane %v16836_v18, 2  ;;  %v6032_v18 = vrot.slane %v17149_v21, 2 }
 0x1d2   : > { %21971 = vst [vmem:[#allocation26_spill] sm:$0xff] %v17139_v32  ;;  %v17151_v50 = vadd.f32 %v3839_v42, %v3441_v1  ;;  %v17157_v32 = vld [vmem:[%s15503_s12 + $0x18] sm:$0xff]   ;;  %v4295_v0 = vadd.f32 %v4154_v40, %v16894_v36  ;;  %v6030_v1 = vrot.slane %v17143_v63, 2  ;;  %v6764_v36 = vshll.u32 %v16889_v43, 16  ;;  %v17193_v63 = vld [vmem:[%s15503_s12 + $0x28] sm:$0xff]  }
 0x1d3   : > { %21974 = vst [vmem:[#allocation30_spill] sm:$0xff] %v17154_v19  ;;  %21975 = vst [vmem:[#allocation29_spill] sm:$0xff] %v17157_v32  ;;  %v14296_v23 = vpop.f32.mrf.mxu0  ;;  %14471 = vmatmul.mubr.msk.bf16.gmra.mxu0 %vm21764_vm0, %v6027_v24  ;;  %v14262_v53 = vpop.f32.mrf.mxu1  ;;  %14437 = vmatmul.mubr.msk.bf16.gmra.mxu1 %vm21764_vm0, %v5588_v25  ;;  %v6442_v24 = vrot.slane %v17154_v19, 2  ;;  %v6443_v42 = vrot.slane %v17157_v32, 2 }
 0x1d4   : > { %v17162_v2 = vadd.f32 %v14296_v23, %v4296_v55  ;;  %14474 = vmatprep.mubr.msk.bf16.mxu0 %vm21764_vm0, %v6029_v35  ;;  %v4300_v52 = vadd.f32 %v14262_v53, %v16899_v59  ;;  %14440 = vmatprep.mubr.msk.bf16.mxu1 %vm21764_vm0, %v5590_v26  ;;  %v6769_v23 = vshrl.u32 %v16892_v20, 16  ;;  %v6772_v55 = vshll.u32 %v16892_v20, 16  ;;  %v15253_v40 = vld [vmem:[%s15543_s19 + $0xa0] ss:$0 sps:$4 sm:$0x33]  }
 0x1d5   : > { %v4602_v8 = vpop.f32.mrf.mxu0  ;;  %v4167_v25 = vpop.f32.mrf.mxu1  ;;  %v5592_v59 = vsel %vm21751_vm4, %v5589_v31, %v5591_v48  ;;  %v17182_v26 = vld [vmem:[%s15503_s12 + $0x20] sm:$0xff]   ;;  %v6031_v20 = vsel %vm21751_vm4, %v6028_v41, %v6030_v1  ;;  %v6033_v32 = vsel %vm21751_vm4, %v6030_v1, %v6032_v18  ;;  %v6444_v48 = vsel %vm21751_vm4, %v6442_v24, %v6443_v42 }
 0x1d6   : > { %21976 = vst [vmem:[#allocation8_spill] sm:$0xff] %v17162_v2  ;;  %v17174_v17 = vadd.f32 %v4602_v8, %v4294_v51  ;;  %v4298_v43 = vadd.f32 %v4167_v25, %v16909_v22  ;;  %v6763_v51 = vrot.slane %v6761_v44, 2  ;;  %v6766_v8 = vrot.slane %v6764_v36, 3 }
 0x1d7   : > { %v14297_v35 = vpop.f32.mrf.mxu0  ;;  %v14263_v53 = vpop.f32.mrf.mxu1  ;;  %v6771_v22 = vrot.slane %v6769_v23, 2  ;;  %v6774_v25 = vrot.slane %v6772_v55, 3  ;;  %v6034_v41 = vrot.slane %v15253_v40, 2  ;;  %v6781_v1 = vshll.u32 %v16917_v11, 16 }
 0x1d8   : > { %21977 = vst [vmem:[#allocation3_spill] sm:$0xff] %v17174_v17  ;;  %v17184_v2 = vadd.f32 %v14297_v35, %v4297_v9  ;;  %v4301_v17 = vadd.f32 %v14263_v53, %v16913_v34  ;;  %v6445_v34 = vrot.slane %v17182_v26, 2  ;;  %v6787_v55 = vshrl.u32 %v16923_v47, 16 }
 0x1d9   : > { %v4605_v19 = vpop.f32.mrf.mxu0  ;;  %v4170_v21 = vpop.f32.mrf.mxu1  ;;  %v6775_v23 = vor.u32 %v6774_v25, %v6771_v22  ;;  %v6783_v22 = vrot.slane %v6781_v1, 3 }
 0x1da   : > { %v17189_v31 = vadd.f32 %v4605_v19, %v4295_v0  ;;  %v4299_v9 = vadd.f32 %v4170_v21, %v16925_v38  ;;  %v6767_v19 = vor.u32 %v6766_v8, %v6763_v51  ;;  %v6778_v0 = vshrl.u32 %v16917_v11, 16 }
 0x1db   : > { %v14300_v35 = vpop.f32.mrf.mxu0  ;;  %14475 = vmatmul.mubr.msk.bf16.gmra.mxu0 %vm21764_vm0, %v6031_v20  ;;  %v14266_v44 = vpop.f32.mrf.mxu1  ;;  %14441 = vmatmul.mubr.msk.bf16.gmra.mxu1 %vm21764_vm0, %v5592_v59  ;;  %v6035_v11 = vsel %vm21751_vm4, %v6032_v18, %v6034_v41  ;;  %v6446_v8 = vsel %vm21751_vm4, %v6443_v42, %v6445_v34  ;;  %v17225_v41 = vld [vmem:[%s15503_s12 + $0x38] sm:$0xff]  }
 0x1dc   : > { %v17198_v36 = vadd.f32 %v14300_v35, %v4300_v52  ;;  %14478 = vmatprep.mubr.msk.bf16.mxu0 %vm21764_vm0, %v6033_v32  ;;  %v4304_v38 = vadd.f32 %v14266_v44, %v16935_v46  ;;  %14484 = vmatprep.mubr.msk.bf16.mxu1 %vm21764_vm0, %v6444_v48  ;;  %v6790_v52 = vshll.u32 %v16923_v47, 16  ;;  %v6447_v32 = vrot.slane %v17193_v63, 2  ;;  %v17214_v46 = vld [vmem:[%s15503_s12 + $0x30] sm:$0xff]  }
 0x1dd   : > { %v4618_v21 = vpop.f32.mrf.mxu0  ;;  %v4183_v24 = vpop.f32.mrf.mxu1  ;;  %v6780_v47 = vrot.slane %v6778_v0, 2  ;;  %v6776_v48 = vsel %vm21747_vm5, %v6767_v19, %v6775_v23  ;;  %v6789_v35 = vrot.slane %v6787_v55, 2  ;;  %v6449_v19 = vrot.slane %v17214_v46, 2 }
 0x1de   : > { %v17208_v59 = vadd.f32 %v4618_v21, %v4298_v43  ;;  %v4302_v40 = vadd.f32 %v4183_v24, %v16945_v49  ;;  %v6792_v49 = vrot.slane %v6790_v52, 3  ;;  %v6448_v18 = vsel %vm21751_vm4, %v6445_v34, %v6447_v32 }
 0x1df   : > { %v14301_v53 = vpop.f32.mrf.mxu0  ;;  %v14267_v20 = vpop.f32.mrf.mxu1  ;;  %v6796_v34 = vshrl.u32 %v16954_v13, 16  ;;  %v6799_v55 = vshll.u32 %v16954_v13, 16 }
 0x1e0   : > { %v17216_v51 = vadd.f32 %v14301_v53, %v4301_v17  ;;  %v4305_v43 = vadd.f32 %v14267_v20, %v16950_v60  ;;  %v17230_v17 = vld [vmem:[%s21676_s3 + $0x40] sm:$0xff]   ;;  %v6793_v24 = vor.u32 %v6792_v49, %v6789_v35  ;;  %v6808_v53 = vshll.u32 %v16960_v7, 16 }
 0x1e1   : > { %v4621_v25 = vpop.f32.mrf.mxu0  ;;  %v4186_v44 = vpop.f32.mrf.mxu1 }
 0x1e2   : > { %v17221_v21 = vadd.f32 %v4621_v25, %v4299_v9  ;;  %v4303_v42 = vadd.f32 %v4186_v44, %v16962_v6  ;;  %v6784_v9 = vor.u32 %v6783_v22, %v6780_v47  ;;  %v17253_v47 = vld [vmem:[%s15503_s12 + $0x40] sm:$0xff]  }
 0x1e3   : > { %v14304_v60 = vpop.f32.mrf.mxu0  ;;  %14479 = vmatmul.mubr.msk.bf16.gmra.mxu0 %vm21764_vm0, %v6035_v11  ;;  %v14270_v0 = vpop.f32.mrf.mxu1  ;;  %14485 = vmatmul.mubr.msk.bf16.vlgmr.msra.gmra.mxu1 %vm21764_vm0, %v6446_v8  ;;  %v6451_v8 = vrot.slane %v17225_v41, 2 }
 0x1e4   : > { %v17235_v1 = vadd.f32 %v14304_v60, %v4304_v38  ;;  %14522 = vmatprep.mubr.msk.bf16.mxu0 %vm21764_vm0, %v6776_v48  ;;  %v4308_v6 = vadd.f32 %v14270_v0, %v16967_v37  ;;  %14559 = vmatpush3.bf16.msra.mxu1 %v16931_v28  ;;  %v6805_v38 = vshrl.u32 %v16960_v7, 16  ;;  %v6450_v28 = vsel %vm21751_vm4, %v6447_v32, %v6449_v19 }
 0x1e5   : > { %v4634_v52 = vpop.f32.mrf.mxu0  ;;  %14488 = vmatprep.mubr.msk.bf16.mxu1 %vm21764_vm0, %v6448_v18  ;;  %v4199_v11 = vpop.f32.mrf.mxu1  ;;  %14634 = vmatprep.subr.bf16.mxu1 %v17230_v17  ;;  %v6785_v7 = vsel %vm21747_vm5, %v6775_v23, %v6784_v9  ;;  %v6798_v48 = vrot.slane %v6796_v34, 2  ;;  %v6794_v44 = vsel %vm21747_vm5, %v6784_v9, %v6793_v24  ;;  %v6452_v32 = vsel %vm21751_vm4, %v6449_v19, %v6451_v8 }
 0x1e6   : > { %v17246_v20 = vadd.f32 %v4634_v52, %v4302_v40  ;;  %v4306_v13 = vadd.f32 %v4199_v11, %v16977_v58  ;;  %v6801_v40 = vrot.slane %v6799_v55, 3  ;;  %v6807_v18 = vrot.slane %v6805_v38, 2  ;;  %v17264_v52 = vld [vmem:[%s15503_s12 + $0x48] sm:$0xff]  }
 0x1e7   : > { %v14305_v37 = vpop.f32.mrf.mxu0  ;;  %v14271_v22 = vpop.f32.mrf.mxu1  ;;  %v6810_v58 = vrot.slane %v6808_v53, 3  ;;  %v6453_v23 = vrot.slane %v17253_v47, 2  ;;  %v6814_v19 = vshrl.u32 %v16985_v39, 16  ;;  %v6817_v9 = vshll.u32 %v16985_v39, 16  ;;  %v21978_v53 = vld [vmem:[#allocation11_spill] sm:$0xff] }
 0x1e8   : > { %v17255_v25 = vadd.f32 %v14305_v37, %v4305_v43  ;;  %v4309_v35 = vadd.f32 %v14271_v22, %v16981_v4  ;;  %v6823_v37 = vshrl.u32 %v21978_v53, 16  ;;  %v21979_v22 = vld [vmem:[#allocation17_spill] sm:$0xff] }
 0x1e9   : > { %v4637_v49 = vpop.f32.mrf.mxu0  ;;  %v4202_v60 = vpop.f32.mrf.mxu1  ;;  %v6811_v38 = vor.u32 %v6810_v58, %v6807_v18 }
 0x1ea   : > { %v17260_v0 = vadd.f32 %v4637_v49, %v4303_v42  ;;  %v4307_v43 = vadd.f32 %v4202_v60, %v16998_v29  ;;  %v6802_v42 = vor.u32 %v6801_v40, %v6798_v48  ;;  %v6455_v48 = vrot.slane %v17264_v52, 2  ;;  %v17286_v49 = vld [vmem:[%s15503_s12 + $0x50] sm:$0xff]  }
 0x1eb   : > { %v14308_v11 = vpop.f32.mrf.mxu0  ;;  %14523 = vmatmul.mubr.msk.bf16.vlgmr.msra.gmra.mxu0 %vm21764_vm0, %v6785_v7  ;;  %v14274_v4 = vpop.f32.mrf.mxu1  ;;  %14489 = vmatmul.mubr.msk.bf16.gmra.mxu1 %vm21764_vm0, %v6450_v28  ;;  %v6816_v60 = vrot.slane %v6814_v19, 2 }
 0x1ec   : > { %v17269_v34 = vadd.f32 %v14308_v11, %v4308_v6  ;;  %14526 = vmatprep.mubr.msk.bf16.mxu0 %vm21764_vm0, %v6794_v44  ;;  %v4312_v29 = vadd.f32 %v14274_v4, %v17004_v62  ;;  %14492 = vmatprep.mubr.msk.bf16.mxu1 %vm21764_vm0, %v6452_v32  ;;  %v6826_v6 = vshll.u32 %v21978_v53, 16  ;;  %v6454_v62 = vsel %vm21751_vm4, %v6451_v8, %v6453_v23 }
 0x1ed   : > { %v4650_v55 = vpop.f32.mrf.mxu0  ;;  %14597 = vmatpush3.bf16.msra.mxu0 %v21979_v22  ;;  %v4215_v28 = vpop.f32.mrf.mxu1  ;;  %v6803_v58 = vsel %vm21747_vm5, %v6793_v24, %v6802_v42  ;;  %v6819_v32 = vrot.slane %v6817_v9, 3  ;;  %v6812_v4 = vsel %vm21747_vm5, %v6802_v42, %v6811_v38  ;;  %v6456_v8 = vsel %vm21751_vm4, %v6453_v23, %v6455_v48  ;;  %v21981_v9 = vld [vmem:[#allocation18_spill] sm:$0xff] }
 0x1ee   : > { %v17280_v7 = vadd.f32 %v4650_v55, %v4306_v13  ;;  %v4310_v40 = vadd.f32 %v4215_v28, %v17013_v61  ;;  %v6825_v55 = vrot.slane %v6823_v37, 2  ;;  %v6828_v61 = vrot.slane %v6826_v6, 3  ;;  %v17297_v28 = vld [vmem:[%s15503_s12 + $0x58] sm:$0xff]  }
 0x1ef   : > { %v14309_v39 = vpop.f32.mrf.mxu0  ;;  %v14275_v44 = vpop.f32.mrf.mxu1  ;;  %21980 = vst [vmem:[#allocation4_spill] sm:$0xff] %v17297_v28  ;;  %v6457_v24 = vrot.slane %v17286_v49, 2  ;;  %v6832_v23 = vshrl.u32 %v17021_v54, 16  ;;  %v6835_v42 = vshll.u32 %v17021_v54, 16 }
 0x1f0   : > { %v17288_v18 = vadd.f32 %v14309_v39, %v4309_v35  ;;  %v4313_v13 = vadd.f32 %v14275_v44, %v17017_v15  ;;  %v6829_v6 = vor.u32 %v6828_v61, %v6825_v55  ;;  %v21982_v44 = vld [vmem:[#allocation20_spill] sm:$0xff] }
 0x1f1   : > { %v4653_v11 = vpop.f32.mrf.mxu0  ;;  %v4218_v53 = vpop.f32.mrf.mxu1  ;;  %v6458_v54 = vsel %vm21751_vm4, %v6455_v48, %v6457_v24  ;;  %v6834_v61 = vrot.slane %v6832_v23, 2 }
 0x1f2   : > { %v17293_v22 = vadd.f32 %v4653_v11, %v4307_v43  ;;  %v4311_v35 = vadd.f32 %v4218_v53, %v17029_v30  ;;  %v6820_v43 = vor.u32 %v6819_v32, %v6816_v60  ;;  %v17318_v53 = vld [vmem:[%s15503_s12 + $0x60] sm:$0xff]  }
 0x1f3   : > { %v14312_v39 = vpop.f32.mrf.mxu0  ;;  %14527 = vmatmul.mubr.msk.bf16.gmra.mxu0 %vm21764_vm0, %v6803_v58  ;;  %v14278_v15 = vpop.f32.mrf.mxu1  ;;  %14493 = vmatmul.mubr.msk.bf16.gmra.mxu1 %vm21764_vm0, %v6454_v62  ;;  %v6841_v58 = vshrl.u32 %v21982_v44, 16 }
 0x1f4   : > { %v17302_v19 = vadd.f32 %v14312_v39, %v4312_v29  ;;  %14530 = vmatprep.mubr.msk.bf16.mxu0 %vm21764_vm0, %v6812_v4  ;;  %v4316_v30 = vadd.f32 %v14278_v15, %v21981_v9  ;;  %14496 = vmatprep.mubr.msk.bf16.mxu1 %vm21764_vm0, %v6456_v8  ;;  %v6844_v29 = vshll.u32 %v21982_v44, 16  ;;  %v6459_v4 = vrot.slane %v17297_v28, 2  ;;  %v17329_v28 = vld [vmem:[%s15503_s12 + $0x68] sm:$0xff]  }
 0x1f5   : > { %v4666_v37 = vpop.f32.mrf.mxu0  ;;  %v4231_v11 = vpop.f32.mrf.mxu1  ;;  %v6821_v55 = vsel %vm21747_vm5, %v6811_v38, %v6820_v43  ;;  %v6837_v15 = vrot.slane %v6835_v42, 3  ;;  %v6843_v44 = vrot.slane %v6841_v58, 2  ;;  %21984 = vst [vmem:[#allocation13_spill] sm:$0xff] %v17329_v28  ;;  %v6461_v38 = vrot.slane %v17318_v53, 2  ;;  %v21985_v42 = vld [vmem:[#allocation19_spill] sm:$0xff] }
 0x1f6   : > { %v17312_v62 = vadd.f32 %v4666_v37, %v4310_v40  ;;  %v4314_v60 = vadd.f32 %v4231_v11, %v17043_v16  ;;  %v6830_v37 = vsel %vm21747_vm5, %v6820_v43, %v6829_v6  ;;  %v6846_v16 = vrot.slane %v6844_v29, 3 }
 0x1f7   : > { %v14313_v32 = vpop.f32.mrf.mxu0  ;;  %v14279_v39 = vpop.f32.mrf.mxu1  ;;  %v6460_v48 = vsel %vm21751_vm4, %v6457_v24, %v6459_v4  ;;  %v6850_v24 = vshrl.u32 %v17051_v10, 16  ;;  %v6853_v43 = vshll.u32 %v17051_v10, 16  ;;  %v6462_v10 = vsel %vm21751_vm4, %v6459_v4, %v6461_v38 }
 0x1f8   : > { %21983 = vst [vmem:[#allocation6_spill] sm:$0xff] %v17312_v62  ;;  %v17320_v8 = vadd.f32 %v14313_v32, %v4313_v13  ;;  %v4317_v40 = vadd.f32 %v14279_v39, %v17047_v3  ;;  %v6847_v29 = vor.u32 %v6846_v16, %v6843_v44  ;;  %v21986_v39 = vld [vmem:[#allocation12_spill] sm:$0xff] }
 0x1f9   : > { %v4669_v9 = vpop.f32.mrf.mxu0  ;;  %v4234_v11 = vpop.f32.mrf.mxu1  ;;  %v6852_v16 = vrot.slane %v6850_v24, 2 }
 0x1fa   : > { %v17325_v62 = vadd.f32 %v4669_v9, %v4311_v35  ;;  %v4315_v13 = vadd.f32 %v4234_v11, %v17059_v5  ;;  %v6838_v35 = vor.u32 %v6837_v15, %v6834_v61  ;;  %v17350_v11 = vld [vmem:[%s15503_s12 + $0x70] sm:$0xff]  }
 0x1fb   : > { %v14316_v32 = vpop.f32.mrf.mxu0  ;;  %14531 = vmatmul.mubr.msk.bf16.gmra.mxu0 %vm21764_vm0, %v6821_v55  ;;  %v14282_v3 = vpop.f32.mrf.mxu1  ;;  %14497 = vmatmul.mubr.msk.bf16.gmra.mxu1 %vm21764_vm0, %v6458_v54  ;;  %v6859_v55 = vshrl.u32 %v21986_v39, 16  ;;  %21988 = vst [vmem:[#allocation14_spill] sm:$0xff] %v17350_v11 }
 0x1fc   : > { %v17334_v23 = vadd.f32 %v14316_v32, %v4316_v30  ;;  %14534 = vmatprep.mubr.msk.bf16.mxu0 %vm21764_vm0, %v6830_v37  ;;  %v4320_v5 = vadd.f32 %v14282_v3, %v21985_v42  ;;  %14500 = vmatprep.mubr.msk.bf16.mxu1 %vm21764_vm0, %v6460_v48  ;;  %v6862_v30 = vshll.u32 %v21986_v39, 16  ;;  %v6463_v37 = vrot.slane %v17329_v28, 2  ;;  %v17361_v28 = vld [vmem:[%s15503_s12 + $0x78] sm:$0xff]  }
 0x1fd   : > { %v4682_v58 = vpop.f32.mrf.mxu0  ;;  %v4247_v9 = vpop.f32.mrf.mxu1  ;;  %v6839_v44 = vsel %vm21747_vm5, %v6829_v6, %v6838_v35  ;;  %v6855_v3 = vrot.slane %v6853_v43, 3  ;;  %v6861_v39 = vrot.slane %v6859_v55, 2  ;;  %21990 = vst [vmem:[#allocation9_spill] sm:$0xff] %v17361_v28  ;;  %v6465_v6 = vrot.slane %v17350_v11, 2  ;;  %v21992_v43 = vld [vmem:[#allocation15_spill] sm:$0xff] }
 0x1fe   : > { %v17344_v54 = vadd.f32 %v4682_v58, %v4314_v60  ;;  %v4318_v61 = vadd.f32 %v4247_v9, %v17073_v14  ;;  %v6848_v58 = vsel %vm21747_vm5, %v6838_v35, %v6847_v29  ;;  %v6864_v14 = vrot.slane %v6862_v30, 3 }
 0x1ff   : > { %v14317_v15 = vpop.f32.mrf.mxu0  ;;  %v14283_v32 = vpop.f32.mrf.mxu1  ;;  %v6464_v4 = vsel %vm21751_vm4, %v6461_v38, %v6463_v37  ;;  %v6868_v35 = vshrl.u32 %v17081_v57, 16  ;;  %v6871_v38 = vshll.u32 %v17081_v57, 16  ;;  %v6466_v57 = vsel %vm21751_vm4, %v6463_v37, %v6465_v6 }
 0x200   : > { %21987 = vst [vmem:[#allocation5_spill] sm:$0xff] %v17344_v54  ;;  %v17352_v48 = vadd.f32 %v14317_v15, %v4317_v40  ;;  %v4321_v60 = vadd.f32 %v14283_v32, %v17077_v33  ;;  %v6865_v30 = vor.u32 %v6864_v14, %v6861_v39  ;;  %v21993_v32 = vld [vmem:[#allocation21_spill] sm:$0xff] }
 0x201   : > { %v4685_v42 = vpop.f32.mrf.mxu0  ;;  %v4250_v9 = vpop.f32.mrf.mxu1  ;;  %v17385_v14 = vld [vmem:[%s15503_s12 + $0x80] sm:$0xff]  }
 0x202   : > { %v17357_v54 = vadd.f32 %v4685_v42, %v4315_v13  ;;  %v4319_v40 = vadd.f32 %v4250_v9, %v17089_v56  ;;  %v6856_v13 = vor.u32 %v6855_v3, %v6852_v16  ;;  %v6467_v16 = vrot.slane %v17361_v28, 2  ;;  %21996 = vst [vmem:[#allocation11_spill] sm:$0xff] %v17385_v14 }
 0x203   : > { %v14320_v15 = vpop.f32.mrf.mxu0  ;;  %14535 = vmatmul.mubr.msk.bf16.gmra.mxu0 %vm21764_vm0, %v6839_v44  ;;  %v14286_v33 = vpop.f32.mrf.mxu1  ;;  %14501 = vmatmul.mubr.msk.bf16.gmra.mxu1 %vm21764_vm0, %v6462_v10  ;;  %v6877_v44 = vshrl.u32 %v21993_v32, 16 }
 0x204   : > { %21989 = vst [vmem:[#allocation7_spill] sm:$0xff] %v17357_v54  ;;  %v17366_v24 = vadd.f32 %v14320_v15, %v4320_v5  ;;  %14538 = vmatprep.mubr.msk.bf16.mxu0 %vm21764_vm0, %v6848_v58  ;;  %v4324_v56 = vadd.f32 %v14286_v33, %v21992_v43  ;;  %14504 = vmatprep.mubr.msk.bf16.mxu1 %vm21764_vm0, %v6464_v4  ;;  %v6880_v5 = vshll.u32 %v21993_v32, 16  ;;  %v6870_v4 = vrot.slane %v6868_v35, 2  ;;  %v21999_v35 = vld [vmem:[#allocation24_spill] sm:$0xff] }
 0x205   : > { %v4698_v55 = vpop.f32.mrf.mxu0  ;;  %v4263_v42 = vpop.f32.mrf.mxu1  ;;  %v6857_v39 = vsel %vm21747_vm5, %v6847_v29, %v6856_v13  ;;  %v6873_v33 = vrot.slane %v6871_v38, 3  ;;  %v6879_v32 = vrot.slane %v6877_v44, 2  ;;  %v6468_v37 = vsel %vm21751_vm4, %v6465_v6, %v6467_v16 }
 0x206   : > { %21991 = vst [vmem:[#allocation31_spill] sm:$0xff] %v17366_v24  ;;  %v17376_v10 = vadd.f32 %v4698_v55, %v4318_v61  ;;  %v4322_v3 = vadd.f32 %v4263_v42, %v17103_v45  ;;  %v6866_v55 = vsel %vm21747_vm5, %v6856_v13, %v6865_v30  ;;  %v6882_v45 = vrot.slane %v6880_v5, 3  ;;  %v17405_v5 = vld [vmem:[%s15503_s12 + $0x90] sm:$0xff]  }
 0x207   : > { %v14321_v58 = vpop.f32.mrf.mxu0  ;;  %v14287_v9 = vpop.f32.mrf.mxu1  ;;  %v6889_v38 = vshll.u32 %v21999_v35, 16  ;;  %v6874_v6 = vor.u32 %v6873_v33, %v6870_v4  ;;  %22001 = vst [vmem:[#allocation19_spill] sm:$0xff] %v17405_v5 }
 0x208   : > { %21994 = vst [vmem:[#allocation10_spill] sm:$0xff] %v17376_v10  ;;  %v17381_v15 = vadd.f32 %v14321_v58, %v4321_v60  ;;  %v4325_v61 = vadd.f32 %v14287_v9, %v17107_v12  ;;  %v17393_v60 = vld [vmem:[%s15503_s12 + $0x88] sm:$0xff]   ;;  %v6886_v12 = vshrl.u32 %v21999_v35, 16 }
 0x209   : > { %v4701_v43 = vpop.f32.mrf.mxu0  ;;  %v4266_v42 = vpop.f32.mrf.mxu1  ;;  %21998 = vst [vmem:[#allocation18_spill] sm:$0xff] %v17393_v60 }
 0x20a   : > { %21995 = vst [vmem:[#allocation16_spill] sm:$0xff] %v17381_v15  ;;  %v17389_v10 = vadd.f32 %v4701_v43, %v4319_v40  ;;  %v4323_v29 = vadd.f32 %v4266_v42, %v17119_v27  ;;  %v6469_v40 = vrot.slane %v17385_v14, 2  ;;  %v22002_v27 = vld [vmem:[#allocation23_spill] sm:$0xff]  ;;  %v22003_v42 = vld [vmem:[#allocation22_spill] sm:$0xff]  ;;  %v22005_v14 = vld [vmem:[#allocation25_spill] sm:$0xff] }
 0x20b   : > { %v14324_v58 = vpop.f32.mrf.mxu0  ;;  %14539 = vmatmul.mubr.msk.bf16.gmra.mxu0 %vm21764_vm0, %v6857_v39  ;;  %v14290_v13 = vpop.f32.mrf.mxu1  ;;  %14505 = vmatmul.mubr.msk.bf16.gmra.mxu1 %vm21764_vm0, %v6466_v57  ;;  %v6883_v39 = vor.u32 %v6882_v45, %v6879_v32  ;;  %v6895_v35 = vshrl.u32 %v22003_v42, 16  ;;  %v6875_v45 = vsel %vm21747_vm5, %v6865_v30, %v6874_v6 }
 0x20c   : > { %21997 = vst [vmem:[#allocation17_spill] sm:$0xff] %v17389_v10  ;;  %v17399_v44 = vadd.f32 %v14324_v58, %v4324_v56  ;;  %14542 = vmatprep.mubr.msk.bf16.mxu0 %vm21764_vm0, %v6866_v55  ;;  %v4328_v9 = vadd.f32 %v14290_v13, %v22002_v27  ;;  %14508 = vmatprep.mubr.msk.bf16.mxu1 %vm21764_vm0, %v6468_v37  ;;  %v6898_v56 = vshll.u32 %v22003_v42, 16  ;;  %v6471_v55 = vrot.slane %v17393_v60, 2  ;;  %v22007_v42 = vld [vmem:[#allocation26_spill] sm:$0xff] }
 0x20d   : > { %v4714_v43 = vpop.f32.mrf.mxu0  ;;  %v4279_v58 = vpop.f32.mrf.mxu1  ;;  %v6891_v10 = vrot.slane %v6889_v38, 3  ;;  %v6470_v32 = vsel %vm21751_vm4, %v6467_v16, %v6469_v40  ;;  %v6473_v37 = vrot.slane %v17405_v5, 2 }
 0x20e   : > { %22000 = vst [vmem:[#allocation20_spill] sm:$0xff] %v17399_v44  ;;  %v17411_v57 = vadd.f32 %v4714_v43, %v4322_v3  ;;  %v4326_v4 = vadd.f32 %v4279_v58, %v22005_v14  ;;  %v6888_v44 = vrot.slane %v6886_v12, 2  ;;  %v6884_v43 = vsel %vm21747_vm5, %v6874_v6, %v6883_v39 }
 0x20f   : > { %v14325_v33 = vpop.f32.mrf.mxu0  ;;  %v14291_v13 = vpop.f32.mrf.mxu1  ;;  %v6897_v14 = vrot.slane %v6895_v35, 2  ;;  %v6900_v12 = vrot.slane %v6898_v56, 3  ;;  %v22012_v56 = vld [vmem:[#allocation27_spill] sm:$0xff] }
 0x210   : > { %22004 = vst [vmem:[#allocation12_spill] sm:$0xff] %v17411_v57  ;;  %v17415_v27 = vadd.f32 %v14325_v33, %v4325_v61  ;;  %v4329_v15 = vadd.f32 %v14291_v13, %v22007_v42  ;;  %v17423_v57 = vld [vmem:[%s15503_s12 + $0x98] sm:$0xff]   ;;  %v6472_v61 = vsel %vm21751_vm4, %v6469_v40, %v6471_v55  ;;  %v6892_v33 = vor.u32 %v6891_v10, %v6888_v44  ;;  %v15270_v40 = vld [vmem:[%s15503_s12 + $0xa0] ss:$0 sps:$4 sm:$0x33]  }
 0x211   : > { %v4717_v3 = vpop.f32.mrf.mxu0  ;;  %22008 = vst [vmem:[#allocation21_spill] sm:$0xff] %v17423_v57  ;;  %v4282_v38 = vpop.f32.mrf.mxu1  ;;  %v22010_v13 = vld [vmem:[#allocation28_spill] sm:$0xff] }
 0x212   : > { %22006 = vst [vmem:[#allocation15_spill] sm:$0xff] %v17415_v27  ;;  %v17425_v58 = vadd.f32 %v4717_v3, %v4323_v29  ;;  %v4327_v16 = vadd.f32 %v4282_v38, %v17151_v50  ;;  %v6904_v42 = vshrl.u32 %v22010_v13, 16  ;;  %v6907_v6 = vshll.u32 %v22010_v13, 16  ;;  %v22017_v27 = vld [vmem:[#allocation3_spill] sm:$0xff] }
 0x213   : > { %v14328_v30 = vpop.f32.mrf.mxu0  ;;  %14543 = vmatmul.mubr.msk.bf16.gmra.mxu0 %vm21764_vm0, %v6875_v45  ;;  %v14334_v35 = vpop.f32.mrf.mxu1  ;;  %14509 = vmatmul.mubr.msk.bf16.gmra.mxu1 %vm21764_vm0, %v6470_v32  ;;  %v6474_v29 = vsel %vm21751_vm4, %v6471_v55, %v6473_v37  ;;  %v6913_v50 = vshrl.u32 %v22012_v56, 16  ;;  %v6916_v3 = vshll.u32 %v22012_v56, 16  ;;  %v22013_v45 = vld [vmem:[#allocation8_spill] sm:$0xff]  ;;  %v6901_v38 = vor.u32 %v6900_v12, %v6897_v14 }
 0x214   : > { %22009 = vst [vmem:[#allocation24_spill] sm:$0xff] %v17425_v58  ;;  %v17432_v5 = vadd.f32 %v14328_v30, %v4328_v9  ;;  %14546 = vmatprep.mubr.msk.bf16.mxu0 %vm21764_vm0, %v6884_v43  ;;  %v5197_v10 = vadd.f32 %v14334_v35, %v22013_v45  ;;  %14512 = vmatprep.mubr.msk.bf16.mxu1 %vm21764_vm0, %v6472_v61  ;;  %v6475_v9 = vrot.slane %v17423_v57, 2  ;;  %v22014_v30 = vld [vmem:[#allocation30_spill] sm:$0xff]  ;;  %v6906_v61 = vrot.slane %v6904_v42, 2 }
 0x215   : > { %v4730_v44 = vpop.f32.mrf.mxu0  ;;  %v7211_v32 = vshrl.u32 %v22014_v30, 16  ;;  %v5052_v43 = vpop.f32.mrf.mxu1  ;;  %v7214_v55 = vshll.u32 %v22014_v30, 16  ;;  %v6893_v60 = vsel %vm21747_vm5, %v6883_v39, %v6892_v33  ;;  %v6909_v28 = vrot.slane %v6907_v6, 3  ;;  %v17452_v57 = vld [vmem:[%s15543_s19 + $0xa0] ss:$0 sps:$4 sm:$0x77]  }
 0x216   : > { %22011 = vst [vmem:[#allocation23_spill] sm:$0xff] %v17432_v5  ;;  %v17444_v13 = vadd.f32 %v4730_v44, %v4326_v4  ;;  %v22016_v5 = vld [vmem:[#allocation29_spill] sm:$0xff]  ;;  %v5195_v35 = vadd.f32 %v5052_v43, %v22017_v27  ;;  %v6477_v12 = vrot.slane %v15270_v40, 2  ;;  %v6915_v44 = vrot.slane %v6913_v50, 2 }
 0x217   : > { %v7219_v58 = vshrl.u32 %v22016_v5, 16  ;;  %v7222_v56 = vshll.u32 %v22016_v5, 16  ;;  %v14329_v45 = vpop.f32.mrf.mxu0  ;;  %v14335_v4 = vpop.f32.mrf.mxu1  ;;  %v6476_v5 = vsel %vm21751_vm4, %v6473_v37, %v6475_v9  ;;  %v6902_v27 = vsel %vm21747_vm5, %v6892_v33, %v6901_v38 }
 0x218   : > { %22015 = vst [vmem:[#allocation22_spill] sm:$0xff] %v17444_v13  ;;  %v17454_v14 = vadd.f32 %v14329_v45, %v4329_v15  ;;  %v6918_v13 = vrot.slane %v6916_v3, 3  ;;  %v5198_v30 = vadd.f32 %v14335_v4, %v17184_v2  ;;  %v7213_v43 = vrot.slane %v7211_v32, 2 }
 0x219   : > { %v4733_v24 = vpop.f32.mrf.mxu0  ;;  %v5055_v39 = vpop.f32.mrf.mxu1  ;;  %v7216_v42 = vrot.slane %v7214_v55, 3  ;;  %v7221_v6 = vrot.slane %v7219_v58, 2  ;;  %v7224_v54 = vrot.slane %v7222_v56, 3  ;;  %v6910_v40 = vor.u32 %v6909_v28, %v6906_v61  ;;  %v7653_v56 = vld [vmem:[%s15543_s19 + $0x10] sm:$0x8] }
 0x21a   : > { %v17459_v11 = vadd.f32 %v4733_v24, %v4327_v16  ;;  %v5196_v15 = vadd.f32 %v5055_v39, %v17189_v31  ;;  %v6922_v2 = vshrl.u32 %v17452_v57, 16  ;;  %v6925_v50 = vshll.u32 %v17452_v57, 16 }
 0x21b   : > { %v14372_v45 = vpop.f32.mrf.mxu0  ;;  %14547 = vmatmul.mubr.msk.bf16.gmra.mxu0 %vm21764_vm0, %v6893_v60  ;;  %v14338_v37 = vpop.f32.mrf.mxu1  ;;  %14513 = vmatmul.mubr.msk.bf16.gmra.mxu1 %vm21764_vm0, %v6474_v29  ;;  %v6919_v24 = vor.u32 %v6918_v13, %v6915_v44  ;;  %v7228_v58 = vshrl.u32 %v17182_v26, 16  ;;  %v7231_v31 = vshll.u32 %v17182_v26, 16  ;;  %v7237_v16 = vshrl.u32 %v17193_v63, 16 }
 0x21c   : > { %v17465_v3 = vadd.f32 %v14372_v45, %v5197_v10  ;;  %14550 = vmatprep.mubr.msk.bf16.mxu0 %vm21764_vm0, %v6902_v27  ;;  %v5201_v60 = vadd.f32 %v14338_v37, %v17198_v36  ;;  %14516 = vmatprep.mubr.msk.bf16.mxu1 %vm21764_vm0, %v6476_v5  ;;  %v7240_v33 = vshll.u32 %v17193_v63, 16  ;;  %v6478_v29 = vsel %vm21751_vm4, %v6475_v9, %v6477_v12 }
 0x21d   : > { %v5370_v28 = vpop.f32.mrf.mxu0  ;;  %v5068_v10 = vpop.f32.mrf.mxu1  ;;  %v7217_v55 = vor.u32 %v7216_v42, %v7213_v43  ;;  %v7225_v13 = vor.u32 %v7224_v54, %v7221_v6  ;;  %v6911_v36 = vsel %vm21747_vm5, %v6901_v38, %v6910_v40  ;;  %v6924_v4 = vrot.slane %v6922_v2, 2  ;;  %v15383_v42 = vld [vmem:[%s15543_s19 + $0x14] sm:$0xf] }
 0x21e   : > { %v17475_v32 = vadd.f32 %v5370_v28, %v5195_v35  ;;  %v5199_v26 = vadd.f32 %v5068_v10, %v17208_v59  ;;  %v6927_v44 = vrot.slane %v6925_v50, 3  ;;  %v6920_v63 = vsel %vm21747_vm5, %v6910_v40, %v6919_v24 }
 0x21f   : > { %v14373_v61 = vpop.f32.mrf.mxu0  ;;  %v14339_v5 = vpop.f32.mrf.mxu1  ;;  %v7230_v35 = vrot.slane %v7228_v58, 2  ;;  %v7233_v39 = vrot.slane %v7231_v31, 3  ;;  %v7239_v54 = vrot.slane %v7237_v16, 2  ;;  %v7242_v43 = vrot.slane %v7240_v33, 3  ;;  %v15384_v33 = vld [vmem:[%s15543_s19 + $0x18] sm:$0xff]  }
 0x220   : > { %v17481_v27 = vadd.f32 %v14373_v61, %v5198_v30  ;;  %v5202_v9 = vadd.f32 %v14339_v5, %v17216_v51  ;;  %v13108_v6 = vcombine.low %v7653_v56, %v15383_v42  ;;  %v7226_v38 = vsel %vm21747_vm5, %v7217_v55, %v7225_v13 }
 0x221   : > { %v5373_v12 = vpop.f32.mrf.mxu0  ;;  %v5071_v59 = vpop.f32.mrf.mxu1  ;;  %v6928_v40 = vor.u32 %v6927_v44, %v6924_v4  ;;  %v7234_v51 = vor.u32 %v7233_v39, %v7230_v35  ;;  %v7249_v58 = vshll.u32 %v17214_v46, 16  ;;  %v7243_v28 = vor.u32 %v7242_v43, %v7239_v54 }
 0x222   : > { %v17486_v45 = vadd.f32 %v5373_v12, %v5196_v15  ;;  %v5200_v2 = vadd.f32 %v5071_v59, %v17221_v21  ;;  %v7246_v15 = vshrl.u32 %v17214_v46, 16  ;;  %v7661_v16 = vrot.slane %v13108_v6, 3  ;;  %v15385_v6 = vld [vmem:[%s15543_s19 + $0x20] sm:$0xff]  }
 0x223   : > { %v14376_v30 = vpop.f32.mrf.mxu0  ;;  %14551 = vmatmul.mubr.msk.bf16.gmra.mxu0 %vm21764_vm0, %v6911_v36  ;;  %v14342_v50 = vpop.f32.mrf.mxu1  ;;  %14517 = vmatmul.mubr.msk.bf16.gmra.mxu1 %vm21764_vm0, %v6478_v29  ;;  %v7662_v10 = vrot.slane %v15384_v33, 3  ;;  %v7255_v29 = vshrl.u32 %v17225_v41, 16  ;;  %v7258_v56 = vshll.u32 %v17225_v41, 16  ;;  %v6929_v4 = vsel %vm21747_vm5, %v6919_v24, %v6928_v40 }
 0x224   : > { %v17491_v37 = vadd.f32 %v14376_v30, %v5201_v60  ;;  %14554 = vmatprep.mubr.msk.bf16.mxu0 %vm21764_vm0, %v6920_v63  ;;  %v5205_v31 = vadd.f32 %v14342_v50, %v17235_v1  ;;  %14560 = vmatprep.mubr.msk.bf16.mxu1 %vm21764_vm0, %v7226_v38  ;;  %v7248_v44 = vrot.slane %v7246_v15, 2  ;;  %v7251_v5 = vrot.slane %v7249_v58, 3 }
 0x225   : > { %v5386_v21 = vpop.f32.mrf.mxu0  ;;  %v5084_v60 = vpop.f32.mrf.mxu1  ;;  %v7663_v39 = vsel %vm21748_vm6, %v7661_v16, %v7662_v10  ;;  %v7257_v54 = vrot.slane %v7255_v29, 2  ;;  %v7664_v59 = vrot.slane %v15385_v6, 3  ;;  %v7264_v40 = vshrl.u32 %v17253_v47, 16  ;;  %v22018_v6 = vld [vmem:[#allocation4_spill] sm:$0xff] }
 0x226   : > { %v17500_v55 = vadd.f32 %v5386_v21, %v5199_v26  ;;  %v5203_v61 = vadd.f32 %v5084_v60, %v17246_v20  ;;  %v7235_v26 = vsel %vm21747_vm5, %v7225_v13, %v7234_v51  ;;  %v7244_v20 = vsel %vm21747_vm5, %v7234_v51, %v7243_v28 }
 0x227   : > { %v14377_v46 = vpop.f32.mrf.mxu0  ;;  %v14343_v36 = vpop.f32.mrf.mxu1  ;;  %v7252_v13 = vor.u32 %v7251_v5, %v7248_v44  ;;  %v7267_v50 = vshll.u32 %v17253_v47, 16  ;;  %v7276_v21 = vshll.u32 %v17264_v52, 16  ;;  %v7665_v29 = vsel %vm21748_vm6, %v7662_v10, %v7664_v59 }
 0x228   : > { %v17505_v1 = vadd.f32 %v14377_v46, %v5202_v9  ;;  %v5206_v63 = vadd.f32 %v14343_v36, %v17255_v25  ;;  %v7260_v9 = vrot.slane %v7258_v56, 3  ;;  %v7266_v46 = vrot.slane %v7264_v40, 2 }
 0x229   : > { %v5389_v35 = vpop.f32.mrf.mxu0  ;;  %v5087_v12 = vpop.f32.mrf.mxu1  ;;  %v7253_v60 = vsel %vm21747_vm5, %v7243_v28, %v7252_v13  ;;  %v7269_v36 = vrot.slane %v7267_v50, 3  ;;  %v7278_v5 = vrot.slane %v7276_v21, 3 }
 0x22a   : > { %v17511_v41 = vadd.f32 %v5389_v35, %v5200_v2  ;;  %v5204_v24 = vadd.f32 %v5087_v12, %v17260_v0  ;;  %v15386_v0 = vld [vmem:[%s15543_s19 + $0x28] sm:$0xff]   ;;  %v7261_v58 = vor.u32 %v7260_v9, %v7257_v54  ;;  %v15387_v35 = vld [vmem:[%s15543_s19 + $0x30] sm:$0xff]   ;;  %v7285_v12 = vshll.u32 %v17286_v49, 16  ;;  %v15388_v9 = vld [vmem:[%s15543_s19 + $0x38] sm:$0xff]  }
 0x22b   : > { %v14380_v43 = vpop.f32.mrf.mxu0  ;;  %14555 = vmatmul.mubr.msk.bf16.gmra.mxu0 %vm21764_vm0, %v6929_v4  ;;  %v14346_v25 = vpop.f32.mrf.mxu1  ;;  %14561 = vmatmul.mubr.msk.bf16.vlgmr.msra.gmra.mxu1 %vm21764_vm0, %v7235_v26  ;;  %v7666_v30 = vrot.slane %v15386_v0, 3  ;;  %v7668_v26 = vrot.slane %v15387_v35, 3 }
 0x22c   : > { %v17516_v42 = vadd.f32 %v14380_v43, %v5205_v31  ;;  %14598 = vmatprep.mubr.msk.bf16.mxu0 %vm21764_vm0, %v7663_v39  ;;  %v5209_v38 = vadd.f32 %v14346_v25, %v17269_v34  ;;  %14635 = vmatpush3.bf16.msra.mxu1 %v17230_v17  ;;  %v7273_v31 = vshrl.u32 %v17264_v52, 16  ;;  %v7282_v39 = vshrl.u32 %v17286_v49, 16 }
 0x22d   : > { %v5402_v2 = vpop.f32.mrf.mxu0  ;;  %14564 = vmatprep.mubr.msk.bf16.mxu1 %vm21764_vm0, %v7244_v20  ;;  %v5100_v51 = vpop.f32.mrf.mxu1 }
 0x22e   : > { %v17527_v15 = vadd.f32 %v5402_v2, %v5203_v61  ;;  %v5207_v34 = vadd.f32 %v5100_v51, %v17280_v7  ;;  %v7667_v61 = vsel %vm21748_vm6, %v7664_v59, %v7666_v30  ;;  %v7262_v7 = vsel %vm21747_vm5, %v7252_v13, %v7261_v58  ;;  %v22019_v2 = vld [vmem:[#allocation6_spill] sm:$0xff] }
 0x22f   : > { %v14381_v17 = vpop.f32.mrf.mxu0  ;;  %v14347_v16 = vpop.f32.mrf.mxu1  ;;  %v7275_v44 = vrot.slane %v7273_v31, 2  ;;  %v7291_v59 = vshrl.u32 %v22018_v6, 16  ;;  %v7284_v51 = vrot.slane %v7282_v39, 2  ;;  %v7287_v31 = vrot.slane %v7285_v12, 3  ;;  %v22020_v12 = vld [vmem:[#allocation13_spill] sm:$0xff] }
 0x230   : > { %v17532_v33 = vadd.f32 %v14381_v17, %v5206_v63  ;;  %v5210_v47 = vadd.f32 %v14347_v16, %v17288_v18 }
 0x231   : > { %v5405_v56 = vpop.f32.mrf.mxu0  ;;  %v5103_v4 = vpop.f32.mrf.mxu1  ;;  %v7279_v13 = vor.u32 %v7278_v5, %v7275_v44 }
 0x232   : > { %v17538_v52 = vadd.f32 %v5405_v56, %v5204_v24  ;;  %v5208_v28 = vadd.f32 %v5103_v4, %v17293_v22  ;;  %v7270_v22 = vor.u32 %v7269_v36, %v7266_v46  ;;  %v7670_v24 = vrot.slane %v15388_v9, 3  ;;  %v15389_v4 = vld [vmem:[%s15543_s19 + $0x40] sm:$0xff]  }
 0x233   : > { %v14384_v63 = vpop.f32.mrf.mxu0  ;;  %14599 = vmatmul.mubr.msk.bf16.vlgmr.msra.gmra.mxu0 %vm21764_vm0, %v7665_v29  ;;  %v14350_v18 = vpop.f32.mrf.mxu1  ;;  %14565 = vmatmul.mubr.msk.bf16.gmra.mxu1 %vm21764_vm0, %v7253_v60 }
 0x234   : > { %v17543_v10 = vadd.f32 %v14384_v63, %v5209_v38  ;;  %14602 = vmatprep.mubr.msk.bf16.mxu0 %vm21764_vm0, %v7667_v61  ;;  %v5213_v20 = vadd.f32 %v14350_v18, %v17302_v19  ;;  %14568 = vmatprep.mubr.msk.bf16.mxu1 %vm21764_vm0, %v7262_v7  ;;  %v7294_v38 = vshll.u32 %v22018_v6, 16  ;;  %v7669_v19 = vsel %vm21748_vm6, %v7666_v30, %v7668_v26 }
 0x235   : > { %v5418_v54 = vpop.f32.mrf.mxu0  ;;  %v5116_v43 = vpop.f32.mrf.mxu1  ;;  %v7671_v16 = vsel %vm21748_vm6, %v7668_v26, %v7670_v24  ;;  %v7280_v56 = vsel %vm21747_vm5, %v7270_v22, %v7279_v13  ;;  %v7672_v7 = vrot.slane %v15389_v4, 3  ;;  %v7300_v63 = vshrl.u32 %v17318_v53, 16 }
 0x236   : > { %v17553_v25 = vadd.f32 %v5418_v54, %v5207_v34  ;;  %v5211_v0 = vadd.f32 %v5116_v43, %v22019_v2  ;;  %v7271_v34 = vsel %vm21747_vm5, %v7261_v58, %v7270_v22  ;;  %v7296_v61 = vrot.slane %v7294_v38, 3  ;;  %v22021_v22 = vld [vmem:[#allocation5_spill] sm:$0xff] }
 0x237   : > { %v14385_v40 = vpop.f32.mrf.mxu0  ;;  %v14351_v49 = vpop.f32.mrf.mxu1  ;;  %v7288_v58 = vor.u32 %v7287_v31, %v7284_v51  ;;  %v7303_v18 = vshll.u32 %v17318_v53, 16  ;;  %v7312_v54 = vshll.u32 %v22020_v12, 16  ;;  %v7673_v38 = vsel %vm21748_vm6, %v7670_v24, %v7672_v7 }
 0x238   : > { %v17558_v50 = vadd.f32 %v14385_v40, %v5210_v47  ;;  %v5214_v21 = vadd.f32 %v14351_v49, %v17320_v8  ;;  %v7293_v47 = vrot.slane %v7291_v59, 2  ;;  %v7302_v40 = vrot.slane %v7300_v63, 2 }
 0x239   : > { %v5421_v17 = vpop.f32.mrf.mxu0  ;;  %v5119_v60 = vpop.f32.mrf.mxu1  ;;  %v7289_v59 = vsel %vm21747_vm5, %v7279_v13, %v7288_v58  ;;  %v7305_v49 = vrot.slane %v7303_v18, 3  ;;  %v22025_v18 = vld [vmem:[#allocation9_spill] sm:$0xff] }
 0x23a   : > { %v17564_v29 = vadd.f32 %v5421_v17, %v5208_v28  ;;  %v5212_v30 = vadd.f32 %v5119_v60, %v17325_v62  ;;  %v15390_v28 = vld [vmem:[%s15543_s19 + $0x48] sm:$0xff]   ;;  %v7297_v39 = vor.u32 %v7296_v61, %v7293_v47  ;;  %v15391_v60 = vld [vmem:[%s15543_s19 + $0x50] sm:$0xff]  }
 0x23b   : > { %v14388_v46 = vpop.f32.mrf.mxu0  ;;  %14603 = vmatmul.mubr.msk.bf16.gmra.mxu0 %vm21764_vm0, %v7669_v19  ;;  %v14354_v8 = vpop.f32.mrf.mxu1  ;;  %14569 = vmatmul.mubr.msk.bf16.gmra.mxu1 %vm21764_vm0, %v7271_v34  ;;  %v7674_v62 = vrot.slane %v15390_v28, 3  ;;  %v22022_v34 = vld [vmem:[#allocation7_spill] sm:$0xff]  ;;  %v22023_v47 = vld [vmem:[#allocation14_spill] sm:$0xff]  ;;  %v7306_v4 = vor.u32 %v7305_v49, %v7302_v40 }
 0x23c   : > { %v17569_v36 = vadd.f32 %v14388_v46, %v5213_v20  ;;  %14606 = vmatprep.mubr.msk.bf16.mxu0 %vm21764_vm0, %v7671_v16  ;;  %v5217_v44 = vadd.f32 %v14354_v8, %v17334_v23  ;;  %14572 = vmatprep.mubr.msk.bf16.mxu1 %vm21764_vm0, %v7280_v56  ;;  %v7309_v20 = vshrl.u32 %v22020_v12, 16  ;;  %v7298_v31 = vsel %vm21747_vm5, %v7288_v58, %v7297_v39  ;;  %v22024_v46 = vld [vmem:[#allocation31_spill] sm:$0xff] }
 0x23d   : > { %v5434_v5 = vpop.f32.mrf.mxu0  ;;  %v5132_v35 = vpop.f32.mrf.mxu1  ;;  %v7676_v56 = vrot.slane %v15391_v60, 3  ;;  %v7318_v61 = vshrl.u32 %v22023_v47, 16  ;;  %v7330_v12 = vshll.u32 %v22025_v18, 16 }
 0x23e   : > { %v17579_v26 = vadd.f32 %v5434_v5, %v5211_v0  ;;  %v5215_v9 = vadd.f32 %v5132_v35, %v22021_v22  ;;  %v7675_v0 = vsel %vm21748_vm6, %v7672_v7, %v7674_v62  ;;  %v7311_v17 = vrot.slane %v7309_v20, 2  ;;  %v15392_v7 = vld [vmem:[%s15543_s19 + $0x58] sm:$0xff]   ;;  %v22026_v20 = vld [vmem:[#allocation10_spill] sm:$0xff] }
 0x23f   : > { %v14389_v23 = vpop.f32.mrf.mxu0  ;;  %v14355_v43 = vpop.f32.mrf.mxu1  ;;  %v7678_v5 = vrot.slane %v15392_v7, 3  ;;  %v7327_v35 = vshrl.u32 %v22025_v18, 16  ;;  %v22030_v7 = vld [vmem:[#allocation11_spill] sm:$0xff] }
 0x240   : > { %v17584_v6 = vadd.f32 %v14389_v23, %v5214_v21  ;;  %v5218_v53 = vadd.f32 %v14355_v43, %v17352_v48  ;;  %v7314_v21 = vrot.slane %v7312_v54, 3  ;;  %v7339_v18 = vshll.u32 %v22030_v7, 16 }
 0x241   : > { %v5437_v2 = vpop.f32.mrf.mxu0  ;;  %v5135_v19 = vpop.f32.mrf.mxu1 }
 0x242   : > { %v17590_v51 = vadd.f32 %v5437_v2, %v5212_v30  ;;  %v5216_v13 = vadd.f32 %v5135_v19, %v22022_v34  ;;  %v7321_v30 = vshll.u32 %v22023_v47, 16  ;;  %v7315_v63 = vor.u32 %v7314_v21, %v7311_v17 }
 0x243   : > { %v14392_v16 = vpop.f32.mrf.mxu0  ;;  %14607 = vmatmul.mubr.msk.bf16.gmra.mxu0 %vm21764_vm0, %v7673_v38  ;;  %v14358_v48 = vpop.f32.mrf.mxu1  ;;  %14573 = vmatmul.mubr.msk.bf16.gmra.mxu1 %vm21764_vm0, %v7289_v59  ;;  %v7677_v59 = vsel %vm21748_vm6, %v7674_v62, %v7676_v56  ;;  %v7320_v38 = vrot.slane %v7318_v61, 2  ;;  %v7679_v19 = vsel %vm21748_vm6, %v7676_v56, %v7678_v5  ;;  %v7332_v34 = vrot.slane %v7330_v12, 3  ;;  %v22029_v61 = vld [vmem:[#allocation20_spill] sm:$0xff] }
 0x244   : > { %v17595_v24 = vadd.f32 %v14392_v16, %v5217_v44  ;;  %14610 = vmatprep.mubr.msk.bf16.mxu0 %vm21764_vm0, %v7675_v0  ;;  %v5221_v8 = vadd.f32 %v14358_v48, %v22024_v46  ;;  %14576 = vmatprep.mubr.msk.bf16.mxu1 %vm21764_vm0, %v7298_v31  ;;  %v7323_v2 = vrot.slane %v7321_v30, 3  ;;  %v22027_v0 = vld [vmem:[#allocation16_spill] sm:$0xff]  ;;  %v7316_v21 = vsel %vm21747_vm5, %v7306_v4, %v7315_v63  ;;  %v22028_v16 = vld [vmem:[#allocation17_spill] sm:$0xff] }
 0x245   : > { %v5450_v58 = vpop.f32.mrf.mxu0  ;;  %v5148_v44 = vpop.f32.mrf.mxu1 }
 0x246   : > { %v17605_v28 = vadd.f32 %v5450_v58, %v5215_v9  ;;  %v5219_v54 = vadd.f32 %v5148_v44, %v22026_v20  ;;  %v7307_v9 = vsel %vm21747_vm5, %v7297_v39, %v7306_v4  ;;  %v7324_v39 = vor.u32 %v7323_v2, %v7320_v38  ;;  %v15394_v58 = vld [vmem:[%s15543_s19 + $0x68] sm:$0xff]  }
 0x247   : > { %v14393_v22 = vpop.f32.mrf.mxu0  ;;  %v14359_v23 = vpop.f32.mrf.mxu1  ;;  %v7682_v4 = vrot.slane %v15394_v58, 3  ;;  %v7336_v44 = vshrl.u32 %v22030_v7, 16  ;;  %v22031_v20 = vld [vmem:[#allocation18_spill] sm:$0xff] }
 0x248   : > { %v17610_v43 = vadd.f32 %v14393_v22, %v5218_v53  ;;  %v5222_v40 = vadd.f32 %v14359_v23, %v22027_v0  ;;  %v7329_v53 = vrot.slane %v7327_v35, 2  ;;  %v7345_v22 = vshrl.u32 %v22031_v20, 16 }
 0x249   : > { %v5453_v49 = vpop.f32.mrf.mxu0  ;;  %v5151_v31 = vpop.f32.mrf.mxu1  ;;  %v7348_v23 = vshll.u32 %v22031_v20, 16 }
 0x24a   : > { %v17616_v17 = vadd.f32 %v5453_v49, %v5216_v13  ;;  %v5220_v62 = vadd.f32 %v5151_v31, %v22028_v16  ;;  %v15393_v13 = vld [vmem:[%s15543_s19 + $0x60] sm:$0xff]   ;;  %v7333_v12 = vor.u32 %v7332_v34, %v7329_v53  ;;  %v22033_v31 = vld [vmem:[#allocation15_spill] sm:$0xff]  ;;  %v7338_v53 = vrot.slane %v7336_v44, 2 }
 0x24b   : > { %v14396_v48 = vpop.f32.mrf.mxu0  ;;  %14611 = vmatmul.mubr.msk.bf16.gmra.mxu0 %vm21764_vm0, %v7677_v59  ;;  %v14362_v60 = vpop.f32.mrf.mxu1  ;;  %14577 = vmatmul.mubr.msk.bf16.gmra.mxu1 %vm21764_vm0, %v7307_v9  ;;  %v7680_v56 = vrot.slane %v15393_v13, 3  ;;  %v22032_v59 = vld [vmem:[#allocation12_spill] sm:$0xff]  ;;  %v7325_v9 = vsel %vm21747_vm5, %v7315_v63, %v7324_v39  ;;  %v7341_v34 = vrot.slane %v7339_v18, 3  ;;  %v22035_v44 = vld [vmem:[#allocation19_spill] sm:$0xff] }
 0x24c   : > { %v17621_v47 = vadd.f32 %v14396_v48, %v5221_v8  ;;  %14614 = vmatprep.mubr.msk.bf16.mxu0 %vm21764_vm0, %v7679_v19  ;;  %v5225_v30 = vadd.f32 %v14362_v60, %v22029_v61  ;;  %14580 = vmatprep.mubr.msk.bf16.mxu1 %vm21764_vm0, %v7316_v21  ;;  %v7334_v13 = vsel %vm21747_vm5, %v7324_v39, %v7333_v12  ;;  %v7347_v61 = vrot.slane %v7345_v22, 2 }
 0x24d   : > { %v5466_v46 = vpop.f32.mrf.mxu0  ;;  %v5164_v8 = vpop.f32.mrf.mxu1  ;;  %v7681_v19 = vsel %vm21748_vm6, %v7678_v5, %v7680_v56  ;;  %v7354_v18 = vshrl.u32 %v22035_v44, 16  ;;  %v7357_v39 = vshll.u32 %v22035_v44, 16 }
 0x24e   : > { %v17631_v35 = vadd.f32 %v5466_v46, %v5219_v54  ;;  %v5223_v38 = vadd.f32 %v5164_v8, %v22032_v59  ;;  %v7683_v54 = vsel %vm21748_vm6, %v7680_v56, %v7682_v4  ;;  %v22034_v46 = vld [vmem:[#allocation24_spill] sm:$0xff]  ;;  %v22036_v8 = vld [vmem:[#allocation23_spill] sm:$0xff] }
 0x24f   : > { %v14397_v2 = vpop.f32.mrf.mxu0  ;;  %v14363_v0 = vpop.f32.mrf.mxu1  ;;  %v15395_v56 = vld [vmem:[%s15543_s19 + $0x70] sm:$0xff]   ;;  %v15396_v59 = vld [vmem:[%s15543_s19 + $0x78] sm:$0xff]  }
 0x250   : > { %v17636_v49 = vadd.f32 %v14397_v2, %v5222_v40  ;;  %v5226_v21 = vadd.f32 %v14363_v0, %v22033_v31  ;;  %v7350_v40 = vrot.slane %v7348_v23, 3  ;;  %v7342_v23 = vor.u32 %v7341_v34, %v7338_v53 }
 0x251   : > { %v5469_v16 = vpop.f32.mrf.mxu0  ;;  %v5167_v48 = vpop.f32.mrf.mxu1  ;;  %v7686_v2 = vrot.slane %v15396_v59, 3  ;;  %v7356_v53 = vrot.slane %v7354_v18, 2  ;;  %v7359_v34 = vrot.slane %v7357_v39, 3 }
 0x252   : > { %v17642_v60 = vadd.f32 %v5469_v16, %v5220_v62  ;;  %v5224_v63 = vadd.f32 %v5167_v48, %v22034_v46  ;;  %v7684_v62 = vrot.slane %v15395_v56, 3 }
 0x253   : > { %v14400_v58 = vpop.f32.mrf.mxu0  ;;  %14615 = vmatmul.mubr.msk.bf16.gmra.mxu0 %vm21764_vm0, %v7681_v19  ;;  %v14366_v5 = vpop.f32.mrf.mxu1  ;;  %14581 = vmatmul.mubr.msk.bf16.gmra.mxu1 %vm21764_vm0, %v7325_v9  ;;  %v7351_v9 = vor.u32 %v7350_v40, %v7347_v61  ;;  %v22037_v19 = vld [vmem:[#allocation21_spill] sm:$0xff] }
 0x254   : > { %v17647_v7 = vadd.f32 %v14400_v58, %v5225_v30  ;;  %14618 = vmatprep.mubr.msk.bf16.mxu0 %vm21764_vm0, %v7683_v54  ;;  %v5229_v20 = vadd.f32 %v14366_v5, %v22036_v8  ;;  %14584 = vmatprep.mubr.msk.bf16.mxu1 %vm21764_vm0, %v7334_v13  ;;  %v7363_v31 = vshrl.u32 %v22037_v19, 16  ;;  %v7366_v16 = vshll.u32 %v22037_v19, 16  ;;  %v22038_v54 = vld [vmem:[#allocation22_spill] sm:$0xff]  ;;  %v17669_v40 = vld [vmem:[%s15503_s12 + $0xa0] ss:$0 sps:$4 sm:$0x77]  }
 0x255   : > { %v5482_v22 = vpop.f32.mrf.mxu0  ;;  %v5180_v30 = vpop.f32.mrf.mxu1  ;;  %v7685_v13 = vsel %vm21748_vm6, %v7682_v4, %v7684_v62  ;;  %v7687_v61 = vsel %vm21748_vm6, %v7684_v62, %v7686_v2  ;;  %v15397_v62 = vld [vmem:[%s15543_s19 + $0x80] sm:$0xff]  }
 0x256   : > { %v17657_v0 = vadd.f32 %v5482_v22, %v5223_v38  ;;  %v5227_v48 = vadd.f32 %v5180_v30, %v22038_v54  ;;  %v7343_v38 = vsel %vm21747_vm5, %v7333_v12, %v7342_v23  ;;  %v7365_v59 = vrot.slane %v7363_v31, 2 }
 0x257   : > { %v14401_v46 = vpop.f32.mrf.mxu0  ;;  %v14367_v58 = vpop.f32.mrf.mxu1  ;;  %v7368_v4 = vrot.slane %v7366_v16, 3  ;;  %v7372_v16 = vshrl.u32 %v17669_v40, 16 }
 0x258   : > { %v17662_v5 = vadd.f32 %v14401_v46, %v5226_v21  ;;  %v5230_v56 = vadd.f32 %v14367_v58, %v17454_v14  ;;  %v7352_v21 = vsel %vm21747_vm5, %v7342_v23, %v7351_v9  ;;  %v7688_v23 = vrot.slane %v15397_v62, 3 }
 0x259   : > { %v5485_v44 = vpop.f32.mrf.mxu0  ;;  %v5183_v8 = vpop.f32.mrf.mxu1  ;;  %v7369_v58 = vor.u32 %v7368_v4, %v7365_v59 }
 0x25a   : > { %v17671_v22 = vadd.f32 %v5485_v44, %v5224_v63  ;;  %v17675_v18 = vadd.f32 %v5183_v8, %v17459_v11  ;;  %v7360_v63 = vor.u32 %v7359_v34, %v7356_v53  ;;  %v15398_v11 = vld [vmem:[%s15543_s19 + $0x88] sm:$0xff]   ;;  %v7971_v34 = vld [vmem:[%s15503_s12 + $0x10] sm:$0x8] }
 0x25b   : > { %v14404_v14 = vpop.f32.mrf.mxu0  ;;  %14619 = vmatmul.mubr.msk.bf16.gmra.mxu0 %vm21764_vm0, %v7685_v13  ;;  %v14410_v39 = vpop.f32.mrf.mxu1  ;;  %14585 = vmatmul.mubr.msk.bf16.gmra.mxu1 %vm21764_vm0, %v7343_v38  ;;  %v7690_v31 = vrot.slane %v15398_v11, 3 }
 0x25c   : > { %v17678_v12 = vadd.f32 %v14404_v14, %v5229_v20  ;;  %14622 = vmatprep.mubr.msk.bf16.mxu0 %vm21764_vm0, %v7687_v61  ;;  %v5832_v30 = vadd.f32 %v14410_v39, %v17465_v3  ;;  %14588 = vmatprep.mubr.msk.bf16.mxu1 %vm21764_vm0, %v7352_v21  ;;  %v7375_v20 = vshll.u32 %v17669_v40, 16  ;;  %v7361_v38 = vsel %vm21747_vm5, %v7351_v9, %v7360_v63 }
 0x25d   : > { %v5498_v19 = vpop.f32.mrf.mxu0  ;;  %v5687_v46 = vpop.f32.mrf.mxu1  ;;  %v7689_v61 = vsel %vm21748_vm6, %v7686_v2, %v7688_v23  ;;  %v7374_v14 = vrot.slane %v7372_v16, 2  ;;  %v15401_v16 = vld [vmem:[%s15543_s19 + $0x98] sm:$0xff]  }
 0x25e   : > { %v17688_v54 = vadd.f32 %v5498_v19, %v5227_v48  ;;  %v5830_v13 = vadd.f32 %v5687_v46, %v17475_v32  ;;  %v7691_v48 = vsel %vm21748_vm6, %v7688_v23, %v7690_v31  ;;  %v7377_v59 = vrot.slane %v7375_v20, 3  ;;  %v15400_v23 = vld [vmem:[%s15543_s19 + $0x90] sm:$0xff]  }
 0x25f   : > { %v14405_v53 = vpop.f32.mrf.mxu0  ;;  %v14411_v3 = vpop.f32.mrf.mxu1  ;;  %v7370_v32 = vsel %vm21747_vm5, %v7360_v63, %v7369_v58  ;;  %v7692_v19 = vrot.slane %v15400_v23, 3  ;;  %v7694_v20 = vrot.slane %v15401_v16, 3  ;;  %v15403_v23 = vld [vmem:[%s15503_s12 + $0x20] sm:$0xff]  }
 0x260   : > { %v17692_v44 = vadd.f32 %v14405_v53, %v5230_v56  ;;  %v5833_v8 = vadd.f32 %v14411_v3, %v17481_v27  ;;  %v15399_v56 = vld [vmem:[%s15503_s12 + $0x14] sm:$0xf] }
 0x261   : > { %v17697_v21 = vpop.f32.mrf.mxu0  ;;  %v5690_v4 = vpop.f32.mrf.mxu1  ;;  %v13130_v39 = vcombine.low %v7971_v34, %v15399_v56 }
 0x262   : > { %v17703_v62 = vadd.f32 %v5690_v4, %v17486_v45  ;;  %v7378_v45 = vor.u32 %v7377_v59, %v7374_v14 }
 0x263   : > { %v14448_v9 = vpop.f32.mrf.mxu0  ;;  %14623 = vmatmul.mubr.msk.bf16.gmra.mxu0 %vm21764_vm0, %v7689_v61  ;;  %v14414_v27 = vpop.f32.mrf.mxu1  ;;  %14589 = vmatmul.mubr.msk.bf16.gmra.mxu1 %vm21764_vm0, %v7361_v38  ;;  %v7978_v34 = vrot.slane %v13130_v39, 3 }
 0x264   : > { %v17706_v2 = vadd.f32 %v14448_v9, %v5832_v30  ;;  %14626 = vmatprep.mubr.msk.bf16.mxu0 %vm21764_vm0, %v7691_v48  ;;  %v5836_v63 = vadd.f32 %v14414_v27, %v17491_v37  ;;  %14592 = vmatprep.mubr.msk.bf16.mxu1 %vm21764_vm0, %v7370_v32  ;;  %v15402_v30 = vld [vmem:[%s15503_s12 + $0x18] sm:$0xff]   ;;  %v7693_v37 = vsel %vm21748_vm6, %v7690_v31, %v7692_v19 }
 0x265   : > { %v6130_v11 = vpop.f32.mrf.mxu0  ;;  %v5703_v46 = vpop.f32.mrf.mxu1  ;;  %v7979_v3 = vrot.slane %v15402_v30, 3  ;;  %v7379_v14 = vsel %vm21747_vm5, %v7369_v58, %v7378_v45  ;;  %v15404_v45 = vld [vmem:[%s15503_s12 + $0x28] sm:$0xff]  }
 0x266   : > { %v17714_v53 = vadd.f32 %v6130_v11, %v5830_v13  ;;  %v5834_v38 = vadd.f32 %v5703_v46, %v17500_v55  ;;  %v7695_v13 = vsel %vm21748_vm6, %v7692_v19, %v7694_v20  ;;  %v7983_v16 = vrot.slane %v15404_v45, 3 }
 0x267   : > { %v14449_v61 = vpop.f32.mrf.mxu0  ;;  %v14415_v48 = vpop.f32.mrf.mxu1  ;;  %v7980_v39 = vsel %vm21748_vm6, %v7978_v34, %v7979_v3 }
 0x268   : > { %v17718_v4 = vadd.f32 %v14449_v61, %v5833_v8  ;;  %v5837_v56 = vadd.f32 %v14415_v48, %v17505_v1  ;;  %v7696_v1 = vrot.slane %v17452_v57, 3 }
 0x269   : > { %v17722_v32 = vpop.f32.mrf.mxu0  ;;  %v5706_v59 = vpop.f32.mrf.mxu1 }
 0x26a   : > { %v17728_v55 = vadd.f32 %v5706_v59, %v17511_v41  ;;  %v7981_v41 = vrot.slane %v15403_v23, 3  ;;  %v7697_v57 = vsel %vm21748_vm6, %v7694_v20, %v7696_v1 }
 0x26b   : > { %v14452_v8 = vpop.f32.mrf.mxu0  ;;  %14627 = vmatmul.mubr.msk.bf16.gmra.mxu0 %vm21764_vm0, %v7693_v37  ;;  %v14418_v31 = vpop.f32.mrf.mxu1  ;;  %14593 = vmatmul.mubr.msk.bf16.gmra.mxu1 %vm21764_vm0, %v7379_v14 }
 0x26c   : > { %v17731_v9 = vadd.f32 %v14452_v8, %v5836_v63  ;;  %14630 = vmatprep.mubr.msk.bf16.mxu0 %vm21764_vm0, %v7695_v13  ;;  %v5840_v58 = vadd.f32 %v14418_v31, %v17516_v42  ;;  %14636 = vmatprep.mubr.msk.bf16.mxu1 %vm21764_vm0, %v7980_v39  ;;  %v7982_v48 = vsel %vm21748_vm6, %v7979_v3, %v7981_v41  ;;  %v15405_v3 = vld [vmem:[%s15503_s12 + $0x30] sm:$0xff]  }
 0x26d   : > { %v6146_v27 = vpop.f32.mrf.mxu0  ;;  %v5719_v19 = vpop.f32.mrf.mxu1  ;;  %v7984_v37 = vsel %vm21748_vm6, %v7981_v41, %v7983_v16  ;;  %v7985_v59 = vrot.slane %v15405_v3, 3 }
 0x26e   : > { %v17739_v11 = vadd.f32 %v6146_v27, %v5834_v38  ;;  %v5838_v63 = vadd.f32 %v5719_v19, %v17527_v15 }
 0x26f   : > { %v14453_v46 = vpop.f32.mrf.mxu0  ;;  %v14419_v34 = vpop.f32.mrf.mxu1  ;;  %v7986_v19 = vsel %vm21748_vm6, %v7983_v16, %v7985_v59 }
 0x270   : > { %v17743_v30 = vadd.f32 %v14453_v46, %v5837_v56  ;;  %v5841_v42 = vadd.f32 %v14419_v34, %v17532_v33 }
 0x271   : > { %v17747_v61 = vpop.f32.mrf.mxu0  ;;  %v5722_v38 = vpop.f32.mrf.mxu1 }
 0x272   : > { %v17752_v14 = vadd.f32 %v5722_v38, %v17538_v52  ;;  %v15406_v52 = vld [vmem:[%s15503_s12 + $0x38] sm:$0xff]  }
 0x273   : > { %v14456_v15 = vpop.f32.mrf.mxu0  ;;  %14631 = vmatmul.mubr.msk.bf16.gmra.mxu0 %vm21764_vm0, %v7697_v57  ;;  %v14422_v56 = vpop.f32.mrf.mxu1  ;;  %14637 = vmatmul.mubr.msk.bf16.vlgmr.msra.gmra.mxu1 %vm21764_vm0, %v7982_v48  ;;  %v7987_v31 = vrot.slane %v15406_v52, 3  ;;  %v15407_v48 = vld [vmem:[%s15503_s12 + $0x40] sm:$0xff]  }
 0x274   : > { %v17755_v13 = vadd.f32 %v14456_v15, %v5840_v58  ;;  %v5844_v33 = vadd.f32 %v14422_v56, %v17543_v10  ;;  %14640 = vmatprep.mubr.msk.bf16.mxu1 %vm21764_vm0, %v7984_v37  ;;  %v7989_v38 = vrot.slane %v15407_v48, 3  ;;  %v15408_v15 = vld [vmem:[%s15503_s12 + $0x48] sm:$0xff]  }
 0x275   : > { %v6162_v20 = vpop.f32.mrf.mxu0  ;;  %v5735_v39 = vpop.f32.mrf.mxu1  ;;  %v7991_v56 = vrot.slane %v15408_v15, 3 }
 0x276   : > { %v17761_v8 = vadd.f32 %v6162_v20, %v5838_v63  ;;  %v5842_v1 = vadd.f32 %v5735_v39, %v17553_v25  ;;  %v7988_v63 = vsel %vm21748_vm6, %v7985_v59, %v7987_v31  ;;  %v7990_v39 = vsel %vm21748_vm6, %v7987_v31, %v7989_v38 }
 0x277   : > { %v14457_v27 = vpop.f32.mrf.mxu0  ;;  %v14423_v58 = vpop.f32.mrf.mxu1 }
 0x278   : > { %v17765_v23 = vadd.f32 %v14457_v27, %v5841_v42  ;;  %v5845_v41 = vadd.f32 %v14423_v58, %v17558_v50 }
 0x279   : > { %v17768_v10 = vpop.f32.mrf.mxu0  ;;  %v5738_v45 = vpop.f32.mrf.mxu1 }
 0x27a   : > { %v17773_v46 = vadd.f32 %v5738_v45, %v17564_v29  ;;  %v15409_v45 = vld [vmem:[%s15503_s12 + $0x50] sm:$0xff]  }
 0x27b   : > { %v14460_v34 = vpop.f32.mrf.mxu0  ;;  %v14426_v25 = vpop.f32.mrf.mxu1  ;;  %14641 = vmatmul.mubr.msk.bf16.gmra.mxu1 %vm21764_vm0, %v7986_v19 }
 0x27c   : > { %v17775_v57 = vadd.f32 %v14460_v34, %v5844_v33  ;;  %v5848_v42 = vadd.f32 %v14426_v25, %v17569_v36  ;;  %14644 = vmatprep.mubr.msk.bf16.mxu1 %vm21764_vm0, %v7988_v63  ;;  %v7993_v63 = vrot.slane %v15409_v45, 3  ;;  %v15410_v25 = vld [vmem:[%s15503_s12 + $0x58] sm:$0xff]  }
 0x27d   : > { %v6178_v50 = vpop.f32.mrf.mxu0  ;;  %v5751_v16 = vpop.f32.mrf.mxu1 }
 0x27e   : > { %v17781_v37 = vadd.f32 %v6178_v50, %v5842_v1  ;;  %v5846_v29 = vadd.f32 %v5751_v16, %v17579_v26  ;;  %v7992_v1 = vsel %vm21748_vm6, %v7989_v38, %v7991_v56  ;;  %v7995_v50 = vrot.slane %v15410_v25, 3 }
 0x27f   : > { %v14461_v20 = vpop.f32.mrf.mxu0  ;;  %v14427_v33 = vpop.f32.mrf.mxu1  ;;  %v7994_v15 = vsel %vm21748_vm6, %v7991_v56, %v7993_v63 }
 0x280   : > { %v17785_v3 = vadd.f32 %v14461_v20, %v5845_v41  ;;  %v5849_v59 = vadd.f32 %v14427_v33, %v17584_v6 }
 0x281   : > { %v17788_v36 = vpop.f32.mrf.mxu0  ;;  %v5754_v52 = vpop.f32.mrf.mxu1 }
 0x282   : > { %v17793_v27 = vadd.f32 %v5754_v52, %v17590_v51 }
 0x283   : > { %v14464_v58 = vpop.f32.mrf.mxu0  ;;  %v14430_v26 = vpop.f32.mrf.mxu1  ;;  %14645 = vmatmul.mubr.msk.bf16.gmra.mxu1 %vm21764_vm0, %v7990_v39 }
 0x284   : > { %v17795_v19 = vadd.f32 %v14464_v58, %v5848_v42  ;;  %v5852_v41 = vadd.f32 %v14430_v26, %v17595_v24  ;;  %14648 = vmatprep.mubr.msk.bf16.mxu1 %vm21764_vm0, %v7992_v1  ;;  %v15411_v1 = vld [vmem:[%s15503_s12 + $0x60] sm:$0xff]  }
 0x285   : > { %v6194_v6 = vpop.f32.mrf.mxu0  ;;  %v5767_v31 = vpop.f32.mrf.mxu1  ;;  %v7997_v58 = vrot.slane %v15411_v1, 3  ;;  %v15414_v1 = vld [vmem:[%s15503_s12 + $0x78] sm:$0xff]  }
 0x286   : > { %v17801_v34 = vadd.f32 %v6194_v6, %v5846_v29  ;;  %v5850_v51 = vadd.f32 %v5767_v31, %v17605_v28  ;;  %v7996_v29 = vsel %vm21748_vm6, %v7993_v63, %v7995_v50  ;;  %v15412_v6 = vld [vmem:[%s15503_s12 + $0x68] sm:$0xff]  }
 0x287   : > { %v14465_v48 = vpop.f32.mrf.mxu0  ;;  %v14431_v42 = vpop.f32.mrf.mxu1  ;;  %v7999_v45 = vrot.slane %v15412_v6, 3 }
 0x288   : > { %v17805_v38 = vadd.f32 %v14465_v48, %v5849_v59  ;;  %v5853_v16 = vadd.f32 %v14431_v42, %v17610_v43  ;;  %v7998_v48 = vsel %vm21748_vm6, %v7995_v50, %v7997_v58 }
 0x289   : > { %v17808_v24 = vpop.f32.mrf.mxu0  ;;  %v5770_v20 = vpop.f32.mrf.mxu1 }
 0x28a   : > { %v17813_v33 = vadd.f32 %v5770_v20, %v17616_v17 }
 0x28b   : > { %v14468_v39 = vpop.f32.mrf.mxu0  ;;  %v14434_v28 = vpop.f32.mrf.mxu1  ;;  %14649 = vmatmul.mubr.msk.bf16.gmra.mxu1 %vm21764_vm0, %v7994_v15 }
 0x28c   : > { %v17815_v52 = vadd.f32 %v14468_v39, %v5852_v41  ;;  %v5856_v59 = vadd.f32 %v14434_v28, %v17621_v47  ;;  %14652 = vmatprep.mubr.msk.bf16.mxu1 %vm21764_vm0, %v7996_v29  ;;  %v15413_v39 = vld [vmem:[%s15503_s12 + $0x70] sm:$0xff]  }
 0x28d   : > { %v6210_v43 = vpop.f32.mrf.mxu0  ;;  %v5783_v56 = vpop.f32.mrf.mxu1  ;;  %v8001_v28 = vrot.slane %v15413_v39, 3 }
 0x28e   : > { %v17821_v26 = vadd.f32 %v6210_v43, %v5850_v51  ;;  %v5854_v17 = vadd.f32 %v5783_v56, %v17631_v35  ;;  %v8000_v51 = vsel %vm21748_vm6, %v7997_v58, %v7999_v45  ;;  %v15277_v35 = vld [vmem:[%s21678_s5 + $0x8] sm:$0xff]   ;;  %v8003_v58 = vrot.slane %v15414_v1, 3 }
 0x28f   : > { %v14469_v63 = vpop.f32.mrf.mxu0  ;;  %v14435_v31 = vpop.f32.mrf.mxu1  ;;  %14672 = vmatprep.subr.bf16.mxu0 %v15277_v35 }
 0x290   : > { %v17825_v41 = vadd.f32 %v14469_v63, %v5853_v16  ;;  %v5857_v25 = vadd.f32 %v14435_v31, %v17636_v49  ;;  %14673 = vmatpush3.bf16.msra.mxu0 %v15277_v35 }
 0x291   : > { %v17828_v47 = vpop.f32.mrf.mxu0  ;;  %v5786_v42 = vpop.f32.mrf.mxu1 }
 0x292   : > { %v17833_v15 = vadd.f32 %v5786_v42, %v17642_v60 }
 0x293   : > { %v14472_v20 = vpop.f32.mrf.mxu0  ;;  %v14438_v16 = vpop.f32.mrf.mxu1  ;;  %14653 = vmatmul.mubr.msk.bf16.gmra.mxu1 %vm21764_vm0, %v7998_v48  ;;  %v8002_v48 = vsel %vm21748_vm6, %v7999_v45, %v8001_v28 }
 0x294   : > { %v17838_v29 = vadd.f32 %v14472_v20, %v5856_v59  ;;  %v5860_v49 = vadd.f32 %v14438_v16, %v17647_v7  ;;  %14656 = vmatprep.mubr.msk.bf16.mxu1 %vm21764_vm0, %v8000_v51  ;;  %v15415_v16 = vld [vmem:[%s15503_s12 + $0x80] sm:$0xff]  }
 0x295   : > { %v6226_v50 = vpop.f32.mrf.mxu0  ;;  %v5799_v60 = vpop.f32.mrf.mxu1 }
 0x296   : > { %v17844_v43 = vadd.f32 %v6226_v50, %v5854_v17  ;;  %v5858_v56 = vadd.f32 %v5799_v60, %v17657_v0  ;;  %v8004_v17 = vsel %vm21748_vm6, %v8001_v28, %v8003_v58  ;;  %v8005_v50 = vrot.slane %v15415_v16, 3  ;;  %v15416_v28 = vld [vmem:[%s15503_s12 + $0x88] sm:$0xff]  }
 0x297   : > { %v14473_v59 = vpop.f32.mrf.mxu0  ;;  %v14439_v6 = vpop.f32.mrf.mxu1  ;;  %v8007_v60 = vrot.slane %v15416_v28, 3 }
 0x298   : > { %v17848_v63 = vadd.f32 %v14473_v59, %v5857_v25  ;;  %v5861_v7 = vadd.f32 %v14439_v6, %v17662_v5 }
 0x299   : > { %v17851_v31 = vpop.f32.mrf.mxu0  ;;  %v5802_v42 = vpop.f32.mrf.mxu1 }
 0x29a   : > { %v17856_v51 = vadd.f32 %v5802_v42, %v17671_v22 }
 0x29b   : > { %v14476_v20 = vpop.f32.mrf.mxu0  ;;  %v14442_v0 = vpop.f32.mrf.mxu1  ;;  %14657 = vmatmul.mubr.msk.bf16.gmra.mxu1 %vm21764_vm0, %v8002_v48  ;;  %v8006_v48 = vsel %vm21748_vm6, %v8003_v58, %v8005_v50 }
 0x29c   : > { %v17858_v35 = vadd.f32 %v14476_v20, %v5860_v49  ;;  %v5864_v25 = vadd.f32 %v14442_v0, %v17678_v12  ;;  %14660 = vmatprep.mubr.msk.bf16.mxu1 %vm21764_vm0, %v8004_v17 }
 0x29d   : > { %v6242_v5 = vpop.f32.mrf.mxu0  ;;  %v5815_v45 = vpop.f32.mrf.mxu1 }
 0x29e   : > { %v17864_v39 = vadd.f32 %v6242_v5, %v5858_v56  ;;  %v5862_v22 = vadd.f32 %v5815_v45, %v17688_v54  ;;  %v8008_v56 = vsel %vm21748_vm6, %v8005_v50, %v8007_v60  ;;  %v15418_v45 = vld [vmem:[%s15503_s12 + $0x98] sm:$0xff]  }
 0x29f   : > { %v14477_v1 = vpop.f32.mrf.mxu0  ;;  %v14443_v49 = vpop.f32.mrf.mxu1  ;;  %v8011_v28 = vrot.slane %v15418_v45, 3 }
 0x2a0   : > { %v17868_v59 = vadd.f32 %v14477_v1, %v5861_v7  ;;  %v5865_v6 = vadd.f32 %v14443_v49, %v17692_v44  ;;  %v15417_v44 = vld [vmem:[%s15503_s12 + $0x90] sm:$0xff]  }
 0x2a1   : > { %v17871_v12 = vpop.f32.mrf.mxu0  ;;  %v17874_v42 = vpop.f32.mrf.mxu1  ;;  %v8009_v5 = vrot.slane %v15417_v44, 3 }
 0x2a3   : > { %v14480_v17 = vpop.f32.mrf.mxu0  ;;  %v14486_v54 = vpop.f32.mrf.mxu1  ;;  %14661 = vmatmul.mubr.msk.bf16.gmra.mxu1 %vm21764_vm0, %v8006_v48 }
 0x2a4   : > { %v17877_v20 = vadd.f32 %v14480_v17, %v5864_v25  ;;  %v6718_v7 = vadd.f32 %v14486_v54, %v17706_v2  ;;  %14664 = vmatprep.mubr.msk.bf16.mxu1 %vm21764_vm0, %v8008_v56  ;;  %v8010_v2 = vsel %vm21748_vm6, %v8007_v60, %v8009_v5  ;;  %v320_v56 = vlaneseq }
 0x2a5   : > { %v6258_v0 = vpop.f32.mrf.mxu0  ;;  %v6573_v58 = vpop.f32.mrf.mxu1 }
 0x2a6   : > { %v17883_v16 = vadd.f32 %v6258_v0, %v5862_v22  ;;  %v6716_v50 = vadd.f32 %v6573_v58, %v17714_v53  ;;  %v8012_v22 = vsel %vm21748_vm6, %v8009_v5, %v8011_v28  ;;  %v17902_v58 = vshrl.u32 %v320_v56, 7 }
 0x2a7   : > { %v14481_v1 = vpop.f32.mrf.mxu0  ;;  %v14487_v49 = vpop.f32.mrf.mxu1 }
 0x2a8   : > { %22039 = vst [vmem:[#allocation25_spill] sm:$0xff] %v17883_v16  ;;  %v17887_v25 = vadd.f32 %v14481_v1, %v5865_v6  ;;  %v6719_v48 = vadd.f32 %v14487_v49, %v17718_v4  ;;  %v8013_v4 = vrot.slane %v17669_v40, 3 }
 0x2a9   : > { %v17890_v17 = vpop.f32.mrf.mxu0  ;;  %v17893_v54 = vpop.f32.mrf.mxu1 }
 0x2aa   : > { %22040 = vst [vmem:[#allocation26_spill] sm:$0xff] %v17887_v25 }
 0x2ab   : > { %v14524_v0 = vpop.f32.mrf.mxu0  ;;  %v14490_v44 = vpop.f32.mrf.mxu1  ;;  %14665 = vmatmul.mubr.msk.bf16.gmra.mxu1 %vm21764_vm0, %v8010_v2 }
 0x2ac   : > { %v17896_v45 = vadd.f32 %v14524_v0, %v6718_v7  ;;  %v6722_v53 = vadd.f32 %v14490_v44, %v17731_v9  ;;  %14668 = vmatprep.mubr.msk.bf16.mxu1 %vm21764_vm0, %v8012_v22  ;;  %v8014_v9 = vsel %vm21748_vm6, %v8011_v28, %v8013_v4  ;;  %v17914_v22 = vadd.s32 16, %v17902_v58 }
 0x2ad   : > { %v7024_v6 = vpop.f32.mrf.mxu0  ;;  %v6589_v60 = vpop.f32.mrf.mxu1  ;;  %v17927_v28 = vadd.s32 24, %v17902_v58 }
 0x2ae   : > { %22041 = vst [vmem:[#allocation28_spill] sm:$0xff] %v17896_v45  ;;  %v17904_v1 = vadd.f32 %v7024_v6, %v6716_v50  ;;  %v6720_v5 = vadd.f32 %v6589_v60, %v17739_v11 }
 0x2af   : > { %v14525_v49 = vpop.f32.mrf.mxu0  ;;  %v14491_v25 = vpop.f32.mrf.mxu1 }
 0x2b0   : > { %22042 = vst [vmem:[#allocation27_spill] sm:$0xff] %v17904_v1  ;;  %v17907_v7 = vadd.f32 %v14525_v49, %v6719_v48  ;;  %v6723_v2 = vadd.f32 %v14491_v25, %v17743_v30  ;;  %v17923_v30 = vmul.u32.u64.low 3817748708, %v17914_v22  ;;  %v17924_v25 = vmul.u32.u64.high 3817748708, %v17914_v22, %v17923_v30 }
 0x2b1   : > { %v17910_v0 = vpop.f32.mrf.mxu0  ;;  %v17916_v40 = vpop.f32.mrf.mxu1  ;;  %v17932_v60 = vmul.u32.u64.low 3817748708, %v17902_v58  ;;  %v17933_v49 = vmul.u32.u64.high 3817748708, %v17902_v58, %v17932_v60 }
 0x2b2   : > { %22043 = vst [vmem:[#allocation8_spill] sm:$0xff] %v17907_v7  ;;  %v17942_v30 = vmul.u32.u64.low 3817748708, %v17927_v28  ;;  %v17943_v7 = vmul.u32.u64.high 3817748708, %v17927_v28, %v17942_v30  ;;  %v17948_v60 = vadd.s32 8, %v17902_v58 }
 0x2b3   : > { %v14528_v56 = vpop.f32.mrf.mxu0  ;;  %v14494_v50 = vpop.f32.mrf.mxu1  ;;  %14669 = vmatmul.mubr.msk.bf16.gmra.mxu1 %vm21764_vm0, %v8014_v9  ;;  %v385_v30 = vshrl.u32 %v17924_v25, 4 }
 0x2b4   : > { %v17918_v44 = vadd.f32 %v14528_v56, %v6722_v53  ;;  %v6726_v11 = vadd.f32 %v14494_v50, %v17755_v13  ;;  %v17966_v45 = vmul.u32.u64.low 3817748708, %v17948_v60  ;;  %v17967_v16 = vmul.u32.u64.high 3817748708, %v17948_v60, %v17966_v45 }
 0x2b5   : > { %v7040_v48 = vpop.f32.mrf.mxu0  ;;  %v6605_v6 = vpop.f32.mrf.mxu1  ;;  %v17983_v45 = vadd.s32 32, %v17902_v58 }
 0x2b6   : > { %22044 = vst [vmem:[#allocation30_spill] sm:$0xff] %v17918_v44  ;;  %v17929_v4 = vadd.f32 %v7040_v48, %v6720_v5  ;;  %v6724_v53 = vadd.f32 %v6605_v6, %v17761_v8 }
 0x2b7   : > { %v14529_v9 = vpop.f32.mrf.mxu0  ;;  %v14495_v56 = vpop.f32.mrf.mxu1 }
 0x2b8   : > { %22045 = vst [vmem:[#allocation29_spill] sm:$0xff] %v17929_v4  ;;  %v17936_v13 = vadd.f32 %v14529_v9, %v6723_v2  ;;  %v6727_v50 = vadd.f32 %v14495_v56, %v17765_v23  ;;  %v22048_v23 = vmov 0  ;;  %v306_v2 = vld [vmem:[#allocation2 + $0x8] sm:$0x3] }
 0x2b9   : > { %v17939_v44 = vpop.f32.mrf.mxu0  ;;  %v17945_v5 = vpop.f32.mrf.mxu1  ;;  %v22049_v23 = vsel %vm17953_vm9, 4294967295, %v22048_v23 }
 0x2ba   : > { %22046 = vst [vmem:[#allocation3_spill] sm:$0xff] %v17936_v13  ;;  %22050 = vst [vmem:[#allocation6_spill] sm:$0xff] %v22049_v23  ;;  %v307_v13 = vsel %vm17953_vm9, 0, %v306_v2 }
 0x2bb   : > { %v14532_v48 = vpop.f32.mrf.mxu0  ;;  %v14498_v8 = vpop.f32.mrf.mxu1  ;;  %308 = vst [vmem:[#allocation2 + $0x8] sm:$0x3] %v307_v13  ;;  %v386_v13 = vmul.u32 18, %v385_v30  ;;  %v312_v30 = vld [vmem:[#allocation2 + $0x98] sm:$0xe] }
 0x2bc   : > { %v17950_v6 = vadd.f32 %v14532_v48, %v6726_v11  ;;  %v6730_v9 = vadd.f32 %v14498_v8, %v17775_v57  ;;  %v363_v11 = vshrl.u32 %v17933_v49, 4  ;;  %v17970_v57 = vadd.s32 48, %v17902_v58 }
 0x2bd   : > { %v7056_v56 = vpop.f32.mrf.mxu0  ;;  %v6621_v4 = vpop.f32.mrf.mxu1  ;;  %v396_v49 = vshrl.u32 %v17943_v7, 4  ;;  %v17995_v7 = vadd.f32 %v17747_v61, %v17728_v55  ;;  %v18005_v23 = vsub.s32 %v17914_v22, %v386_v13 }
 0x2be   : > { %22047 = vst [vmem:[#allocation4_spill] sm:$0xff] %v17950_v6  ;;  %v17961_v1 = vadd.f32 %v7056_v56, %v6724_v53  ;;  %v6728_v48 = vadd.f32 %v6621_v4, %v17781_v37  ;;  %v5546_v37 = vadd.f32 %v17697_v21, %v17675_v18  ;;  %v17987_v56 = vadd.f32 %v17722_v32, %v17703_v62 }
 0x2bf   : > { %v14533_v6 = vpop.f32.mrf.mxu0  ;;  %v14499_v25 = vpop.f32.mrf.mxu1  ;;  %v18001_v62 = vadd.f32 %v17768_v10, %v17752_v14  ;;  %22051 = vst [vmem:[#allocation13_spill] sm:$0xff] %v18005_v23  ;;  %v397_v55 = vmul.u32 18, %v396_v49  ;;  %v18016_v14 = vmul.u32.u64.low 3817748708, %v17983_v45  ;;  %v18017_v10 = vmul.u32.u64.high 3817748708, %v17983_v45, %v18016_v14 }
 0x2c0   : > { %v17972_v8 = vadd.f32 %v14533_v6, %v6727_v50  ;;  %v6731_v2 = vadd.f32 %v14499_v25, %v17785_v3  ;;  %v364_v6 = vmul.u32 18, %v363_v11  ;;  %vm755_vm13 = vcmp.ne.s32.totalorder %v18005_v23, 0 }
 0x2c1   : > { %v17975_v53 = vpop.f32.mrf.mxu0  ;;  %v17980_v4 = vpop.f32.mrf.mxu1  ;;  %v17990_v3 = vmul.u32.u64.low 3817748708, %v17970_v57  ;;  %v17991_v25 = vmul.u32.u64.high 3817748708, %v17970_v57, %v17990_v3  ;;  %vm791_vm14 = vcmp.lt.s32.totalorder %v18005_v23, 0 }
 0x2c2   : > { %v22052_v3 = vmov 0  ;;  %v18025_v49 = vsub.s32 %v17902_v58, %v364_v6  ;;  %vm18086_vm5 = vmand %vm791_vm14, %vm755_vm13 }
 0x2c3   : > { %v14536_v50 = vpop.f32.mrf.mxu0  ;;  %v14502_v18 = vpop.f32.mrf.mxu1  ;;  %v22053_v3 = vsel %vm18007_vm12, 4294967295, %v22052_v3 }
 0x2c4   : > { %v17997_v21 = vadd.f32 %v14536_v50, %v6730_v9  ;;  %v6734_v32 = vadd.f32 %v14502_v18, %v17795_v19  ;;  %22054 = vst [vmem:[#allocation5_spill] sm:$0xff] %v22053_v3  ;;  %v313_v50 = vsel %vm18007_vm12, 0, %v312_v30  ;;  %v18021_v19 = vadd.f32 %v17788_v36, %v17773_v46  ;;  %22056 = vst [vmem:[#allocation14_spill] sm:$0xff] %v18025_v49 }
 0x2c5   : > { %v7072_v11 = vpop.f32.mrf.mxu0  ;;  %v6637_v61 = vpop.f32.mrf.mxu1  ;;  %314 = vst [vmem:[#allocation2 + $0x98] sm:$0xe] %v313_v50  ;;  %v18030_v18 = vadd.f32 %v17808_v24, %v17793_v27  ;;  %v18034_v30 = vadd.f32 %v17828_v47, %v17813_v33  ;;  %v18039_v36 = vadd.s32 56, %v17902_v58  ;;  %v18050_v24 = vsub.s32 %v17927_v28, %v397_v55 }
 0x2c6   : > { %v18011_v9 = vadd.f32 %v7072_v11, %v6728_v48  ;;  %v6732_v22 = vadd.f32 %v6637_v61, %v17801_v34  ;;  %v374_v48 = vshrl.u32 %v17967_v16, 4  ;;  %v18043_v34 = vadd.f32 %v17851_v31, %v17833_v15 }
 0x2c7   : > { %v14537_v13 = vpop.f32.mrf.mxu0  ;;  %v14503_v11 = vpop.f32.mrf.mxu1  ;;  %v5863_v16 = vadd.f32 %v17874_v42, %v5546_v37  ;;  %22058 = vst [vmem:[#allocation9_spill] sm:$0xff] %v18050_v24  ;;  %v18057_v47 = vadd.s32 18, %v18005_v23  ;;  %v18060_v15 = vadd.s32 40, %v17902_v58  ;;  %vm753_vm15 = vcmp.ne.s32.totalorder %v18025_v49, 0 }
 0x2c8   : > { %22055 = vst [vmem:[#allocation7_spill] sm:$0xff] %v18011_v9  ;;  %v18036_v46 = vadd.f32 %v14537_v13, %v6731_v2  ;;  %v6735_v6 = vadd.f32 %v14503_v11, %v17805_v38  ;;  %vm789_vm7 = vcmp.lt.s32.totalorder %v18025_v49, 0  ;;  %v375_v38 = vmul.u32 18, %v374_v48 }
 0x2c9   : > { %v18047_v27 = vpop.f32.mrf.mxu0  ;;  %v18052_v33 = vpop.f32.mrf.mxu1  ;;  %22059 = vst [vmem:[#allocation10_spill] sm:$0xff] %v18057_v47  ;;  %v18065_v42 = vadd.s32 80, %v17902_v58  ;;  %v429_v37 = vshrl.u32 %v17991_v25, 4  ;;  %v18071_v55 = vmul.u32.u64.low 3817748708, %v18039_v36  ;;  %v18072_v61 = vmul.u32.u64.high 3817748708, %v18039_v36, %v18071_v55  ;;  %vm18100_vm6 = vmand %vm789_vm7, %vm753_vm15 }
 0x2ca   : > { %22057 = vst [vmem:[#allocation31_spill] sm:$0xff] %v18036_v46  ;;  %v18076_v13 = vadd.s32 18, %v18025_v49  ;;  %vm756_vm10 = vcmp.ne.s32.totalorder %v18050_v24, 0  ;;  %vm792_vm11 = vcmp.lt.s32.totalorder %v18050_v24, 0  ;;  %v22063_v25 = vmov 0 }
 0x2cb   : > { %v14540_v31 = vpop.f32.mrf.mxu0  ;;  %v14506_v28 = vpop.f32.mrf.mxu1  ;;  %v22064_v25 = vsel %vm18086_vm5, 4294967295, %v22063_v25  ;;  %vm18117_vm13 = vmand %vm792_vm11, %vm756_vm10  ;;  %v430_v46 = vmul.u32 18, %v429_v37  ;;  %v18126_v9 = vadd.f32 %v17871_v12, %v17856_v51 }
 0x2cc   : > { %v18067_v2 = vadd.f32 %v14540_v31, %v6734_v32  ;;  %v6738_v50 = vadd.f32 %v14506_v28, %v17815_v52  ;;  %22061 = vst [vmem:[#allocation17_spill] sm:$0xff] %v18076_v13  ;;  %22065 = vst [vmem:[#allocation11_spill] sm:$0xff] %v22064_v25  ;;  %v407_v52 = vshrl.u32 %v18017_v10, 4 }
 0x2cd   : > { %v7088_v14 = vpop.f32.mrf.mxu0  ;;  %v6653_v48 = vpop.f32.mrf.mxu1  ;;  %v18092_v32 = vmul.u32.u64.low 3817748708, %v18060_v15  ;;  %v18093_v31 = vmul.u32.u64.high 3817748708, %v18060_v15, %v18092_v32  ;;  %v18108_v10 = vmul.u32.u64.low 3817748708, %v18065_v42  ;;  %v18109_v3 = vmul.u32.u64.high 3817748708, %v18065_v42, %v18108_v10 }
 0x2ce   : > { %22060 = vst [vmem:[#allocation16_spill] sm:$0xff] %v18067_v2  ;;  %v18080_v11 = vadd.f32 %v7088_v14, %v6732_v22  ;;  %v6736_v28 = vadd.f32 %v6653_v48, %v17821_v26  ;;  %v22066_v22 = vmov 0  ;;  %v18105_v14 = vadd.s32 18, %v18050_v24 }
 0x2cf   : > { %v14541_v55 = vpop.f32.mrf.mxu0  ;;  %v22067_v22 = vsel %vm18100_vm6, 4294967295, %v22066_v22  ;;  %v6717_v32 = vadd.f32 %v17893_v54, %v17987_v56  ;;  %v14507_v26 = vpop.f32.mrf.mxu1  ;;  %v18122_v2 = vsub.s32 %v17948_v60, %v375_v38  ;;  %v6721_v54 = vadd.f32 %v17916_v40, %v17995_v7 }
 0x2d0   : > { %22062 = vst [vmem:[#allocation20_spill] sm:$0xff] %v18080_v11  ;;  %22068 = vst [vmem:[#allocation18_spill] sm:$0xff] %v22067_v22  ;;  %v18113_v48 = vadd.f32 %v14541_v55, %v6735_v6  ;;  %v22070_v11 = vmov 0  ;;  %v6739_v56 = vadd.f32 %v14507_v26, %v17825_v41  ;;  %v18134_v55 = vadd.s32 64, %v17902_v58 }
 0x2d1   : > { %22069 = vst [vmem:[#allocation12_spill] sm:$0xff] %v18105_v14  ;;  %v22071_v11 = vsel %vm18117_vm13, 4294967295, %v22070_v11  ;;  %22073 = vst [vmem:[#allocation24_spill] sm:$0xff] %v18122_v2  ;;  %v18131_v6 = vpop.f32.mrf.mxu0  ;;  %v18137_v10 = vadd.f32 %v17890_v17, %v5863_v16  ;;  %v18140_v60 = vadd.f32 %v17910_v0, %v6717_v32  ;;  %v18142_v38 = vpop.f32.mrf.mxu1  ;;  %v408_v12 = vmul.u32 18, %v407_v52 }
 0x2d2   : > { %22072 = vst [vmem:[#allocation15_spill] sm:$0xff] %v22071_v11  ;;  %v6725_v41 = vadd.f32 %v17945_v5, %v18001_v62  ;;  %v18151_v40 = vadd.f32 %v17939_v44, %v6721_v54  ;;  %vm754_vm14 = vcmp.ne.s32.totalorder %v18122_v2, 0  ;;  %v18165_v5 = vsub.s32 %v17970_v57, %v430_v46 }
 0x2d3   : > { %v14544_v7 = vpop.f32.mrf.mxu0  ;;  %v14510_v16 = vpop.f32.mrf.mxu1  ;;  %v440_v44 = vshrl.u32 %v18072_v61, 4  ;;  %v18170_v32 = vmul.u32.u64.low 3817748708, %v18134_v55  ;;  %v18171_v26 = vmul.u32.u64.high 3817748708, %v18134_v55, %v18170_v32  ;;  %v18174_v54 = vadd.s32 88, %v17902_v58 }
 0x2d4   : > { %v18161_v37 = vadd.f32 %v14544_v7, %v6738_v50  ;;  %22074 = vst [vmem:[#allocation19_spill] sm:$0xff] %v18165_v5  ;;  %v6742_v62 = vadd.f32 %v14510_v16, %v17838_v29  ;;  %vm790_vm15 = vcmp.lt.s32.totalorder %v18122_v2, 0  ;;  %v18180_v57 = vsub.s32 %v17983_v45, %v408_v12 }
 0x2d5   : > { %v7104_v52 = vpop.f32.mrf.mxu0  ;;  %v6669_v0 = vpop.f32.mrf.mxu1  ;;  %v418_v46 = vshrl.u32 %v18093_v31, 4  ;;  %v18184_v29 = vadd.f32 %v17975_v53, %v6725_v41  ;;  %v473_v16 = vshrl.u32 %v18109_v3, 4  ;;  %v18189_v32 = vadd.s32 72, %v17902_v58  ;;  %vm18216_vm4 = vmand %vm790_vm15, %vm754_vm14 }
 0x2d6   : > { %v18176_v50 = vadd.f32 %v7104_v52, %v6736_v28  ;;  %22075 = vst [vmem:[#allocation23_spill] sm:$0xff] %v18180_v57  ;;  %v6740_v61 = vadd.f32 %v6669_v0, %v17844_v43  ;;  %vm759_vm7 = vcmp.ne.s32.totalorder %v18165_v5, 0  ;;  %vm795_vm10 = vcmp.lt.s32.totalorder %v18165_v5, 0 }
 0x2d7   : > { %v14545_v7 = vpop.f32.mrf.mxu0  ;;  %v14511_v28 = vpop.f32.mrf.mxu1  ;;  %v441_v45 = vmul.u32 18, %v440_v44  ;;  %v18199_v43 = vmul.u32.u64.low 3817748708, %v18174_v54  ;;  %v18200_v12 = vmul.u32.u64.high 3817748708, %v18174_v54, %v18199_v43  ;;  %v18203_v3 = vadd.s32 112, %v17902_v58  ;;  %vm18235_vm14 = vmand %vm795_vm10, %vm759_vm7 }
 0x2d8   : > { %v18191_v52 = vadd.f32 %v14545_v7, %v6739_v56  ;;  %v6743_v31 = vadd.f32 %v14511_v28, %v17848_v63  ;;  %v18208_v56 = vadd.s32 18, %v18122_v2  ;;  %vm757_vm11 = vcmp.ne.s32.totalorder %v18180_v57, 0 }
 0x2d9   : > { %v18196_v53 = vpop.f32.mrf.mxu0  ;;  %v18205_v41 = vpop.f32.mrf.mxu1  ;;  %vm793_vm3 = vcmp.lt.s32.totalorder %v18180_v57, 0  ;;  %v419_v0 = vmul.u32 18, %v418_v46  ;;  %v22077_v44 = vmov 0  ;;  %v18221_v7 = vadd.s32 18, %v18165_v5 }
 0x2da   : > { %22076 = vst [vmem:[#allocation21_spill] sm:$0xff] %v18208_v56  ;;  %v22078_v44 = vsel %vm18216_vm4, 4294967295, %v22077_v44  ;;  %v474_v28 = vmul.u32 18, %v473_v16  ;;  %v18224_v43 = vmul.u32.u64.low 3817748708, %v18189_v32  ;;  %v18225_v17 = vmul.u32.u64.high 3817748708, %v18189_v32, %v18224_v43  ;;  %vm18253_vm15 = vmand %vm793_vm3, %vm757_vm11 }
 0x2db   : > { %v14548_v63 = vpop.f32.mrf.mxu0  ;;  %22079 = vst [vmem:[#allocation22_spill] sm:$0xff] %v22078_v44  ;;  %22080 = vst [vmem:[#allocation32_spill] sm:$0xff] %v18221_v7  ;;  %v6729_v46 = vadd.f32 %v17980_v4, %v18021_v19  ;;  %v14514_v51 = vpop.f32.mrf.mxu1  ;;  %v22081_v14 = vmov 0  ;;  %v18240_v16 = vadd.s32 18, %v18180_v57  ;;  %v18243_v11 = vsub.s32 %v18039_v36, %v441_v45  ;;  %v15278_v4 = vld [vmem:[%s21678_s5] sm:$0xff]  }
 0x2dc   : > { %v18229_v24 = vadd.f32 %v14548_v63, %v6742_v62  ;;  %v22082_v14 = vsel %vm18235_vm14, 4294967295, %v22081_v14  ;;  %v6746_v19 = vadd.f32 %v14514_v51, %v17858_v35  ;;  %v22086_v63 = vmov 0  ;;  %14710 = vmatprep.subr.bf16.mxu1 %v15278_v4 }
 0x2dd   : > { %22083 = vst [vmem:[#allocation33_spill] sm:$0xff] %v22082_v14  ;;  %22084 = vst [vmem:[#allocation34_spill] sm:$0xff] %v18240_v16  ;;  %v7120_v62 = vpop.f32.mrf.mxu0  ;;  %v22087_v63 = vsel %vm18253_vm15, 4294967295, %v22086_v63  ;;  %v451_v43 = vshrl.u32 %v18171_v26, 4  ;;  %v18259_v36 = vmul.u32.u64.low 3817748708, %v18203_v3  ;;  %v18260_v45 = vmul.u32.u64.high 3817748708, %v18203_v3, %v18259_v36  ;;  %v6685_v49 = vpop.f32.mrf.mxu1  ;;  %14711 = vmatpush3.bf16.msra.mxu1 %v15278_v4 }
 0x2de   : > { %22085 = vst [vmem:[#allocation35_spill] sm:$0xff] %v18243_v11  ;;  %22088 = vst [vmem:[#allocation36_spill] sm:$0xff] %v22087_v63  ;;  %v18262_v13 = vadd.f32 %v7120_v62, %v6740_v61  ;;  %vm21780_vm7 = vcmask 125952   ;;  %v18269_v51 = vsub.s32 %v18060_v15, %v419_v0  ;;  %v18272_v22 = vadd.f32 %v18047_v27, %v6729_v46 }
 0x2df   : > { %v6744_v26 = vadd.f32 %v6685_v49, %v17864_v39  ;;  %v14549_v23 = vpop.f32.mrf.mxu0  ;;  %v18280_v62 = vsub.s32 %v18065_v42, %v474_v28  ;;  %v6733_v15 = vadd.f32 %v18052_v33, %v18030_v18  ;;  %v14515_v0 = vpop.f32.mrf.mxu1  ;;  %vm760_vm3 = vcmp.ne.s32.totalorder %v18243_v11, 0 }
 0x2e0   : > { %22089 = vst [vmem:[#allocation37_spill] sm:$0xff] %v18262_v13  ;;  %22090 = vst [vmem:[#allocation38_spill] sm:$0xff] %v18269_v51  ;;  %v18284_v36 = vadd.f32 %v14549_v23, %v6743_v31  ;;  %v6747_v49 = vadd.f32 %v14515_v0, %v17868_v59  ;;  %vm796_vm10 = vcmp.lt.s32.totalorder %v18243_v11, 0  ;;  %v452_v42 = vmul.u32 18, %v451_v43 }
 0x2e1   : > { %22091 = vst [vmem:[#allocation39_spill] sm:$0xff] %v18280_v62  ;;  %v18292_v27 = vpop.f32.mrf.mxu0  ;;  %v484_v28 = vshrl.u32 %v18200_v12, 4  ;;  %v18296_v18 = vpop.f32.mrf.mxu1  ;;  %v18299_v23 = vadd.s32 18, %v18243_v11  ;;  %vm758_vm11 = vcmp.ne.s32.totalorder %v18269_v51, 0  ;;  %vm794_vm2 = vcmp.lt.s32.totalorder %v18269_v51, 0  ;;  %vm18335_vm0 = vmand %vm796_vm10, %vm760_vm3 }
 0x2e2   : > { %22092 = vst [vmem:[#allocation40_spill] sm:$0xff] %v18284_v36  ;;  %v18304_v33 = vadd.s32 96, %v17902_v58  ;;  %v18307_v31 = vadd.s32 18, %v18269_v51  ;;  %vm763_vm1 = vcmp.ne.s32.totalorder %v18280_v62, 0  ;;  %v462_v12 = vshrl.u32 %v18225_v17, 4  ;;  %vm18357_vm3 = vmand %vm794_vm2, %vm758_vm11 }
 0x2e3   : > { %22093 = vst [vmem:[#allocation41_spill] sm:$0xff] %v18299_v23  ;;  %v14552_v59 = vpop.f32.mrf.mxu0  ;;  %v18312_v46 = vadd.s32 120, %v17902_v58  ;;  %v14518_v4 = vpop.f32.mrf.mxu1  ;;  %vm799_vm8 = vcmp.lt.s32.totalorder %v18280_v62, 0  ;;  %v18318_v0 = vadd.s32 104, %v17902_v58  ;;  %v18322_v35 = vsub.s32 %v18134_v55, %v452_v42 }
 0x2e4   : > { %22094 = vst [vmem:[#allocation42_spill] sm:$0xff] %v18307_v31  ;;  %v18314_v43 = vadd.f32 %v14552_v59, %v6746_v19  ;;  %v6750_v39 = vadd.f32 %v14518_v4, %v17877_v20  ;;  %v485_v57 = vmul.u32 18, %v484_v28  ;;  %v517_v17 = vshrl.u32 %v18260_v45, 4  ;;  %v22101_v28 = vld [vmem:[#allocation25_spill] sm:$0xff]  ;;  %vm18379_vm2 = vmand %vm799_vm8, %vm763_vm1  ;;  %v22118_v31 = vld [vmem:[#allocation27_spill] sm:$0xff] }
 0x2e5   : > { %v7136_v61 = vpop.f32.mrf.mxu0  ;;  %22096 = vst [vmem:[#allocation44_spill] sm:$0xff] %v18322_v35  ;;  %v15437_v16 = vmov 0   ;;  %v6701_v19 = vpop.f32.mrf.mxu1  ;;  %v22098_v20 = vmov 0  ;;  %v18340_v55 = vmul.u32.u64.low 3817748708, %v18304_v33  ;;  %v18341_v45 = vmul.u32.u64.high 3817748708, %v18304_v33, %v18340_v55 }
 0x2e6   : > { %22095 = vst [vmem:[#allocation43_spill] sm:$0xff] %v18314_v43  ;;  %301 = vst.msk [vmem:[#allocation2] sm:$0xf] %vm21780_vm7, %v15437_v16  ;;  %v18329_v59 = vadd.f32 %v7136_v61, %v6744_v26  ;;  %v22099_v20 = vsel %vm18335_vm0, 4294967295, %v22098_v20  ;;  %v18344_v42 = vadd.s32 144, %v17902_v58  ;;  %v463_v26 = vmul.u32 18, %v462_v12 }
 0x2e7   : > { %302 = vst.msk [vmem:[#allocation2 + $0x4] sm:$0xf] %vm21780_vm7, %v15437_v16  ;;  %315 = vst.msk [vmem:[#allocation2 + $0x9c] sm:$0xf] %vm21780_vm7, %v15437_v16  ;;  %v14553_v4 = vpop.f32.mrf.mxu0  ;;  %v18348_v61 = vmul.u32.u64.low 3817748708, %v18312_v46  ;;  %v18349_v63 = vmul.u32.u64.high 3817748708, %v18312_v46, %v18348_v61  ;;  %v14519_v5 = vpop.f32.mrf.mxu1  ;;  %v6737_v23 = vadd.f32 %v18142_v38, %v18034_v30 }
 0x2e8   : > { %316 = vst.msk [vmem:[#allocation2 + $0xa0] sm:$0xf] %vm21780_vm7, %v15437_v16  ;;  %22097 = vst [vmem:[#allocation45_spill] sm:$0xff] %v18329_v59  ;;  %v6748_v16 = vadd.f32 %v6701_v19, %v22101_v28  ;;  %v18351_v7 = vadd.f32 %v14553_v4, %v6747_v49  ;;  %v22103_v55 = vmov 0  ;;  %v18362_v14 = vadd.s32 18, %v18280_v62  ;;  %v22107_v28 = vld [vmem:[#allocation26_spill] sm:$0xff] }
 0x2e9   : > { %22100 = vst [vmem:[#allocation46_spill] sm:$0xff] %v22099_v20  ;;  %v22104_v55 = vsel %vm18357_vm3, 4294967295, %v22103_v55  ;;  %v18365_v12 = vmul.u32.u64.low 3817748708, %v18318_v0  ;;  %v18366_v19 = vmul.u32.u64.high 3817748708, %v18318_v0, %v18365_v12  ;;  %v6751_v61 = vadd.f32 %v14519_v5, %v22107_v28  ;;  %v18369_v2 = vpop.f32.mrf.mxu0  ;;  %v18389_v28 = vpop.f32.mrf.mxu1 }
 0x2ea   : > { %22102 = vst [vmem:[#allocation25_spill] sm:$0xff] %v18351_v7  ;;  %22105 = vst [vmem:[#allocation47_spill] sm:$0xff] %v22104_v55  ;;  %v22108_v4 = vmov 0  ;;  %v518_v56 = vmul.u32 18, %v517_v17  ;;  %v18384_v12 = vadd.s32 128, %v17902_v58  ;;  %v18387_v5 = vadd.f32 %v18131_v6, %v6733_v15  ;;  %v22115_v17 = vld [vmem:[#allocation28_spill] sm:$0xff] }
 0x2eb   : > { %22106 = vst [vmem:[#allocation48_spill] sm:$0xff] %v18362_v14  ;;  %v22109_v4 = vsel %vm18379_vm2, 4294967295, %v22108_v4  ;;  %v18392_v20 = vsub.s32 %v18174_v54, %v485_v57  ;;  %v18395_v49 = vmul.u32.u64.low 3817748708, %v18344_v42  ;;  %v18396_v11 = vmul.u32.u64.high 3817748708, %v18344_v42, %v18395_v49  ;;  %v14556_v44 = vpop.f32.mrf.mxu0  ;;  %v14562_v57 = vpop.f32.mrf.mxu1 }
 0x2ec   : > { %22110 = vst [vmem:[#allocation26_spill] sm:$0xff] %v22109_v4  ;;  %vm761_vm1 = vcmp.ne.s32.totalorder %v18322_v35, 0  ;;  %v18406_v6 = vsub.s32 %v18189_v32, %v463_v26  ;;  %v18408_v54 = vadd.f32 %v14556_v44, %v6750_v39  ;;  %v18416_v30 = vadd.s32 18, %v18322_v35 }
 0x2ed   : > { %22111 = vst [vmem:[#allocation49_spill] sm:$0xff] %v18392_v20  ;;  %v8950_v38 = vld [vmem:[#allocation2] sm:$0xf]  ;;  %v18419_v51 = vadd.f32 %v14562_v57, %v22115_v17  ;;  %v7152_v32 = vpop.f32.mrf.mxu0  ;;  %v18422_v44 = vsub.s32 %v18203_v3, %v518_v56  ;;  %v18425_v39 = vmul.u32.u64.low 3817748708, %v18384_v12  ;;  %v18426_v26 = vmul.u32.u64.high 3817748708, %v18384_v12, %v18425_v39  ;;  %v7474_v15 = vpop.f32.mrf.mxu1 }
 0x2ee   : > { %22112 = vst [vmem:[#allocation50_spill] sm:$0xff] %v18406_v6  ;;  %22113 = vst [vmem:[#allocation51_spill] sm:$0xff] %v18408_v54  ;;  %v8951_v49 = vld [vmem:[#allocation2 + $0x4] sm:$0xf]  ;;  %v18428_v4 = vadd.f32 %v7152_v32, %v6748_v16  ;;  %v495_v62 = vshrl.u32 %v18341_v45, 4  ;;  %v18435_v17 = vadd.f32 %v7474_v15, %v22118_v31  ;;  %v528_v3 = vshrl.u32 %v18349_v63, 4 }
 0x2ef   : > { %22114 = vst [vmem:[#allocation52_spill] sm:$0xff] %v18416_v30  ;;  %22116 = vst [vmem:[#allocation28_spill] sm:$0xff] %v18422_v44  ;;  %v18432_v14 = vcombine.low %v8950_v38, %v8951_v49  ;;  %v14557_v57 = vpop.f32.mrf.mxu0  ;;  %v14563_v16 = vpop.f32.mrf.mxu1  ;;  %v506_v32 = vshrl.u32 %v18366_v19, 4  ;;  %vm22120_vm10 = vcmask 130048   ;;  %v18447_v31 = vadd.s32 152, %v17902_v58  ;;  %v22121_v45 = vld [vmem:[#allocation8_spill] sm:$0xff] }
 0x2f0   : > { %22117 = vst [vmem:[#allocation53_spill] sm:$0xff] %v18428_v4  ;;  %v18440_v56 = vadd.f32 %v14557_v57, %v6751_v61  ;;  %v18450_v15 = vadd.f32 %v14563_v16, %v22121_v45  ;;  %vm22122_vm7 = vcmp.lt.s32.totalorder %v18322_v35, 0  ;;  %v22123_v63 = vmov 0  ;;  %v22144_v54 = vld [vmem:[#allocation30_spill] sm:$0xff] }
 0x2f1   : > { %14712 = vmatprep.mubr.msk.bf16.mxu1 %vm22120_vm10, %v18432_v14  ;;  %v18452_v38 = vpop.f32.mrf.mxu0  ;;  %vm18458_vm11 = vmand %vm22122_vm7, %vm761_vm1  ;;  %vm767_vm8 = vcmp.ne.s32.totalorder %v18422_v44, 0  ;;  %v18465_v19 = vadd.f32 %v18196_v53, %v6737_v23  ;;  %v18467_v61 = vpop.f32.mrf.mxu1  ;;  %vm22127_vm9 = vcmp.ne.s32.totalorder %v18392_v20, 0  ;;  %vm22128_vm12 = vcmp.lt.s32.totalorder %v18392_v20, 0 }
 0x2f2   : > { %22119 = vst [vmem:[#allocation27_spill] sm:$0xff] %v18440_v56  ;;  %v22124_v63 = vsel %vm18458_vm11, 4294967295, %v22123_v63  ;;  %vm18473_vm2 = vmand %vm22128_vm12, %vm22127_vm9  ;;  %v22129_v49 = vmov 0  ;;  %v18478_v39 = vadd.s32 18, %v18392_v20  ;;  %v496_v57 = vmul.u32 18, %v495_v62 }
 0x2f3   : > { %22125 = vst [vmem:[#allocation8_spill] sm:$0xff] %v22124_v63  ;;  %22126 = vst [vmem:[#allocation54_spill] sm:$0xff] %v18465_v19  ;;  %v22130_v49 = vsel %vm18473_vm2, 4294967295, %v22129_v49  ;;  %v561_v16 = vshrl.u32 %v18396_v11, 4  ;;  %v6741_v53 = vadd.f32 %v18205_v41, %v18043_v34  ;;  %v18483_v23 = vpop.f32.mrf.mxu0  ;;  %vm22133_vm7 = vcmp.ne.s32.totalorder %v18406_v6, 0  ;;  %v14566_v56 = vpop.f32.mrf.mxu1 }
 0x2f4   : > { %22131 = vst [vmem:[#allocation55_spill] sm:$0xff] %v22130_v49  ;;  %22132 = vst [vmem:[#allocation56_spill] sm:$0xff] %v18478_v39  ;;  %vm22134_vm1 = vcmp.lt.s32.totalorder %v18406_v6, 0  ;;  %v22135_v45 = vmov 0  ;;  %v18494_v55 = vadd.s32 18, %v18406_v6  ;;  %v18497_v62 = vadd.s32 18, %v18422_v44 }
 0x2f5   : > { %vm18489_vm10 = vmand %vm22134_vm1, %vm22133_vm7  ;;  %v529_v11 = vmul.u32 18, %v528_v3  ;;  %vm22140_vm9 = vcmp.lt.s32.totalorder %v18422_v44, 0  ;;  %v22141_v34 = vmov 0  ;;  %v507_v41 = vmul.u32 18, %v506_v32  ;;  %v18517_v3 = vpop.f32.mrf.mxu0  ;;  %v7490_v19 = vpop.f32.mrf.mxu1 }
 0x2f6   : > { %v22136_v45 = vsel %vm18489_vm10, 4294967295, %v22135_v45  ;;  %22138 = vst [vmem:[#allocation58_spill] sm:$0xff] %v18494_v55  ;;  %22139 = vst [vmem:[#allocation59_spill] sm:$0xff] %v18497_v62  ;;  %v18508_v47 = vmul.u32.u64.low 3817748708, %v18447_v31  ;;  %v18509_v25 = vmul.u32.u64.high 3817748708, %v18447_v31, %v18508_v47  ;;  %v18512_v4 = vadd.s32 136, %v17902_v58 }
 0x2f7   : > { %22137 = vst [vmem:[#allocation57_spill] sm:$0xff] %v22136_v45  ;;  %vm18503_vm12 = vmand %vm22140_vm9, %vm767_vm8  ;;  %v18515_v7 = vadd.f32 %v14566_v56, %v22144_v54  ;;  %v539_v43 = vshrl.u32 %v18426_v26, 4  ;;  %v18525_v32 = vadd.s32 176, %v17902_v58  ;;  %v18528_v47 = vadd.f32 %v18292_v27, %v6741_v53  ;;  %v22146_v26 = vld [vmem:[#allocation29_spill] sm:$0xff]  ;;  %v18542_v30 = vpop.f32.mrf.mxu0  ;;  %v22149_v53 = vld [vmem:[#allocation3_spill] sm:$0xff] }
 0x2f8   : > { %v22142_v34 = vsel %vm18503_vm12, 4294967295, %v22141_v34  ;;  %v18535_v56 = vsub.s32 %v18304_v33, %v496_v57  ;;  %v562_v36 = vmul.u32 18, %v561_v16  ;;  %v6745_v59 = vadd.f32 %v18296_v18, %v18126_v9  ;;  %v14567_v57 = vpop.f32.mrf.mxu1 }
 0x2f9   : > { %22143 = vst [vmem:[#allocation60_spill] sm:$0xff] %v22142_v34  ;;  %22145 = vst [vmem:[#allocation30_spill] sm:$0xff] %v18528_v47  ;;  %v18540_v35 = vadd.f32 %v7490_v19, %v22146_v26  ;;  %v18553_v16 = vsub.s32 %v18312_v46, %v529_v11  ;;  %v18556_v9 = vsub.s32 %v18318_v0, %v507_v41  ;;  %v18565_v27 = vpop.f32.mrf.mxu0  ;;  %v540_v54 = vmul.u32 18, %v539_v43 }
 0x2fa   : > { %v18559_v18 = vmul.u32.u64.low 3817748708, %v18512_v4  ;;  %v18560_v19 = vmul.u32.u64.high 3817748708, %v18512_v4, %v18559_v18  ;;  %v18563_v26 = vadd.f32 %v14567_v57, %v22149_v53  ;;  %v18572_v46 = vadd.f32 %v18369_v2, %v6745_v59  ;;  %v18574_v11 = vpop.f32.mrf.mxu1 }
 0x2fb   : > { %22147 = vst [vmem:[#allocation29_spill] sm:$0xff] %v18553_v16  ;;  %22148 = vst [vmem:[#allocation61_spill] sm:$0xff] %v18556_v9  ;;  %v18568_v34 = vmul.u32.u64.low 3817748708, %v18525_v32  ;;  %v18569_v33 = vmul.u32.u64.high 3817748708, %v18525_v32, %v18568_v34  ;;  %v18579_v0 = vsub.s32 %v18344_v42, %v562_v36  ;;  %v6749_v41 = vadd.f32 %v18389_v28, %v18137_v10  ;;  %v18583_v43 = vpop.f32.mrf.mxu0  ;;  %v22153_v42 = vld [vmem:[#allocation4_spill] sm:$0xff] }
 0x2fc   : > { %22150 = vst [vmem:[#allocation3_spill] sm:$0xff] %v18572_v46  ;;  %v18586_v57 = vadd.s32 18, %v18535_v56  ;;  %v572_v2 = vshrl.u32 %v18509_v25, 4  ;;  %v18590_v59 = vadd.s32 160, %v17902_v58  ;;  %v14570_v34 = vpop.f32.mrf.mxu1  ;;  %v18595_v36 = vadd.s32 18, %v18553_v16 }
 0x2fd   : > { %22151 = vst [vmem:[#allocation62_spill] sm:$0xff] %v18579_v0  ;;  %v18598_v10 = vadd.s32 184, %v17902_v58  ;;  %v18601_v28 = vadd.f32 %v14570_v34, %v22153_v42  ;;  %v18603_v18 = vpop.f32.mrf.mxu0  ;;  %v18608_v25 = vsub.s32 %v18384_v12, %v540_v54  ;;  %vm22155_vm9 = vcmp.ne.s32.totalorder %v18535_v56, 0 }
 0x2fe   : > { %22152 = vst [vmem:[#allocation63_spill] sm:$0xff] %v18595_v36  ;;  %v7506_v53 = vpop.f32.mrf.mxu1  ;;  %vm22156_vm1 = vcmp.lt.s32.totalorder %v18535_v56, 0  ;;  %v22157_v44 = vmov 0  ;;  %v18619_v34 = vadd.s32 18, %v18556_v9  ;;  %v18624_v42 = vadd.s32 18, %v18579_v0 }
 0x2ff   : > { %22154 = vst [vmem:[#allocation4_spill] sm:$0xff] %v18608_v25  ;;  %vm18614_vm12 = vmand %vm22156_vm1, %vm22155_vm9  ;;  %v18627_v12 = vadd.f32 %v7506_v53, %v17961_v1  ;;  %v18629_v54 = vpop.f32.mrf.mxu0  ;;  %vm22162_vm1 = vcmp.ne.s32.totalorder %v18553_v16, 0  ;;  %vm22163_vm9 = vcmp.lt.s32.totalorder %v18553_v16, 0  ;;  %v22164_v62 = vmov 0 }
 0x300   : > { %v22158_v44 = vsel %vm18614_vm12, 4294967295, %v22157_v44  ;;  %22160 = vst [vmem:[#allocation65_spill] sm:$0xff] %v18619_v34  ;;  %22161 = vst [vmem:[#allocation66_spill] sm:$0xff] %v18624_v42  ;;  %v573_v6 = vmul.u32 18, %v572_v2  ;;  %v18640_v55 = vmul.u32.u64.low 3817748708, %v18590_v59  ;;  %v18641_v45 = vmul.u32.u64.high 3817748708, %v18590_v59, %v18640_v55  ;;  %v14571_v20 = vpop.f32.mrf.mxu1 }
 0x301   : > { %22159 = vst [vmem:[#allocation64_spill] sm:$0xff] %v22158_v44  ;;  %vm18635_vm8 = vmand %vm22163_vm9, %vm22162_vm1  ;;  %vm22167_vm7 = vcmp.ne.s32.totalorder %v18556_v9, 0  ;;  %vm22168_vm10 = vcmp.lt.s32.totalorder %v18556_v9, 0  ;;  %v22169_v1 = vmov 0  ;;  %v550_v53 = vshrl.u32 %v18560_v19, 4  ;;  %v18662_v63 = vpop.f32.mrf.mxu0  ;;  %v15282_v19 = vld [vmem:[%s21678_s5 + $0x10] sm:$0xff]  }
 0x302   : > { %v22165_v62 = vsel %vm18635_vm8, 4294967295, %v22164_v62  ;;  %vm18647_vm2 = vmand %vm22168_vm10, %vm22167_vm7  ;;  %v18653_v39 = vmul.u32.u64.low 3817748708, %v18598_v10  ;;  %v18654_v49 = vmul.u32.u64.high 3817748708, %v18598_v10, %v18653_v39  ;;  %v18657_v2 = vadd.s32 168, %v17902_v58  ;;  %v18670_v47 = vpop.f32.mrf.mxu1  ;;  %14748 = vmatprep.subr.bf16.mxu0 %v15282_v19  ;;  %v22183_v34 = vld [vmem:[#allocation7_spill] sm:$0xff] }
 0x303   : > { %22166 = vst [vmem:[#allocation67_spill] sm:$0xff] %v22165_v62  ;;  %v22170_v1 = vsel %vm18647_vm2, 4294967295, %v22169_v1  ;;  %v18660_v55 = vadd.f32 %v14571_v20, %v17972_v8  ;;  %vm769_vm1 = vcmp.ne.s32.totalorder %v18608_v25, 0  ;;  %v605_v46 = vshrl.u32 %v18569_v33, 4  ;;  %v18695_v62 = vpop.f32.mrf.mxu0 }
 0x304   : > { %22171 = vst [vmem:[#allocation68_spill] sm:$0xff] %v22170_v1  ;;  %vm22172_vm7 = vcmp.ne.s32.totalorder %v18579_v0, 0  ;;  %vm22173_vm9 = vcmp.lt.s32.totalorder %v18579_v0, 0  ;;  %v22174_v39 = vmov 0  ;;  %v9086_v33 = vshrl.u32 %v18432_v14, 16  ;;  %v14574_v36 = vpop.f32.mrf.mxu1 }
 0x305   : > { %vm18684_vm10 = vmand %vm22173_vm9, %vm22172_vm7  ;;  %v9088_v13 = vshll.u32 %v18432_v14, 16  ;;  %v18691_v44 = vadd.f32 %v18452_v38, %v6749_v41  ;;  %v7618_v8 = vadd.f32 %v18467_v61, %v18140_v60  ;;  %v18702_v16 = vadd.s32 18, %v18608_v25  ;;  %v18726_v9 = vpop.f32.mrf.mxu0 }
 0x306   : > { %v22175_v39 = vsel %vm18684_vm10, 4294967295, %v22174_v39  ;;  %vm22178_vm7 = vcmp.lt.s32.totalorder %v18608_v25, 0  ;;  %v22179_v14 = vmov 0  ;;  %v18713_v60 = vsub.s32 %v18447_v31, %v573_v6 }
 0x307   : > { %22176 = vst [vmem:[#allocation69_spill] sm:$0xff] %v22175_v39  ;;  %22177 = vst [vmem:[#allocation70_spill] sm:$0xff] %v18702_v16  ;;  %v551_v38 = vmul.u32 18, %v550_v53  ;;  %v18716_v61 = vmul.u32.u64.low 3817748708, %v18657_v2  ;;  %v18717_v41 = vmul.u32.u64.high 3817748708, %v18657_v2, %v18716_v61  ;;  %v18721_v19 = vadd.f32 %v18483_v23, %v18419_v51  ;;  %v7522_v51 = vpop.f32.mrf.mxu1 }
 0x308   : > { %vm18708_vm9 = vmand %vm22178_vm7, %vm769_vm1  ;;  %22182 = vst [vmem:[#allocation72_spill] sm:$0xff] %v18713_v60  ;;  %v18724_v20 = vadd.f32 %v14574_v36, %v17997_v21  ;;  %v606_v31 = vmul.u32 18, %v605_v46  ;;  %v18734_v53 = vadd.f32 %v18517_v3, %v18435_v17  ;;  %v18738_v61 = vadd.f32 %v18542_v30, %v18450_v15  ;;  %v18749_v46 = vpop.f32.mrf.mxu0 }
 0x309   : > { %v22180_v14 = vsel %vm18708_vm9, 4294967295, %v22179_v14  ;;  %v9090_v23 = vrot.slane %v9088_v13, 1  ;;  %v18741_v21 = vadd.s32 208, %v17902_v58  ;;  %v18744_v36 = vadd.f32 %v18565_v27, %v7618_v8  ;;  %v14575_v15 = vpop.f32.mrf.mxu1  ;;  %v22185_v27 = vld [vmem:[#allocation31_spill] sm:$0xff] }
 0x30a   : > { %22181 = vst [vmem:[#allocation71_spill] sm:$0xff] %v22180_v14  ;;  %v18747_v39 = vadd.f32 %v7522_v51, %v22183_v34  ;;  %v583_v30 = vshrl.u32 %v18641_v45, 4  ;;  %vm772_vm1 = vcmp.ne.s32.totalorder %v18713_v60, 0  ;;  %vm808_vm7 = vcmp.lt.s32.totalorder %v18713_v60, 0  ;;  %v18765_v8 = vpop.f32.mrf.mxu0 }
 0x30b   : > { %v18759_v13 = vsub.s32 %v18512_v4, %v551_v38  ;;  %v616_v3 = vshrl.u32 %v18654_v49, 4  ;;  %v18763_v34 = vadd.f32 %v14575_v15, %v22185_v27  ;;  %v18768_v51 = vsub.s32 %v18525_v32, %v606_v31  ;;  %v18776_v25 = vpop.f32.mrf.mxu1  ;;  %vm18804_vm9 = vmand %vm808_vm7, %vm772_vm1 }
 0x30c   : > { %v18771_v45 = vmul.u32.u64.low 3817748708, %v18741_v21  ;;  %v18772_v17 = vmul.u32.u64.high 3817748708, %v18741_v21, %v18771_v45  ;;  %v7622_v6 = vadd.f32 %v18574_v11, %v18151_v40  ;;  %v18779_v4 = vadd.s32 18, %v18713_v60  ;;  %v18798_v11 = vpop.f32.mrf.mxu0 }
 0x30d   : > { %22184 = vst [vmem:[#allocation7_spill] sm:$0xff] %v18759_v13  ;;  %22186 = vst [vmem:[#allocation31_spill] sm:$0xff] %v18768_v51  ;;  %v18781_v49 = vor.u32 %v9090_v23, %v9086_v33  ;;  %v18784_v38 = vadd.s32 192, %v17902_v58  ;;  %v18788_v32 = vadd.f32 %v18583_v43, %v18515_v7  ;;  %v18792_v31 = vadd.f32 %v18603_v18, %v18540_v35  ;;  %v14578_v43 = vpop.f32.mrf.mxu1  ;;  %v22192_v18 = vld [vmem:[#allocation16_spill] sm:$0xff] }
 0x30e   : > { %22187 = vst [vmem:[#allocation73_spill] sm:$0xff] %v18779_v4  ;;  %v18796_v40 = vadd.f32 %v18629_v54, %v18563_v26  ;;  %v22189_v33 = vmov 0  ;;  %v584_v7 = vmul.u32 18, %v583_v30  ;;  %vm770_vm10 = vcmp.ne.s32.totalorder %v18759_v13, 0  ;;  %v18814_v23 = vpop.f32.mrf.mxu0 }
 0x30f   : > { %22188 = vst [vmem:[#allocation74_spill] sm:$0xff] %v18781_v49  ;;  %v22190_v33 = vsel %vm18804_vm9, 4294967295, %v22189_v33  ;;  %vm806_vm2 = vcmp.lt.s32.totalorder %v18759_v13, 0  ;;  %v617_v35 = vmul.u32 18, %v616_v3  ;;  %v594_v26 = vshrl.u32 %v18717_v41, 4  ;;  %v7538_v30 = vpop.f32.mrf.mxu1 }
 0x310   : > { %22191 = vst [vmem:[#allocation75_spill] sm:$0xff] %v22190_v33  ;;  %v18812_v54 = vadd.f32 %v14578_v43, %v22192_v18  ;;  %vm775_vm8 = vcmp.ne.s32.totalorder %v18768_v51, 0  ;;  %vm811_vm1 = vcmp.lt.s32.totalorder %v18768_v51, 0  ;;  %v18819_v15 = vadd.s32 216, %v17902_v58  ;;  %v22194_v43 = vld [vmem:[#allocation20_spill] sm:$0xff]  ;;  %v18835_v49 = vpop.f32.mrf.mxu0  ;;  %vm18841_vm7 = vmand %vm806_vm2, %vm770_vm10 }
 0x311   : > { %v18826_v41 = vadd.s32 18, %v18759_v13  ;;  %v18829_v27 = vmul.u32.u64.low 3817748708, %v18784_v38  ;;  %v18830_v45 = vmul.u32.u64.high 3817748708, %v18784_v38, %v18829_v27  ;;  %v18833_v18 = vadd.f32 %v7538_v30, %v22194_v43  ;;  %v14579_v4 = vpop.f32.mrf.mxu1  ;;  %vm18863_vm2 = vmand %vm811_vm1, %vm775_vm8 }
 0x312   : > { %v22195_v16 = vmov 0  ;;  %v18846_v3 = vadd.s32 18, %v18768_v51  ;;  %v18849_v60 = vsub.s32 %v18590_v59, %v584_v7  ;;  %v18852_v27 = vadd.s32 200, %v17902_v58 }
 0x313   : > { %22193 = vst [vmem:[#allocation16_spill] sm:$0xff] %v18826_v41  ;;  %v22196_v16 = vsel %vm18841_vm7, 4294967295, %v22195_v16  ;;  %v7626_v30 = vadd.f32 %v18670_v47, %v18184_v29  ;;  %v18857_v43 = vadd.f32 %v18662_v63, %v7622_v6  ;;  %v22200_v33 = vmov 0  ;;  %v7843_v29 = vpop.f32.mrf.mxu0 }
 0x314   : > { %22197 = vst [vmem:[#allocation20_spill] sm:$0xff] %v22196_v16  ;;  %22198 = vst [vmem:[#allocation76_spill] sm:$0xff] %v18846_v3  ;;  %v22201_v33 = vsel %vm18863_vm2, 4294967295, %v22200_v33  ;;  %v18868_v59 = vsub.s32 %v18598_v10, %v617_v35  ;;  %v595_v7 = vmul.u32 18, %v594_v26  ;;  %v18871_v14 = vadd.f32 %v14579_v4, %v18113_v48  ;;  %v18886_v10 = vpop.f32.mrf.mxu1 }
 0x315   : > { %22199 = vst [vmem:[#allocation77_spill] sm:$0xff] %v18849_v60  ;;  %22202 = vst [vmem:[#allocation78_spill] sm:$0xff] %v22201_v33  ;;  %v649_v63 = vshrl.u32 %v18772_v17, 4  ;;  %v18875_v47 = vmul.u32.u64.low 3817748708, %v18819_v15  ;;  %v18876_v6 = vmul.u32.u64.high 3817748708, %v18819_v15, %v18875_v47  ;;  %v18880_v0 = vadd.f32 %v18695_v62, %v18601_v28  ;;  %v18895_v4 = vpop.f32.mrf.mxu0 }
 0x316   : > { %22203 = vst [vmem:[#allocation79_spill] sm:$0xff] %v18868_v59  ;;  %v18884_v42 = vadd.f32 %v18726_v9, %v18627_v12  ;;  %v18893_v17 = vadd.s32 240, %v17902_v58  ;;  %v18903_v9 = vmul.u32.u64.low 3817748708, %v18852_v27  ;;  %v18904_v28 = vmul.u32.u64.high 3817748708, %v18852_v27, %v18903_v9  ;;  %v14582_v12 = vpop.f32.mrf.mxu1 }
 0x317   : > { %vm809_vm10 = vcmp.lt.s32.totalorder %v18849_v60, 0  ;;  %v18909_v35 = vsub.s32 %v18657_v2, %v595_v7  ;;  %v627_v26 = vshrl.u32 %v18830_v45, 4  ;;  %v18913_v47 = vadd.f32 %v14582_v12, %v18161_v37  ;;  %v18915_v62 = vpop.f32.mrf.mxu0 }
 0x318   : > { %v650_v48 = vmul.u32 18, %v649_v63  ;;  %v18919_v9 = vadd.s32 224, %v17902_v58  ;;  %v7554_v51 = vpop.f32.mrf.mxu1  ;;  %v18922_v3 = vadd.s32 18, %v18849_v60  ;;  %v660_v2 = vshrl.u32 %v18876_v6, 4 }
 0x319   : > { %22204 = vst [vmem:[#allocation80_spill] sm:$0xff] %v18909_v35  ;;  %v18926_v7 = vmul.u32.u64.low 3817748708, %v18893_v17  ;;  %v18927_v45 = vmul.u32.u64.high 3817748708, %v18893_v17, %v18926_v7  ;;  %v18931_v37 = vadd.f32 %v18749_v46, %v18660_v55  ;;  %v18934_v12 = vadd.f32 %v18765_v8, %v7626_v30  ;;  %v14617_v33 = vpop.f32.mrf.mxu0 }
 0x31a   : > { %22205 = vst [vmem:[#allocation81_spill] sm:$0xff] %v18922_v3  ;;  %v18937_v63 = vadd.f32 %v7554_v51, %v18176_v50  ;;  %vm22206_vm8 = vcmp.ne.s32.totalorder %v18849_v60, 0  ;;  %v22207_v6 = vmov 0  ;;  %v18948_v7 = vadd.s32 18, %v18868_v59  ;;  %v14583_v55 = vpop.f32.mrf.mxu1 }
 0x31b   : > { %vm18943_vm1 = vmand %vm809_vm10, %vm22206_vm8  ;;  %vm22211_vm2 = vcmp.ne.s32.totalorder %v18868_v59, 0  ;;  %vm22212_vm7 = vcmp.lt.s32.totalorder %v18868_v59, 0  ;;  %v22213_v50 = vmov 0  ;;  %vm774_vm12 = vcmp.ne.s32.totalorder %v18909_v35, 0  ;;  %v18964_v30 = vpop.f32.mrf.mxu0 }
 0x31c   : > { %v22208_v6 = vsel %vm18943_vm1, 4294967295, %v22207_v6  ;;  %22210 = vst [vmem:[#allocation83_spill] sm:$0xff] %v18948_v7  ;;  %vm18954_vm9 = vmand %vm22212_vm7, %vm22211_vm2  ;;  %vm810_vm11 = vcmp.lt.s32.totalorder %v18909_v35, 0  ;;  %v628_v46 = vmul.u32 18, %v627_v26  ;;  %v638_v8 = vshrl.u32 %v18904_v28, 4  ;;  %v7557_v28 = vpop.f32.mrf.mxu1 }
 0x31d   : > { %22209 = vst [vmem:[#allocation82_spill] sm:$0xff] %v22208_v6  ;;  %v22214_v50 = vsel %vm18954_vm9, 4294967295, %v22213_v50  ;;  %v18962_v51 = vadd.f32 %v14583_v55, %v18191_v52  ;;  %v18967_v13 = vsub.s32 %v18741_v21, %v650_v48  ;;  %v7630_v1 = vadd.f32 %v18776_v25, %v18272_v22  ;;  %v18987_v48 = vpop.f32.mrf.mxu0  ;;  %vm19009_vm7 = vmand %vm810_vm11, %vm774_vm12 }
 0x31e   : > { %22215 = vst [vmem:[#allocation84_spill] sm:$0xff] %v22214_v50  ;;  %v18970_v41 = vmul.u32.u64.low 3817748708, %v18919_v9  ;;  %v18971_v16 = vmul.u32.u64.high 3817748708, %v18919_v9, %v18970_v41  ;;  %v18977_v26 = vadd.f32 %v18798_v11, %v18724_v20  ;;  %v661_v55 = vmul.u32 18, %v660_v2 }
 0x31f   : > { %22216 = vst [vmem:[#allocation85_spill] sm:$0xff] %v18967_v13  ;;  %v18985_v21 = vadd.f32 %v18814_v23, %v18747_v39  ;;  %v18994_v25 = vadd.s32 18, %v18909_v35  ;;  %v18997_v20 = vadd.s32 248, %v17902_v58  ;;  %v19001_v11 = vadd.f32 %v18835_v49, %v18763_v34  ;;  %v14586_v39 = vpop.f32.mrf.mxu1  ;;  %v7872_v34 = vpop.f32.mrf.mxu0 }
 0x320   : > { %v19003_v41 = vadd.f32 %v7843_v29, %v7630_v1  ;;  %v22218_v23 = vmov 0  ;;  %v19014_v2 = vsub.s32 %v18784_v38, %v628_v46  ;;  %v639_v22 = vmul.u32 18, %v638_v8  ;;  %v22223_v8 = vld [vmem:[#allocation37_spill] sm:$0xff] }
 0x321   : > { %22217 = vst [vmem:[#allocation86_spill] sm:$0xff] %v18994_v25  ;;  %v22219_v23 = vsel %vm19009_vm7, 4294967295, %v22218_v23  ;;  %v19017_v52 = vadd.f32 %v14586_v39, %v18229_v24  ;;  %vm779_vm2 = vcmp.ne.s32.totalorder %v18967_v13, 0  ;;  %vm815_vm8 = vcmp.lt.s32.totalorder %v18967_v13, 0  ;;  %v7570_v49 = vpop.f32.mrf.mxu1  ;;  %v14621_v7 = vpop.f32.mrf.mxu0 }
 0x322   : > { %22220 = vst [vmem:[#allocation87_spill] sm:$0xff] %v22219_v23  ;;  %22221 = vst [vmem:[#allocation88_spill] sm:$0xff] %v19014_v2  ;;  %v19022_v1 = vadd.s32 232, %v17902_v58  ;;  %v19025_v29 = vsub.s32 %v18819_v15, %v661_v55  ;;  %v693_v59 = vshrl.u32 %v18927_v45, 4  ;;  %v7634_v24 = vadd.f32 %v18886_v10, %v18387_v5 }
 0x323   : > { %v19029_v38 = vmul.u32.u64.low 3817748708, %v18997_v20  ;;  %v19030_v46 = vmul.u32.u64.high 3817748708, %v18997_v20, %v19029_v38  ;;  %v19035_v39 = vadd.f32 %v7570_v49, %v22223_v8  ;;  %v19042_v15 = vadd.s32 18, %v18967_v13  ;;  %v14587_v55 = vpop.f32.mrf.mxu1  ;;  %vm19050_vm11 = vmand %vm815_vm8, %vm779_vm2  ;;  %v22229_v49 = vld [vmem:[#allocation40_spill] sm:$0xff]  ;;  %v7875_v8 = vpop.f32.mrf.mxu0 }
 0x324   : > { %22222 = vst [vmem:[#allocation89_spill] sm:$0xff] %v19025_v29  ;;  %v19046_v45 = vadd.f32 %v18895_v4, %v18812_v54  ;;  %v22225_v5 = vmov 0  ;;  %vm777_vm12 = vcmp.ne.s32.totalorder %v19014_v2, 0  ;;  %vm813_vm10 = vcmp.lt.s32.totalorder %v19014_v2, 0 }
 0x325   : > { %22224 = vst [vmem:[#allocation37_spill] sm:$0xff] %v19042_v15  ;;  %v22226_v5 = vsel %vm19050_vm11, 4294967295, %v22225_v5  ;;  %v19057_v10 = vsub.s32 %v18852_v27, %v639_v22  ;;  %v19060_v38 = vadd.f32 %v14587_v55, %v22229_v49  ;;  %v671_v54 = vshrl.u32 %v18971_v16, 4  ;;  %v7573_v35 = vpop.f32.mrf.mxu1  ;;  %v14624_v16 = vpop.f32.mrf.mxu0  ;;  %vm19087_vm2 = vmand %vm813_vm10, %vm777_vm12  ;;  %v22238_v15 = vld [vmem:[#allocation43_spill] sm:$0xff] }
 0x326   : > { %22227 = vst [vmem:[#allocation90_spill] sm:$0xff] %v22226_v5  ;;  %v19064_v4 = vmul.u32.u64.low 3817748708, %v19022_v1  ;;  %v19065_v50 = vmul.u32.u64.high 3817748708, %v19022_v1, %v19064_v4  ;;  %v19068_v25 = vadd.s32 18, %v19014_v2  ;;  %v694_v27 = vmul.u32 18, %v693_v59 }
 0x327   : > { %22228 = vst [vmem:[#allocation91_spill] sm:$0xff] %v19057_v10  ;;  %v19074_v22 = vadd.f32 %v18915_v62, %v18833_v18  ;;  %v19077_v55 = vadd.f32 %v14617_v33, %v18871_v14  ;;  %v22232_v4 = vmov 0  ;;  %v19092_v18 = vadd.s32 18, %v19025_v29  ;;  %v14590_v59 = vpop.f32.mrf.mxu1  ;;  %v22236_v62 = vld [vmem:[#allocation54_spill] sm:$0xff]  ;;  %v19107_v23 = vpop.f32.mrf.mxu0 }
 0x328   : > { %22230 = vst [vmem:[#allocation40_spill] sm:$0xff] %v19068_v25  ;;  %v22233_v4 = vsel %vm19087_vm2, 4294967295, %v22232_v4  ;;  %vm778_vm8 = vcmp.ne.s32.totalorder %v19057_v10, 0  ;;  %v704_v14 = vshrl.u32 %v19030_v46, 4  ;;  %v19098_v33 = vadd.s32 272, %v17902_v58 }
 0x329   : > { %22231 = vst [vmem:[#allocation92_spill] sm:$0xff] %v19077_v55  ;;  %22234 = vst [vmem:[#allocation93_spill] sm:$0xff] %v22233_v4  ;;  %v7638_v49 = vadd.f32 %v7557_v28, %v22236_v62  ;;  %v19102_v13 = vadd.f32 %v18964_v30, %v7634_v24  ;;  %v19105_v5 = vadd.f32 %v14590_v59, %v22238_v15  ;;  %vm22239_vm12 = vcmp.ne.s32.totalorder %v19025_v29, 0  ;;  %v7586_v60 = vpop.f32.mrf.mxu1  ;;  %v22246_v59 = vld [vmem:[#allocation45_spill] sm:$0xff] }
 0x32a   : > { %22235 = vst [vmem:[#allocation94_spill] sm:$0xff] %v19092_v18  ;;  %vm22240_vm10 = vcmp.lt.s32.totalorder %v19025_v29, 0  ;;  %v22241_v55 = vmov 0  ;;  %v672_v46 = vmul.u32 18, %v671_v54  ;;  %v19122_v28 = vadd.s32 18, %v19057_v10 }
 0x32b   : > { %22237 = vst [vmem:[#allocation54_spill] sm:$0xff] %v19102_v13  ;;  %vm19113_vm7 = vmand %vm22240_vm10, %vm22239_vm12  ;;  %v19125_v24 = vsub.s32 %v18893_v17, %v694_v27  ;;  %v705_v15 = vmul.u32 18, %v704_v14  ;;  %v19128_v62 = vadd.f32 %v7586_v60, %v22246_v59  ;;  %v14625_v13 = vpop.f32.mrf.mxu0  ;;  %vm22247_vm12 = vcmp.lt.s32.totalorder %v19057_v10, 0  ;;  %v14591_v27 = vpop.f32.mrf.mxu1 }
 0x32c   : > { %v22242_v55 = vsel %vm19113_vm7, 4294967295, %v22241_v55  ;;  %22244 = vst [vmem:[#allocation95_spill] sm:$0xff] %v19122_v28  ;;  %vm19134_vm10 = vmand %vm22247_vm12, %vm778_vm8  ;;  %v22248_v54 = vmov 0  ;;  %v682_v30 = vshrl.u32 %v19065_v50, 4  ;;  %v19145_v17 = vadd.f32 %v18987_v48, %v18913_v47 }
 0x32d   : > { %22243 = vst [vmem:[#allocation43_spill] sm:$0xff] %v22242_v55  ;;  %22245 = vst [vmem:[#allocation96_spill] sm:$0xff] %v19125_v24  ;;  %v22249_v54 = vsel %vm19134_vm10, 4294967295, %v22248_v54  ;;  %v19140_v2 = vmul.u32.u64.low 3817748708, %v19098_v33  ;;  %v19141_v25 = vmul.u32.u64.high 3817748708, %v19098_v33, %v19140_v2  ;;  %v19148_v60 = vadd.f32 %v7872_v34, %v18937_v63  ;;  %v7891_v47 = vpop.f32.mrf.mxu0 }
 0x32e   : > { %22250 = vst [vmem:[#allocation45_spill] sm:$0xff] %v22249_v54  ;;  %22251 = vst [vmem:[#allocation97_spill] sm:$0xff] %v19145_v17  ;;  %v19155_v59 = vadd.s32 256, %v17902_v58  ;;  %v19158_v50 = vadd.f32 %v14621_v7, %v18962_v51  ;;  %v22254_v2 = vld [vmem:[#allocation25_spill] sm:$0xff]  ;;  %v19164_v48 = vsub.s32 %v18919_v9, %v672_v46  ;;  %v683_v63 = vmul.u32 18, %v682_v30  ;;  %v22257_v51 = vld [vmem:[#allocation30_spill] sm:$0xff] }
 0x32f   : > { %22252 = vst [vmem:[#allocation98_spill] sm:$0xff] %v19148_v60  ;;  %v19161_v4 = vadd.f32 %v14591_v27, %v22254_v2  ;;  %v19166_v34 = vadd.f32 %v7875_v8, %v7638_v49  ;;  %v7589_v60 = vpop.f32.mrf.mxu1  ;;  %v19174_v7 = vsub.s32 %v18997_v20, %v705_v15  ;;  %v7642_v27 = vadd.f32 %v7573_v35, %v22257_v51  ;;  %v14628_v2 = vpop.f32.mrf.mxu0  ;;  %v22260_v35 = vld [vmem:[#allocation51_spill] sm:$0xff] }
 0x330   : > { %22253 = vst [vmem:[#allocation99_spill] sm:$0xff] %v19158_v50  ;;  %22255 = vst [vmem:[#allocation25_spill] sm:$0xff] %v19164_v48  ;;  %v737_v9 = vshrl.u32 %v19141_v25, 4  ;;  %v19180_v8 = vadd.s32 280, %v17902_v58  ;;  %v19183_v46 = vadd.s32 18, %v19125_v24  ;;  %v19186_v30 = vsub.s32 %v19022_v1, %v683_v63 }
 0x331   : > { %22256 = vst [vmem:[#allocation100_spill] sm:$0xff] %v19166_v34  ;;  %v14594_v49 = vpop.f32.mrf.mxu1  ;;  %v19189_v20 = vmul.u32.u64.low 3817748708, %v19155_v59  ;;  %v19190_v15 = vmul.u32.u64.high 3817748708, %v19155_v59, %v19189_v20  ;;  %v7904_v14 = vpop.f32.mrf.mxu0  ;;  %v19198_v25 = vadd.s32 264, %v17902_v58  ;;  %v19201_v10 = vadd.f32 %v14624_v16, %v19017_v52 }
 0x332   : > { %22258 = vst [vmem:[#allocation30_spill] sm:$0xff] %v19183_v46  ;;  %22259 = vst [vmem:[#allocation101_spill] sm:$0xff] %v19186_v30  ;;  %v19193_v51 = vadd.f32 %v14594_v49, %v22260_v35  ;;  %v19204_v63 = vadd.s32 18, %v19164_v48  ;;  %v738_v20 = vmul.u32 18, %v737_v9  ;;  %v22263_v49 = vld [vmem:[#allocation53_spill] sm:$0xff]  ;;  %vm22264_vm12 = vcmp.ne.s32.totalorder %v19125_v24, 0 }
 0x333   : > { %22261 = vst [vmem:[#allocation51_spill] sm:$0xff] %v19201_v10  ;;  %v7602_v1 = vpop.f32.mrf.mxu1  ;;  %v14629_v28 = vpop.f32.mrf.mxu0  ;;  %vm22265_vm8 = vcmp.lt.s32.totalorder %v19125_v24, 0  ;;  %v22266_v58 = vmov 0  ;;  %v19220_v52 = vmul.u32.u64.low 3817748708, %v19180_v8  ;;  %v19221_v16 = vmul.u32.u64.high 3817748708, %v19180_v8, %v19220_v52  ;;  %v22280_v9 = vld [vmem:[#allocation27_spill] sm:$0xff] }
 0x334   : > { %22262 = vst [vmem:[#allocation102_spill] sm:$0xff] %v19204_v63  ;;  %v19208_v35 = vadd.f32 %v7602_v1, %v22263_v49  ;;  %vm19214_vm7 = vmand %vm22265_vm8, %vm22264_vm12  ;;  %v22269_v1 = vld [vmem:[#allocation10_spill] sm:$0xff]  ;;  %v22270_v49 = vld [vmem:[#allocation13_spill] sm:$0xff]  ;;  %vm22274_vm8 = vcmp.ne.s32.totalorder %v19164_v48, 0  ;;  %vm22275_vm12 = vcmp.lt.s32.totalorder %v19164_v48, 0  ;;  %v22276_v18 = vmov 0 }
 0x335   : > { %v22267_v58 = vsel %vm19214_vm7, 4294967295, %v22266_v58  ;;  %v14595_v10 = vpop.f32.mrf.mxu1  ;;  %v22271_v54 = vsel %vm18086_vm5, %v22269_v1, %v22270_v49  ;;  %vm19236_vm11 = vmand %vm22275_vm12, %vm22274_vm8  ;;  %vm782_vm2 = vcmp.ne.s32.totalorder %v19186_v30, 0  ;;  %v19243_v52 = vsub.s32 %v19098_v33, %v738_v20  ;;  %v7907_v49 = vpop.f32.mrf.mxu0  ;;  %v19307_v20 = vld [vmem:[%s21677_s4] ss:$0 sm:$0xff]  ;;  %v22296_v63 = vld [vmem:[#allocation12_spill] sm:$0xff] }
 0x336   : > { %vm19228_vm10 = vcmp.lt.s32.totalorder %v22271_v54, 16  ;;  %v22277_v18 = vsel %vm19236_vm11, 4294967295, %v22276_v18  ;;  %v715_v54 = vshrl.u32 %v19190_v15, 4  ;;  %v7652_v1 = vadd.f32 %v14595_v10, %v22280_v9  ;;  %v22282_v15 = vld [vmem:[#allocation17_spill] sm:$0xff]  ;;  %v22283_v10 = vld [vmem:[#allocation14_spill] sm:$0xff] }
 0x337   : > { %22278 = vst [vmem:[#allocation53_spill] sm:$0xff] %v22277_v18  ;;  %22279 = vst [vmem:[#allocation11_spill] sm:$0xff] %v19243_v52  ;;  %v19248_v55 = vadd.s32 18, %v19174_v7  ;;  %v19251_v34 = vmul.u32.u64.low 3817748708, %v19198_v25  ;;  %v19252_v50 = vmul.u32.u64.high 3817748708, %v19198_v25, %v19251_v34  ;;  %v19256_v17 = vadd.f32 %v19107_v23, %v19035_v39  ;;  %v7605_v33 = vpop.f32.mrf.mxu1  ;;  %v22297_v18 = vld [vmem:[#allocation9_spill] sm:$0xff] }
 0x338   : > { %v19259_v3 = vadd.f32 %v14625_v13, %v19060_v38  ;;  %v22284_v9 = vsel %vm18100_vm6, %v22282_v15, %v22283_v10  ;;  %vm22287_vm8 = vcmp.ne.s32.totalorder %v19174_v7, 0  ;;  %vm22288_vm12 = vcmp.lt.s32.totalorder %v19174_v7, 0  ;;  %v14632_v38 = vpop.f32.mrf.mxu0  ;;  %v22294_v34 = vld [vmem:[#allocation3_spill] sm:$0xff] }
 0x339   : > { %vm19266_vm5 = vcmp.lt.s32.totalorder %v22284_v9, 16  ;;  %vm19278_vm9 = vmand %vm22288_vm12, %vm22287_vm8  ;;  %v22289_v13 = vmov 0  ;;  %v19283_v23 = vadd.s32 18, %v19186_v30  ;;  %v19285_v39 = vadd.f32 %v7891_v47, %v7642_v27  ;;  %v14638_v24 = vpop.f32.mrf.mxu1 }
 0x33a   : > { %v22290_v13 = vsel %vm19278_vm9, 4294967295, %v22289_v13  ;;  %vm22291_vm6 = vcmp.lt.s32.totalorder %v19186_v30, 0  ;;  %v22292_v15 = vmov 0  ;;  %v716_v10 = vmul.u32 18, %v715_v54 }
 0x33b   : > { %vm19295_vm7 = vmand %vm22291_vm6, %vm782_vm2  ;;  %v748_v9 = vshrl.u32 %v19221_v16, 4  ;;  %v7646_v47 = vadd.f32 %v7589_v60, %v22294_v34  ;;  %v19302_v27 = vadd.f32 %v14628_v2, %v19105_v5  ;;  %v22298_v46 = vsel %vm18117_vm13, %v22296_v63, %v22297_v18  ;;  %v7920_v2 = vpop.f32.mrf.mxu0  ;;  %v8109_v63 = vpop.f32.mrf.mxu1  ;;  %v22305_v34 = vld [vmem:[#allocation21_spill] sm:$0xff] }
 0x33c   : > { %v22293_v15 = vsel %vm19295_vm7, 4294967295, %v22292_v15  ;;  %vm19314_vm2 = vcmp.lt.s32.totalorder %v22298_v46, 16  ;;  %vm787_vm8 = vcmp.ne.s32.totalorder %v19243_v52, 0  ;;  %vm823_vm12 = vcmp.lt.s32.totalorder %v19243_v52, 0 }
 0x33d   : > { %v19321_v5 = vadd.f32 %v7904_v14, %v19128_v62  ;;  %v8254_v60 = vadd.f32 %v14638_v24, %v18721_v19  ;;  %v19329_v18 = vsub.s32 %v19155_v59, %v716_v10  ;;  %v19332_v46 = vadd.f32 %v14629_v28, %v19161_v4  ;;  %v22306_v62 = vld [vmem:[#allocation24_spill] sm:$0xff]  ;;  %v14633_v16 = vpop.f32.mrf.mxu0 }
 0x33e   : > { %v22307_v14 = vsel %vm18216_vm4, %v22305_v34, %v22306_v62  ;;  %v19348_v59 = vadd.s32 18, %v19243_v52  ;;  %v749_v4 = vmul.u32 18, %v748_v9  ;;  %v8252_v10 = vadd.f32 %v8109_v63, %v18734_v53  ;;  %vm19356_vm4 = vmand %vm823_vm12, %vm787_vm8  ;;  %v22313_v53 = vld [vmem:[#allocation32_spill] sm:$0xff]  ;;  %v22314_v63 = vld [vmem:[#allocation19_spill] sm:$0xff] }
 0x33f   : > { %22301 = vst [vmem:[#allocation10_spill] sm:$0xff] %v19321_v5  ;;  %22302 = vst [vmem:[#allocation13_spill] sm:$0xff] %v19329_v18  ;;  %vm19339_vm13 = vcmp.lt.s32.totalorder %v22307_v14, 16  ;;  %v8297_v28 = vadd.f32 %v19307_v20, %v8254_v60  ;;  %vm785_vm6 = vcmp.ne.s32.totalorder %v19329_v18, 0  ;;  %vm821_vm7 = vcmp.lt.s32.totalorder %v19329_v18, 0  ;;  %v14639_v60 = vpop.f32.mrf.mxu1  ;;  %v22359_v52 = vld [vmem:[#allocation52_spill] sm:$0xff] }
 0x340   : > { %22303 = vst [vmem:[#allocation27_spill] sm:$0xff] %v19332_v46  ;;  %v7650_v62 = vadd.f32 %v7605_v33, %v18691_v44  ;;  %v19363_v9 = vadd.f32 %v7907_v49, %v7646_v47  ;;  %v22315_v24 = vsel %vm18235_vm14, %v22313_v53, %v22314_v63  ;;  %v19375_v46 = vadd.s32 18, %v19329_v18  ;;  %v7923_v47 = vpop.f32.mrf.mxu0  ;;  %vm19383_vm8 = vmand %vm821_vm7, %vm785_vm6 }
 0x341   : > { %vm19370_vm9 = vcmp.lt.s32.totalorder %v22315_v24, 16  ;;  %v726_v5 = vshrl.u32 %v19252_v50, 4  ;;  %v19379_v30 = vadd.f32 %v14632_v38, %v19193_v51  ;;  %v8333_v44 = vmax.f32 %v8297_v28, 0.0  ;;  %v8112_v63 = vpop.f32.mrf.mxu1  ;;  %v22326_v51 = vld [vmem:[#allocation34_spill] sm:$0xff]  ;;  %v22327_v38 = vld [vmem:[#allocation23_spill] sm:$0xff] }
 0x342   : > { %22318 = vst [vmem:[#allocation18_spill] sm:$0xff] %v19375_v46  ;;  %v8295_v49 = vadd.f32 %v19307_v20, %v8252_v10  ;;  %v8255_v33 = vadd.f32 %v14639_v60, %v18738_v61  ;;  %v22320_v14 = vmov 0  ;;  %v19388_v24 = vadd.f32 %v7920_v2, %v19208_v35 }
 0x343   : > { %22319 = vst [vmem:[#allocation17_spill] sm:$0xff] %v19379_v30  ;;  %v22321_v14 = vsel %vm19383_vm8, 4294967295, %v22320_v14  ;;  %v19390_v53 = vadd.f32 %v14633_v16, %v7652_v1  ;;  %v22328_v28 = vsel %vm18253_vm15, %v22326_v51, %v22327_v38  ;;  %v19406_v35 = vsub.s32 %v19180_v8, %v749_v4  ;;  %v14642_v38 = vpop.f32.mrf.mxu1  ;;  %v22357_v30 = vld [vmem:[#allocation8_spill] sm:$0xff] }
 0x344   : > { %22322 = vst [vmem:[#allocation14_spill] sm:$0xff] %v22321_v14  ;;  %22323 = vst [vmem:[#allocation3_spill] sm:$0xff] %v19388_v24  ;;  %vm19397_vm14 = vcmp.lt.s32.totalorder %v22328_v28, 16  ;;  %v8369_v1 = vsel %vm19228_vm10, %v8333_v44, 0.0  ;;  %v8331_v2 = vmax.f32 %v8295_v49, 0.0  ;;  %v8298_v16 = vadd.f32 %v19307_v20, %v8255_v33 }
 0x345   : > { %22324 = vst [vmem:[#allocation15_spill] sm:$0xff] %v19390_v53  ;;  %vm8511_vm7 = vsmask.f32 5392  ;;  %v8253_v60 = vadd.f32 %v8112_v63, %v18744_v36  ;;  %v13441_v50 = vpack.c.bf16 %v8369_v1, %v8369_v1  ;;  %v19412_v51 = vadd.f32 %v7923_v47, %v7650_v62  ;;  %v8125_v47 = vpop.f32.mrf.mxu1 }
 0x346   : > { %v19418_v8 = vmul.u32 18, %v726_v5  ;;  %v8367_v29 = vsel %vm19266_vm5, %v8331_v2, 0.0  ;;  %v8334_v4 = vmax.f32 %v8298_v16, 0.0  ;;  %v8258_v49 = vadd.f32 %v14642_v38, %v18788_v32 }
 0x347   : > { %22331 = vst [vmem:[#allocation12_spill] sm:$0xff] %v19412_v51  ;;  %v8296_v44 = vadd.f32 %v19307_v20, %v8253_v60  ;;  %v8533_v36 = vshrl.u32 %v13441_v50, 16  ;;  %v8536_v33 = vshll.u32 %v13441_v50, 16  ;;  %v13439_v62 = vpack.c.bf16 %v8367_v29, %v8367_v29  ;;  %v14643_v32 = vpop.f32.mrf.mxu1 }
 0x348   : > { %v19425_v63 = vadd.s32 18, %v19406_v35  ;;  %v8370_v1 = vsel %vm19314_vm2, %v8334_v4, 0.0  ;;  %v8301_v28 = vadd.f32 %v19307_v20, %v8258_v49  ;;  %v8256_v6 = vadd.f32 %v8125_v47, %v18792_v31  ;;  %v8909_v49 = vld [vmem:[#allocation2 + $0x8] sm:$0xe] }
 0x349   : > { %v8332_v5 = vmax.f32 %v8296_v44, 0.0  ;;  %v8535_v2 = vrot.slane %v8533_v36, 6  ;;  %v8538_v16 = vrot.slane %v8536_v33, 7  ;;  %v8514_v60 = vshrl.u32 %v13439_v62, 16  ;;  %v8128_v24 = vpop.f32.mrf.mxu1 }
 0x34a   : > { %22332 = vst [vmem:[#allocation9_spill] sm:$0xff] %v19425_v63  ;;  %v8517_v61 = vshll.u32 %v13439_v62, 16  ;;  %v13442_v38 = vpack.c.bf16 %v8370_v1, %v8370_v1  ;;  %v8337_v29 = vmax.f32 %v8301_v28, 0.0  ;;  %v8299_v51 = vadd.f32 %v19307_v20, %v8256_v6  ;;  %v22334_v28 = vld [vmem:[#allocation41_spill] sm:$0xff]  ;;  %v22335_v6 = vld [vmem:[#allocation35_spill] sm:$0xff] }
 0x34b   : > { %v8368_v50 = vsel %vm19339_vm13, %v8332_v5, 0.0  ;;  %v8539_v53 = vor.u32 %v8538_v16, %v8535_v2  ;;  %v8516_v54 = vrot.slane %v8514_v60, 6  ;;  %v22336_v2 = vsel %vm18335_vm0, %v22334_v28, %v22335_v6  ;;  %v22340_v60 = vld [vmem:[#allocation42_spill] sm:$0xff]  ;;  %v14646_v5 = vpop.f32.mrf.mxu1 }
 0x34c   : > { %v8519_v4 = vrot.slane %v8517_v61, 7  ;;  %v13440_v44 = vpack.c.bf16 %v8368_v50, %v8368_v50  ;;  %v8543_v18 = vshrl.u32 %v13442_v38, 16  ;;  %v8546_v31 = vshll.u32 %v13442_v38, 16  ;;  %v22341_v38 = vld [vmem:[#allocation38_spill] sm:$0xff] }
 0x34d   : > { %v8373_v36 = vsel %vm19370_vm9, %v8337_v29, 0.0  ;;  %v8335_v33 = vmax.f32 %v8299_v51, 0.0  ;;  %v8541_v62 = vrot.slane %v8539_v53, 4  ;;  %vm19441_vm15 = vcmp.lt.s32.totalorder %v22336_v2, 16  ;;  %v22345_v50 = vld [vmem:[#allocation26_spill] sm:$0xff]  ;;  %v22347_v29 = vld [vmem:[#allocation48_spill] sm:$0xff] }
 0x34e   : > { %v8520_v47 = vor.u32 %v8519_v4, %v8516_v54  ;;  %v8523_v1 = vshrl.u32 %v13440_v44, 16  ;;  %v8526_v19 = vshll.u32 %v13440_v44, 16  ;;  %v22342_v48 = vsel %vm18357_vm3, %v22340_v60, %v22341_v38  ;;  %v22348_v54 = vld [vmem:[#allocation39_spill] sm:$0xff] }
 0x34f   : > { %vm19450_vm9 = vcmp.lt.s32.totalorder %v22342_v48, 16  ;;  %vm22346_vm10 = vnez %v22345_v50  ;;  %v8545_v28 = vrot.slane %v8543_v18, 6  ;;  %v8548_v6 = vrot.slane %v8546_v31, 7  ;;  %v22355_v48 = vld [vmem:[#allocation5_spill] sm:$0xff] }
 0x350   : > { %v22349_v4 = vsel %vm22346_vm10, %v22347_v29, %v22348_v54  ;;  %v13445_v2 = vpack.c.bf16 %v8373_v36, %v8373_v36  ;;  %v8371_v16 = vsel %vm19397_vm14, %v8335_v33, 0.0  ;;  %vm22352_vm0 = vsmask.f32 1280 }
 0x351   : > { %vm19459_vm5 = vcmp.lt.s32.totalorder %v22349_v4, 16  ;;  %vm19467_vm3 = vmor %vm22352_vm0, %vm8511_vm7  ;;  %v8521_v38 = vrot.slane %v8520_v47, 4  ;;  %vm22356_vm2 = vnez %v22355_v48  ;;  %v8525_v29 = vrot.slane %v8523_v1, 6  ;;  %v8141_v4 = vpop.f32.mrf.mxu1  ;;  %v22360_v48 = vld [vmem:[#allocation44_spill] sm:$0xff] }
 0x352   : > { %v8910_v50 = vsel %vm22356_vm2, %v8520_v47, %v8909_v49  ;;  %v8528_v54 = vrot.slane %v8526_v19, 7  ;;  %v8549_v18 = vor.u32 %v8548_v6, %v8545_v28  ;;  %v8573_v31 = vshrl.u32 %v13445_v2, 16 }
 0x353   : > { %8911 = vst [vmem:[#allocation2 + $0x8] sm:$0xe] %v8910_v50  ;;  %v8576_v36 = vshll.u32 %v13445_v2, 16  ;;  %v13443_v46 = vpack.c.bf16 %v8371_v16, %v8371_v16  ;;  %v8259_v33 = vadd.f32 %v14643_v32, %v18796_v40  ;;  %v8257_v14 = vadd.f32 %v8128_v24, %v18857_v43  ;;  %v14647_v1 = vpop.f32.mrf.mxu1  ;;  %v22367_v32 = vld [vmem:[#allocation56_spill] sm:$0xff] }
 0x354   : > { %v8529_v10 = vor.u32 %v8528_v54, %v8525_v29  ;;  %v8262_v63 = vadd.f32 %v14646_v5, %v18880_v0  ;;  %vm22358_vm12 = vnez %v22357_v30  ;;  %v8550_v19 = vsel %vm19467_vm3, %v8541_v62, %v8549_v18  ;;  %v22368_v5 = vld [vmem:[#allocation49_spill] sm:$0xff] }
 0x355   : > { %v22361_v49 = vsel %vm22358_vm12, %v22359_v52, %v22360_v48  ;;  %v8551_v28 = vrot.slane %v8549_v18, 4  ;;  %v8575_v6 = vrot.slane %v8573_v31, 6  ;;  %v8578_v40 = vrot.slane %v8576_v36, 7  ;;  %v22365_v52 = vld [vmem:[#allocation55_spill] sm:$0xff]  ;;  %v8144_v62 = vpop.f32.mrf.mxu1  ;;  %v15300_v50 = vld [vmem:[%s21678_s5 + $0x18] sm:$0xff]  }
 0x356   : > { %vm19481_vm13 = vcmp.lt.s32.totalorder %v22361_v49, 16  ;;  %vm22364_vm6 = vcmask 125952   ;;  %v8530_v0 = vsel %vm19467_vm3, %v8521_v38, %v8529_v10  ;;  %v8531_v43 = vrot.slane %v8529_v10, 4  ;;  %14786 = vmatprep.subr.bf16.mxu1 %v15300_v50 }
 0x357   : > { %8914 = vst.msk [vmem:[#allocation2 + $0x14] sm:$0xf] %vm22364_vm6, %v8550_v19  ;;  %v8553_v30 = vshrl.u32 %v13443_v46, 16  ;;  %v8556_v24 = vshll.u32 %v13443_v46, 16  ;;  %vm22366_vm14 = vnez %v22365_v52  ;;  %vm22372_vm10 = vmmov %vm22364_vm6  ;;  %v19503_v38 = vor.u32 %v8578_v40, %v8575_v6  ;;  %v14650_v48 = vpop.f32.mrf.mxu1  ;;  %v22377_v52 = vld [vmem:[#allocation50_spill] sm:$0xff] }
 0x358   : > { %v22369_v2 = vsel %vm22366_vm14, %v22367_v32, %v22368_v5  ;;  %8912 = vst.msk [vmem:[#allocation2 + $0xc] sm:$0xf] %vm22372_vm10, %v8530_v0  ;;  %v8302_v46 = vadd.f32 %v19307_v20, %v8259_v33  ;;  %v8300_v29 = vadd.f32 %v19307_v20, %v8257_v14  ;;  %v8305_v54 = vadd.f32 %v19307_v20, %v8262_v63  ;;  %vm22373_vm0 = vmmov %vm22364_vm6 }
 0x359   : > { %vm19495_vm7 = vcmp.lt.s32.totalorder %v22369_v2, 16  ;;  %v8540_v18 = vsel %vm19467_vm3, %v8531_v43, %v8539_v53  ;;  %v8555_v31 = vrot.slane %v8553_v30, 6  ;;  %v8558_v36 = vrot.slane %v8556_v24, 7  ;;  %v19516_v0 = vpop.f32.mrf.mxu1  ;;  %v22374_v30 = vld [vmem:[#allocation57_spill] sm:$0xff]  ;;  %v22376_v24 = vld [vmem:[#allocation58_spill] sm:$0xff] }
 0x35a   : > { %v8260_v10 = vadd.f32 %v8141_v4, %v18884_v42  ;;  %8913 = vst.msk [vmem:[#allocation2 + $0x10] sm:$0xf] %vm22373_vm0, %v8540_v18  ;;  %v8581_v49 = vrot.slane %v19503_v38, 4  ;;  %v8338_v19 = vmax.f32 %v8302_v46, 0.0  ;;  %v8336_v6 = vmax.f32 %v8300_v29, 0.0  ;;  %v22384_v18 = vld [vmem:[#allocation59_spill] sm:$0xff] }
 0x35b   : > { %v8341_v33 = vmax.f32 %v8305_v54, 0.0  ;;  %v8559_v40 = vor.u32 %v8558_v36, %v8555_v31  ;;  %v8263_v63 = vadd.f32 %v14647_v1, %v18931_v37  ;;  %v8261_v53 = vadd.f32 %v8144_v62, %v18934_v12  ;;  %v19536_v2 = vpop.f32.mrf.mxu1  ;;  %v22382_v54 = vld [vmem:[#allocation60_spill] sm:$0xff]  ;;  %v22413_v37 = vld [vmem:[#allocation69_spill] sm:$0xff] }
 0x35c   : > { %v8303_v14 = vadd.f32 %v19307_v20, %v8260_v10  ;;  %v8374_v42 = vsel %vm19441_vm15, %v8338_v19, 0.0  ;;  %v8372_v4 = vsel %vm19450_vm9, %v8336_v6, 0.0  ;;  %vm22375_vm2 = vnez %v22374_v30  ;;  %vm22381_vm15 = vmmov %vm22373_vm0 }
 0x35d   : > { %v8377_v43 = vsel %vm19459_vm5, %v8341_v33, 0.0  ;;  %v22378_v32 = vsel %vm22375_vm2, %v22376_v24, %v22377_v52  ;;  %v8266_v12 = vadd.f32 %v14650_v48, %v18977_v26  ;;  %v8560_v61 = vsel %vm19467_vm3, %v8551_v28, %v8559_v40  ;;  %v22385_v26 = vld [vmem:[#allocation28_spill] sm:$0xff]  ;;  %v8160_v6 = vpop.f32.mrf.mxu1  ;;  %vm22403_vm2 = vmmov %vm22381_vm15 }
 0x35e   : > { %vm19529_vm12 = vcmp.lt.s32.totalorder %v22378_v32, 16  ;;  %v8561_v1 = vrot.slane %v8559_v40, 4  ;;  %v13446_v51 = vpack.c.bf16 %v8374_v42, %v8374_v42  ;;  %v13444_v5 = vpack.c.bf16 %v8372_v4, %v8372_v4  ;;  %8915 = vst.msk [vmem:[#allocation2 + $0x18] sm:$0xf] %vm22381_vm15, %v8560_v61  ;;  %vm22404_vm15 = vmmov %vm22403_vm2 }
 0x35f   : > { %v13449_v44 = vpack.c.bf16 %v8377_v43, %v8377_v43  ;;  %v8339_v62 = vmax.f32 %v8303_v14, 0.0  ;;  %v8306_v46 = vadd.f32 %v19307_v20, %v8263_v63  ;;  %v8304_v29 = vadd.f32 %v19307_v20, %v8261_v53  ;;  %v19552_v53 = vld [vmem:[#allocation2 + $0x8] sm:$0xff]   ;;  %v14654_v24 = vpop.f32.mrf.mxu1 }
 0x360   : > { %vm22383_vm9 = vnez %v22382_v54  ;;  %v8583_v36 = vshrl.u32 %v13446_v51, 16  ;;  %v8586_v10 = vshll.u32 %v13446_v51, 16  ;;  %v8563_v48 = vshrl.u32 %v13444_v5, 16 }
 0x361   : > { %v22386_v31 = vsel %vm22383_vm9, %v22384_v18, %v22385_v26  ;;  %v8566_v19 = vshll.u32 %v13444_v5, 16  ;;  %v8613_v33 = vshrl.u32 %v13449_v44, 16  ;;  %v8616_v40 = vshll.u32 %v13449_v44, 16  ;;  %v19558_v5 = vld [vmem:[#allocation2 + $0x10] sm:$0xff]  }
 0x362   : > { %vm19546_vm5 = vcmp.lt.s32.totalorder %v22386_v31, 16  ;;  %v8375_v14 = vsel %vm19481_vm13, %v8339_v62, 0.0  ;;  %v8342_v63 = vmax.f32 %v8306_v46, 0.0  ;;  %v8585_v42 = vrot.slane %v8583_v36, 6 }
 0x363   : > { %v8588_v4 = vrot.slane %v8586_v10, 7  ;;  %v8565_v43 = vrot.slane %v8563_v48, 6  ;;  %v8568_v30 = vrot.slane %v8566_v19, 7  ;;  %v8615_v52 = vrot.slane %v8613_v33, 6  ;;  %v22399_v19 = vld [vmem:[#allocation29_spill] sm:$0xff] }
 0x364   : > { %v8618_v32 = vrot.slane %v8616_v40, 7  ;;  %v13447_v61 = vpack.c.bf16 %v8375_v14, %v8375_v14  ;;  %v8378_v51 = vsel %vm19495_vm7, %v8342_v63, 0.0  ;;  %vm22389_vm6 = vcmask 130048   ;;  %v22405_v63 = vld [vmem:[#allocation68_spill] sm:$0xff] }
 0x365   : > { %14713 = vmatmul.mubr.msk.bf16.vlgmr.msra.gmra.mxu1 %vm22389_vm6, %v19552_v53  ;;  %v8589_v47 = vor.u32 %v8588_v4, %v8585_v42  ;;  %v8569_v44 = vor.u32 %v8568_v30, %v8565_v43  ;;  %v13450_v62 = vpack.c.bf16 %v8378_v51, %v8378_v51  ;;  %v8340_v46 = vmax.f32 %v8304_v29, 0.0  ;;  %vm22390_vm13 = vmmov %vm22389_vm6  ;;  %v22407_v42 = vld [vmem:[#allocation65_spill] sm:$0xff] }
 0x366   : > { %14787 = vmatpush3.bf16.msra.mxu1 %v15300_v50  ;;  %v8593_v54 = vshrl.u32 %v13447_v61, 16  ;;  %v8596_v18 = vshll.u32 %v13447_v61, 16  ;;  %v8309_v26 = vadd.f32 %v19307_v20, %v8266_v12  ;;  %14716 = vmatprep.mubr.msk.bf16.mxu1 %vm22390_vm13, %v19558_v5  ;;  %v19565_v16 = vsub.s32 %v19198_v25, %v19418_v8  ;;  %v22391_v50 = vld [vmem:[#allocation64_spill] sm:$0xff]  ;;  %v22396_v25 = vld [vmem:[#allocation67_spill] sm:$0xff]  ;;  %v22408_v4 = vld [vmem:[#allocation61_spill] sm:$0xff] }
 0x367   : > { %v8590_v31 = vsel %vm19467_vm3, %v8581_v49, %v8589_v47  ;;  %v8570_v36 = vsel %vm19467_vm3, %v8561_v1, %v8569_v44  ;;  %v8571_v10 = vrot.slane %v8569_v44, 4  ;;  %v19571_v29 = vor.u32 %v8618_v32, %v8615_v52  ;;  %v22398_v8 = vld [vmem:[#allocation63_spill] sm:$0xff]  ;;  %v8173_v1 = vpop.f32.mrf.mxu1  ;;  %vm22412_vm13 = vmmov %vm22403_vm2 }
 0x368   : > { %vm22392_vm14 = vnez %v22391_v50  ;;  %vm22397_vm10 = vnez %v22396_v25  ;;  %v8591_v40 = vrot.slane %v8589_v47, 4  ;;  %8918 = vst.msk [vmem:[#allocation2 + $0x24] sm:$0xf] %vm22403_vm2, %v8590_v31  ;;  %v8623_v14 = vshrl.u32 %v13450_v62, 16 }
 0x369   : > { %v22393_v12 = vsel %vm22392_vm14, %v18586_v57, %v18535_v56  ;;  %v22400_v49 = vsel %vm22397_vm10, %v22398_v8, %v22399_v19  ;;  %8916 = vst.msk [vmem:[#allocation2 + $0x1c] sm:$0xf] %vm22404_vm15, %v8570_v36  ;;  %v8595_v56 = vrot.slane %v8593_v54, 6  ;;  %v8598_v57 = vrot.slane %v8596_v18, 7 }
 0x36a   : > { %vm19578_vm7 = vcmp.lt.s32.totalorder %v22393_v12, 16  ;;  %vm19587_vm0 = vcmp.lt.s32.totalorder %v22400_v49, 16  ;;  %vm22406_vm9 = vnez %v22405_v63  ;;  %v8580_v52 = vsel %vm19467_vm3, %v8571_v10, %v19503_v38  ;;  %v19624_v12 = vpop.f32.mrf.mxu1 }
 0x36b   : > { %v22409_v43 = vsel %vm22406_vm9, %v22407_v42, %v22408_v4  ;;  %v8626_v32 = vshll.u32 %v13450_v62, 16  ;;  %v8376_v61 = vsel %vm19529_vm12, %v8340_v46, 0.0  ;;  %v8345_v51 = vmax.f32 %v8309_v26, 0.0  ;;  %8917 = vst.msk [vmem:[#allocation2 + $0x20] sm:$0xf] %vm22412_vm13, %v8580_v52  ;;  %v22415_v46 = vld [vmem:[#allocation66_spill] sm:$0xff] }
 0x36c   : > { %vm19598_vm6 = vcmp.lt.s32.totalorder %v22409_v43, 16  ;;  %v8599_v47 = vor.u32 %v8598_v57, %v8595_v56  ;;  %v8625_v44 = vrot.slane %v8623_v14, 6  ;;  %v13448_v54 = vpack.c.bf16 %v8376_v61, %v8376_v61  ;;  %v22416_v26 = vld [vmem:[#allocation62_spill] sm:$0xff]  ;;  %v22421_v42 = vld [vmem:[#allocation71_spill] sm:$0xff]  ;;  %v22424_v43 = vld [vmem:[#allocation4_spill] sm:$0xff]  ;;  %v19648_v61 = vpop.f32.mrf.mxu1 }
 0x36d   : > { %v8264_v18 = vadd.f32 %v19516_v0, %v18985_v21  ;;  %v8628_v31 = vrot.slane %v8626_v32, 7  ;;  %v8381_v36 = vsel %vm19546_vm5, %v8345_v51, 0.0  ;;  %v8267_v38 = vadd.f32 %v19536_v2, %v19001_v11  ;;  %vm22420_vm5 = vmmov %vm22403_vm2  ;;  %v22423_v4 = vld [vmem:[#allocation70_spill] sm:$0xff]  ;;  %v22450_v32 = vld [vmem:[#allocation76_spill] sm:$0xff] }
 0x36e   : > { %v8265_v62 = vadd.f32 %v8160_v6, %v19003_v41  ;;  %vm22414_vm12 = vnez %v22413_v37  ;;  %v8621_v21 = vrot.slane %v19571_v29, 4  ;;  %v8600_v0 = vsel %vm19467_vm3, %v8591_v40, %v8599_v47  ;;  %vm22428_vm15 = vmmov %vm22420_vm5 }
 0x36f   : > { %v22417_v10 = vsel %vm22414_vm12, %v22415_v46, %v22416_v26  ;;  %v8603_v28 = vshrl.u32 %v13448_v54, 16  ;;  %v8606_v11 = vshll.u32 %v13448_v54, 16  ;;  %8919 = vst.msk [vmem:[#allocation2 + $0x28] sm:$0xf] %vm22420_vm5, %v8600_v0  ;;  %v19630_v41 = vor.u32 %v8628_v31, %v8625_v44  ;;  %vm22430_vm13 = vmmov %vm22420_vm5  ;;  %v19669_v0 = vpop.f32.mrf.mxu1 }
 0x370   : > { %vm19620_vm14 = vcmp.lt.s32.totalorder %v22417_v10, 16  ;;  %v13453_v2 = vpack.c.bf16 %v8381_v36, %v8381_v36  ;;  %v8307_v6 = vadd.f32 %v19307_v20, %v8264_v18  ;;  %v8310_v25 = vadd.f32 %v19307_v20, %v8267_v38  ;;  %v19650_v51 = vld [vmem:[#allocation2 + $0x18] sm:$0xff]  }
 0x371   : > { %v8605_v8 = vrot.slane %v8603_v28, 6  ;;  %v8608_v19 = vrot.slane %v8606_v11, 7  ;;  %v8308_v49 = vadd.f32 %v19307_v20, %v8265_v62  ;;  %v8270_v56 = vadd.f32 %v14654_v24, %v19046_v45 }
 0x372   : > { %v8601_v57 = vrot.slane %v8599_v47, 4  ;;  %v8630_v40 = vsel %vm19467_vm3, %v8621_v21, %v19630_v41  ;;  %v8653_v14 = vshrl.u32 %v13453_v2, 16  ;;  %v8656_v63 = vshll.u32 %v13453_v2, 16  ;;  %v19657_v38 = vld [vmem:[#allocation2 + $0x20] sm:$0xff]  }
 0x373   : > { %vm22422_vm10 = vnez %v22421_v42  ;;  %8922 = vst.msk [vmem:[#allocation2 + $0x34] sm:$0xf] %vm22428_vm15, %v8630_v40  ;;  %v8609_v45 = vor.u32 %v8608_v19, %v8605_v8  ;;  %v8343_v24 = vmax.f32 %v8307_v6, 0.0  ;;  %v8346_v47 = vmax.f32 %v8310_v25, 0.0 }
 0x374   : > { %v22425_v52 = vsel %vm22422_vm10, %v22423_v4, %v22424_v43  ;;  %v8344_v44 = vmax.f32 %v8308_v49, 0.0  ;;  %v8655_v54 = vrot.slane %v8653_v14, 6  ;;  %v8658_v18 = vrot.slane %v8656_v63, 7  ;;  %v8189_v14 = vpop.f32.mrf.mxu1 }
 0x375   : > { %vm19644_vm2 = vcmp.lt.s32.totalorder %v22425_v52, 16  ;;  %v8313_v31 = vadd.f32 %v19307_v20, %v8270_v56  ;;  %v8268_v36 = vadd.f32 %v8173_v1, %v19074_v22  ;;  %vm22429_vm9 = vcmask 130048   ;;  %v22433_v52 = vld [vmem:[#allocation75_spill] sm:$0xff] }
 0x376   : > { %14717 = vmatmul.mubr.msk.bf16.gmra.mxu1 %vm22429_vm9, %v19650_v51  ;;  %v8610_v62 = vsel %vm19467_vm3, %v8601_v57, %v8609_v45  ;;  %v8611_v37 = vrot.slane %v8609_v45, 4  ;;  %v8379_v46 = vsel %vm19578_vm7, %v8343_v24, 0.0  ;;  %v8382_v26 = vsel %vm19587_vm0, %v8346_v47, 0.0  ;;  %vm22431_vm12 = vmmov %vm22429_vm9  ;;  %v22435_v45 = vld [vmem:[#allocation73_spill] sm:$0xff]  ;;  %v22436_v24 = vld [vmem:[#allocation72_spill] sm:$0xff] }
 0x377   : > { %v8631_v10 = vrot.slane %v19630_v41, 4  ;;  %8920 = vst.msk [vmem:[#allocation2 + $0x2c] sm:$0xf] %vm22430_vm13, %v8610_v62  ;;  %v13451_v22 = vpack.c.bf16 %v8379_v46, %v8379_v46  ;;  %v13454_v1 = vpack.c.bf16 %v8382_v26, %v8382_v26  ;;  %v8380_v21 = vsel %vm19598_vm6, %v8344_v44, 0.0  ;;  %14720 = vmatprep.mubr.msk.bf16.mxu1 %vm22431_vm12, %v19657_v38  ;;  %vm22432_vm7 = vmmov %vm22420_vm5  ;;  %v22442_v62 = vld [vmem:[#allocation16_spill] sm:$0xff] }
 0x378   : > { %v8620_v48 = vsel %vm19467_vm3, %v8611_v37, %v19571_v29  ;;  %v13452_v33 = vpack.c.bf16 %v8380_v21, %v8380_v21  ;;  %v8349_v28 = vmax.f32 %v8313_v31, 0.0  ;;  %v8311_v11 = vadd.f32 %v19307_v20, %v8268_v36  ;;  %v22440_v36 = vld [vmem:[#allocation20_spill] sm:$0xff]  ;;  %v22443_v37 = vld [vmem:[#allocation7_spill] sm:$0xff]  ;;  %vm22447_vm10 = vmmov %vm22432_vm7 }
 0x379   : > { %8921 = vst.msk [vmem:[#allocation2 + $0x30] sm:$0xf] %vm22432_vm7, %v8620_v48  ;;  %v8659_v41 = vor.u32 %v8658_v18, %v8655_v54  ;;  %v8633_v2 = vshrl.u32 %v13451_v22, 16  ;;  %v8636_v6 = vshll.u32 %v13451_v22, 16  ;;  %v8663_v30 = vshrl.u32 %v13454_v1, 16  ;;  %vm22461_vm13 = vmmov %vm22431_vm12 }
 0x37a   : > { %v8666_v25 = vshll.u32 %v13454_v1, 16  ;;  %v8643_v8 = vshrl.u32 %v13452_v33, 16  ;;  %v8646_v19 = vshll.u32 %v13452_v33, 16  ;;  %v8385_v49 = vsel %vm19620_vm14, %v8349_v28, 0.0  ;;  %vm22462_vm12 = vmmov %vm22432_vm7 }
 0x37b   : > { %v8635_v56 = vrot.slane %v8633_v2, 6  ;;  %v8638_v57 = vrot.slane %v8636_v6, 7  ;;  %v8665_v40 = vrot.slane %v8663_v30, 6  ;;  %v13457_v29 = vpack.c.bf16 %v8385_v49, %v8385_v49  ;;  %v14659_v30 = vpop.f32.mrf.mxu1 }
 0x37c   : > { %v8668_v63 = vrot.slane %v8666_v25, 7  ;;  %v8645_v42 = vrot.slane %v8643_v8, 6  ;;  %v8648_v4 = vrot.slane %v8646_v19, 7  ;;  %v8347_v43 = vmax.f32 %v8311_v11, 0.0 }
 0x37d   : > { %vm22434_vm0 = vnez %v22433_v52  ;;  %v8639_v50 = vor.u32 %v8638_v57, %v8635_v56  ;;  %v8693_v54 = vshrl.u32 %v13457_v29, 16  ;;  %v8696_v18 = vshll.u32 %v13457_v29, 16  ;;  %v22448_v56 = vld [vmem:[#allocation78_spill] sm:$0xff]  ;;  %v22451_v57 = vld [vmem:[#allocation31_spill] sm:$0xff] }
 0x37e   : > { %v22437_v47 = vsel %vm22434_vm0, %v22435_v45, %v22436_v24  ;;  %v9101_v31 = vshll.u32 %v19558_v5, 16  ;;  %vm22441_vm14 = vnez %v22440_v36  ;;  %v8661_v22 = vrot.slane %v8659_v41, 4  ;;  %v19701_v33 = vld [vmem:[#allocation2 + $0x28] sm:$0xff]  }
 0x37f   : > { %vm19685_vm6 = vcmp.lt.s32.totalorder %v22437_v47, 16  ;;  %v22444_v46 = vsel %vm22441_vm14, %v22442_v62, %v22443_v37  ;;  %v8669_v1 = vor.u32 %v8668_v63, %v8665_v40  ;;  %v8649_v21 = vor.u32 %v8648_v4, %v8645_v42  ;;  %v22456_v63 = vld [vmem:[#allocation81_spill] sm:$0xff]  ;;  %14721 = vmatmul.mubr.msk.bf16.gmra.mxu1 %vm22461_vm13, %v19701_v33  ;;  %v22465_v37 = vld [vmem:[#allocation54_spill] sm:$0xff] }
 0x380   : > { %vm19695_vm5 = vcmp.lt.s32.totalorder %v22444_v46, 16  ;;  %v8383_v48 = vsel %vm19644_vm2, %v8347_v43, 0.0  ;;  %v8640_v28 = vsel %vm19467_vm3, %v8631_v10, %v8639_v50  ;;  %v8641_v11 = vrot.slane %v8639_v50, 4  ;;  %v22457_v42 = vld [vmem:[#allocation77_spill] sm:$0xff]  ;;  %v19728_v52 = vld [vmem:[#allocation2 + $0x30] sm:$0xff]  }
 0x381   : > { %v8695_v2 = vrot.slane %v8693_v54, 6  ;;  %v8698_v6 = vrot.slane %v8696_v18, 7  ;;  %8923 = vst.msk [vmem:[#allocation2 + $0x38] sm:$0xf] %vm22447_vm10, %v8640_v28  ;;  %v8670_v25 = vsel %vm19467_vm3, %v8661_v22, %v8669_v1  ;;  %v8671_v8 = vrot.slane %v8669_v1, 4  ;;  %v22463_v50 = vld [vmem:[#allocation92_spill] sm:$0xff]  ;;  %v8192_v1 = vpop.f32.mrf.mxu1 }
 0x382   : > { %v8651_v19 = vrot.slane %v8649_v21, 4  ;;  %v13455_v49 = vpack.c.bf16 %v8383_v48, %v8383_v48  ;;  %vm22449_vm15 = vnez %v22448_v56  ;;  %v22458_v4 = vsel %vm18943_vm1, %v22456_v63, %v22457_v42  ;;  %8926 = vst.msk [vmem:[#allocation2 + $0x44] sm:$0xf] %vm22462_vm12, %v8670_v25  ;;  %vm22464_vm1 = vmmov %vm22432_vm7  ;;  %v22472_v25 = vld [vmem:[#allocation79_spill] sm:$0xff]  ;;  %v22483_v63 = vld [vmem:[#allocation98_spill] sm:$0xff] }
 0x383   : > { %v22452_v40 = vsel %vm22449_vm15, %v22450_v32, %v22451_v57  ;;  %vm19722_vm9 = vcmp.lt.s32.totalorder %v22458_v4, 16  ;;  %v8650_v45 = vsel %vm19467_vm3, %v8641_v11, %v8649_v21  ;;  %v19733_v24 = vor.u32 %v8698_v6, %v8695_v2  ;;  %vm22466_vm7 = vmmov %vm22461_vm13  ;;  %v22468_v11 = vld [vmem:[#allocation97_spill] sm:$0xff]  ;;  %v22469_v2 = vld [vmem:[#allocation84_spill] sm:$0xff] }
 0x384   : > { %vm19713_vm2 = vcmp.lt.s32.totalorder %v22452_v40, 16  ;;  %v19735_v47 = vrot.slane %v9101_v31, 1  ;;  %v8271_v54 = vadd.f32 %v19624_v12, %v22463_v50  ;;  %v8660_v18 = vsel %vm19467_vm3, %v8651_v19, %v8659_v41  ;;  %8924 = vst.msk [vmem:[#allocation2 + $0x3c] sm:$0xf] %vm22464_vm1, %v8650_v45  ;;  %14724 = vmatprep.mubr.msk.bf16.mxu1 %vm22466_vm7, %v19728_v52  ;;  %vm22467_vm0 = vmmov %vm22464_vm1  ;;  %v22471_v6 = vld [vmem:[#allocation83_spill] sm:$0xff]  ;;  %v22479_v32 = vld [vmem:[#allocation80_spill] sm:$0xff] }
 0x385   : > { %v8673_v36 = vshrl.u32 %v13455_v49, 16  ;;  %v8676_v62 = vshll.u32 %v13455_v49, 16  ;;  %v8269_v46 = vadd.f32 %v19648_v61, %v22465_v37  ;;  %8925 = vst.msk [vmem:[#allocation2 + $0x40] sm:$0xf] %vm22467_vm0, %v8660_v18  ;;  %v8701_v31 = vrot.slane %v19733_v24, 4  ;;  %v22476_v56 = vld [vmem:[#allocation87_spill] sm:$0xff]  ;;  %vm22488_vm1 = vmmov %vm22466_vm7 }
 0x386   : > { %v8314_v22 = vadd.f32 %v19307_v20, %v8271_v54  ;;  %v9093_v12 = vshll.u32 %v19552_v53, 16  ;;  %v9097_v41 = vshrl.u32 %v19552_v53, 16  ;;  %v8274_v61 = vadd.f32 %v19669_v0, %v22468_v11  ;;  %v22478_v53 = vld [vmem:[#allocation86_spill] sm:$0xff]  ;;  %v22484_v4 = vld [vmem:[#allocation99_spill] sm:$0xff] }
 0x387   : > { %v8675_v21 = vrot.slane %v8673_v36, 6  ;;  %v8678_v48 = vrot.slane %v8676_v62, 7  ;;  %v8312_v28 = vadd.f32 %v19307_v20, %v8269_v46  ;;  %vm22470_vm14 = vnez %v22469_v2  ;;  %v22485_v36 = vld [vmem:[#allocation100_spill] sm:$0xff]  ;;  %v22486_v46 = vld [vmem:[#allocation74_spill] sm:$0xff] }
 0x388   : > { %v22473_v19 = vsel %vm22470_vm14, %v22471_v6, %v22472_v25  ;;  %vm22477_vm15 = vnez %v22476_v56  ;;  %v8350_v10 = vmax.f32 %v8314_v22, 0.0  ;;  %v9095_v0 = vrot.slane %v9093_v12, 1 }
 0x389   : > { %vm19759_vm10 = vcmp.lt.s32.totalorder %v22473_v19, 16  ;;  %v22480_v57 = vsel %vm22477_vm15, %v22478_v53, %v22479_v32  ;;  %v8272_v42 = vadd.f32 %v8189_v14, %v22483_v63  ;;  %v8275_v45 = vadd.f32 %v14659_v30, %v22484_v4  ;;  %v15304_v14 = vld [vmem:[%s21678_s5 + $0x20] sm:$0xff]   ;;  %v19797_v19 = vpop.f32.mrf.mxu1 }
 0x38a   : > { %vm19768_vm13 = vcmp.lt.s32.totalorder %v22480_v57, 16  ;;  %v8679_v50 = vor.u32 %v8678_v48, %v8675_v21  ;;  %v8348_v54 = vmax.f32 %v8312_v28, 0.0  ;;  %v8317_v18 = vadd.f32 %v19307_v20, %v8274_v61 }
 0x38b   : > { %v8273_v62 = vadd.f32 %v8192_v1, %v22485_v36  ;;  %v8386_v37 = vsel %vm19685_vm6, %v8350_v10, 0.0  ;;  %vm22487_vm12 = vsmask.f32 7424  ;;  %v9099_v2 = vor.u32 %v9097_v41, %v9095_v0  ;;  %vm22489_vm6 = vmmov %vm22467_vm0  ;;  %v19792_v61 = vld [vmem:[#allocation2 + $0x38] sm:$0xff]   ;;  %v15419_v10 = vld [vmem:[%s21678_s5 + $0x10] sm:$0xff]  }
 0x38c   : > { %v9096_v11 = vsel %vm22487_vm12, %v22486_v46, %v9095_v0  ;;  %v8315_v22 = vadd.f32 %v19307_v20, %v8272_v42  ;;  %v8680_v30 = vsel %vm19467_vm3, %v8671_v8, %v8679_v50  ;;  %v8681_v12 = vrot.slane %v8679_v50, 4  ;;  %vm22490_vm7 = vmmov %vm22487_vm12  ;;  %v19799_v56 = vld [vmem:[#allocation2 + $0x40] sm:$0xff]   ;;  %v8205_v46 = vpop.f32.mrf.mxu1 }
 0x38d   : > { %v13458_v21 = vpack.c.bf16 %v8386_v37, %v8386_v37  ;;  %v8384_v1 = vsel %vm19695_vm5, %v8348_v54, 0.0  ;;  %14674 = vmatprep.mubr.msk.bf16.mxu0 %vm22488_vm1, %v9096_v11  ;;  %8927 = vst.msk [vmem:[#allocation2 + $0x48] sm:$0xf] %vm22489_vm6, %v8680_v30  ;;  %v8353_v41 = vmax.f32 %v8317_v18, 0.0  ;;  %v9104_v48 = vsel %vm22490_vm7, %v9099_v2, %v19735_v47  ;;  %vm22491_vm0 = vmmov %vm22488_vm1 }
 0x38e   : > { %v13456_v44 = vpack.c.bf16 %v8384_v1, %v8384_v1  ;;  %v8351_v28 = vmax.f32 %v8315_v22, 0.0  ;;  %14675 = vmatmul.mubr.msk.bf16.vlgmr.msra.gmra.mxu0 %vm22491_vm0, %v9104_v48  ;;  %v8318_v8 = vadd.f32 %v19307_v20, %v8275_v45  ;;  %v8316_v26 = vadd.f32 %v19307_v20, %v8273_v62  ;;  %vm22492_vm5 = vmmov %vm22491_vm0 }
 0x38f   : > { %v8703_v6 = vshrl.u32 %v13458_v21, 16  ;;  %v8706_v25 = vshll.u32 %v13458_v21, 16  ;;  %v8389_v57 = vsel %vm19713_vm2, %v8353_v41, 0.0  ;;  %14749 = vmatpush3.bf16.msra.mxu0 %v15419_v10  ;;  %14725 = vmatmul.mubr.msk.bf16.gmra.mxu1 %vm22492_vm5, %v19792_v61  ;;  %vm22493_vm14 = vmmov %vm22491_vm0 }
 0x390   : > { %v8683_v53 = vshrl.u32 %v13456_v44, 16  ;;  %v8686_v32 = vshll.u32 %v13456_v44, 16  ;;  %v8387_v0 = vsel %vm19722_vm9, %v8351_v28, 0.0  ;;  %v13461_v4 = vpack.c.bf16 %v8389_v57, %v8389_v57  ;;  %14728 = vmatprep.mubr.msk.bf16.mxu1 %vm22493_vm14, %v19799_v56  ;;  %14824 = vmatprep.subr.bf16.mxu0 %v15304_v14  ;;  %vm22494_vm2 = vmmov %vm22489_vm6  ;;  %v22536_v57 = vld [vmem:[#allocation30_spill] sm:$0xff] }
 0x391   : > { %v8705_v63 = vrot.slane %v8703_v6, 6  ;;  %v8708_v42 = vrot.slane %v8706_v25, 7  ;;  %v13459_v45 = vpack.c.bf16 %v8387_v0, %v8387_v0  ;;  %v8354_v54 = vmax.f32 %v8318_v8, 0.0  ;;  %vm22495_vm9 = vmmov %vm22494_vm2 }
 0x392   : > { %v8685_v29 = vrot.slane %v8683_v53, 6  ;;  %v8688_v50 = vrot.slane %v8686_v32, 7  ;;  %v8352_v18 = vmax.f32 %v8316_v26, 0.0  ;;  %v8733_v62 = vshrl.u32 %v13461_v4, 16  ;;  %v22496_v26 = vld [vmem:[#allocation90_spill] sm:$0xff]  ;;  %v22499_v53 = vld [vmem:[#allocation85_spill] sm:$0xff]  ;;  %vm22517_vm7 = vmmov %vm22494_vm2 }
 0x393   : > { %v8709_v36 = vor.u32 %v8708_v42, %v8705_v63  ;;  %v8736_v37 = vshll.u32 %v13461_v4, 16  ;;  %v8713_v43 = vshrl.u32 %v13459_v45, 16  ;;  %v8716_v2 = vshll.u32 %v13459_v45, 16  ;;  %v22505_v4 = vld [vmem:[#allocation40_spill] sm:$0xff]  ;;  %vm22525_vm14 = vmmov %vm22494_vm2 }
 0x394   : > { %v8689_v11 = vor.u32 %v8688_v50, %v8685_v29  ;;  %v8390_v22 = vsel %vm19759_vm10, %v8354_v54, 0.0  ;;  %v8388_v30 = vsel %vm19768_vm13, %v8352_v18, 0.0  ;;  %v8735_v1 = vrot.slane %v8733_v62, 6  ;;  %v22506_v45 = vld [vmem:[#allocation88_spill] sm:$0xff]  ;;  %v22510_v54 = vld [vmem:[#allocation43_spill] sm:$0xff]  ;;  %v22512_v18 = vld [vmem:[#allocation94_spill] sm:$0xff] }
 0x395   : > { %v8710_v14 = vsel %vm19467_vm3, %v8701_v31, %v8709_v36  ;;  %v8711_v21 = vrot.slane %v8709_v36, 4  ;;  %v8738_v44 = vrot.slane %v8736_v37, 7  ;;  %v8715_v28 = vrot.slane %v8713_v43, 6  ;;  %v22498_v31 = vld [vmem:[#allocation37_spill] sm:$0xff] }
 0x396   : > { %8930 = vst.msk [vmem:[#allocation2 + $0x54] sm:$0xf] %vm22494_vm2, %v8710_v14  ;;  %v8690_v41 = vsel %vm19467_vm3, %v8681_v12, %v8689_v11  ;;  %v8691_v48 = vrot.slane %v8689_v11, 4  ;;  %v8718_v49 = vrot.slane %v8716_v2, 7  ;;  %v13462_v6 = vpack.c.bf16 %v8390_v22, %v8390_v22  ;;  %v14663_v12 = vpop.f32.mrf.mxu1  ;;  %v22513_v36 = vld [vmem:[#allocation89_spill] sm:$0xff] }
 0x397   : > { %8928 = vst.msk [vmem:[#allocation2 + $0x4c] sm:$0xf] %vm22495_vm9, %v8690_v41  ;;  %v8739_v40 = vor.u32 %v8738_v44, %v8735_v1  ;;  %v13460_v25 = vpack.c.bf16 %v8388_v30, %v8388_v30  ;;  %v9105_v8 = vshrl.u32 %v19558_v5, 16  ;;  %vm22497_vm10 = vnez %v22496_v26  ;;  %v22503_v5 = vld [vmem:[#allocation93_spill] sm:$0xff]  ;;  %v22520_v44 = vld [vmem:[#allocation95_spill] sm:$0xff] }
 0x398   : > { %v22500_v32 = vsel %vm22497_vm10, %v22498_v31, %v22499_v53  ;;  %v8700_v10 = vsel %vm19467_vm3, %v8691_v48, %v19733_v24  ;;  %v8719_v0 = vor.u32 %v8718_v49, %v8715_v28  ;;  %v9109_v63 = vshll.u32 %v19650_v51, 16  ;;  %v22518_v1 = vld [vmem:[#allocation45_spill] sm:$0xff]  ;;  %v22521_v41 = vld [vmem:[#allocation91_spill] sm:$0xff]  ;;  %vm22529_vm10 = vmmov %vm22517_vm7 }
 0x399   : > { %vm19830_vm15 = vcmp.lt.s32.totalorder %v22500_v32, 16  ;;  %v9113_v42 = vshrl.u32 %v19650_v51, 16  ;;  %vm22504_vm13 = vnez %v22503_v5  ;;  %vm22511_vm1 = vnez %v22510_v54  ;;  %8929 = vst.msk [vmem:[#allocation2 + $0x50] sm:$0xf] %vm22517_vm7, %v8700_v10 }
 0x39a   : > { %v22507_v29 = vsel %vm22504_vm13, %v22505_v4, %v22506_v45  ;;  %v22514_v62 = vsel %vm22511_vm1, %v22512_v18, %v22513_v36  ;;  %v8741_v51 = vrot.slane %v8739_v40, 4  ;;  %v8743_v37 = vshrl.u32 %v13462_v6, 16 }
 0x39b   : > { %vm19844_vm12 = vcmp.lt.s32.totalorder %v22507_v29, 16  ;;  %vm19853_vm6 = vcmp.lt.s32.totalorder %v22514_v62, 16  ;;  %v8746_v43 = vshll.u32 %v13462_v6, 16  ;;  %v8723_v11 = vshrl.u32 %v13460_v25, 16 }
 0x39c   : > { %v8720_v2 = vsel %vm19467_vm3, %v8711_v21, %v8719_v0  ;;  %v8721_v22 = vrot.slane %v8719_v0, 4  ;;  %v8726_v30 = vshll.u32 %v13460_v25, 16  ;;  %v9107_v14 = vor.u32 %v9105_v8, %v19735_v47  ;;  %v8208_v21 = vpop.f32.mrf.mxu1  ;;  %v22526_v25 = vld [vmem:[#allocation51_spill] sm:$0xff] }
 0x39d   : > { %vm22519_vm0 = vnez %v22518_v1  ;;  %8931 = vst.msk [vmem:[#allocation2 + $0x58] sm:$0xf] %vm22525_vm14, %v8720_v2  ;;  %v8745_v49 = vrot.slane %v8743_v37, 6  ;;  %v8748_v6 = vrot.slane %v8746_v43, 7  ;;  %v8725_v26 = vrot.slane %v8723_v11, 6 }
 0x39e   : > { %v22522_v48 = vsel %vm22519_vm0, %v22520_v44, %v22521_v41  ;;  %v9111_v31 = vrot.slane %v9109_v63, 1  ;;  %v8728_v53 = vrot.slane %v8726_v30, 7  ;;  %v8278_v47 = vadd.f32 %v19797_v19, %v22526_v25  ;;  %v19882_v19 = vld [vmem:[#allocation2 + $0x48] sm:$0xff]   ;;  %v22537_v41 = vld [vmem:[#allocation96_spill] sm:$0xff] }
 0x39f   : > { %vm19866_vm5 = vcmp.lt.s32.totalorder %v22522_v48, 16  ;;  %v9117_v8 = vshll.u32 %v19657_v38, 16  ;;  %v8276_v32 = vadd.f32 %v8205_v46, %v19256_v17  ;;  %v19875_v10 = vor.u32 %v8748_v6, %v8745_v49 }
 0x3a0   : > { %vm22527_vm2 = vsmask.f32 7424  ;;  %v9115_v5 = vor.u32 %v9113_v42, %v9111_v31  ;;  %v8279_v4 = vadd.f32 %v14663_v12, %v19259_v3  ;;  %v8729_v45 = vor.u32 %v8728_v53, %v8725_v26  ;;  %v14666_v12 = vpop.f32.mrf.mxu1 }
 0x3a1   : > { %v9112_v0 = vsel %vm22527_vm2, %v9107_v14, %v9111_v31  ;;  %vm22528_vm9 = vcmask 130048   ;;  %v8321_v63 = vadd.f32 %v19307_v20, %v8278_v47  ;;  %v9119_v29 = vrot.slane %v9117_v8, 1  ;;  %vm22530_vm13 = vmmov %vm22527_vm2 }
 0x3a2   : > { %14678 = vmatprep.mubr.msk.bf16.mxu0 %vm22528_vm9, %v9112_v0  ;;  %v8319_v54 = vadd.f32 %v19307_v20, %v8276_v32  ;;  %v8750_v17 = vsel %vm19467_vm3, %v8741_v51, %v19875_v10  ;;  %v8751_v46 = vrot.slane %v19875_v10, 4  ;;  %v8322_v42 = vadd.f32 %v19307_v20, %v8279_v4  ;;  %vm22531_vm1 = vmmov %vm22528_vm9  ;;  %v19896_v51 = vld [vmem:[#allocation2 + $0x50] sm:$0xff]   ;;  %v8221_v49 = vpop.f32.mrf.mxu1 }
 0x3a3   : > { %v8277_v3 = vadd.f32 %v8208_v21, %v19285_v39  ;;  %8934 = vst.msk [vmem:[#allocation2 + $0x64] sm:$0xf] %vm22529_vm10, %v8750_v17  ;;  %v8730_v18 = vsel %vm19467_vm3, %v8721_v22, %v8729_v45  ;;  %v8731_v36 = vrot.slane %v8729_v45, 4  ;;  %v8357_v62 = vmax.f32 %v8321_v63, 0.0  ;;  %14729 = vmatmul.mubr.msk.bf16.gmra.mxu1 %vm22531_vm1, %v19882_v19  ;;  %vm22532_vm0 = vmmov %vm22531_vm1 }
 0x3a4   : > { %v9120_v37 = vsel %vm22530_vm13, %v9115_v5, %v9119_v29  ;;  %8932 = vst.msk [vmem:[#allocation2 + $0x5c] sm:$0xf] %vm22517_vm7, %v8730_v18  ;;  %v8355_v39 = vmax.f32 %v8319_v54, 0.0  ;;  %v8358_v43 = vmax.f32 %v8322_v42, 0.0  ;;  %v9121_v2 = vshrl.u32 %v19657_v38, 16  ;;  %vm22533_vm14 = vmmov %vm22532_vm0  ;;  %v22544_v54 = vld [vmem:[#allocation25_spill] sm:$0xff]  ;;  %v14667_v28 = vpop.f32.mrf.mxu1 }
 0x3a5   : > { %14679 = vmatmul.mubr.msk.bf16.gmra.mxu0 %vm22532_vm0, %v9120_v37  ;;  %v8320_v11 = vadd.f32 %v19307_v20, %v8277_v3  ;;  %v8740_v22 = vsel %vm19467_vm3, %v8731_v36, %v8739_v40  ;;  %v8393_v30 = vsel %vm19830_vm15, %v8357_v62, 0.0  ;;  %v9125_v14 = vshll.u32 %v19701_v33, 16  ;;  %14732 = vmatprep.mubr.msk.bf16.mxu1 %vm22533_vm14, %v19896_v51  ;;  %vm22534_vm2 = vmmov %vm22517_vm7 }
 0x3a6   : > { %v9129_v1 = vshrl.u32 %v19701_v33, 16  ;;  %8933 = vst.msk [vmem:[#allocation2 + $0x60] sm:$0xf] %vm22534_vm2, %v8740_v22  ;;  %v13465_v44 = vpack.c.bf16 %v8393_v30, %v8393_v30  ;;  %v8391_v20 = vsel %vm19844_vm12, %v8355_v39, 0.0  ;;  %v8394_v38 = vsel %vm19853_vm6, %v8358_v43, 0.0  ;;  %vm22541_vm12 = vmmov %vm22530_vm13 }
 0x3a7   : > { %v8356_v40 = vmax.f32 %v8320_v11, 0.0  ;;  %vm22535_vm9 = vnez %v22267_v58  ;;  %v13463_v6 = vpack.c.bf16 %v8391_v20, %v8391_v20  ;;  %v13466_v26 = vpack.c.bf16 %v8394_v38, %v8394_v38  ;;  %vm22548_vm13 = vmmov %vm22532_vm0 }
 0x3a8   : > { %v22538_v48 = vsel %vm22535_vm9, %v22536_v57, %v22537_v41  ;;  %v9123_v31 = vor.u32 %v9121_v2, %v9119_v29  ;;  %v9127_v21 = vrot.slane %v9125_v14, 1  ;;  %v8773_v50 = vshrl.u32 %v13465_v44, 16  ;;  %v22543_v29 = vld [vmem:[#allocation102_spill] sm:$0xff]  ;;  %v22554_v2 = vld [vmem:[#allocation101_spill] sm:$0xff]  ;;  %v8224_v41 = vpop.f32.mrf.mxu1  ;;  %vm22559_vm14 = vmmov %vm22548_vm13 }
 0x3a9   : > { %vm19920_vm15 = vcmp.lt.s32.totalorder %v22538_v48, 16  ;;  %v8776_v53 = vshll.u32 %v13465_v44, 16  ;;  %v8392_v24 = vsel %vm19866_vm5, %v8356_v40, 0.0  ;;  %v8282_v25 = vadd.f32 %v14666_v12, %v19302_v27  ;;  %v22558_v40 = vld [vmem:[#allocation10_spill] sm:$0xff]  ;;  %vm22560_vm2 = vmmov %vm22548_vm13 }
 0x3aa   : > { %v8753_v58 = vshrl.u32 %v13463_v6, 16  ;;  %v8756_v47 = vshll.u32 %v13463_v6, 16  ;;  %v8783_v8 = vshrl.u32 %v13466_v26, 16  ;;  %v8786_v32 = vshll.u32 %v13466_v26, 16  ;;  %v19977_v48 = vld [vmem:[%s21678_s5 + $0x28] sm:$0xff]  }
 0x3ab   : > { %v8775_v0 = vrot.slane %v8773_v50, 6  ;;  %v8778_v5 = vrot.slane %v8776_v53, 7  ;;  %v13464_v4 = vpack.c.bf16 %v8392_v24, %v8392_v24  ;;  %v9128_v45 = vsel %vm22541_vm12, %v9123_v31, %v9127_v21  ;;  %v19958_v14 = vld [vmem:[#allocation2 + $0x58] sm:$0xff]   ;;  %14862 = vmatprep.subr.bf16.mxu1 %v19977_v48  ;;  %v22563_v24 = vld [vmem:[#allocation27_spill] sm:$0xff] }
 0x3ac   : > { %v22545_v17 = vsel %vm19236_vm11, %v22543_v29, %v22544_v54  ;;  %vm788_vm5 = vcmp.ne.s32.totalorder %v19406_v35, 0  ;;  %vm824_vm10 = vcmp.lt.s32.totalorder %v19406_v35, 0  ;;  %v8755_v27 = vrot.slane %v8753_v58, 6  ;;  %14682 = vmatprep.mubr.msk.bf16.mxu0 %vm22548_vm13, %v9128_v45  ;;  %14733 = vmatmul.mubr.msk.bf16.gmra.mxu1 %vm22559_vm14, %v19958_v14 }
 0x3ad   : > { %vm19933_vm6 = vcmp.lt.s32.totalorder %v22545_v17, 16  ;;  %v8758_v3 = vrot.slane %v8756_v47, 7  ;;  %v8785_v12 = vrot.slane %v8783_v8, 6  ;;  %v8788_v18 = vrot.slane %v8786_v32, 7  ;;  %v19969_v44 = vld [vmem:[#allocation2 + $0x60] sm:$0xff]   ;;  %vm20025_vm14 = vmand %vm824_vm10, %vm788_vm5 }
 0x3ae   : > { %v8779_v36 = vor.u32 %v8778_v5, %v8775_v0  ;;  %v8763_v62 = vshrl.u32 %v13464_v4, 16  ;;  %v8766_v37 = vshll.u32 %v13464_v4, 16  ;;  %v9131_v39 = vor.u32 %v9129_v1, %v9127_v21  ;;  %14736 = vmatprep.mubr.msk.bf16.mxu1 %vm22560_vm2, %v19969_v44  ;;  %v22565_v4 = vld [vmem:[#allocation11_spill] sm:$0xff]  ;;  %vm22583_vm10 = vmmov %vm22560_vm2 }
 0x3af   : > { %vm22549_vm11 = vnez %v22290_v13  ;;  %vm22553_vm7 = vnez %v22293_v15  ;;  %v8759_v1 = vor.u32 %v8758_v3, %v8755_v27  ;;  %v19960_v13 = vor.u32 %v8788_v18, %v8785_v12 }
 0x3b0   : > { %v22550_v43 = vsel %vm22549_vm11, %v19248_v55, %v19174_v7  ;;  %v22555_v22 = vsel %vm22553_vm7, %v19283_v23, %v22554_v2  ;;  %v19965_v55 = vld [vmem:[%s21677_s4] ss:$0 sm:$0xff]  ;;  %v9133_v15 = vshll.u32 %v19728_v52, 16  ;;  %v8781_v23 = vrot.slane %v8779_v36, 4  ;;  %vm22570_vm7 = vmmov %vm22560_vm2 }
 0x3b1   : > { %vm19945_vm1 = vcmp.lt.s32.totalorder %v22550_v43, 16  ;;  %vm19954_vm0 = vcmp.lt.s32.totalorder %v22555_v22, 16  ;;  %v8325_v7 = vadd.f32 %v19965_v55, %v8282_v25  ;;  %v8765_v20 = vrot.slane %v8763_v62, 6  ;;  %v22574_v22 = vld [vmem:[#allocation17_spill] sm:$0xff] }
 0x3b2   : > { %v8768_v38 = vrot.slane %v8766_v37, 7  ;;  %v8280_v57 = vadd.f32 %v8221_v49, %v22558_v40  ;;  %v8760_v6 = vsel %vm19467_vm3, %v8751_v46, %v8759_v1  ;;  %v8761_v26 = vrot.slane %v8759_v1, 4  ;;  %v22575_v40 = vld [vmem:[#allocation9_spill] sm:$0xff] }
 0x3b3   : > { %v8791_v31 = vrot.slane %v19960_v13, 4  ;;  %v8361_v21 = vmax.f32 %v8325_v7, 0.0  ;;  %vm22561_vm9 = vcmask 125952   ;;  %v8790_v49 = vsel %vm19467_vm3, %v8781_v23, %v19960_v13 }
 0x3b4   : > { %8935 = vst.msk [vmem:[#allocation2 + $0x68] sm:$0xf] %vm22561_vm9, %v8760_v6  ;;  %v8769_v50 = vor.u32 %v8768_v38, %v8765_v20  ;;  %v9135_v53 = vrot.slane %v9133_v15, 1  ;;  %v8323_v10 = vadd.f32 %v19965_v55, %v8280_v57  ;;  %vm22562_vm12 = vmmov %vm22561_vm9  ;;  %v8283_v25 = vadd.f32 %v14667_v28, %v22563_v24  ;;  %v14670_v28 = vpop.f32.mrf.mxu1 }
 0x3b5   : > { %8938 = vst.msk [vmem:[#allocation2 + $0x74] sm:$0xf] %vm22562_vm12, %v8790_v49  ;;  %v8397_v46 = vsel %vm19920_vm15, %v8361_v21, 0.0  ;;  %v8281_v58 = vadd.f32 %v8224_v41, %v19363_v9  ;;  %v9137_v47 = vshrl.u32 %v19728_v52, 16  ;;  %vm22564_vm13 = vsmask.f32 7424  ;;  %vm22569_vm15 = vmmov %vm22561_vm9 }
 0x3b6   : > { %v8770_v8 = vsel %vm19467_vm3, %v8761_v26, %v8769_v50  ;;  %v8771_v32 = vrot.slane %v8769_v50, 4  ;;  %v13469_v0 = vpack.c.bf16 %v8397_v46, %v8397_v46  ;;  %v9136_v5 = vsel %vm22564_vm13, %v9131_v39, %v9135_v53  ;;  %v8237_v38 = vpop.f32.mrf.mxu1  ;;  %v22578_v21 = vld [vmem:[#allocation18_spill] sm:$0xff]  ;;  %v22579_v49 = vld [vmem:[#allocation13_spill] sm:$0xff] }
 0x3b7   : > { %v22566_v45 = vsel %vm19356_vm4, %v19348_v59, %v22565_v4  ;;  %8936 = vst.msk [vmem:[#allocation2 + $0x6c] sm:$0xf] %vm22569_vm15, %v8770_v8  ;;  %14683 = vmatmul.mubr.msk.bf16.gmra.mxu0 %vm22570_vm7, %v9136_v5  ;;  %v8359_v9 = vmax.f32 %v8323_v10, 0.0  ;;  %v8326_v52 = vadd.f32 %v19965_v55, %v8283_v25  ;;  %v8324_v63 = vadd.f32 %v19965_v55, %v8281_v58  ;;  %vm22571_vm4 = vmmov %vm22561_vm9 }
 0x3b8   : > { %vm20006_vm11 = vcmp.lt.s32.totalorder %v22566_v45, 16  ;;  %v9139_v29 = vor.u32 %v9137_v47, %v9135_v53  ;;  %v8780_v34 = vsel %vm19467_vm3, %v8771_v32, %v8779_v36  ;;  %v8813_v54 = vshrl.u32 %v13469_v0, 16  ;;  %v22584_v45 = vld [vmem:[#allocation3_spill] sm:$0xff] }
 0x3b9   : > { %v8816_v17 = vshll.u32 %v13469_v0, 16  ;;  %v9141_v59 = vshll.u32 %v19792_v61, 16  ;;  %8937 = vst.msk [vmem:[#allocation2 + $0x70] sm:$0xf] %vm22571_vm4, %v8780_v34  ;;  %v8395_v27 = vsel %vm19933_vm6, %v8359_v9, 0.0  ;;  %v8362_v3 = vmax.f32 %v8326_v52, 0.0  ;;  %vm22576_vm6 = vmmov %vm22564_vm13  ;;  %v14671_v52 = vpop.f32.mrf.mxu1 }
 0x3ba   : > { %v8360_v12 = vmax.f32 %v8324_v63, 0.0  ;;  %v9145_v18 = vshrl.u32 %v19792_v61, 16  ;;  %v8815_v62 = vrot.slane %v8813_v54, 6  ;;  %v13467_v39 = vpack.c.bf16 %v8395_v27, %v8395_v27 }
 0x3bb   : > { %v8818_v37 = vrot.slane %v8816_v17, 7  ;;  %v9143_v43 = vrot.slane %v9141_v59, 1  ;;  %v8398_v42 = vsel %vm19945_vm1, %v8362_v3, 0.0  ;;  %v8286_v1 = vadd.f32 %v14670_v28, %v22574_v22  ;;  %vm22586_vm1 = vmmov %vm22576_vm6 }
 0x3bc   : > { %v8396_v2 = vsel %vm19954_vm0, %v8360_v12, 0.0  ;;  %v9149_v7 = vshll.u32 %v19799_v56, 16  ;;  %v8793_v15 = vshrl.u32 %v13467_v39, 16  ;;  %v8796_v23 = vshll.u32 %v13467_v39, 16  ;;  %vm22587_vm0 = vmmov %vm22560_vm2 }
 0x3bd   : > { %v13470_v20 = vpack.c.bf16 %v8398_v42, %v8398_v42  ;;  %v932_v57 = vsel %vm20025_vm14, %v22575_v40, %v19406_v35  ;;  %v8819_v41 = vor.u32 %v8818_v37, %v8815_v62  ;;  %v13468_v6 = vpack.c.bf16 %v8396_v2, %v8396_v2  ;;  %vm22589_vm9 = vmmov %vm22587_vm0  ;;  %v22592_v37 = vld [vmem:[#allocation15_spill] sm:$0xff]  ;;  %v22595_v40 = vld [vmem:[#allocation12_spill] sm:$0xff] }
 0x3be   : > { %v9144_v11 = vsel %vm22576_vm6, %v9139_v29, %v9143_v43  ;;  %v8329_v30 = vadd.f32 %v19965_v55, %v8286_v1  ;;  %v22580_v50 = vsel %vm19383_vm8, %v22578_v21, %v22579_v49  ;;  %v8795_v10 = vrot.slane %v8793_v15, 6  ;;  %v20051_v32 = vld [vmem:[#allocation2 + $0x68] sm:$0xff]   ;;  %vm22585_vm8 = vmmov %vm22560_vm2 }
 0x3bf   : > { %vm20046_vm5 = vcmp.lt.s32.totalorder %v22580_v50, 16  ;;  %v8798_v46 = vrot.slane %v8796_v23, 7  ;;  %v8823_v24 = vshrl.u32 %v13470_v20, 16  ;;  %v9147_v25 = vor.u32 %v9145_v18, %v9143_v43  ;;  %14686 = vmatprep.mubr.msk.bf16.mxu0 %vm22583_vm10, %v9144_v11  ;;  %14737 = vmatmul.mubr.msk.bf16.gmra.mxu1 %vm22585_vm8, %v20051_v32  ;;  %vm22588_vm2 = vmmov %vm22571_vm4  ;;  %v8240_v43 = vpop.f32.mrf.mxu1 }
 0x3c0   : > { %v8826_v35 = vshll.u32 %v13470_v20, 16  ;;  %v8803_v58 = vshrl.u32 %v13468_v6, 16  ;;  %v8806_v47 = vshll.u32 %v13468_v6, 16  ;;  %v8365_v8 = vmax.f32 %v8329_v30, 0.0  ;;  %v20054_v63 = vld [vmem:[#allocation2 + $0x70] sm:$0xff]   ;;  %vm22594_vm15 = vmmov %vm22588_vm2 }
 0x3c1   : > { %v8799_v0 = vor.u32 %v8798_v46, %v8795_v10  ;;  %v8825_v5 = vrot.slane %v8823_v24, 6  ;;  %v9151_v4 = vrot.slane %v9149_v7, 1  ;;  %v8284_v9 = vadd.f32 %v8237_v38, %v22584_v45  ;;  %14740 = vmatprep.mubr.msk.bf16.mxu1 %vm22587_vm0, %v20054_v63  ;;  %vm22596_vm4 = vmmov %vm22588_vm2 }
 0x3c2   : > { %v8828_v29 = vrot.slane %v8826_v35, 7  ;;  %v8805_v34 = vrot.slane %v8803_v58, 6  ;;  %v8808_v54 = vrot.slane %v8806_v47, 7  ;;  %v8401_v17 = vsel %vm20006_vm11, %v8365_v8, 0.0  ;;  %vm22593_vm11 = vmmov %vm22588_vm2 }
 0x3c3   : > { %v8821_v59 = vrot.slane %v8819_v41, 4  ;;  %v8800_v28 = vsel %vm19467_vm3, %v8791_v31, %v8799_v0  ;;  %v13473_v27 = vpack.c.bf16 %v8401_v17, %v8401_v17  ;;  %v9152_v3 = vsel %vm22586_vm1, %v9147_v25, %v9151_v4  ;;  %vm22598_vm10 = vmmov %vm22587_vm0 }
 0x3c4   : > { %v8801_v12 = vrot.slane %v8799_v0, 4  ;;  %8939 = vst.msk [vmem:[#allocation2 + $0x78] sm:$0xf] %vm22588_vm2, %v8800_v28  ;;  %v20068_v33 = vor.u32 %v8828_v29, %v8825_v5  ;;  %v8809_v18 = vor.u32 %v8808_v54, %v8805_v34  ;;  %14687 = vmatmul.mubr.msk.bf16.gmra.mxu0 %vm22589_vm9, %v9152_v3  ;;  %v8327_v36 = vadd.f32 %v19965_v55, %v8284_v9  ;;  %vm22599_vm8 = vmmov %vm22586_vm1 }
 0x3c5   : > { %v8853_v13 = vshrl.u32 %v13473_v27, 16  ;;  %v8856_v62 = vshll.u32 %v13473_v27, 16  ;;  %vm20072_vm12 = vcmp.lt.s32.totalorder %v932_v57, 16  ;;  %v8287_v39 = vadd.f32 %v14671_v52, %v22592_v37  ;;  %vm22601_vm2 = vmmov %vm22587_vm0 }
 0x3c6   : > { %v8830_v42 = vsel %vm19467_vm3, %v8821_v59, %v20068_v33  ;;  %v8810_v2 = vsel %vm19467_vm3, %v8801_v12, %v8809_v18  ;;  %v8811_v22 = vrot.slane %v8809_v18, 4  ;;  %vm786_vm13 = vcmp.ne.s32.totalorder %v19565_v16, 0  ;;  %vm22602_vm9 = vmmov %vm22596_vm4 }
 0x3c7   : > { %8942 = vst.msk [vmem:[#allocation2 + $0x84] sm:$0xf] %vm22593_vm11, %v8830_v42  ;;  %v8855_v1 = vrot.slane %v8853_v13, 6  ;;  %v8858_v7 = vrot.slane %v8856_v62, 7  ;;  %v8363_v15 = vmax.f32 %v8327_v36, 0.0  ;;  %v8330_v23 = vadd.f32 %v19965_v55, %v8287_v39 }
 0x3c8   : > { %8940 = vst.msk [vmem:[#allocation2 + $0x7c] sm:$0xf] %vm22594_vm15, %v8810_v2  ;;  %v8820_v20 = vsel %vm19467_vm3, %v8811_v22, %v8819_v41  ;;  %vm822_vm7 = vcmp.lt.s32.totalorder %v19565_v16, 0  ;;  %v894_v38 = vadd.s32 18, %v19565_v16  ;;  %v8285_v57 = vadd.f32 %v8240_v43, %v22595_v40  ;;  %v8947_v39 = vld [vmem:[#allocation2 + $0x98] sm:$0x3]  ;;  %vm22607_vm15 = vmmov %vm22587_vm0 }
 0x3c9   : > { %v8831_v6 = vrot.slane %v20068_v33, 4  ;;  %8941 = vst.msk [vmem:[#allocation2 + $0x80] sm:$0xf] %vm22596_vm4, %v8820_v20  ;;  %v8399_v11 = vsel %vm20046_vm5, %v8363_v15, 0.0  ;;  %v8366_v30 = vmax.f32 %v8330_v23, 0.0  ;;  %vm858_vm14 = vmand %vm822_vm7, %vm786_vm13  ;;  %v9153_v26 = vshrl.u32 %v19799_v56, 16 }
 0x3ca   : > { %v13471_v41 = vpack.c.bf16 %v8399_v11, %v8399_v11  ;;  %v930_v21 = vsel %vm858_vm14, %v894_v38, %v19565_v16  ;;  %v8328_v49 = vadd.f32 %v19965_v55, %v8285_v57  ;;  %v9157_v50 = vshll.u32 %v19882_v19, 16  ;;  %vm22597_vm5 = vmmov %vm22586_vm1 }
 0x3cb   : > { %v20101_v10 = vor.u32 %v8858_v7, %v8855_v1  ;;  %v8402_v46 = vsel %vm20072_vm12, %v8366_v30, 0.0  ;;  %vm966_vm6 = vcmp.lt.s32.totalorder %v930_v21, 16  ;;  %v9155_v53 = vor.u32 %v9153_v26, %v9151_v4  ;;  %vm22600_vm1 = vmmov %vm22587_vm0 }
 0x3cc   : > { %v8833_v24 = vshrl.u32 %v13471_v41, 16  ;;  %v8836_v25 = vshll.u32 %v13471_v41, 16  ;;  %v13474_v35 = vpack.c.bf16 %v8402_v46, %v8402_v46  ;;  %v8364_v58 = vmax.f32 %v8328_v49, 0.0  ;;  %vm22603_vm12 = vmmov %vm22596_vm4 }
 0x3cd   : > { %v9159_v47 = vrot.slane %v9157_v50, 1  ;;  %v9161_v8 = vshrl.u32 %v19882_v19, 16  ;;  %v9165_v16 = vshll.u32 %v19896_v51, 16  ;;  %v9169_v55 = vshrl.u32 %v19896_v51, 16  ;;  %vm22604_vm13 = vmmov %vm22597_vm5 }
 0x3ce   : > { %v8835_v0 = vrot.slane %v8833_v24, 6  ;;  %v8838_v5 = vrot.slane %v8836_v25, 7  ;;  %v8863_v45 = vshrl.u32 %v13474_v35, 16  ;;  %v8866_v9 = vshll.u32 %v13474_v35, 16  ;;  %vm22608_vm7 = vmmov %vm22597_vm5  ;;  %v20140_v24 = vld [vmem:[#allocation2 + $0xc] sm:$0xf] }
 0x3cf   : > { %v8400_v52 = vsel %vm966_vm6, %v8364_v58, 0.0  ;;  %v9160_v29 = vsel %vm22597_vm5, %v9155_v53, %v9159_v47  ;;  %v9163_v34 = vor.u32 %v9161_v8, %v9159_v47  ;;  %v9167_v4 = vrot.slane %v9165_v16, 1  ;;  %v20109_v54 = vld [vmem:[#allocation2 + $0x78] sm:$0xff]   ;;  %v9689_v25 = vld [vmem:[#allocation2] sm:$0xe]  ;;  %vm22609_vm4 = vmmov %vm22597_vm5 }
 0x3d0   : > { %v8839_v17 = vor.u32 %v8838_v5, %v8835_v0  ;;  %v8865_v59 = vrot.slane %v8863_v45, 6  ;;  %v8868_v28 = vrot.slane %v8866_v9, 7  ;;  %v13472_v27 = vpack.c.bf16 %v8400_v52, %v8400_v52  ;;  %14690 = vmatprep.mubr.msk.bf16.mxu0 %vm22598_vm10, %v9160_v29  ;;  %v20112_v3 = vld [vmem:[#allocation2 + $0x80] sm:$0xff]   ;;  %14741 = vmatmul.mubr.msk.bf16.gmra.mxu1 %vm22600_vm1, %v20109_v54  ;;  %v10006_v16 = vld [vmem:[#allocation2 + $0x8] sm:$0xe]  ;;  %vm22610_vm14 = vmmov %vm22602_vm9 }
 0x3d1   : > { %v8861_v12 = vrot.slane %v20101_v10, 4  ;;  %v9168_v33 = vsel %vm22599_vm8, %v9163_v34, %v9167_v4  ;;  %v9171_v18 = vor.u32 %v9169_v55, %v9167_v4  ;;  %v9173_v36 = vshll.u32 %v19958_v14, 16  ;;  %14744 = vmatprep.mubr.msk.bf16.mxu1 %vm22601_vm2, %v20112_v3  ;;  %v20146_v55 = vld [vmem:[#allocation2 + $0x10] sm:$0xff]   ;;  %vm22611_vm6 = vmmov %vm22587_vm0  ;;  %v15421_v34 = vld [vmem:[#allocation2 + $0x4] sm:$0xf] }
 0x3d2   : > { %v8840_v13 = vsel %vm19467_vm3, %v8831_v6, %v8839_v17  ;;  %v8869_v62 = vor.u32 %v8868_v28, %v8865_v59  ;;  %v8843_v31 = vshrl.u32 %v13472_v27, 16  ;;  %14691 = vmatmul.mubr.msk.bf16.gmra.mxu0 %vm22587_vm0, %v9168_v33  ;;  %v9177_v37 = vshrl.u32 %v19958_v14, 16  ;;  %v22605_v6 = vld [vmem:[#allocation6_spill] sm:$0xff]  ;;  %vm22612_vm5 = vmmov %vm22587_vm0 }
 0x3d3   : > { %8943 = vst.msk [vmem:[#allocation2 + $0x88] sm:$0xf] %vm22602_vm9, %v8840_v13  ;;  %v8846_v43 = vshll.u32 %v13472_v27, 16  ;;  %v9175_v42 = vrot.slane %v9173_v36, 1  ;;  %v9181_v2 = vshll.u32 %v19969_v44, 16  ;;  %v9185_v22 = vshrl.u32 %v19969_v44, 16  ;;  %vm22613_vm10 = vmmov %vm22602_vm9 }
 0x3d4   : > { %v8870_v1 = vsel %vm19467_vm3, %v8861_v12, %v8869_v62  ;;  %v8871_v7 = vrot.slane %v8869_v62, 4  ;;  %v8845_v15 = vrot.slane %v8843_v31, 6  ;;  %v9189_v23 = vshll.u32 %v20051_v32, 16  ;;  %v20162_v28 = vld [vmem:[#allocation2 + $0x20] sm:$0xff]   ;;  %v20166_v12 = vld [vmem:[#allocation2 + $0x30] sm:$0xff]   ;;  %v20170_v13 = vld [vmem:[#allocation2 + $0x38] sm:$0xff]  }
 0x3d5   : > { %8946 = vst.msk [vmem:[#allocation2 + $0x94] sm:$0xf] %vm22603_vm12, %v8870_v1  ;;  %v8848_v20 = vrot.slane %v8846_v43, 7  ;;  %v9176_v38 = vsel %vm22604_vm13, %v9171_v18, %v9175_v42  ;;  %v9179_v40 = vor.u32 %v9177_v37, %v9175_v42  ;;  %v9183_v57 = vrot.slane %v9181_v2, 1  ;;  %v20174_v42 = vld [vmem:[#allocation2 + $0x40] sm:$0xff]   ;;  %v15423_v2 = vld [vmem:[#allocation2 + $0x10] sm:$0xff]   ;;  %vm22617_vm2 = vmmov %vm22587_vm0 }
 0x3d6   : > { %vm22606_vm11 = vnez %v22605_v6  ;;  %14694 = vmatprep.mubr.msk.bf16.mxu0 %vm22607_vm15, %v9176_v38  ;;  %v9191_v30 = vrot.slane %v9189_v23, 1  ;;  %v9197_v26 = vshll.u32 %v20054_v63, 16  ;;  %v8841_v41 = vrot.slane %v8839_v17, 4  ;;  %v20158_v17 = vld [vmem:[#allocation2 + $0x18] sm:$0xff]   ;;  %vm22618_vm9 = vmmov %vm22587_vm0 }
 0x3d7   : > { %v8948_v11 = vsel %vm22606_vm11, %v8871_v7, %v8947_v39  ;;  %v8849_v21 = vor.u32 %v8848_v20, %v8845_v15  ;;  %v9184_v49 = vsel %vm22608_vm7, %v9179_v40, %v9183_v57  ;;  %v9187_v50 = vor.u32 %v9185_v22, %v9183_v57  ;;  %v15422_v39 = vld [vmem:[#allocation2 + $0x8] sm:$0xff]   ;;  %v15424_v40 = vld [vmem:[#allocation2 + $0x18] sm:$0xff]   ;;  %vm22621_vm11 = vmmov %vm22587_vm0 }
 0x3d8   : > { %8949 = vst [vmem:[#allocation2 + $0x98] sm:$0x3] %v8948_v11  ;;  %v9193_v46 = vshrl.u32 %v20051_v32, 16  ;;  %v9205_v53 = vshll.u32 %v20109_v54, 16  ;;  %v9213_v8 = vshll.u32 %v20112_v3, 16  ;;  %v9199_v5 = vrot.slane %v9197_v26, 1 }
 0x3d9   : > { %v8850_v35 = vsel %vm19467_vm3, %v8841_v41, %v8849_v21  ;;  %v8851_v58 = vrot.slane %v8849_v21, 4  ;;  %v9192_v47 = vsel %vm22609_vm4, %v9187_v50, %v9191_v30  ;;  %v9209_v52 = vshrl.u32 %v20109_v54, 16  ;;  %v15426_v41 = vld [vmem:[#allocation2 + $0x28] sm:$0xff]  }
 0x3da   : > { %8944 = vst.msk [vmem:[#allocation2 + $0x8c] sm:$0xf] %vm22610_vm14, %v8850_v35  ;;  %14695 = vmatmul.mubr.msk.bf16.gmra.mxu0 %vm22611_vm6, %v9184_v49  ;;  %v9195_v0 = vor.u32 %v9193_v46, %v9191_v30  ;;  %v9207_v45 = vrot.slane %v9205_v53, 1  ;;  %v20156_v29 = vcombine.low %v10006_v16, %v20140_v24  ;;  %v13248_v4 = vcombine.low %v9689_v25, %v15421_v34  ;;  %v15425_v30 = vld [vmem:[#allocation2 + $0x20] sm:$0xff]   ;;  %v20186_v50 = vld [vmem:[#allocation2 + $0x8] sm:$0xc] }
 0x3db   : > { %v8860_v9 = vsel %vm19467_vm3, %v8851_v58, %v20101_v10  ;;  %14698 = vmatprep.mubr.msk.bf16.mxu0 %vm22612_vm5, %v9192_v47  ;;  %v9201_v59 = vshrl.u32 %v20054_v63, 16  ;;  %v9215_v60 = vrot.slane %v9213_v8, 1  ;;  %v20164_v10 = vld [vmem:[#allocation2 + $0x28] sm:$0xff]   ;;  %vm22614_vm3 = vmmov %vm22609_vm4  ;;  %v10140_v36 = vrot.slane %v20146_v55, 1 }
 0x3dc   : > { %8945 = vst.msk [vmem:[#allocation2 + $0x90] sm:$0xf] %vm22613_vm10, %v8860_v9  ;;  %v9211_v27 = vor.u32 %v9209_v52, %v9207_v45  ;;  %v9200_v33 = vsel %vm22614_vm3, %v9195_v0, %v9199_v5  ;;  %v10139_v62 = vrot.slane %v20156_v29, 1  ;;  %v9217_v31 = vshrl.u32 %v20112_v3, 16  ;;  %vm22615_vm8 = vmmov %vm22614_vm3  ;;  %v15427_v0 = vld [vmem:[#allocation2 + $0x30] sm:$0xff]  }
 0x3dd   : > { %v9203_v18 = vor.u32 %v9201_v59, %v9199_v5  ;;  %v9696_v37 = vrot.slane %v13248_v4, 1  ;;  %v9697_v43 = vrot.slane %v15422_v39, 1  ;;  %v9699_v22 = vrot.slane %v15423_v2, 1  ;;  %vm22616_vm1 = vmmov %vm22614_vm3  ;;  %v20207_v9 = vld [vmem:[#allocation2 + $0x50] sm:$0xff]  }
 0x3de   : > { %v10142_v7 = vrot.slane %v20158_v17, 1  ;;  %v10144_v15 = vrot.slane %v20162_v28, 1  ;;  %v9216_v23 = vsel %vm22616_vm1, %v9211_v27, %v9215_v60  ;;  %v9219_v38 = vor.u32 %v9217_v31, %v9215_v60 }
 0x3df   : > { %v9208_v1 = vsel %vm22615_vm8, %v9203_v18, %v9207_v45  ;;  %v9701_v57 = vrot.slane %v15424_v40, 1  ;;  %v10146_v6 = vrot.slane %v20164_v10, 1  ;;  %v10148_v11 = vrot.slane %v20166_v12, 1  ;;  %v20205_v45 = vld [vmem:[#allocation2 + $0x48] sm:$0xff]  }
 0x3e0   : > { %v9703_v26 = vrot.slane %v15425_v30, 1  ;;  %v9705_v21 = vrot.slane %v15426_v41, 1  ;;  %v10150_v49 = vrot.slane %v20170_v13, 1  ;;  %vm22619_vm12 = vcmask 1046528   ;;  %v20273_v41 = vld [vmem:[#allocation2 + $0x70] sm:$0xff]  }
 0x3e1   : > { %v20180_v20 = vld [vmem:[#allocation2 + $0x88] sm:$0xff]   ;;  %v10141_v46 = vsel %vm22619_vm12, %v10139_v62, %v10140_v36  ;;  %vm22620_vm13 = vmmov %vm22619_vm12  ;;  %v10152_v35 = vrot.slane %v20174_v42, 1  ;;  %v9707_v5 = vrot.slane %v15427_v0, 1  ;;  %v13332_v59 = vcombine.low %v20186_v50, %v20140_v24  ;;  %v20227_v62 = vld [vmem:[#allocation2 + $0x60] sm:$0xff]  }
 0x3e2   : > { %14699 = vmatmul.mubr.msk.bf16.gmra.mxu0 %vm22587_vm0, %v9200_v33  ;;  %14745 = vmatmul.mubr.msk.bf16.gmra.mxu1 %vm22618_vm9, %v20180_v20  ;;  %v9221_v53 = vshll.u32 %v20180_v20, 16  ;;  %v20194_v25 = vsel %vm22620_vm13, %v9696_v37, %v9697_v43  ;;  %vm22622_vm15 = vmmov %vm22619_vm12  ;;  %v9225_v27 = vshrl.u32 %v20180_v20, 16  ;;  %v9709_v18 = vrot.slane %v19792_v61, 1 }
 0x3e3   : > { %14702 = vmatprep.mubr.msk.bf16.mxu0 %vm22617_vm2, %v9208_v1  ;;  %14788 = vmatprep.mubr.msk.bf16.mxu1 %vm22621_vm11, %v10141_v46  ;;  %v20198_v58 = vld [vmem:[#allocation2 + $0x90] ss:$0 sps:$4 sm:$0x11]   ;;  %v10143_v47 = vsel %vm22622_vm15, %v10140_v36, %v10142_v7  ;;  %vm22623_vm7 = vmmov %vm22619_vm12  ;;  %v20225_v36 = vld [vmem:[#allocation2 + $0x58] sm:$0xff]   ;;  %vm22632_vm0 = vsmask.f32 7424 }
 0x3e4   : > { %v10145_v8 = vsel %vm22623_vm7, %v10142_v7, %v10144_v15  ;;  %vm22624_vm4 = vmmov %vm22623_vm7  ;;  %v9223_v52 = vrot.slane %v9221_v53, 1  ;;  %v9229_v31 = vshll.u32 %v20198_v58, 16  ;;  %v10154_v61 = vrot.slane %v20205_v45, 1 }
 0x3e5   : > { %v20203_v16 = vsel %vm22624_vm4, %v9697_v43, %v9699_v22  ;;  %vm22625_vm14 = vmmov %vm22624_vm4  ;;  %v21874_v1 = vrot.slane %v19799_v56, 1  ;;  %v21875_v7 = vrot.slane %v19882_v19, 1  ;;  %v9717_v40 = vrot.slane %v19958_v14, 1 }
 0x3e6   : > { %v20210_v34 = vsel %vm22625_vm14, %v9699_v22, %v9701_v57  ;;  %vm22626_vm6 = vmmov %vm22624_vm4  ;;  %v9224_v43 = vsel %vm22632_vm0, %v9219_v38, %v9223_v52  ;;  %v10156_v22 = vrot.slane %v20207_v9, 1  ;;  %v21873_v38 = vrot.slane %v20227_v62, 1 }
 0x3e7   : > { %v20213_v4 = vsel %vm22626_vm6, %v10144_v15, %v10146_v6  ;;  %vm22627_vm5 = vmmov %vm22624_vm4  ;;  %v9715_v15 = vrot.slane %v19896_v51, 1  ;;  %v9227_v30 = vor.u32 %v9225_v27, %v9223_v52  ;;  %v9723_v53 = vrot.slane %v20054_v63, 1 }
 0x3e8   : > { %v20219_v60 = vsel %vm22627_vm5, %v10146_v6, %v10148_v11  ;;  %vm22628_vm10 = vmmov %vm22624_vm4  ;;  %v9719_v6 = vrot.slane %v19969_v44, 1  ;;  %v9727_v0 = vrot.slane %v20112_v3, 1 }
 0x3e9   : > { %v20222_v33 = vsel %vm22628_vm10, %v9701_v57, %v9703_v26  ;;  %vm22629_vm3 = vmmov %vm22624_vm4  ;;  %v10158_v57 = vrot.slane %v20225_v36, 1 }
 0x3ea   : > { %v20231_v37 = vsel %vm22629_vm3, %v9703_v26, %v9705_v21  ;;  %vm22630_vm8 = vmmov %vm22629_vm3  ;;  %14703 = vmatmul.mubr.msk.bf16.gmra.mxu0 %vm22618_vm9, %v9216_v23  ;;  %v9231_v26 = vrot.slane %v9229_v31, 1  ;;  %v20271_v23 = vld [vmem:[#allocation2 + $0x68] sm:$0xff]  }
 0x3eb   : > { %v20234_v24 = vsel %vm22630_vm8, %v10148_v11, %v10150_v49  ;;  %vm22631_vm1 = vmmov %vm22629_vm3  ;;  %v9721_v11 = vrot.slane %v20051_v32, 1  ;;  %v10567_v27 = vshll.u32 %v20271_v23, 16 }
 0x3ec   : > { %v20237_v39 = vsel %vm22631_vm1, %v10150_v49, %v10152_v35  ;;  %vm22633_vm2 = vmmov %vm22631_vm1  ;;  %v9232_v52 = vsel %vm22632_vm0, %v9227_v30, %v9231_v26 }
 0x3ed   : > { %v20241_v2 = vsel %vm22633_vm2, %v9705_v21, %v9707_v5  ;;  %vm22634_vm12 = vmmov %vm22618_vm9 }
 0x3ee   : > { %14706 = vmatprep.mubr.msk.bf16.mxu0 %vm22634_vm12, %v9224_v43  ;;  %vm22635_vm13 = vmmov %vm22618_vm9  ;;  %v9731_v43 = vrot.slane %v20198_v58, 1 }
 0x3ef   : > { %14789 = vmatmul.mubr.msk.bf16.vlgmr.msra.gmra.mxu1 %vm22635_vm13, %v10143_v47  ;;  %vm22636_vm11 = vmmov %vm22631_vm1 }
 0x3f0   : > { %v20259_v51 = vsel %vm22636_vm11, %v21875_v7, %v9715_v15  ;;  %vm22637_vm15 = vmmov %vm22631_vm1  ;;  %14863 = vmatpush3.bf16.msra.mxu1 %v19977_v48  ;;  %v10906_v48 = vrot.slane %v13332_v59, 2  ;;  %v10465_v59 = vshrl.u32 %v20146_v55, 16 }
 0x3f1   : > { %v20262_v14 = vsel %vm22637_vm15, %v9715_v15, %v9717_v40  ;;  %vm22638_vm7 = vmmov %vm22618_vm9  ;;  %v10468_v15 = vshll.u32 %v20146_v55, 16 }
 0x3f2   : > { %14792 = vmatprep.mubr.msk.bf16.mxu1 %vm22638_vm7, %v10145_v8  ;;  %vm22639_vm4 = vmmov %vm22631_vm1  ;;  %v20298_v8 = vsel %vm22631_vm1, %v10158_v57, %v21873_v38 }
 0x3f3   : > { %v20266_v44 = vsel %vm22639_vm4, %v9707_v5, %v9709_v18  ;;  %vm22640_vm14 = vmmov %vm22631_vm1  ;;  %v9729_v5 = vrot.slane %v20180_v20, 1  ;;  %v10907_v20 = vrot.slane %v20146_v55, 2  ;;  %vm22652_vm4 = vcmask 1045504  }
 0x3f4   : > { %v20269_v32 = vsel %vm22640_vm14, %v10152_v35, %v10154_v61  ;;  %vm22641_vm6 = vmmov %vm22631_vm1  ;;  %v9725_v35 = vrot.slane %v20109_v54, 1  ;;  %v10467_v55 = vrot.slane %v10465_v59, 1  ;;  %v10470_v30 = vrot.slane %v10468_v15, 2 }
 0x3f5   : > { %v20276_v21 = vsel %vm22641_vm6, %v9717_v40, %v9719_v6  ;;  %vm22642_vm5 = vmmov %vm22631_vm1  ;;  %v10909_v40 = vrot.slane %v20158_v17, 2  ;;  %v20331_v58 = vsel %vm22652_vm4, %v10906_v48, %v10907_v20  ;;  %v10915_v48 = vrot.slane %v20166_v12, 2 }
 0x3f6   : > { %v20279_v49 = vsel %vm22642_vm5, %v9719_v6, %v9721_v11  ;;  %vm22643_vm10 = vmmov %vm22631_vm1 }
 0x3f7   : > { %v20282_v50 = vsel %vm22643_vm10, %v10154_v61, %v10156_v22  ;;  %vm22644_vm3 = vmmov %vm22631_vm1  ;;  %v10457_v61 = vshrl.u32 %v20156_v29, 16  ;;  %14793 = vmatmul.mubr.msk.bf16.gmra.mxu1 %vm22638_vm7, %v20213_v4 }
 0x3f8   : > { %v20287_v46 = vsel %vm22644_vm3, %v9709_v18, %v21874_v1  ;;  %vm22645_vm8 = vmmov %vm22631_vm1  ;;  %vm22657_vm3 = vsmask.f32 6400 }
 0x3f9   : > { %v20293_v47 = vsel %vm22645_vm8, %v10156_v22, %v10158_v57  ;;  %vm22646_vm2 = vmmov %vm22631_vm1  ;;  %v10460_v22 = vshll.u32 %v20156_v29, 16  ;;  %v10911_v57 = vrot.slane %v20162_v28, 2  ;;  %v10459_v6 = vrot.slane %v10457_v61, 1 }
 0x3fa   : > { %v20304_v63 = vsel %vm22646_vm2, %v9721_v11, %v9723_v53  ;;  %vm22647_vm9 = vmmov %vm22631_vm1 }
 0x3fb   : > { %v20307_v54 = vsel %vm22647_vm9, %v9723_v53, %v9725_v35  ;;  %vm22648_vm12 = vmmov %vm22631_vm1  ;;  %v10462_v11 = vrot.slane %v10460_v22, 2  ;;  %v10474_v53 = vshrl.u32 %v20158_v17, 16  ;;  %v10492_v22 = vshrl.u32 %v20164_v10, 16 }
 0x3fc   : > { %v20312_v31 = vsel %vm22648_vm12, %v9725_v35, %v9727_v0  ;;  %vm22649_vm13 = vmmov %vm22631_vm1  ;;  %v10477_v35 = vshll.u32 %v20158_v17, 16  ;;  %v20357_v17 = vld [vmem:[%s21678_s5 + $0x30] sm:$0xff]  }
 0x3fd   : > { %v20315_v3 = vsel %vm22649_vm13, %v9727_v0, %v9729_v5  ;;  %vm22650_vm11 = vmmov %vm22638_vm7  ;;  %v10463_v4 = vor.u32 %v10462_v11, %v10459_v6  ;;  %v10483_v0 = vshrl.u32 %v20162_v28, 16  ;;  %v10494_v11 = vrot.slane %v10492_v22, 1 }
 0x3fe   : > { %14707 = vmatmul.mubr.msk.bf16.gmra.mxu0 %vm22650_vm11, %v9232_v52  ;;  %vm22651_vm15 = vmmov %vm22638_vm7  ;;  %v10486_v52 = vshll.u32 %v20162_v28, 16 }
 0x3ff   : > { %14750 = vmatprep.mubr.msk.bf16.mxu0 %vm22651_vm15, %v20194_v25  ;;  %vm22653_vm14 = vmmov %vm22631_vm1  ;;  %v10485_v61 = vrot.slane %v10483_v0, 1  ;;  %v15428_v0 = vld [vmem:[%s21678_s5 + $0x20] sm:$0xff]  }
 0x400   : > { %v20334_v29 = vsel %vm22653_vm14, %v9729_v5, %v9731_v43  ;;  %vm22654_vm6 = vmmov %vm22638_vm7  ;;  %v10471_v5 = vor.u32 %v10470_v30, %v10467_v55  ;;  %v10476_v43 = vrot.slane %v10474_v53, 1  ;;  %v10488_v15 = vrot.slane %v10486_v52, 2 }
 0x401   : > { %14796 = vmatprep.mubr.msk.bf16.mxu1 %vm22654_vm6, %v20219_v60  ;;  %vm22655_vm5 = vmmov %vm22652_vm4  ;;  %v10913_v60 = vrot.slane %v20164_v10, 2  ;;  %v10495_v55 = vshll.u32 %v20164_v10, 16  ;;  %v10501_v30 = vshrl.u32 %v20166_v12, 16  ;;  %v10504_v53 = vshll.u32 %v20166_v12, 16  ;;  %v20384_v12 = vld [vmem:[%s21678_s5 + $0x38] sm:$0xff]  }
 0x402   : > { %v20339_v26 = vsel %vm22655_vm5, %v10907_v20, %v10909_v40  ;;  %vm22656_vm10 = vmmov %vm22652_vm4  ;;  %v10479_v20 = vrot.slane %v10477_v35, 2  ;;  %v20352_v59 = vsel %vm22657_vm3, %v10463_v4, %v10471_v5  ;;  %v10489_v4 = vor.u32 %v10488_v15, %v10485_v61  ;;  %14938 = vmatprep.subr.bf16.mxu1 %v20384_v12 }
 0x403   : > { %v20342_v25 = vsel %vm22656_vm10, %v10909_v40, %v10911_v57  ;;  %vm22658_vm8 = vmmov %vm22652_vm4  ;;  %v10917_v35 = vrot.slane %v20170_v13, 2  ;;  %v10497_v52 = vrot.slane %v10495_v55, 2  ;;  %v10513_v15 = vshll.u32 %v20170_v13, 16 }
 0x404   : > { %v20360_v28 = vsel %vm22658_vm8, %v10911_v57, %v10913_v60  ;;  %vm22659_vm1 = vmmov %vm22652_vm4  ;;  %v10480_v6 = vor.u32 %v10479_v20, %v10476_v43  ;;  %v10919_v57 = vrot.slane %v20174_v42, 2  ;;  %v10522_v55 = vshll.u32 %v20174_v42, 16 }
 0x405   : > { %v20363_v40 = vsel %vm22659_vm1, %v10913_v60, %v10915_v48  ;;  %vm22660_vm0 = vmmov %vm22654_vm6  ;;  %v10510_v60 = vshrl.u32 %v20170_v13, 16  ;;  %v10498_v61 = vor.u32 %v10497_v52, %v10494_v11  ;;  %v10528_v11 = vshrl.u32 %v20205_v45, 16 }
 0x406   : > { %14751 = vmatmul.mubr.msk.bf16.vlgmr.msra.gmra.mxu0 %vm22660_vm0, %v20203_v16  ;;  %vm22661_vm2 = vmmov %vm22660_vm0  ;;  %v10503_v16 = vrot.slane %v10501_v30, 1  ;;  %v10923_v30 = vrot.slane %v20207_v9, 2 }
 0x407   : > { %14825 = vmatpush3.bf16.msra.mxu0 %v15428_v0  ;;  %14754 = vmatprep.mubr.msk.bf16.mxu0 %vm22661_vm2, %v20210_v34  ;;  %vm22662_vm9 = vmmov %vm22657_vm3  ;;  %v10506_v34 = vrot.slane %v10504_v53, 2  ;;  %v10512_v22 = vrot.slane %v10510_v60, 1  ;;  %v10524_v0 = vrot.slane %v10522_v55, 2  ;;  %v10530_v60 = vrot.slane %v10528_v11, 1 }
 0x408   : > { %v20378_v10 = vsel %vm22662_vm9, %v10471_v5, %v10480_v6  ;;  %vm22663_vm12 = vmmov %vm22660_vm0  ;;  %14900 = vmatprep.subr.bf16.mxu0 %v20357_v17  ;;  %v10549_v11 = vshll.u32 %v20225_v36, 16 }
 0x409   : > { %14797 = vmatmul.mubr.msk.bf16.gmra.mxu1 %vm22663_vm12, %v20234_v24  ;;  %vm22664_vm13 = vmmov %vm22657_vm3  ;;  %v10519_v24 = vshrl.u32 %v20174_v42, 16 }
 0x40a   : > { %v20390_v43 = vsel %vm22664_vm13, %v10480_v6, %v10489_v4  ;;  %vm22665_vm11 = vmmov %vm22659_vm1  ;;  %v10507_v6 = vor.u32 %v10506_v34, %v10503_v16  ;;  %v10531_v34 = vshll.u32 %v20205_v45, 16 }
 0x40b   : > { %v20393_v5 = vsel %vm22665_vm11, %v10915_v48, %v10917_v35  ;;  %vm22666_vm15 = vmmov %vm22659_vm1  ;;  %v10921_v48 = vrot.slane %v20205_v45, 2 }
 0x40c   : > { %v20396_v20 = vsel %vm22666_vm15, %v10917_v35, %v10919_v57  ;;  %vm22667_vm7 = vmmov %vm22660_vm0  ;;  %v10515_v35 = vrot.slane %v10513_v15, 2  ;;  %v10533_v55 = vrot.slane %v10531_v34, 2 }
 0x40d   : > { %14800 = vmatprep.mubr.msk.bf16.mxu1 %vm22667_vm7, %v20237_v39  ;;  %vm22668_vm4 = vmmov %vm22657_vm3  ;;  %v10521_v39 = vrot.slane %v10519_v24, 1  ;;  %v10925_v24 = vrot.slane %v20225_v36, 2 }
 0x40e   : > { %v20407_v53 = vsel %vm22668_vm4, %v10489_v4, %v10498_v61  ;;  %vm22669_vm14 = vmmov %vm22657_vm3  ;;  %v10516_v16 = vor.u32 %v10515_v35, %v10512_v22  ;;  %v10537_v4 = vshrl.u32 %v20207_v9, 16 }
 0x40f   : > { %v20411_v13 = vsel %vm22669_vm14, %v10498_v61, %v10507_v6  ;;  %vm22670_vm6 = vmmov %vm22659_vm1  ;;  %v10525_v15 = vor.u32 %v10524_v0, %v10521_v39  ;;  %v10540_v61 = vshll.u32 %v20207_v9, 16  ;;  %v10555_v0 = vshrl.u32 %v20227_v62, 16 }
 0x410   : > { %v20414_v52 = vsel %vm22670_vm6, %v10919_v57, %v10921_v48  ;;  %vm22671_vm5 = vmmov %vm22659_vm1  ;;  %v10927_v57 = vrot.slane %v20227_v62, 2  ;;  %v10539_v45 = vrot.slane %v10537_v4, 1  ;;  %v10929_v4 = vrot.slane %v20271_v23, 2 }
 0x411   : > { %v20417_v42 = vsel %vm22671_vm5, %v10921_v48, %v10923_v30  ;;  %vm22672_vm10 = vmmov %vm22660_vm0  ;;  %v10546_v48 = vshrl.u32 %v20225_v36, 16  ;;  %v10542_v9 = vrot.slane %v10540_v61, 2  ;;  %v10931_v61 = vrot.slane %v20273_v41, 2 }
 0x412   : > { %14755 = vmatmul.mubr.msk.bf16.gmra.mxu0 %vm22672_vm10, %v20222_v33  ;;  %vm22673_vm3 = vmmov %vm22660_vm0  ;;  %v10564_v36 = vshrl.u32 %v20271_v23, 16 }
 0x413   : > { %14758 = vmatprep.mubr.msk.bf16.mxu0 %vm22673_vm3, %v20231_v37  ;;  %vm22674_vm8 = vmmov %vm22668_vm4  ;;  %v10534_v37 = vor.u32 %v10533_v55, %v10530_v60  ;;  %v10543_v34 = vor.u32 %v10542_v9, %v10539_v45  ;;  %v10557_v60 = vrot.slane %v10555_v0, 1 }
 0x414   : > { %v20429_v22 = vsel %vm22674_vm8, %v10507_v6, %v10516_v16  ;;  %vm22675_vm1 = vmmov %vm22660_vm0  ;;  %v10548_v6 = vrot.slane %v10546_v48, 1  ;;  %v10566_v38 = vrot.slane %v10564_v36, 1 }
 0x415   : > { %14801 = vmatmul.mubr.msk.bf16.gmra.mxu1 %vm22675_vm1, %v20269_v32  ;;  %vm22676_vm0 = vmmov %vm22668_vm4  ;;  %v20447_v32 = vld [vmem:[#allocation2 + $0x78] sm:$0xff]  }
 0x416   : > { %v20435_v33 = vsel %vm22676_vm0, %v10516_v16, %v10525_v15  ;;  %vm22677_vm2 = vmmov %vm22671_vm5  ;;  %v20449_v16 = vld [vmem:[#allocation2 + $0x80] sm:$0xff]  }
 0x417   : > { %v20438_v35 = vsel %vm22677_vm2, %v10923_v30, %v10925_v24  ;;  %vm22678_vm9 = vmmov %vm22677_vm2  ;;  %v10558_v30 = vshll.u32 %v20227_v62, 16 }
 0x418   : > { %v20441_v39 = vsel %vm22678_vm9, %v10925_v24, %v10927_v57  ;;  %vm22679_vm12 = vmmov %vm22675_vm1 }
 0x419   : > { %14804 = vmatprep.mubr.msk.bf16.mxu1 %vm22679_vm12, %v20282_v50  ;;  %vm22680_vm13 = vmmov %vm22676_vm0  ;;  %v10551_v50 = vrot.slane %v10549_v11, 2  ;;  %v10560_v48 = vrot.slane %v10558_v30, 2  ;;  %v20471_v11 = vld [vmem:[#allocation2 + $0x88] sm:$0xff]   ;;  %v10933_v30 = vrot.slane %v20447_v32, 2 }
 0x41a   : > { %v20455_v24 = vsel %vm22680_vm13, %v10525_v15, %v10534_v37  ;;  %vm22681_vm11 = vmmov %vm22676_vm0  ;;  %v10573_v15 = vshrl.u32 %v20273_v41, 16 }
 0x41b   : > { %v20459_v55 = vsel %vm22681_vm11, %v10534_v37, %v10543_v34  ;;  %vm22682_vm15 = vmmov %vm22677_vm2  ;;  %v10552_v9 = vor.u32 %v10551_v50, %v10548_v6  ;;  %v20473_v37 = vld [vmem:[#allocation2 + $0x90] sm:$0xff]   ;;  %v10561_v0 = vor.u32 %v10560_v48, %v10557_v60  ;;  %v10569_v50 = vrot.slane %v10567_v27, 2 }
 0x41c   : > { %v20462_v18 = vsel %vm22682_vm15, %v10927_v57, %v10929_v4  ;;  %vm22683_vm7 = vmmov %vm22677_vm2  ;;  %v10576_v57 = vshll.u32 %v20273_v41, 16  ;;  %v10575_v36 = vrot.slane %v10573_v15, 1  ;;  %v10591_v15 = vshrl.u32 %v20449_v16, 16 }
 0x41d   : > { %v20465_v45 = vsel %vm22683_vm7, %v10929_v4, %v10931_v61  ;;  %vm22684_vm4 = vmmov %vm22675_vm1  ;;  %v10935_v4 = vrot.slane %v20449_v16, 2  ;;  %vm22701_vm11 = vcmask 1046528  }
 0x41e   : > { %14759 = vmatmul.mubr.msk.bf16.gmra.mxu0 %vm22684_vm4, %v20241_v2  ;;  %vm22685_vm14 = vmmov %vm22675_vm1  ;;  %v10582_v2 = vshrl.u32 %v20447_v32, 16  ;;  %v10578_v48 = vrot.slane %v10576_v57, 2  ;;  %v10937_v57 = vrot.slane %v20471_v11, 2 }
 0x41f   : > { %14762 = vmatprep.mubr.msk.bf16.mxu0 %vm22685_vm14, %v20266_v44  ;;  %vm22686_vm6 = vmmov %vm22676_vm0  ;;  %v10570_v44 = vor.u32 %v10569_v50, %v10566_v38 }
 0x420   : > { %v20481_v6 = vsel %vm22686_vm6, %v10543_v34, %v10552_v9  ;;  %vm22687_vm5 = vmmov %vm22675_vm1  ;;  %v10584_v27 = vrot.slane %v10582_v2, 1  ;;  %v10585_v34 = vshll.u32 %v20447_v32, 16 }
 0x421   : > { %14805 = vmatmul.mubr.msk.bf16.gmra.mxu1 %vm22687_vm5, %v20293_v47  ;;  %vm22688_vm10 = vmmov %vm22676_vm0  ;;  %v10579_v47 = vor.u32 %v10578_v48, %v10575_v36 }
 0x422   : > { %v20487_v60 = vsel %vm22688_vm10, %v10552_v9, %v10561_v0  ;;  %vm22690_vm3 = vmmov %vm22677_vm2  ;;  %14808 = vmatprep.mubr.msk.bf16.mxu1 %vm22675_vm1, %v20298_v8  ;;  %v10594_v9 = vshll.u32 %v20449_v16, 16  ;;  %v10600_v8 = vshrl.u32 %v20471_v11, 16 }
 0x423   : > { %22689 = vst [vmem:[#allocation22_spill] sm:$0xff] %v20487_v60  ;;  %v20490_v1 = vsel %vm22690_vm3, %v10931_v61, %v10933_v30  ;;  %vm22692_vm8 = vmmov %vm22677_vm2  ;;  %v21876_v61 = vrot.slane %v20473_v37, 2 }
 0x424   : > { %22691 = vst [vmem:[#allocation21_spill] sm:$0xff] %v20490_v1  ;;  %v20493_v7 = vsel %vm22692_vm8, %v10933_v30, %v10935_v4  ;;  %v20503_v1 = vsel %vm22676_vm0, %v10561_v0, %v10570_v44  ;;  %v10587_v30 = vrot.slane %v10585_v34, 2  ;;  %vm22694_vm2 = vmmov %vm22676_vm0  ;;  %v10596_v50 = vrot.slane %v10594_v9, 2 }
 0x425   : > { %22693 = vst [vmem:[#allocation24_spill] sm:$0xff] %v20493_v7  ;;  %v10593_v7 = vrot.slane %v10591_v15, 1  ;;  %v20507_v38 = vsel %vm22694_vm2, %v10570_v44, %v10579_v47  ;;  %vm22695_vm9 = vmmov %vm22690_vm3  ;;  %v10602_v60 = vrot.slane %v10600_v8, 1  ;;  %v10603_v0 = vshll.u32 %v20471_v11, 16 }
 0x426   : > { %v20510_v2 = vsel %vm22695_vm9, %v10935_v4, %v10937_v57  ;;  %vm22697_vm12 = vmmov %vm22690_vm3  ;;  %v10588_v48 = vor.u32 %v10587_v30, %v10584_v27  ;;  %v10609_v34 = vshrl.u32 %v20473_v37, 16  ;;  %v22699_v44 = vrot.slane %v19882_v19, 1 }
 0x427   : > { %22696 = vst [vmem:[#allocation33_spill] sm:$0xff] %v20510_v2  ;;  %v20515_v36 = vsel %vm22697_vm12, %v10937_v57, %v21876_v61  ;;  %vm22698_vm13 = vmmov %vm22675_vm1  ;;  %v22700_v15 = vrot.slane %v19799_v56, 1  ;;  %v10597_v9 = vor.u32 %v10596_v50, %v10593_v7  ;;  %v10612_v2 = vshll.u32 %v20473_v37, 16 }
 0x428   : > { %14763 = vmatmul.mubr.msk.bf16.gmra.mxu0 %vm22698_vm13, %v20287_v46  ;;  %vm22702_vm15 = vmmov %vm22675_vm1  ;;  %v22703_v27 = vrot.slane %v20271_v23, 1  ;;  %v22704_v57 = vrot.slane %v20227_v62, 1  ;;  %v10605_v46 = vrot.slane %v10603_v0, 2  ;;  %v10611_v19 = vrot.slane %v10609_v34, 1 }
 0x429   : > { %v9714_v4 = vsel %vm22701_vm11, %v22700_v15, %v22699_v44  ;;  %vm22705_vm7 = vmmov %vm22701_vm11  ;;  %v22708_v56 = vrot.slane %v20273_v41, 1  ;;  %v10614_v15 = vrot.slane %v10612_v2, 2  ;;  %v10168_v34 = vrot.slane %v20449_v16, 1  ;;  %v15319_v41 = vld [vmem:[#allocation2 + $0x98] ss:$0 sps:$4 sm:$0x11]  }
 0x42a   : > { %14766 = vmatprep.mubr.msk.bf16.mxu0 %vm22702_vm15, %v9714_v4  ;;  %v10163_v30 = vsel %vm22705_vm7, %v22704_v57, %v22703_v27  ;;  %vm22706_vm4 = vmmov %vm22676_vm0  ;;  %v22709_v7 = vmov %v22703_v27  ;;  %v10606_v62 = vor.u32 %v10605_v46, %v10602_v60  ;;  %v10170_v16 = vrot.slane %v20471_v11, 1  ;;  %v20600_v11 = vld [vmem:[#allocation2 + $0x14] sm:$0xf]  ;;  %v20616_v57 = vld [vmem:[#allocation2 + $0x48] sm:$0xff]  }
 0x42b   : > { %v20534_v8 = vsel %vm22706_vm4, %v10579_v47, %v10588_v48  ;;  %vm22707_vm14 = vmmov %vm22675_vm1  ;;  %v20546_v4 = vor.u32 %v10614_v15, %v10611_v19  ;;  %v10166_v47 = vrot.slane %v20447_v32, 1  ;;  %v22716_v60 = vmov %v22708_v56  ;;  %v20606_v27 = vld [vmem:[#allocation2 + $0x30] sm:$0xff]   ;;  %v20633_v15 = vld [vmem:[#allocation2 + $0x68] sm:$0xff]  }
 0x42c   : > { %14809 = vmatmul.mubr.msk.bf16.gmra.mxu1 %vm22707_vm14, %v10163_v30  ;;  %vm22710_vm6 = vmmov %vm22705_vm7  ;;  %v20624_v19 = vld [vmem:[#allocation2 + $0x50] sm:$0xff]  }
 0x42d   : > { %v10165_v50 = vsel %vm22710_vm6, %v22709_v7, %v22708_v56  ;;  %vm22711_vm5 = vmmov %vm22676_vm0  ;;  %v20626_v56 = vld [vmem:[#allocation2 + $0x58] sm:$0xff]  }
 0x42e   : > { %v20543_v44 = vsel %vm22711_vm5, %v10588_v48, %v10597_v9  ;;  %vm22712_vm10 = vmmov %vm22675_vm1  ;;  %v10172_v48 = vrot.slane %v20473_v37, 1 }
 0x42f   : > { %14812 = vmatprep.mubr.msk.bf16.mxu1 %vm22712_vm10, %v10165_v50  ;;  %vm22713_vm3 = vmmov %vm22676_vm0 }
 0x430   : > { %v20550_v0 = vsel %vm22713_vm3, %v10597_v9, %v10606_v62  ;;  %vm22714_vm8 = vmmov %vm22676_vm0  ;;  %14767 = vmatmul.mubr.msk.bf16.gmra.mxu0 %vm22675_vm1, %v20259_v51  ;;  %v10174_v9 = vrot.slane %v15319_v41, 1  ;;  %v20658_v41 = vld [vmem:[#allocation2 + $0xa0] ss:$0 sps:$4 sm:$0x77]  }
 0x431   : > { %v20555_v23 = vsel %vm22714_vm8, %v10606_v62, %v20546_v4  ;;  %vm22715_vm0 = vmmov %vm22675_vm1  ;;  %v20637_v62 = vld [vmem:[#allocation2 + $0x78] sm:$0xff]  }
 0x432   : > { %14770 = vmatprep.mubr.msk.bf16.mxu0 %vm22715_vm0, %v20262_v14  ;;  %vm22717_vm2 = vmmov %vm22710_vm6 }
 0x433   : > { %v10167_v2 = vsel %vm22717_vm2, %v22716_v60, %v10166_v47  ;;  %vm22718_vm9 = vmmov %vm22715_vm0 }
 0x434   : > { %14813 = vmatmul.mubr.msk.bf16.gmra.mxu1 %vm22718_vm9, %v10167_v2  ;;  %vm22719_vm12 = vmmov %vm22717_vm2  ;;  %v20644_v2 = vld [vmem:[#allocation2 + $0x80] sm:$0xff]  }
 0x435   : > { %v10169_v32 = vsel %vm22719_vm12, %v10166_v47, %v10168_v34  ;;  %vm22720_vm13 = vmmov %vm22715_vm0  ;;  %v12123_v47 = vrot.slane %v20606_v27, 3 }
 0x436   : > { %14816 = vmatprep.mubr.msk.bf16.mxu1 %vm22720_vm13, %v10169_v32  ;;  %vm22721_vm11 = vmmov %vm22715_vm0  ;;  %v20646_v32 = vld [vmem:[#allocation2 + $0x88] sm:$0xff]  }
 0x437   : > { %vm22722_vm15 = vmmov %vm22715_vm0 }
 0x438   : > { %14771 = vmatmul.mubr.msk.bf16.gmra.mxu0 %vm22721_vm11, %v20276_v21  ;;  %vm22723_vm7 = vmmov %vm22717_vm2 }
 0x439   : > { %14774 = vmatprep.mubr.msk.bf16.mxu0 %vm22722_vm15, %v20279_v49  ;;  %v10171_v51 = vsel %vm22723_vm7, %v10168_v34, %v10170_v16  ;;  %vm22724_vm4 = vmmov %vm22715_vm0  ;;  %v20593_v49 = vpop.f32.mrf.mxu1 }
 0x43a   : > { %vm22725_vm14 = vmmov %vm22717_vm2 }
 0x43b   : > { %v10173_v14 = vsel %vm22725_vm14, %v10170_v16, %v10172_v48  ;;  %vm22726_vm6 = vmmov %vm22715_vm0 }
 0x43c   : > { %14817 = vmatmul.mubr.msk.bf16.gmra.mxu1 %vm22724_vm4, %v10171_v51  ;;  %vm22727_vm5 = vmmov %vm22715_vm0  ;;  %vm22739_vm4 = vcmask 1044480   ;;  %v12129_v51 = vrot.slane %v20616_v57, 3 }
 0x43d   : > { %14820 = vmatprep.mubr.msk.bf16.mxu1 %vm22726_vm6, %v10173_v14  ;;  %vm22728_vm10 = vmmov %vm22715_vm0  ;;  %v20656_v14 = vld [vmem:[#allocation2 + $0x90] sm:$0xff]  }
 0x43e   : > { %vm22729_vm3 = vmmov %vm22717_vm2 }
 0x43f   : > { %v10175_v21 = vsel %vm22729_vm3, %v10172_v48, %v10174_v9  ;;  %vm22730_vm8 = vmmov %vm22715_vm0 }
 0x440   : > { %14775 = vmatmul.mubr.msk.bf16.gmra.mxu0 %vm22727_vm5, %v20304_v63  ;;  %vm22731_vm1 = vmmov %vm22715_vm0  ;;  %v20596_v63 = vpop.f32.mrf.mxu1 }
 0x441   : > { %14778 = vmatprep.mubr.msk.bf16.mxu0 %vm22728_vm10, %v20307_v54  ;;  %vm22732_vm2 = vmmov %vm22715_vm0  ;;  %v20598_v54 = vld [vmem:[#allocation2 + $0x18] sm:$0xff]  }
 0x442   : > { %vm22733_vm9 = vmmov %vm22715_vm0  ;;  %v12117_v46 = vrot.slane %v20598_v54, 3 }
 0x443   : > { %vm22734_vm12 = vmmov %vm22715_vm0 }
 0x444   : > { %14821 = vmatmul.mubr.msk.bf16.gmra.mxu1 %vm22730_vm8, %v10175_v21  ;;  %vm22735_vm13 = vmmov %vm22715_vm0 }
 0x445   : > { %14864 = vmatprep.mubr.msk.bf16.mxu1 %vm22731_vm1, %v20331_v58  ;;  %v12109_v58 = vld [vmem:[#allocation2 + $0x10] sm:$0x8]  ;;  %vm22736_vm11 = vmmov %vm22715_vm0 }
 0x446   : > { %v13416_v30 = vcombine.low %v12109_v58, %v20600_v11  ;;  %vm22737_vm15 = vmmov %vm22715_vm0 }
 0x447   : > { %vm22738_vm7 = vmmov %vm22715_vm0 }
 0x448   : > { %14779 = vmatmul.mubr.msk.bf16.gmra.mxu0 %vm22715_vm0, %v20312_v31  ;;  %v20602_v31 = vld [vmem:[#allocation2 + $0x20] sm:$0xff]   ;;  %v12116_v7 = vrot.slane %v13416_v30, 3  ;;  %vm22741_vm14 = vmmov %vm22739_vm4 }
 0x449   : > { %14782 = vmatprep.mubr.msk.bf16.mxu0 %vm22732_vm2, %v20315_v3  ;;  %v20604_v3 = vld [vmem:[#allocation2 + $0x28] sm:$0xff]   ;;  %v12119_v50 = vrot.slane %v20602_v31, 3  ;;  %vm22743_vm6 = vmmov %vm22739_vm4  ;;  %v20672_v30 = vld [vmem:[%s21678_s5 + $0x40] sm:$0xff]  }
 0x44a   : > { %vm22745_vm5 = vmmov %vm22739_vm4 }
 0x44b   : > { %v20652_v16 = vsel %vm22741_vm14, %v12117_v46, %v12119_v50  ;;  %vm22747_vm10 = vmmov %vm22739_vm4 }
 0x44c   : > { %14865 = vmatmul.mubr.msk.bf16.vlgmr.msra.gmra.mxu1 %vm22733_vm9, %v20339_v26  ;;  %v20608_v26 = vld [vmem:[#allocation2 + $0x38] sm:$0xff]   ;;  %22742 = vst [vmem:[#allocation19_spill] sm:$0xff] %v20652_v16  ;;  %vm22749_vm3 = vmmov %vm22739_vm4  ;;  %v12145_v16 = vrot.slane %v20646_v32, 3 }
 0x44d   : > { %14868 = vmatprep.mubr.msk.bf16.mxu1 %vm22734_vm12, %v20342_v25  ;;  %14939 = vmatpush3.bf16.msra.mxu1 %v20384_v12  ;;  %v20612_v25 = vpop.f32.mrf.mxu1  ;;  %v20614_v12 = vld [vmem:[#allocation2 + $0x40] sm:$0xff]   ;;  %v12125_v34 = vrot.slane %v20608_v26, 3  ;;  %vm22751_vm8 = vmmov %vm22749_vm3 }
 0x44e   : > { %v12127_v48 = vrot.slane %v20614_v12, 3  ;;  %vm22753_vm1 = vmmov %vm22715_vm0 }
 0x44f   : > { %v20642_v60 = vpop.f32.mrf.mxu1  ;;  %v20667_v58 = vsel %vm22747_vm10, %v12123_v47, %v12125_v34  ;;  %vm22754_vm0 = vmmov %vm22749_vm3 }
 0x450   : > { %14783 = vmatmul.mubr.msk.bf16.gmra.mxu0 %vm22735_vm13, %v20334_v29  ;;  %v20628_v29 = vld [vmem:[#allocation2 + $0x60] sm:$0xff]   ;;  %22748 = vst [vmem:[#allocation23_spill] sm:$0xff] %v20667_v58  ;;  %v20680_v61 = vsel %vm22751_vm8, %v12127_v48, %v12129_v51  ;;  %v12137_v58 = vrot.slane %v20633_v15, 3  ;;  %vm22756_vm2 = vmmov %vm22754_vm0 }
 0x451   : > { %14826 = vmatprep.mubr.msk.bf16.mxu0 %vm22736_vm11, %v20352_v59  ;;  %v20635_v59 = vld [vmem:[#allocation2 + $0x70] sm:$0xff]   ;;  %22752 = vst [vmem:[#allocation41_spill] sm:$0xff] %v20680_v61  ;;  %vm22758_vm9 = vmmov %vm22753_vm1 }
 0x452   : > { %vm22759_vm12 = vmmov %vm22754_vm0 }
 0x453   : > { %vm22761_vm13 = vmmov %vm22754_vm0 }
 0x454   : > { %14869 = vmatmul.mubr.msk.bf16.gmra.mxu1 %vm22737_vm15, %v20360_v28  ;;  %v12121_v28 = vrot.slane %v20604_v3, 3  ;;  %vm22763_vm11 = vmmov %vm22754_vm0 }
 0x455   : > { %14872 = vmatprep.mubr.msk.bf16.mxu1 %vm22738_vm7, %v20363_v40  ;;  %v20649_v40 = vsel %vm22739_vm4, %v12116_v7, %v12117_v46  ;;  %v20674_v46 = vld [vmem:[#allocation2 + $0x98] sm:$0xff]   ;;  %v20677_v7 = vsel %vm22749_vm3, %v12125_v34, %v12127_v48  ;;  %v20690_v34 = vpop.f32.mrf.mxu1  ;;  %vm22765_vm15 = vmmov %vm22753_vm1 }
 0x456   : > { %22740 = vst [vmem:[#allocation32_spill] sm:$0xff] %v20649_v40  ;;  %v20661_v9 = vsel %vm22743_vm6, %v12119_v50, %v12121_v28  ;;  %v20664_v21 = vsel %vm22745_vm5, %v12121_v28, %v12123_v47  ;;  %22750 = vst [vmem:[#allocation46_spill] sm:$0xff] %v20677_v7  ;;  %v12131_v50 = vrot.slane %v20624_v19, 3  ;;  %v12133_v28 = vrot.slane %v20626_v56, 3 }
 0x457   : > { %22744 = vst [vmem:[#allocation36_spill] sm:$0xff] %v20661_v9  ;;  %22746 = vst [vmem:[#allocation34_spill] sm:$0xff] %v20664_v21  ;;  %v12135_v47 = vrot.slane %v20628_v29, 3  ;;  %v12139_v21 = vrot.slane %v20635_v59, 3  ;;  %v12141_v9 = vrot.slane %v20637_v62, 3  ;;  %v12143_v7 = vrot.slane %v20644_v2, 3 }
 0x458   : > { %14827 = vmatmul.mubr.msk.bf16.vlgmr.msra.gmra.mxu0 %vm22753_vm1, %v20378_v10  ;;  %v20693_v48 = vsel %vm22754_vm0, %v12129_v51, %v12131_v50  ;;  %v20696_v61 = vsel %vm22756_vm2, %v12131_v50, %v12133_v28  ;;  %v12147_v50 = vrot.slane %v20656_v14, 3  ;;  %vm22766_vm7 = vmmov %vm22754_vm0 }
 0x459   : > { %22755 = vst [vmem:[#allocation35_spill] sm:$0xff] %v20693_v48  ;;  %22757 = vst [vmem:[#allocation47_spill] sm:$0xff] %v20696_v61  ;;  %14901 = vmatpush3.bf16.msra.mxu0 %v20357_v17  ;;  %14830 = vmatprep.mubr.msk.bf16.mxu0 %vm22758_vm9, %v20390_v43  ;;  %v20704_v40 = vsel %vm22759_vm12, %v12133_v28, %v12135_v47  ;;  %v20707_v10 = vsel %vm22761_vm13, %v12135_v47, %v12137_v58  ;;  %v9562_v61 = vpop.f32.mrf.mxu1 }
 0x45a   : > { %22760 = vst [vmem:[#allocation42_spill] sm:$0xff] %v20704_v40  ;;  %22762 = vst [vmem:[#allocation38_spill] sm:$0xff] %v20707_v10  ;;  %v20710_v51 = vsel %vm22763_vm11, %v12137_v58, %v12139_v21  ;;  %14976 = vmatprep.subr.bf16.mxu0 %v20672_v30  ;;  %v20717_v17 = vsel %vm22766_vm7, %v12139_v21, %v12141_v9  ;;  %v12149_v58 = vrot.slane %v20674_v46, 3  ;;  %v11684_v40 = vshrl.u32 %v20602_v31, 16 }
 0x45b   : > { %22764 = vst [vmem:[#allocation26_spill] sm:$0xff] %v20710_v51  ;;  %22767 = vst [vmem:[#allocation48_spill] sm:$0xff] %v20717_v17  ;;  %v14719_v51 = vpop.f32.mrf.mxu1 }
 0x45c   : > { %14873 = vmatmul.mubr.msk.bf16.gmra.mxu1 %vm22765_vm15, %v20393_v5  ;;  %vm22768_vm4 = vmmov %vm22754_vm0  ;;  %v12151_v5 = vrot.slane %v20658_v41, 3 }
 0x45d   : > { %v20720_v43 = vsel %vm22768_vm4, %v12141_v9, %v12143_v7  ;;  %vm22770_vm14 = vmmov %vm22754_vm0 }
 0x45e   : > { %22769 = vst [vmem:[#allocation39_spill] sm:$0xff] %v20720_v43  ;;  %v20723_v28 = vsel %vm22770_vm14, %v12143_v7, %v12145_v16  ;;  %vm22772_vm6 = vmmov %vm22753_vm1  ;;  %v9565_v43 = vpop.f32.mrf.mxu1 }
 0x45f   : > { %22771 = vst [vmem:[#allocation5_spill] sm:$0xff] %v20723_v28  ;;  %14876 = vmatprep.mubr.msk.bf16.mxu1 %vm22772_vm6, %v20396_v20  ;;  %vm22773_vm5 = vmmov %vm22754_vm0 }
 0x460   : > { %v20729_v47 = vsel %vm22773_vm5, %v12145_v16, %v12147_v50  ;;  %vm22775_vm10 = vmmov %vm22754_vm0  ;;  %v20746_v20 = vpop.f32.mrf.mxu1 }
 0x461   : > { %22774 = vst [vmem:[#allocation8_spill] sm:$0xff] %v20729_v47  ;;  %v20733_v21 = vsel %vm22775_vm10, %v12147_v50, %v12149_v58  ;;  %vm22777_vm3 = vmmov %vm22754_vm0 }
 0x462   : > { %22776 = vst [vmem:[#allocation52_spill] sm:$0xff] %v20733_v21  ;;  %v20736_v9 = vsel %vm22777_vm3, %v12149_v58, %v12151_v5  ;;  %vm22779_vm8 = vmmov %vm22753_vm1  ;;  %v20748_v16 = vpop.f32.mrf.mxu1  ;;  %v11675_v5 = vshrl.u32 %v20598_v54, 16 }
 0x463   : > { %22778 = vst [vmem:[#allocation44_spill] sm:$0xff] %v20736_v9  ;;  %14831 = vmatmul.mubr.msk.bf16.gmra.mxu0 %vm22779_vm8, %v20407_v53  ;;  %vm22780_vm0 = vmmov %vm22753_vm1 }
 0x464   : > { %14834 = vmatprep.mubr.msk.bf16.mxu0 %vm22753_vm1, %v20411_v13  ;;  %14877 = vmatmul.mubr.msk.bf16.gmra.mxu1 %vm22780_vm0, %v20414_v52  ;;  %vm22781_vm2 = vmmov %vm22780_vm0  ;;  %v20750_v7 = vpop.f32.mrf.mxu1  ;;  %v14676_v13 = vpop.f32.mrf.mxu0  ;;  %v11677_v21 = vrot.slane %v11675_v5, 2 }
 0x465   : > { %14880 = vmatprep.mubr.msk.bf16.mxu1 %vm22781_vm2, %v20417_v42  ;;  %vm22782_vm9 = vmmov %vm22780_vm0  ;;  %v20763_v52 = vadd.f32 %v20593_v49, %v14676_v13 }
 0x466   : > { %vm22783_vm12 = vmmov %vm22780_vm0  ;;  %v20758_v53 = vpop.f32.mrf.mxu1  ;;  %v9327_v50 = vpop.f32.mrf.mxu0 }
 0x467   : > { %vm22784_vm13 = vmmov %vm22780_vm0 }
 0x468   : > { %vm22785_vm11 = vmmov %vm22780_vm0  ;;  %v20765_v42 = vpop.f32.mrf.mxu1 }
 0x469   : > { %vm22786_vm15 = vmmov %vm22780_vm0 }
 0x46a   : > { %vm22787_vm7 = vmmov %vm22780_vm0 }
 0x46b   : > { %14835 = vmatmul.mubr.msk.bf16.gmra.mxu0 %vm22782_vm9, %v20429_v22  ;;  %v20770_v22 = vadd.f32 %v20596_v63, %v9327_v50  ;;  %vm22788_vm4 = vmmov %vm22780_vm0  ;;  %v22793_v63 = vld [vmem:[#allocation21_spill] sm:$0xff] }
 0x46c   : > { %14838 = vmatprep.mubr.msk.bf16.mxu0 %vm22783_vm12, %v20435_v33  ;;  %14881 = vmatmul.mubr.msk.bf16.gmra.mxu1 %vm22784_vm13, %v20438_v35  ;;  %v14677_v33 = vpop.f32.mrf.mxu0  ;;  %vm22789_vm14 = vmmov %vm22780_vm0  ;;  %vm22805_vm13 = vcmask 1045504  }
 0x46d   : > { %14884 = vmatprep.mubr.msk.bf16.mxu1 %vm22785_vm11, %v20441_v39  ;;  %v20777_v35 = vadd.f32 %v20612_v25, %v14677_v33  ;;  %v20779_v39 = vpop.f32.mrf.mxu1  ;;  %vm22790_vm6 = vmmov %vm22780_vm0  ;;  %v22795_v25 = vld [vmem:[#allocation24_spill] sm:$0xff] }
 0x46e   : > { %vm22792_vm5 = vmmov %vm22780_vm0  ;;  %v20795_v58 = vpop.f32.mrf.mxu0 }
 0x46f   : > { %v20783_v49 = vpop.f32.mrf.mxu1  ;;  %vm22794_vm10 = vmmov %vm22780_vm0 }
 0x470   : > { %vm22796_vm3 = vmmov %vm22780_vm0  ;;  %v14680_v50 = vpop.f32.mrf.mxu0 }
 0x471   : > { %vm22797_vm8 = vmmov %vm22780_vm0  ;;  %v20807_v33 = vadd.f32 %v20690_v34, %v14680_v50  ;;  %v15323_v34 = vld [vmem:[#allocation2 + $0x98] ss:$0 sps:$4 sm:$0x33]  }
 0x472   : > { %vm22798_vm1 = vmmov %vm22780_vm0  ;;  %v10941_v48 = vrot.slane %v15323_v34, 2 }
 0x473   : > { %14839 = vmatmul.mubr.msk.bf16.gmra.mxu0 %vm22786_vm15, %v20455_v24  ;;  %v22791_v24 = vld [vmem:[#allocation22_spill] sm:$0xff]  ;;  %vm22800_vm2 = vmmov %vm22780_vm0  ;;  %vm22807_vm15 = vsmask.f32 5376 }
 0x474   : > { %14842 = vmatprep.mubr.msk.bf16.mxu0 %vm22787_vm7, %v20459_v55  ;;  %14885 = vmatmul.mubr.msk.bf16.gmra.mxu1 %vm22788_vm4, %v20462_v18  ;;  %v11216_v55 = vld [vmem:[#allocation2 + $0x10] sm:$0xc]  ;;  %v20791_v18 = vpop.f32.mrf.mxu1  ;;  %vm22802_vm9 = vmmov %vm22780_vm0 }
 0x475   : > { %14888 = vmatprep.mubr.msk.bf16.mxu1 %vm22789_vm14, %v20465_v45  ;;  %v20798_v45 = vcombine.low %v11216_v55, %v20600_v11  ;;  %v9343_v11 = vpop.f32.mrf.mxu0  ;;  %v22799_v55 = vld [vmem:[#allocation33_spill] sm:$0xff]  ;;  %vm22803_vm12 = vmmov %vm22780_vm0 }
 0x476   : > { %v20802_v13 = vpop.f32.mrf.mxu1  ;;  %v20817_v9 = vadd.f32 %v9562_v61, %v9343_v11  ;;  %v11693_v11 = vshrl.u32 %v20604_v3, 16  ;;  %vm22806_vm11 = vmmov %vm22780_vm0 }
 0x477   : > { %v14681_v50 = vpop.f32.mrf.mxu0  ;;  %vm22808_vm7 = vmmov %vm22780_vm0 }
 0x478   : > { %v20823_v10 = vadd.f32 %v14719_v51, %v14681_v50  ;;  %v11686_v50 = vrot.slane %v11684_v40, 2  ;;  %vm22809_vm4 = vmmov %vm22780_vm0 }
 0x479   : > { %vm22810_vm14 = vmmov %vm22780_vm0 }
 0x47b   : > { %14843 = vmatmul.mubr.msk.bf16.gmra.mxu0 %vm22790_vm6, %v20481_v6  ;;  %v11678_v6 = vshll.u32 %v20598_v54, 16  ;;  %vm22811_vm6 = vmmov %vm22807_vm15 }
 0x47c   : > { %14846 = vmatprep.mubr.msk.bf16.mxu0 %vm22792_vm5, %v22791_v24  ;;  %14889 = vmatmul.mubr.msk.bf16.gmra.mxu1 %vm22794_vm10, %v22793_v63  ;;  %v11667_v24 = vshrl.u32 %v20798_v45, 16  ;;  %v11670_v63 = vshll.u32 %v20798_v45, 16  ;;  %vm22812_vm5 = vmmov %vm22780_vm0 }
 0x47d   : > { %14892 = vmatprep.mubr.msk.bf16.mxu1 %vm22796_vm3, %v22795_v25  ;;  %v20811_v25 = vpop.f32.mrf.mxu1  ;;  %vm22813_vm10 = vmmov %vm22811_vm6 }
 0x47e   : > { %v11669_v28 = vrot.slane %v11667_v24, 2  ;;  %v11672_v17 = vrot.slane %v11670_v63, 3  ;;  %v22804_v24 = vrot.slane %v20473_v37, 2  ;;  %v11705_v37 = vshll.u32 %v20606_v27, 16  ;;  %vm22814_vm3 = vmmov %vm22780_vm0 }
 0x47f   : > { %v20819_v47 = vpop.f32.mrf.mxu1 }
 0x480   : > { %v11673_v51 = vor.u32 %v11672_v17, %v11669_v28  ;;  %v10942_v63 = vsel %vm22805_vm13, %v22804_v24, %v10941_v48  ;;  %v10621_v17 = vshll.u32 %v15323_v34, 16  ;;  %v11711_v24 = vshrl.u32 %v20608_v26, 16 }
 0x481   : > { %v20827_v61 = vpop.f32.mrf.mxu1 }
 0x483   : > { %14847 = vmatmul.mubr.msk.bf16.gmra.mxu0 %vm22797_vm8, %v20503_v1  ;;  %v11680_v1 = vrot.slane %v11678_v6, 3  ;;  %vm22815_vm8 = vsmask.f32 6400 }
 0x484   : > { %14850 = vmatprep.mubr.msk.bf16.mxu0 %vm22798_vm1, %v20507_v38  ;;  %14893 = vmatmul.mubr.msk.bf16.gmra.mxu1 %vm22780_vm0, %v22799_v55  ;;  %v9346_v38 = vpop.f32.mrf.mxu0  ;;  %v11687_v55 = vshll.u32 %v20602_v31, 16  ;;  %vm22816_vm1 = vmmov %vm22780_vm0 }
 0x485   : > { %14896 = vmatprep.mubr.msk.bf16.mxu1 %vm22800_vm2, %v20515_v36  ;;  %v11681_v5 = vor.u32 %v11680_v1, %v11677_v21  ;;  %v20829_v6 = vadd.f32 %v9565_v43, %v9346_v38  ;;  %v11696_v36 = vshll.u32 %v20604_v3, 16  ;;  %v20840_v43 = vpop.f32.mrf.mxu1  ;;  %v11695_v38 = vrot.slane %v11693_v11, 2  ;;  %vm22817_vm0 = vmmov %vm22805_vm13 }
 0x486   : > { %v11689_v21 = vrot.slane %v11687_v55, 3  ;;  %v14684_v40 = vpop.f32.mrf.mxu0  ;;  %vm22818_vm2 = vmmov %vm22816_vm1 }
 0x487   : > { %22801 = vst [vmem:[#allocation55_spill] sm:$0xff] %v20829_v6  ;;  %v11682_v1 = vsel %vm22807_vm15, %v11673_v51, %v11681_v5  ;;  %v11698_v6 = vrot.slane %v11696_v36, 3  ;;  %v20847_v48 = vpop.f32.mrf.mxu1  ;;  %v20852_v11 = vadd.f32 %v20746_v20, %v14684_v40  ;;  %v10623_v36 = vrot.slane %v10621_v17, 2  ;;  %vm22821_vm13 = vmmov %vm22811_vm6 }
 0x488   : > { %v11690_v28 = vor.u32 %v11689_v21, %v11686_v50  ;;  %v9359_v51 = vpop.f32.mrf.mxu0  ;;  %vm22823_vm15 = vmmov %vm22817_vm0 }
 0x489   : > { %v11699_v55 = vor.u32 %v11698_v6, %v11695_v38  ;;  %v20860_v6 = vadd.f32 %v20748_v16, %v9359_v51  ;;  %v20862_v38 = vpop.f32.mrf.mxu1  ;;  %v11350_v16 = vrot.slane %v20598_v54, 2  ;;  %v11720_v51 = vshrl.u32 %v20614_v12, 16 }
 0x48a   : > { %v11691_v50 = vsel %vm22811_vm6, %v11681_v5, %v11690_v28 }
 0x48b   : > { %14851 = vmatmul.mubr.msk.bf16.gmra.mxu0 %vm22802_vm9, %v20534_v8  ;;  %v10618_v8 = vshrl.u32 %v15323_v34, 16  ;;  %v11700_v20 = vsel %vm22813_vm10, %v11690_v28, %v11699_v55  ;;  %v11723_v28 = vshll.u32 %v20614_v12, 16  ;;  %vm22819_vm9 = vmmov %vm22811_vm6 }
 0x48c   : > { %14854 = vmatprep.mubr.msk.bf16.mxu0 %vm22803_vm12, %v20543_v44  ;;  %14897 = vmatmul.mubr.msk.bf16.gmra.mxu1 %vm22806_vm11, %v10942_v63  ;;  %v11702_v44 = vshrl.u32 %v20606_v27, 16  ;;  %v11714_v63 = vshll.u32 %v20608_v26, 16  ;;  %vm22820_vm12 = vmmov %vm22816_vm1 }
 0x48d   : > { %14940 = vmatprep.mubr.msk.bf16.mxu1 %vm22808_vm7, %v11682_v1  ;;  %v10620_v34 = vrot.slane %v10618_v8, 1  ;;  %v11707_v1 = vrot.slane %v11705_v37, 3  ;;  %v11713_v8 = vrot.slane %v11711_v24, 2  ;;  %v11349_v24 = vrot.slane %v20798_v45, 2  ;;  %vm22822_vm11 = vmmov %vm22816_vm1 }
 0x48e   : > { %v11704_v21 = vrot.slane %v11702_v44, 2  ;;  %v11716_v17 = vrot.slane %v11714_v63, 3  ;;  %vm22824_vm7 = vmmov %vm22816_vm1 }
 0x48f   : > { %v10624_v5 = vor.u32 %v10623_v36, %v10620_v34  ;;  %v11732_v34 = vshll.u32 %v20616_v57, 16  ;;  %vm22828_vm10 = vmmov %vm22811_vm6 }
 0x490   : > { %v11708_v37 = vor.u32 %v11707_v1, %v11704_v21  ;;  %v11717_v63 = vor.u32 %v11716_v17, %v11713_v8  ;;  %v11722_v21 = vrot.slane %v11720_v51, 2  ;;  %v11725_v1 = vrot.slane %v11723_v28, 3 }
 0x491   : > { %v10625_v54 = vsel %vm22815_vm8, %v20546_v4, %v10624_v5  ;;  %v11734_v17 = vrot.slane %v11732_v34, 3  ;;  %v11352_v5 = vrot.slane %v20602_v31, 2  ;;  %v11750_v31 = vshll.u32 %v20626_v56, 16  ;;  %vm22830_vm8 = vmmov %vm22817_vm0 }
 0x492   : > { %v11709_v36 = vsel %vm22819_vm9, %v11699_v55, %v11708_v37  ;;  %v11354_v55 = vrot.slane %v20604_v3, 2  ;;  %v11726_v28 = vor.u32 %v11725_v1, %v11722_v21  ;;  %vm22832_vm9 = vmmov %vm22811_vm6 }
 0x493   : > { %14855 = vmatmul.mubr.msk.bf16.gmra.mxu0 %vm22809_vm4, %v20550_v0  ;;  %v14685_v0 = vpop.f32.mrf.mxu0  ;;  %vm22825_vm4 = vmmov %vm22817_vm0 }
 0x494   : > { %14858 = vmatprep.mubr.msk.bf16.mxu0 %vm22810_vm14, %v20555_v23  ;;  %14941 = vmatmul.mubr.msk.bf16.vlgmr.msra.gmra.mxu1 %vm22812_vm5, %v11691_v50  ;;  %v20868_v23 = vadd.f32 %v20750_v7, %v14685_v0  ;;  %v20876_v50 = vpop.f32.mrf.mxu1  ;;  %v11729_v7 = vshrl.u32 %v20616_v57, 16  ;;  %v11718_v0 = vsel %vm22821_vm13, %v11708_v37, %v11717_v63  ;;  %v11741_v37 = vshll.u32 %v20624_v19, 16  ;;  %vm22826_vm14 = vmmov %vm22816_vm1 }
 0x495   : > { %14944 = vmatprep.mubr.msk.bf16.mxu1 %vm22814_vm3, %v11700_v20  ;;  %v9362_v40 = vpop.f32.mrf.mxu0  ;;  %v11727_v1 = vsel %vm22811_vm6, %v11717_v63, %v11726_v28  ;;  %vm22827_vm5 = vmmov %vm22816_vm1  ;;  %v11756_v63 = vshrl.u32 %v20628_v29, 16 }
 0x496   : > { %v20872_v44 = vadd.f32 %v20758_v53, %v9362_v40  ;;  %v11351_v53 = vsel %vm22817_vm0, %v11349_v24, %v11350_v16  ;;  %v20887_v20 = vpop.f32.mrf.mxu1  ;;  %v11731_v8 = vrot.slane %v11729_v7, 2  ;;  %v11738_v24 = vshrl.u32 %v20624_v19, 16  ;;  %vm22829_vm3 = vmmov %vm22816_vm1 }
 0x497   : > { %v14688_v45 = vpop.f32.mrf.mxu0  ;;  %vm22834_vm13 = vmmov %vm22811_vm6 }
 0x498   : > { %v20892_v4 = vadd.f32 %v20765_v42, %v14688_v45  ;;  %v20902_v7 = vpop.f32.mrf.mxu1  ;;  %v11735_v42 = vor.u32 %v11734_v17, %v11731_v8  ;;  %v11740_v45 = vrot.slane %v11738_v24, 2  ;;  %v11752_v17 = vrot.slane %v11750_v31, 3 }
 0x499   : > { %v9375_v40 = vpop.f32.mrf.mxu0  ;;  %v11759_v24 = vshll.u32 %v20628_v29, 16 }
 0x49a   : > { %v20898_v51 = vadd.f32 %v20779_v39, %v9375_v40  ;;  %v11355_v39 = vsel %vm22825_vm4, %v11352_v5, %v11354_v55  ;;  %vm22838_vm4 = vmmov %vm22817_vm0 }
 0x49b   : > { %14859 = vmatmul.mubr.msk.bf16.gmra.mxu0 %vm22816_vm1, %v10625_v54  ;;  %v14689_v34 = vpop.f32.mrf.mxu0  ;;  %v11747_v54 = vshrl.u32 %v20626_v56, 16 }
 0x49c   : > { %14902 = vmatprep.mubr.msk.bf16.mxu0 %vm22818_vm2, %v11351_v53  ;;  %14945 = vmatmul.mubr.msk.bf16.gmra.mxu1 %vm22820_vm12, %v11709_v36  ;;  %v11353_v53 = vsel %vm22823_vm15, %v11350_v16, %v11352_v5  ;;  %v20908_v3 = vadd.f32 %v20783_v49, %v14689_v34  ;;  %v20918_v16 = vpop.f32.mrf.mxu1  ;;  %v11736_v49 = vsel %vm22828_vm10, %v11726_v28, %v11735_v42  ;;  %v11356_v5 = vrot.slane %v20606_v27, 2  ;;  %vm22831_vm2 = vmmov %vm22816_vm1 }
 0x49d   : > { %14948 = vmatprep.mubr.msk.bf16.mxu1 %vm22822_vm11, %v11718_v0  ;;  %v9378_v36 = vpop.f32.mrf.mxu0  ;;  %v11743_v0 = vrot.slane %v11741_v37, 3  ;;  %v11749_v8 = vrot.slane %v11747_v54, 2  ;;  %v11765_v34 = vshrl.u32 %v20633_v15, 16  ;;  %v11768_v28 = vshll.u32 %v20633_v15, 16  ;;  %vm22833_vm12 = vmmov %vm22816_vm1 }
 0x49e   : > { %v20915_v21 = vadd.f32 %v20791_v18, %v9378_v36  ;;  %v20925_v40 = vpop.f32.mrf.mxu1  ;;  %v11357_v54 = vsel %vm22830_vm8, %v11354_v55, %v11356_v5  ;;  %v11758_v36 = vrot.slane %v11756_v63, 2  ;;  %vm22835_vm11 = vmmov %vm22816_vm1 }
 0x49f   : > { %v11744_v18 = vor.u32 %v11743_v0, %v11740_v45  ;;  %v11753_v37 = vor.u32 %v11752_v17, %v11749_v8  ;;  %v14692_v31 = vpop.f32.mrf.mxu0  ;;  %v11767_v0 = vrot.slane %v11765_v34, 2  ;;  %v11777_v34 = vshll.u32 %v20635_v59, 16  ;;  %vm22836_vm15 = vmmov %vm22817_vm0 }
 0x4a0   : > { %vm22841_vm10 = vmmov %vm22811_vm6 }
 0x4a1   : > { %v9391_v45 = vpop.f32.mrf.mxu0  ;;  %v11754_v55 = vsel %vm22834_vm13, %v11744_v18, %v11753_v37  ;;  %vm22843_vm8 = vmmov %vm22817_vm0 }
 0x4a2   : > { %v20944_v8 = vadd.f32 %v20811_v25, %v9391_v45  ;;  %vm22847_vm13 = vmmov %vm22811_vm6 }
 0x4a3   : > { %14903 = vmatmul.mubr.msk.bf16.vlgmr.msra.gmra.mxu0 %vm22824_vm7, %v11353_v53  ;;  %v11745_v53 = vsel %vm22832_vm9, %v11735_v42, %v11744_v18  ;;  %v14693_v17 = vpop.f32.mrf.mxu0  ;;  %v11362_v42 = vrot.slane %v20616_v57, 2  ;;  %v11774_v18 = vshrl.u32 %v20635_v59, 16  ;;  %vm22837_vm7 = vmmov %vm22816_vm1 }
 0x4a4   : > { %14977 = vmatpush3.bf16.msra.mxu0 %v20672_v30  ;;  %14906 = vmatprep.mubr.msk.bf16.mxu0 %vm22826_vm14, %v11355_v39  ;;  %v11358_v30 = vrot.slane %v20608_v26, 2  ;;  %v20935_v26 = vadd.f32 %v20802_v13, %v14692_v31  ;;  %v20939_v39 = vpop.f32.mrf.mxu1  ;;  %v11360_v13 = vrot.slane %v20614_v12, 2  ;;  %v11786_v12 = vshll.u32 %v20637_v62, 16  ;;  %vm22839_vm14 = vmmov %vm22816_vm1 }
 0x4a5   : > { %14949 = vmatmul.mubr.msk.bf16.gmra.mxu1 %vm22827_vm5, %v11727_v1  ;;  %v11761_v1 = vrot.slane %v11759_v24, 3  ;;  %v11776_v45 = vrot.slane %v11774_v18, 2  ;;  %vm22840_vm5 = vmmov %vm22816_vm1 }
 0x4a6   : > { %14952 = vmatprep.mubr.msk.bf16.mxu1 %vm22829_vm3, %v11736_v49  ;;  %v11359_v27 = vsel %vm22817_vm0, %v11356_v5, %v11358_v30  ;;  %v11770_v49 = vrot.slane %v11768_v28, 3  ;;  %v20950_v5 = vadd.f32 %v20819_v47, %v14693_v17  ;;  %v20952_v24 = vpop.f32.mrf.mxu1  ;;  %v9394_v28 = vpop.f32.mrf.mxu0  ;;  %v11361_v57 = vsel %vm22836_vm15, %v11358_v30, %v11360_v13  ;;  %vm22842_vm3 = vmmov %vm22816_vm1 }
 0x4a7   : > { %v11762_v63 = vor.u32 %v11761_v1, %v11758_v36  ;;  %v20959_v31 = vadd.f32 %v20827_v61, %v9394_v28  ;;  %vm22845_vm9 = vmmov %vm22811_vm6 }
 0x4a8   : > { %v11771_v25 = vor.u32 %v11770_v49, %v11767_v0  ;;  %v14696_v47 = vpop.f32.mrf.mxu0  ;;  %v20969_v1 = vpop.f32.mrf.mxu1  ;;  %v11788_v49 = vrot.slane %v11786_v12, 3  ;;  %vm22849_vm15 = vmmov %vm22817_vm0 }
 0x4a9   : > { %v11763_v36 = vsel %vm22811_vm6, %v11753_v37, %v11762_v63  ;;  %v11366_v37 = vrot.slane %v20626_v56, 2 }
 0x4aa   : > { %v9407_v61 = vpop.f32.mrf.mxu0  ;;  %v11772_v30 = vsel %vm22841_vm10, %v11762_v63, %v11771_v25  ;;  %v11792_v63 = vshrl.u32 %v20644_v2, 16  ;;  %vm22854_vm10 = vmmov %vm22811_vm6 }
 0x4ab   : > { %14907 = vmatmul.mubr.msk.bf16.gmra.mxu0 %vm22816_vm1, %v11357_v54  ;;  %v11783_v54 = vshrl.u32 %v20637_v62, 16 }
 0x4ac   : > { %14910 = vmatprep.mubr.msk.bf16.mxu0 %vm22831_vm2, %v11359_v27  ;;  %v11363_v27 = vsel %vm22838_vm4, %v11360_v13, %v11362_v42  ;;  %v20974_v13 = vadd.f32 %v20847_v48, %v9407_v61  ;;  %v14697_v17 = vpop.f32.mrf.mxu0  ;;  %vm22844_vm2 = vmmov %vm22816_vm1  ;;  %v11794_v61 = vrot.slane %v11792_v63, 2 }
 0x4ad   : > { %14953 = vmatmul.mubr.msk.bf16.gmra.mxu1 %vm22833_vm12, %v11745_v53  ;;  %v20965_v53 = vadd.f32 %v20840_v43, %v14696_v47  ;;  %v11785_v0 = vrot.slane %v11783_v54, 2  ;;  %v11364_v43 = vrot.slane %v20624_v19, 2  ;;  %v20980_v18 = vadd.f32 %v20862_v38, %v14697_v17  ;;  %vm22846_vm12 = vmmov %vm22816_vm1 }
 0x4ae   : > { %14956 = vmatprep.mubr.msk.bf16.mxu1 %vm22835_vm11, %v11754_v55  ;;  %v11779_v55 = vrot.slane %v11777_v34, 3  ;;  %v20982_v34 = vpop.f32.mrf.mxu1  ;;  %v11795_v54 = vshll.u32 %v20644_v2, 16  ;;  %v9410_v12 = vpop.f32.mrf.mxu0  ;;  %v11804_v19 = vshll.u32 %v20646_v32, 16  ;;  %vm22848_vm11 = vmmov %vm22816_vm1 }
 0x4af   : > { %v11789_v48 = vor.u32 %v11788_v49, %v11785_v0  ;;  %v20989_v47 = vadd.f32 %v20876_v50, %v9410_v12  ;;  %v11365_v56 = vsel %vm22843_vm8, %v11362_v42, %v11364_v43  ;;  %vm22851_vm4 = vmmov %vm22817_vm0 }
 0x4b0   : > { %v11780_v28 = vor.u32 %v11779_v55, %v11776_v45  ;;  %v14700_v38 = vpop.f32.mrf.mxu0  ;;  %v14746_v45 = vpop.f32.mrf.mxu1  ;;  %v11806_v49 = vrot.slane %v11804_v19, 3  ;;  %vm22857_vm8 = vmmov %vm22817_vm0 }
 0x4b2   : > { %v11781_v55 = vsel %vm22845_vm9, %v11771_v25, %v11780_v28  ;;  %v9423_v0 = vpop.f32.mrf.mxu0  ;;  %v11790_v50 = vsel %vm22847_vm13, %v11780_v28, %v11789_v48  ;;  %v11370_v25 = vrot.slane %v20633_v15, 2  ;;  %v11810_v28 = vshrl.u32 %v20656_v14, 16  ;;  %vm22859_vm9 = vmmov %vm22811_vm6 }
 0x4b3   : > { %14911 = vmatmul.mubr.msk.bf16.gmra.mxu0 %vm22837_vm7, %v11361_v57  ;;  %v11801_v57 = vshrl.u32 %v20646_v32, 16  ;;  %v21002_v17 = vadd.f32 %v20902_v7, %v9423_v0  ;;  %vm22850_vm7 = vmmov %vm22816_vm1 }
 0x4b4   : > { %14914 = vmatprep.mubr.msk.bf16.mxu0 %vm22839_vm14, %v11363_v27  ;;  %v11367_v27 = vsel %vm22817_vm0, %v11364_v43, %v11366_v37  ;;  %v9674_v43 = vpop.f32.mrf.mxu1  ;;  %v14701_v12 = vpop.f32.mrf.mxu0  ;;  %vm22852_vm14 = vmmov %vm22816_vm1 }
 0x4b5   : > { %14957 = vmatmul.mubr.msk.bf16.gmra.mxu1 %vm22840_vm5, %v11763_v36  ;;  %v20995_v36 = vadd.f32 %v20887_v20, %v14700_v38  ;;  %v11803_v42 = vrot.slane %v11801_v57, 2  ;;  %v11368_v20 = vrot.slane %v20628_v29, 2  ;;  %v21008_v63 = vadd.f32 %v20918_v16, %v14701_v12  ;;  %vm22853_vm5 = vmmov %vm22816_vm1 }
 0x4b6   : > { %14960 = vmatprep.mubr.msk.bf16.mxu1 %vm22842_vm3, %v11772_v30  ;;  %v11797_v30 = vrot.slane %v11795_v54, 3  ;;  %v14747_v54 = vpop.f32.mrf.mxu1  ;;  %v11813_v57 = vshll.u32 %v20656_v14, 16  ;;  %v9426_v19 = vpop.f32.mrf.mxu0  ;;  %v11819_v16 = vshrl.u32 %v20674_v46, 16  ;;  %v11372_v12 = vrot.slane %v20635_v59, 2  ;;  %vm22856_vm3 = vmmov %vm22816_vm1 }
 0x4b7   : > { %v11807_v7 = vor.u32 %v11806_v49, %v11803_v42  ;;  %v21013_v38 = vadd.f32 %v20925_v40, %v9426_v19  ;;  %v11369_v29 = vsel %vm22849_vm15, %v11366_v37, %v11368_v20  ;;  %v11371_v15 = vsel %vm22851_vm4, %v11368_v20, %v11370_v25  ;;  %vm22861_vm13 = vmmov %vm22811_vm6 }
 0x4b8   : > { %v11815_v37 = vrot.slane %v11813_v57, 3  ;;  %vm22863_vm15 = vmmov %vm22817_vm0 }
 0x4b9   : > { %vm22865_vm4 = vmmov %vm22817_vm0 }
 0x4bb   : > { %14915 = vmatmul.mubr.msk.bf16.gmra.mxu0 %vm22816_vm1, %v11365_v56  ;;  %v11798_v56 = vor.u32 %v11797_v30, %v11794_v61  ;;  %v11822_v61 = vshll.u32 %v20674_v46, 16 }
 0x4bc   : > { %14918 = vmatprep.mubr.msk.bf16.mxu0 %vm22844_vm2, %v11367_v27  ;;  %v9677_v27 = vpop.f32.mrf.mxu1  ;;  %vm22858_vm2 = vmmov %vm22816_vm1 }
 0x4bd   : > { %14961 = vmatmul.mubr.msk.bf16.gmra.mxu1 %vm22846_vm12, %v11781_v55  ;;  %v14704_v55 = vpop.f32.mrf.mxu0  ;;  %v11799_v40 = vsel %vm22811_vm6, %v11789_v48, %v11798_v56  ;;  %v11808_v49 = vsel %vm22854_vm10, %v11798_v56, %v11807_v7  ;;  %v11824_v48 = vrot.slane %v11822_v61, 3  ;;  %v11828_v56 = vshrl.u32 %v20658_v41, 16  ;;  %vm22860_vm12 = vmmov %vm22816_vm1 }
 0x4be   : > { %14964 = vmatprep.mubr.msk.bf16.mxu1 %vm22848_vm11, %v11790_v50  ;;  %v21021_v30 = vadd.f32 %v20939_v39, %v14704_v55  ;;  %v14790_v0 = vpop.f32.mrf.mxu1  ;;  %v11812_v50 = vrot.slane %v11810_v28, 2  ;;  %v11821_v55 = vrot.slane %v11819_v16, 2  ;;  %vm22862_vm11 = vmmov %vm22816_vm1 }
 0x4bf   : > { %v9439_v42 = vpop.f32.mrf.mxu0  ;;  %vm22868_vm10 = vmmov %vm22817_vm0 }
 0x4c0   : > { %v21028_v20 = vadd.f32 %v20952_v24, %v9439_v42  ;;  %v10270_v39 = vpop.f32.mrf.mxu1  ;;  %v11831_v24 = vshll.u32 %v20658_v41, 16  ;;  %v11373_v42 = vsel %vm22857_vm8, %v11370_v25, %v11372_v12  ;;  %vm22870_vm8 = vmmov %vm22817_vm0 }
 0x4c1   : > { %v14705_v19 = vpop.f32.mrf.mxu0 }
 0x4c2   : > { %22855 = vst [vmem:[#allocation56_spill] sm:$0xff] %v21028_v20  ;;  %v21034_v28 = vadd.f32 %v20969_v1, %v14705_v19  ;;  %v14791_v57 = vpop.f32.mrf.mxu1  ;;  %v11825_v1 = vor.u32 %v11824_v48, %v11821_v55 }
 0x4c3   : > { %14919 = vmatmul.mubr.msk.bf16.gmra.mxu0 %vm22850_vm7, %v11369_v29  ;;  %v11374_v29 = vrot.slane %v20637_v62, 2  ;;  %vm22864_vm7 = vmmov %vm22816_vm1 }
 0x4c4   : > { %14922 = vmatprep.mubr.msk.bf16.mxu0 %vm22852_vm14, %v11371_v15  ;;  %v11816_v15 = vor.u32 %v11815_v37, %v11812_v50  ;;  %v11830_v50 = vrot.slane %v11828_v56, 2  ;;  %v11833_v37 = vrot.slane %v11831_v24, 3  ;;  %vm22866_vm14 = vmmov %vm22816_vm1 }
 0x4c5   : > { %14965 = vmatmul.mubr.msk.bf16.gmra.mxu1 %vm22853_vm5, %v11799_v40  ;;  %v9442_v40 = vpop.f32.mrf.mxu0  ;;  %v11375_v62 = vsel %vm22817_vm0, %v11372_v12, %v11374_v29  ;;  %v11378_v12 = vrot.slane %v20646_v32, 2  ;;  %vm22867_vm5 = vmmov %vm22816_vm1 }
 0x4c6   : > { %14968 = vmatprep.mubr.msk.bf16.mxu1 %vm22856_vm3, %v11808_v49  ;;  %v21039_v59 = vadd.f32 %v20982_v34, %v9442_v40  ;;  %v10273_v49 = vpop.f32.mrf.mxu1  ;;  %v11817_v41 = vsel %vm22859_vm9, %v11807_v7, %v11816_v15  ;;  %v11826_v25 = vsel %vm22861_vm13, %v11816_v15, %v11825_v1  ;;  %v11376_v40 = vrot.slane %v20644_v2, 2  ;;  %vm22869_vm3 = vmmov %vm22816_vm1 }
 0x4c7   : > { %v14708_v20 = vpop.f32.mrf.mxu0  ;;  %v11834_v48 = vor.u32 %v11833_v37, %v11830_v50  ;;  %vm22874_vm9 = vmmov %vm22816_vm1 }
 0x4c8   : > { %v21044_v16 = vadd.f32 %v14746_v45, %v14708_v20  ;;  %v14794_v61 = vpop.f32.mrf.mxu1  ;;  %v11379_v2 = vsel %vm22865_vm4, %v11376_v40, %v11378_v12  ;;  %vm22878_vm13 = vmmov %vm22816_vm1 }
 0x4c9   : > { %v9455_v34 = vpop.f32.mrf.mxu0  ;;  %v11835_v32 = vsel %vm22811_vm6, %v11825_v1, %v11834_v48  ;;  %vm22886_vm4 = vmmov %vm22816_vm1 }
 0x4ca   : > { %v21050_v19 = vadd.f32 %v9674_v43, %v9455_v34  ;;  %v10286_v45 = vpop.f32.mrf.mxu1  ;;  %vm22890_vm6 = vmmov %vm22816_vm1 }
 0x4cb   : > { %14923 = vmatmul.mubr.msk.bf16.gmra.mxu0 %vm22816_vm1, %v11373_v42  ;;  %v14709_v20 = vpop.f32.mrf.mxu0  ;;  %v11377_v42 = vsel %vm22863_vm15, %v11374_v29, %v11376_v40  ;;  %v11380_v29 = vrot.slane %v20656_v14, 2  ;;  %vm22882_vm15 = vmmov %vm22816_vm1 }
 0x4cc   : > { %14926 = vmatprep.mubr.msk.bf16.mxu0 %vm22858_vm2, %v11375_v62  ;;  %v21055_v55 = vadd.f32 %v14747_v54, %v14709_v20  ;;  %v14795_v7 = vpop.f32.mrf.mxu1  ;;  %v11382_v20 = vrot.slane %v20674_v46, 2  ;;  %vm22872_vm2 = vmmov %vm22816_vm1 }
 0x4cd   : > { %14969 = vmatmul.mubr.msk.bf16.gmra.mxu1 %vm22860_vm12, %v11817_v41  ;;  %v9458_v56 = vpop.f32.mrf.mxu0  ;;  %vm22876_vm12 = vmmov %vm22816_vm1 }
 0x4ce   : > { %14972 = vmatprep.mubr.msk.bf16.mxu1 %vm22862_vm11, %v11826_v25  ;;  %v21057_v24 = vadd.f32 %v9677_v27, %v9458_v56  ;;  %v10289_v15 = vpop.f32.mrf.mxu1  ;;  %v9550_v25 = vadd.f32 %v20642_v60, %v20795_v58  ;;  %vm22880_vm11 = vmmov %vm22816_vm1 }
 0x4cf   : > { %v14752_v43 = vpop.f32.mrf.mxu0 }
 0x4d0   : > { %v9972_v62 = vadd.f32 %v14752_v43, %v20763_v52  ;;  %v14798_v41 = vpop.f32.mrf.mxu1  ;;  %v11383_v43 = vsel %vm22870_vm8, %v11380_v29, %v11382_v20  ;;  %vm22899_vm8 = vmmov %vm22816_vm1 }
 0x4d1   : > { %v9827_v54 = vpop.f32.mrf.mxu0 }
 0x4d2   : > { %v9970_v27 = vadd.f32 %v9827_v54, %v20770_v22  ;;  %v21068_v50 = vadd.f32 %v14790_v0, %v9972_v62  ;;  %v10302_v34 = vpop.f32.mrf.mxu1  ;;  %v11381_v22 = vsel %vm22868_vm10, %v11378_v12, %v11380_v29  ;;  %vm22894_vm10 = vmmov %vm22816_vm1 }
 0x4d3   : > { %14927 = vmatmul.mubr.msk.bf16.gmra.mxu0 %vm22864_vm7, %v11377_v42  ;;  %v14753_v37 = vpop.f32.mrf.mxu0  ;;  %v15345_v42 = vld [vmem:[#allocation2 + $0xa0] ss:$0 sps:$4 sm:$0x33]   ;;  %vm22884_vm7 = vmmov %vm22816_vm1 }
 0x4d4   : > { %14930 = vmatprep.mubr.msk.bf16.mxu0 %vm22866_vm14, %v11379_v2  ;;  %v9973_v52 = vadd.f32 %v14753_v37, %v20777_v35  ;;  %v21073_v40 = vadd.f32 %v10270_v39, %v9970_v27  ;;  %v14799_v48 = vpop.f32.mrf.mxu1  ;;  %v11384_v12 = vrot.slane %v15345_v42, 2  ;;  %vm22888_vm14 = vmmov %vm22816_vm1 }
 0x4d5   : > { %14973 = vmatmul.mubr.msk.bf16.gmra.mxu1 %vm22867_vm5, %v11835_v32  ;;  %v9830_v1 = vpop.f32.mrf.mxu0  ;;  %vm22892_vm5 = vmmov %vm22816_vm1 }
 0x4d6   : > { %v9971_v56 = vadd.f32 %v9830_v1, %v9550_v25  ;;  %v21077_v14 = vadd.f32 %v14791_v57, %v9973_v52  ;;  %v10305_v60 = vpop.f32.mrf.mxu1 }
 0x4d7   : > { %v14756_v0 = vpop.f32.mrf.mxu0 }
 0x4d8   : > { %v9976_v35 = vadd.f32 %v14756_v0, %v20807_v33  ;;  %v21083_v58 = vadd.f32 %v10273_v49, %v9971_v56  ;;  %v14802_v39 = vpop.f32.mrf.mxu1  ;;  %v22871_v33 = vld [vmem:[#allocation55_spill] sm:$0xff]  ;;  %v11385_v49 = vsel %vm22817_vm0, %v11382_v20, %v11384_v12  ;;  %v22873_v56 = vld [vmem:[#allocation32_spill] sm:$0xff]  ;;  %vm22902_vm0 = vmmov %vm22816_vm1 }
 0x4d9   : > { %v9843_v46 = vpop.f32.mrf.mxu0 }
 0x4da   : > { %v9974_v2 = vadd.f32 %v9843_v46, %v20817_v9  ;;  %v21086_v62 = vadd.f32 %v14794_v61, %v9976_v35  ;;  %v10318_v32 = vpop.f32.mrf.mxu1 }
 0x4db   : > { %14931 = vmatmul.mubr.msk.bf16.gmra.mxu0 %vm22869_vm3, %v11381_v22  ;;  %v14757_v57 = vpop.f32.mrf.mxu0  ;;  %vm22897_vm3 = vmmov %vm22816_vm1 }
 0x4dc   : > { %14934 = vmatprep.mubr.msk.bf16.mxu0 %vm22816_vm1, %v11383_v43  ;;  %v9977_v54 = vadd.f32 %v14757_v57, %v20823_v10  ;;  %v21089_v27 = vadd.f32 %v10286_v45, %v9974_v2  ;;  %v14803_v37 = vpop.f32.mrf.mxu1  ;;  %v22875_v57 = vld [vmem:[#allocation19_spill] sm:$0xff] }
 0x4dd   : > { %v9846_v29 = vpop.f32.mrf.mxu0 }
 0x4de   : > { %v9975_v25 = vadd.f32 %v9846_v29, %v22871_v33  ;;  %v21093_v52 = vadd.f32 %v14795_v7, %v9977_v54  ;;  %v10321_v9 = vpop.f32.mrf.mxu1 }
 0x4df   : > { %v14760_v1 = vpop.f32.mrf.mxu0 }
 0x4e0   : > { %v9980_v61 = vadd.f32 %v14760_v1, %v20852_v11  ;;  %v21099_v10 = vadd.f32 %v10289_v15, %v9975_v25 }
 0x4e1   : > { %v9859_v45 = vpop.f32.mrf.mxu0  ;;  %v14806_v22 = vpop.f32.mrf.mxu1 }
 0x4e2   : > { %v9978_v42 = vadd.f32 %v9859_v45, %v20860_v6  ;;  %v21102_v0 = vadd.f32 %v14798_v41, %v9980_v61  ;;  %v22877_v41 = vld [vmem:[#allocation36_spill] sm:$0xff] }
 0x4e3   : > { %14935 = vmatmul.mubr.msk.bf16.gmra.mxu0 %vm22872_vm2, %v11385_v49  ;;  %v14761_v20 = vpop.f32.mrf.mxu0  ;;  %v10334_v7 = vpop.f32.mrf.mxu1  ;;  %vm22904_vm2 = vmmov %vm22902_vm0 }
 0x4e4   : > { %14978 = vmatprep.mubr.msk.bf16.mxu0 %vm22874_vm9, %v22873_v56  ;;  %v9981_v43 = vadd.f32 %v14761_v20, %v20868_v23  ;;  %v21105_v35 = vadd.f32 %v10302_v34, %v9978_v42  ;;  %v22879_v42 = vld [vmem:[#allocation34_spill] sm:$0xff]  ;;  %vm22906_vm9 = vmmov %vm22902_vm0 }
 0x4e5   : > { %v9862_v46 = vpop.f32.mrf.mxu0  ;;  %v14807_v2 = vpop.f32.mrf.mxu1 }
 0x4e6   : > { %v9979_v11 = vadd.f32 %v9862_v46, %v20872_v44  ;;  %v21108_v12 = vadd.f32 %v14799_v48, %v9981_v43 }
 0x4e7   : > { %v10337_v54 = vpop.f32.mrf.mxu1 }
 0x4e8   : > { %v14764_v15 = vpop.f32.mrf.mxu0  ;;  %v21115_v29 = vadd.f32 %v10305_v60, %v9979_v11 }
 0x4e9   : > { %v9984_v6 = vadd.f32 %v14764_v15, %v20892_v4 }
 0x4ea   : > { %v9875_v23 = vpop.f32.mrf.mxu0 }
 0x4eb   : > { %14979 = vmatmul.mubr.msk.bf16.vlgmr.msra.gmra.mxu0 %vm22876_vm12, %v22875_v57  ;;  %v9982_v33 = vadd.f32 %v9875_v23, %v20898_v51  ;;  %v21118_v25 = vadd.f32 %v14802_v39, %v9984_v6  ;;  %v22881_v39 = vld [vmem:[#allocation23_spill] sm:$0xff]  ;;  %vm22908_vm12 = vmmov %vm22902_vm0 }
 0x4ec   : > { %14982 = vmatprep.mubr.msk.bf16.mxu0 %vm22878_vm13, %v22877_v41  ;;  %v14810_v34 = vpop.f32.mrf.mxu1  ;;  %v14765_v44 = vpop.f32.mrf.mxu0  ;;  %vm22910_vm13 = vmmov %vm22902_vm0 }
 0x4ed   : > { %v9985_v49 = vadd.f32 %v14765_v44, %v20908_v3  ;;  %v21121_v1 = vadd.f32 %v10318_v32, %v9982_v33  ;;  %v22883_v33 = vld [vmem:[#allocation46_spill] sm:$0xff] }
 0x4ee   : > { %v10350_v48 = vpop.f32.mrf.mxu1  ;;  %v9878_v61 = vpop.f32.mrf.mxu0 }
 0x4ef   : > { %v9983_v4 = vadd.f32 %v9878_v61, %v20915_v21  ;;  %v21124_v45 = vadd.f32 %v14803_v37, %v9985_v49 }
 0x4f0   : > { %v14811_v56 = vpop.f32.mrf.mxu1  ;;  %v14768_v60 = vpop.f32.mrf.mxu0 }
 0x4f1   : > { %v9988_v51 = vadd.f32 %v14768_v60, %v20935_v26  ;;  %v21131_v43 = vadd.f32 %v10321_v9, %v9983_v4 }
 0x4f2   : > { %v10353_v20 = vpop.f32.mrf.mxu1  ;;  %v9891_v3 = vpop.f32.mrf.mxu0 }
 0x4f3   : > { %14983 = vmatmul.mubr.msk.bf16.gmra.mxu0 %vm22880_vm11, %v22879_v42  ;;  %v9986_v46 = vadd.f32 %v9891_v3, %v20944_v8  ;;  %v21134_v11 = vadd.f32 %v14806_v22, %v9988_v51  ;;  %v22885_v22 = vld [vmem:[#allocation41_spill] sm:$0xff]  ;;  %vm22911_vm11 = vmmov %vm22902_vm0 }
 0x4f4   : > { %14986 = vmatprep.mubr.msk.bf16.mxu0 %vm22882_vm15, %v22881_v39  ;;  %v14814_v32 = vpop.f32.mrf.mxu1  ;;  %v14769_v21 = vpop.f32.mrf.mxu0  ;;  %vm22912_vm15 = vmmov %vm22902_vm0 }
 0x4f5   : > { %v9989_v15 = vadd.f32 %v14769_v21, %v20950_v5  ;;  %v21137_v57 = vadd.f32 %v10334_v7, %v9986_v46  ;;  %v22887_v46 = vld [vmem:[#allocation35_spill] sm:$0xff] }
 0x4f6   : > { %v10366_v37 = vpop.f32.mrf.mxu1  ;;  %v9894_v6 = vpop.f32.mrf.mxu0 }
 0x4f7   : > { %v9987_v26 = vadd.f32 %v9894_v6, %v20959_v31  ;;  %v21140_v23 = vadd.f32 %v14807_v2, %v9989_v15 }
 0x4f8   : > { %v14815_v41 = vpop.f32.mrf.mxu1  ;;  %v14772_v9 = vpop.f32.mrf.mxu0 }
 0x4f9   : > { %v9992_v8 = vadd.f32 %v14772_v9, %v20965_v53  ;;  %v21147_v49 = vadd.f32 %v10337_v54, %v9987_v26 }
 0x4fa   : > { %v10369_v44 = vpop.f32.mrf.mxu1  ;;  %v9907_v5 = vpop.f32.mrf.mxu0 }
 0x4fb   : > { %14987 = vmatmul.mubr.msk.bf16.gmra.mxu0 %vm22884_vm7, %v22883_v33  ;;  %v9990_v61 = vadd.f32 %v9907_v5, %v20974_v13  ;;  %v21150_v4 = vadd.f32 %v14810_v34, %v9992_v8  ;;  %v22889_v34 = vld [vmem:[#allocation47_spill] sm:$0xff]  ;;  %vm22913_vm7 = vmmov %vm22902_vm0 }
 0x4fc   : > { %14990 = vmatprep.mubr.msk.bf16.mxu0 %vm22886_vm4, %v22885_v22  ;;  %v14818_v7 = vpop.f32.mrf.mxu1  ;;  %v14773_v31 = vpop.f32.mrf.mxu0  ;;  %vm22914_vm4 = vmmov %vm22902_vm0 }
 0x4fd   : > { %v9993_v60 = vadd.f32 %v14773_v31, %v20980_v18  ;;  %v21153_v42 = vadd.f32 %v10350_v48, %v9990_v61  ;;  %v22891_v61 = vld [vmem:[#allocation42_spill] sm:$0xff] }
 0x4fe   : > { %v10382_v2 = vpop.f32.mrf.mxu1  ;;  %v9910_v51 = vpop.f32.mrf.mxu0 }
 0x4ff   : > { %v9991_v53 = vadd.f32 %v9910_v51, %v20989_v47  ;;  %v21156_v3 = vadd.f32 %v14811_v56, %v9993_v60  ;;  %v22895_v51 = vld [vmem:[#allocation56_spill] sm:$0xff] }
 0x500   : > { %v14819_v39 = vpop.f32.mrf.mxu1  ;;  %v14776_v54 = vpop.f32.mrf.mxu0 }
 0x501   : > { %v9996_v13 = vadd.f32 %v14776_v54, %v20995_v36  ;;  %v21163_v15 = vadd.f32 %v10353_v20, %v9991_v53 }
 0x502   : > { %v10385_v21 = vpop.f32.mrf.mxu1  ;;  %v9923_v18 = vpop.f32.mrf.mxu0 }
 0x503   : > { %14991 = vmatmul.mubr.msk.bf16.gmra.mxu0 %vm22888_vm14, %v22887_v46  ;;  %v9994_v6 = vadd.f32 %v9923_v18, %v21002_v17  ;;  %v21166_v26 = vadd.f32 %v14814_v32, %v9996_v13  ;;  %v22893_v32 = vld [vmem:[#allocation38_spill] sm:$0xff]  ;;  %vm22915_vm14 = vmmov %vm22902_vm0 }
 0x504   : > { %14994 = vmatprep.mubr.msk.bf16.mxu0 %vm22890_vm6, %v22889_v34  ;;  %v14822_v48 = vpop.f32.mrf.mxu1  ;;  %v14777_v47 = vpop.f32.mrf.mxu0  ;;  %vm22916_vm6 = vmmov %vm22902_vm0 }
 0x505   : > { %v9997_v9 = vadd.f32 %v14777_v47, %v21008_v63  ;;  %v21169_v33 = vadd.f32 %v10366_v37, %v9994_v6  ;;  %v22896_v47 = vld [vmem:[#allocation26_spill] sm:$0xff] }
 0x506   : > { %v10398_v56 = vpop.f32.mrf.mxu1  ;;  %v9926_v8 = vpop.f32.mrf.mxu0 }
 0x507   : > { %v9995_v36 = vadd.f32 %v9926_v8, %v21013_v38  ;;  %v21172_v5 = vadd.f32 %v14815_v41, %v9997_v9  ;;  %v22898_v8 = vld [vmem:[#allocation48_spill] sm:$0xff] }
 0x508   : > { %v14823_v22 = vpop.f32.mrf.mxu1  ;;  %v14780_v20 = vpop.f32.mrf.mxu0 }
 0x509   : > { %v10000_v17 = vadd.f32 %v14780_v20, %v21021_v30  ;;  %v21179_v60 = vadd.f32 %v10369_v44, %v9995_v36 }
 0x50a   : > { %v10401_v31 = vpop.f32.mrf.mxu1  ;;  %v9939_v63 = vpop.f32.mrf.mxu0 }
 0x50b   : > { %14995 = vmatmul.mubr.msk.bf16.gmra.mxu0 %vm22892_vm5, %v22891_v61  ;;  %v9998_v53 = vadd.f32 %v9939_v63, %v22895_v51  ;;  %v21182_v54 = vadd.f32 %v14818_v7, %v10000_v17  ;;  %vm22917_vm5 = vmmov %vm22902_vm0 }
 0x50c   : > { %14998 = vmatprep.mubr.msk.bf16.mxu0 %vm22894_vm10, %v22893_v32  ;;  %v14866_v37 = vpop.f32.mrf.mxu1  ;;  %v14781_v38 = vpop.f32.mrf.mxu0  ;;  %vm22918_vm10 = vmmov %vm22902_vm0 }
 0x50d   : > { %v10001_v46 = vadd.f32 %v14781_v38, %v21034_v28  ;;  %v21185_v13 = vadd.f32 %v10382_v2, %v9998_v53  ;;  %v22900_v38 = vld [vmem:[#allocation39_spill] sm:$0xff] }
 0x50e   : > { %v11037_v41 = vpop.f32.mrf.mxu1  ;;  %v9942_v34 = vpop.f32.mrf.mxu0 }
 0x50f   : > { %v9999_v30 = vadd.f32 %v9942_v34, %v21039_v59  ;;  %v21188_v6 = vadd.f32 %v14819_v39, %v10001_v46 }
 0x510   : > { %v14867_v18 = vpop.f32.mrf.mxu1  ;;  %v14784_v44 = vpop.f32.mrf.mxu0 }
 0x511   : > { %v10004_v7 = vadd.f32 %v14784_v44, %v21044_v16  ;;  %v21195_v36 = vadd.f32 %v10385_v21, %v9999_v30 }
 0x512   : > { %v11040_v9 = vpop.f32.mrf.mxu1  ;;  %v9955_v28 = vpop.f32.mrf.mxu0 }
 0x513   : > { %14999 = vmatmul.mubr.msk.bf16.gmra.mxu0 %vm22897_vm3, %v22896_v47  ;;  %v10002_v20 = vadd.f32 %v9955_v28, %v21050_v19  ;;  %v21198_v61 = vadd.f32 %v14822_v48, %v10004_v7  ;;  %v22901_v48 = vld [vmem:[#allocation5_spill] sm:$0xff]  ;;  %vm22919_vm3 = vmmov %vm22902_vm0 }
 0x514   : > { %15002 = vmatprep.mubr.msk.bf16.mxu0 %vm22899_vm8, %v22898_v8  ;;  %v14870_v2 = vpop.f32.mrf.mxu1  ;;  %v14785_v59 = vpop.f32.mrf.mxu0  ;;  %vm22920_vm8 = vmmov %vm22902_vm0 }
 0x515   : > { %v10005_v17 = vadd.f32 %v14785_v59, %v21055_v55  ;;  %v21201_v32 = vadd.f32 %v10398_v56, %v10002_v20  ;;  %v22903_v59 = vld [vmem:[#allocation8_spill] sm:$0xff] }
 0x516   : > { %v11053_v39 = vpop.f32.mrf.mxu1  ;;  %v9958_v63 = vpop.f32.mrf.mxu0 }
 0x517   : > { %v10003_v16 = vadd.f32 %v9958_v63, %v21057_v24  ;;  %v21204_v53 = vadd.f32 %v14823_v22, %v10005_v17 }
 0x518   : > { %v14871_v51 = vpop.f32.mrf.mxu1  ;;  %v14828_v21 = vpop.f32.mrf.mxu0 }
 0x519   : > { %v10865_v19 = vadd.f32 %v14828_v21, %v21068_v50  ;;  %v21211_v34 = vadd.f32 %v10401_v31, %v10003_v16 }
 0x51a   : > { %v11056_v46 = vpop.f32.mrf.mxu1  ;;  %v10720_v55 = vpop.f32.mrf.mxu0 }
 0x51b   : > { %15003 = vmatmul.mubr.msk.bf16.gmra.mxu0 %vm22816_vm1, %v22900_v38  ;;  %v10863_v30 = vadd.f32 %v10720_v55, %v21073_v40  ;;  %v21214_v44 = vadd.f32 %v14866_v37, %v10865_v19  ;;  %v22905_v37 = vld [vmem:[#allocation52_spill] sm:$0xff]  ;;  %vm22921_vm1 = vmmov %vm22902_vm0 }
 0x51c   : > { %15006 = vmatprep.mubr.msk.bf16.mxu0 %vm22902_vm0, %v22901_v48  ;;  %v14874_v56 = vpop.f32.mrf.mxu1  ;;  %v14829_v24 = vpop.f32.mrf.mxu0 }
 0x51d   : > { %v10866_v47 = vadd.f32 %v14829_v24, %v21077_v14  ;;  %v21217_v7 = vadd.f32 %v11037_v41, %v10863_v30  ;;  %v22907_v24 = vld [vmem:[#allocation44_spill] sm:$0xff] }
 0x51e   : > { %v11069_v22 = vpop.f32.mrf.mxu1  ;;  %v10723_v8 = vpop.f32.mrf.mxu0 }
 0x51f   : > { %v10864_v50 = vadd.f32 %v10723_v8, %v21083_v58  ;;  %v21220_v20 = vadd.f32 %v14867_v18, %v10866_v47 }
 0x520   : > { %v14875_v28 = vpop.f32.mrf.mxu1 }
 0x521   : > { %v21227_v63 = vadd.f32 %v11040_v9, %v10864_v50 }
 0x522   : > { %v11072_v17 = vpop.f32.mrf.mxu1 }
 0x523   : > { %v14832_v31 = vpop.f32.mrf.mxu0  ;;  %15007 = vmatmul.mubr.msk.bf16.gmra.mxu0 %vm22904_vm2, %v22903_v59  ;;  %vm22922_vm2 = vmmov %vm22902_vm0 }
 0x524   : > { %v10869_v40 = vadd.f32 %v14832_v31, %v21086_v62  ;;  %15010 = vmatprep.mubr.msk.bf16.mxu0 %vm22906_vm9, %v22905_v37  ;;  %v14878_v41 = vpop.f32.mrf.mxu1  ;;  %vm22923_vm9 = vmmov %vm22902_vm0 }
 0x525   : > { %v10736_v14 = vpop.f32.mrf.mxu0 }
 0x526   : > { %v10867_v16 = vadd.f32 %v10736_v14, %v21089_v27  ;;  %v21230_v21 = vadd.f32 %v14870_v2, %v10869_v40  ;;  %v11085_v18 = vpop.f32.mrf.mxu1 }
 0x527   : > { %v14833_v58 = vpop.f32.mrf.mxu0 }
 0x528   : > { %v10870_v38 = vadd.f32 %v14833_v58, %v21093_v52  ;;  %v21233_v19 = vadd.f32 %v11053_v39, %v10867_v16  ;;  %v14879_v55 = vpop.f32.mrf.mxu1 }
 0x529   : > { %v10739_v48 = vpop.f32.mrf.mxu0 }
 0x52a   : > { %v10868_v62 = vadd.f32 %v10739_v48, %v21099_v10  ;;  %v21236_v30 = vadd.f32 %v14871_v51, %v10870_v38  ;;  %v11088_v47 = vpop.f32.mrf.mxu1 }
 0x52b   : > { %v14836_v9 = vpop.f32.mrf.mxu0  ;;  %15011 = vmatmul.mubr.msk.bf16.gmra.mxu0 %vm22908_vm12, %v22907_v24  ;;  %vm22924_vm12 = vmmov %vm22902_vm0 }
 0x52c   : > { %v10873_v27 = vadd.f32 %v14836_v9, %v21102_v0  ;;  %v21241_v2 = vadd.f32 %v11056_v46, %v10868_v62  ;;  %v14882_v50 = vpop.f32.mrf.mxu1 }
 0x52d   : > { %v10752_v8 = vpop.f32.mrf.mxu0 }
 0x52e   : > { %v10871_v52 = vadd.f32 %v10752_v8, %v21105_v35  ;;  %v21244_v39 = vadd.f32 %v14874_v56, %v10873_v27  ;;  %v11101_v59 = vpop.f32.mrf.mxu1 }
 0x52f   : > { %v14837_v31 = vpop.f32.mrf.mxu0 }
 0x530   : > { %v10874_v10 = vadd.f32 %v14837_v31, %v21108_v12  ;;  %v21247_v51 = vadd.f32 %v11069_v22, %v10871_v52  ;;  %v14883_v37 = vpop.f32.mrf.mxu1 }
 0x531   : > { %v10755_v40 = vpop.f32.mrf.mxu0 }
 0x532   : > { %v10872_v14 = vadd.f32 %v10755_v40, %v21115_v29  ;;  %v21250_v16 = vadd.f32 %v14875_v28, %v10874_v10  ;;  %v11104_v46 = vpop.f32.mrf.mxu1 }
 0x533   : > { %v14840_v0 = vpop.f32.mrf.mxu0 }
 0x534   : > { %v10877_v58 = vadd.f32 %v14840_v0, %v21118_v25  ;;  %v21253_v38 = vadd.f32 %v11072_v17, %v10872_v14  ;;  %v14886_v56 = vpop.f32.mrf.mxu1 }
 0x535   : > { %v10768_v35 = vpop.f32.mrf.mxu0 }
 0x536   : > { %v10875_v48 = vadd.f32 %v10768_v35, %v21121_v1  ;;  %v21256_v62 = vadd.f32 %v14878_v41, %v10877_v58  ;;  %v11117_v22 = vpop.f32.mrf.mxu1 }
 0x537   : > { %v14841_v12 = vpop.f32.mrf.mxu0 }
 0x538   : > { %v10878_v9 = vadd.f32 %v14841_v12, %v21124_v45  ;;  %v21259_v24 = vadd.f32 %v11085_v18, %v10875_v48  ;;  %v14887_v28 = vpop.f32.mrf.mxu1 }
 0x539   : > { %v10771_v29 = vpop.f32.mrf.mxu0 }
 0x53a   : > { %v10876_v27 = vadd.f32 %v10771_v29, %v21131_v43  ;;  %v21262_v8 = vadd.f32 %v14879_v55, %v10878_v9  ;;  %v11120_v17 = vpop.f32.mrf.mxu1 }
 0x53b   : > { %v14844_v25 = vpop.f32.mrf.mxu0 }
 0x53c   : > { %v10881_v52 = vadd.f32 %v14844_v25, %v21134_v11  ;;  %v21265_v31 = vadd.f32 %v11088_v47, %v10876_v27  ;;  %v14890_v41 = vpop.f32.mrf.mxu1 }
 0x53d   : > { %v10784_v1 = vpop.f32.mrf.mxu0 }
 0x53e   : > { %v10879_v10 = vadd.f32 %v10784_v1, %v21137_v57  ;;  %v21268_v40 = vadd.f32 %v14882_v50, %v10881_v52  ;;  %v11133_v18 = vpop.f32.mrf.mxu1 }
 0x53f   : > { %v14845_v45 = vpop.f32.mrf.mxu0 }
 0x540   : > { %v10882_v14 = vadd.f32 %v14845_v45, %v21140_v23  ;;  %v21271_v0 = vadd.f32 %v11101_v59, %v10879_v10  ;;  %v14891_v55 = vpop.f32.mrf.mxu1 }
 0x541   : > { %v10787_v43 = vpop.f32.mrf.mxu0 }
 0x542   : > { %v10880_v58 = vadd.f32 %v10787_v43, %v21147_v49  ;;  %v21274_v35 = vadd.f32 %v14883_v37, %v10882_v14  ;;  %v11136_v47 = vpop.f32.mrf.mxu1 }
 0x543   : > { %v14848_v11 = vpop.f32.mrf.mxu0 }
 0x544   : > { %v10885_v48 = vadd.f32 %v14848_v11, %v21150_v4  ;;  %v21277_v12 = vadd.f32 %v11104_v46, %v10880_v58  ;;  %v14894_v50 = vpop.f32.mrf.mxu1 }
 0x545   : > { %v10800_v57 = vpop.f32.mrf.mxu0 }
 0x546   : > { %v10883_v9 = vadd.f32 %v10800_v57, %v21153_v42  ;;  %v21280_v29 = vadd.f32 %v14886_v56, %v10885_v48  ;;  %v11149_v59 = vpop.f32.mrf.mxu1 }
 0x547   : > { %v14849_v23 = vpop.f32.mrf.mxu0 }
 0x548   : > { %v10886_v27 = vadd.f32 %v14849_v23, %v21156_v3  ;;  %v21283_v25 = vadd.f32 %v11117_v22, %v10883_v9  ;;  %v14895_v46 = vpop.f32.mrf.mxu1 }
 0x549   : > { %v10803_v49 = vpop.f32.mrf.mxu0 }
 0x54a   : > { %v10884_v37 = vadd.f32 %v10803_v49, %v21163_v15  ;;  %v21286_v52 = vadd.f32 %v14887_v28, %v10886_v27  ;;  %v11152_v3 = vpop.f32.mrf.mxu1 }
 0x54b   : > { %v14852_v4 = vpop.f32.mrf.mxu0 }
 0x54c   : > { %v10889_v1 = vadd.f32 %v14852_v4, %v21166_v26  ;;  %v21289_v10 = vadd.f32 %v11120_v17, %v10884_v37  ;;  %v14898_v26 = vpop.f32.mrf.mxu1 }
 0x54d   : > { %v10816_v42 = vpop.f32.mrf.mxu0 }
 0x54e   : > { %v10887_v56 = vadd.f32 %v10816_v42, %v21169_v33  ;;  %v21292_v45 = vadd.f32 %v14890_v41, %v10889_v1  ;;  %v11165_v9 = vpop.f32.mrf.mxu1 }
 0x54f   : > { %v14853_v14 = vpop.f32.mrf.mxu0 }
 0x550   : > { %v10890_v22 = vadd.f32 %v14853_v14, %v21172_v5  ;;  %v21295_v43 = vadd.f32 %v11133_v18, %v10887_v56  ;;  %v14899_v49 = vpop.f32.mrf.mxu1 }
 0x551   : > { %v10819_v15 = vpop.f32.mrf.mxu0 }
 0x552   : > { %v10888_v28 = vadd.f32 %v10819_v15, %v21179_v60  ;;  %v21298_v58 = vadd.f32 %v14891_v55, %v10890_v22  ;;  %v11168_v1 = vpop.f32.mrf.mxu1 }
 0x553   : > { %v14856_v11 = vpop.f32.mrf.mxu0 }
 0x554   : > { %v10893_v17 = vadd.f32 %v14856_v11, %v21182_v54  ;;  %v21301_v48 = vadd.f32 %v11136_v47, %v10888_v28  ;;  %v21324_v14 = vpop.f32.mrf.mxu1 }
 0x555   : > { %v10832_v33 = vpop.f32.mrf.mxu0 }
 0x556   : > { %v10891_v41 = vadd.f32 %v10832_v33, %v21185_v13  ;;  %v21304_v57 = vadd.f32 %v14894_v50, %v10893_v17 }
 0x557   : > { %v14857_v5 = vpop.f32.mrf.mxu0 }
 0x558   : > { %v10894_v18 = vadd.f32 %v14857_v5, %v21188_v6  ;;  %v21307_v23 = vadd.f32 %v11149_v59, %v10891_v41 }
 0x559   : > { %v10835_v60 = vpop.f32.mrf.mxu0 }
 0x55a   : > { %v10892_v55 = vadd.f32 %v10835_v60, %v21195_v36  ;;  %v21310_v27 = vadd.f32 %v14895_v46, %v10894_v18 }
 0x55b   : > { %v14860_v54 = vpop.f32.mrf.mxu0 }
 0x55c   : > { %v10897_v47 = vadd.f32 %v14860_v54, %v21198_v61  ;;  %v21313_v37 = vadd.f32 %v11152_v3, %v10892_v55 }
 0x55d   : > { %v10848_v13 = vpop.f32.mrf.mxu0 }
 0x55e   : > { %v10895_v50 = vadd.f32 %v10848_v13, %v21201_v32  ;;  %v21316_v4 = vadd.f32 %v14898_v26, %v10897_v47 }
 0x55f   : > { %v14861_v6 = vpop.f32.mrf.mxu0 }
 0x560   : > { %v10898_v59 = vadd.f32 %v14861_v6, %v21204_v53  ;;  %v21319_v42 = vadd.f32 %v11165_v9, %v10895_v50  ;;  %v21334_v53 = vpop.f32.mrf.mxu1 }
 0x561   : > { %v10851_v36 = vpop.f32.mrf.mxu0 }
 0x562   : > { %v10896_v46 = vadd.f32 %v10851_v36, %v21211_v34  ;;  %v21322_v56 = vadd.f32 %v14899_v49, %v10898_v59  ;;  %v21342_v17 = vpop.f32.mrf.mxu1 }
 0x563   : > { %v14904_v61 = vpop.f32.mrf.mxu0 }
 0x564   : > { %v21327_v3 = vadd.f32 %v14904_v61, %v21214_v44  ;;  %v21329_v32 = vadd.f32 %v11168_v1, %v10896_v46  ;;  %v21350_v9 = vpop.f32.mrf.mxu1 }
 0x565   : > { %v11480_v22 = vpop.f32.mrf.mxu0 }
 0x566   : > { %v21332_v15 = vadd.f32 %v11480_v22, %v21217_v7  ;;  %v21358_v60 = vpop.f32.mrf.mxu1 }
 0x567   : > { %v14905_v28 = vpop.f32.mrf.mxu0 }
 0x568   : > { %v21337_v11 = vadd.f32 %v14905_v28, %v21220_v20  ;;  %v21366_v54 = vpop.f32.mrf.mxu1 }
 0x569   : > { %v11483_v34 = vpop.f32.mrf.mxu0 }
 0x56a   : > { %v21340_v26 = vadd.f32 %v11483_v34, %v21227_v63  ;;  %v21374_v50 = vpop.f32.mrf.mxu1 }
 0x56b   : > { %v14908_v44 = vpop.f32.mrf.mxu0 }
 0x56c   : > { %v21345_v33 = vadd.f32 %v14908_v44, %v21230_v21  ;;  %v21382_v59 = vpop.f32.mrf.mxu1 }
 0x56d   : > { %v11496_v41 = vpop.f32.mrf.mxu0 }
 0x56e   : > { %v21348_v7 = vadd.f32 %v11496_v41, %v21233_v19  ;;  %v21390_v61 = vpop.f32.mrf.mxu1 }
 0x56f   : > { %v14909_v5 = vpop.f32.mrf.mxu0 }
 0x570   : > { %v21353_v20 = vadd.f32 %v14909_v5, %v21236_v30  ;;  %v21398_v34 = vpop.f32.mrf.mxu1 }
 0x571   : > { %v11499_v18 = vpop.f32.mrf.mxu0 }
 0x572   : > { %v21356_v63 = vadd.f32 %v11499_v18, %v21241_v2  ;;  %v21406_v5 = vpop.f32.mrf.mxu1 }
 0x573   : > { %v14912_v55 = vpop.f32.mrf.mxu0 }
 0x574   : > { %v21361_v21 = vadd.f32 %v14912_v55, %v21244_v39 }
 0x575   : > { %v11512_v49 = vpop.f32.mrf.mxu0 }
 0x576   : > { %v21364_v19 = vadd.f32 %v11512_v49, %v21247_v51  ;;  %v21414_v49 = vpop.f32.mrf.mxu1 }
 0x577   : > { %v14913_v47 = vpop.f32.mrf.mxu0 }
 0x578   : > { %v21369_v30 = vadd.f32 %v14913_v47, %v21250_v16 }
 0x579   : > { %v11515_v13 = vpop.f32.mrf.mxu0 }
 0x57a   : > { %v21372_v2 = vadd.f32 %v11515_v13, %v21253_v38 }
 0x57b   : > { %v14916_v1 = vpop.f32.mrf.mxu0 }
 0x57c   : > { %v21377_v39 = vadd.f32 %v14916_v1, %v21256_v62  ;;  %v21422_v1 = vpop.f32.mrf.mxu1 }
 0x57d   : > { %v11528_v6 = vpop.f32.mrf.mxu0 }
 0x57e   : > { %v21380_v51 = vadd.f32 %v11528_v6, %v21259_v24 }
 0x57f   : > { %v14917_v36 = vpop.f32.mrf.mxu0 }
 0x580   : > { %v21385_v16 = vadd.f32 %v14917_v36, %v21262_v8 }
 0x581   : > { %v11531_v46 = vpop.f32.mrf.mxu0 }
 0x582   : > { %v21388_v38 = vadd.f32 %v11531_v46, %v21265_v31  ;;  %v21430_v46 = vpop.f32.mrf.mxu1 }
 0x583   : > { %v14920_v22 = vpop.f32.mrf.mxu0 }
 0x584   : > { %v21393_v62 = vadd.f32 %v14920_v22, %v21268_v40 }
 0x585   : > { %v11544_v28 = vpop.f32.mrf.mxu0 }
 0x586   : > { %v21396_v24 = vadd.f32 %v11544_v28, %v21271_v0 }
 0x587   : > { %v14921_v44 = vpop.f32.mrf.mxu0 }
 0x588   : > { %v21401_v8 = vadd.f32 %v14921_v44, %v21274_v35  ;;  %v21438_v44 = vpop.f32.mrf.mxu1 }
 0x589   : > { %v11547_v41 = vpop.f32.mrf.mxu0 }
 0x58a   : > { %v21404_v31 = vadd.f32 %v11547_v41, %v21277_v12 }
 0x58b   : > { %v14924_v18 = vpop.f32.mrf.mxu0 }
 0x58c   : > { %v21409_v40 = vadd.f32 %v14924_v18, %v21280_v29 }
 0x58d   : > { %v11560_v55 = vpop.f32.mrf.mxu0 }
 0x58e   : > { %v21412_v0 = vadd.f32 %v11560_v55, %v21283_v25  ;;  %v21446_v55 = vpop.f32.mrf.mxu1 }
 0x58f   : > { %v14925_v47 = vpop.f32.mrf.mxu0 }
 0x590   : > { %v21417_v35 = vadd.f32 %v14925_v47, %v21286_v52 }
 0x591   : > { %v11563_v13 = vpop.f32.mrf.mxu0 }
 0x592   : > { %v21420_v12 = vadd.f32 %v11563_v13, %v21289_v10 }
 0x593   : > { %v14928_v6 = vpop.f32.mrf.mxu0 }
 0x594   : > { %v21425_v29 = vadd.f32 %v14928_v6, %v21292_v45  ;;  %v21454_v6 = vpop.f32.mrf.mxu1 }
 0x595   : > { %v11576_v36 = vpop.f32.mrf.mxu0 }
 0x596   : > { %v21428_v25 = vadd.f32 %v11576_v36, %v21295_v43 }
 0x597   : > { %v14929_v22 = vpop.f32.mrf.mxu0 }
 0x598   : > { %v21433_v52 = vadd.f32 %v14929_v22, %v21298_v58 }
 0x599   : > { %v11579_v28 = vpop.f32.mrf.mxu0 }
 0x59a   : > { %v21436_v10 = vadd.f32 %v11579_v28, %v21301_v48  ;;  %v21462_v28 = vpop.f32.mrf.mxu1 }
 0x59b   : > { %v14932_v41 = vpop.f32.mrf.mxu0 }
 0x59c   : > { %v21441_v45 = vadd.f32 %v14932_v41, %v21304_v57 }
 0x59d   : > { %v11592_v18 = vpop.f32.mrf.mxu0 }
 0x59e   : > { %v21444_v43 = vadd.f32 %v11592_v18, %v21307_v23 }
 0x59f   : > { %v14933_v47 = vpop.f32.mrf.mxu0 }
 0x5a0   : > { %v21449_v58 = vadd.f32 %v14933_v47, %v21310_v27  ;;  %v12075_v47 = vadd.f32 %v21324_v14, %v21327_v3  ;;  %v12076_v14 = vadd.f32 %v21342_v17, %v21337_v11 }
 0x5a1   : > { %v11595_v13 = vpop.f32.mrf.mxu0 }
 0x5a2   : > { %v21452_v48 = vadd.f32 %v11595_v13, %v21313_v37  ;;  %v21472_v13 = vpop.f32.mrf.mxu1 }
 0x5a3   : > { %v14936_v36 = vpop.f32.mrf.mxu0 }
 0x5a4   : > { %v21457_v57 = vadd.f32 %v14936_v36, %v21316_v4  ;;  %v21485_v3 = vpop.f32.mrf.mxu1 }
 0x5a5   : > { %v11608_v22 = vpop.f32.mrf.mxu0 }
 0x5a6   : > { %v21460_v23 = vadd.f32 %v11608_v22, %v21319_v42  ;;  %v21478_v42 = vld [vmem:[%s21679_s6] ss:$0 sm:$0xff] }
 0x5a7   : > { %v14937_v41 = vpop.f32.mrf.mxu0 }
 0x5a8   : > { %v21465_v27 = vadd.f32 %v14937_v41, %v21322_v56  ;;  %v12073_v56 = vadd.f32 %v21334_v53, %v21332_v15 }
 0x5a9   : > { %v11611_v18 = vpop.f32.mrf.mxu0 }
 0x5aa   : > { %v21468_v37 = vadd.f32 %v11611_v18, %v21329_v32 }
 0x5ab   : > { %v14980_v4 = vpop.f32.mrf.mxu0 }
 0x5ac   : > { %22909 = vst [vmem:[#allocation49_spill] sm:$0xff] %v21468_v37  ;;  %v12392_v36 = vadd.f32 %v14980_v4, %v12075_v47  ;;  %v12074_v4 = vadd.f32 %v21350_v9, %v21340_v26  ;;  %v21500_v37 = vpop.f32.mrf.mxu1  ;;  %v12077_v9 = vadd.f32 %v21366_v54, %v21348_v7  ;;  %v12078_v54 = vadd.f32 %v21382_v59, %v21356_v63 }
 0x5ad   : > { %v12247_v22 = vpop.f32.mrf.mxu0  ;;  %v12081_v59 = vadd.f32 %v21398_v34, %v21364_v19  ;;  %v12082_v34 = vadd.f32 %v21414_v49, %v21372_v2  ;;  %v12085_v49 = vadd.f32 %v21430_v46, %v21380_v51  ;;  %v12086_v46 = vadd.f32 %v21446_v55, %v21388_v38 }
 0x5ae   : > { %v12435_v32 = vadd.f32 %v21478_v42, %v12392_v36  ;;  %v12390_v41 = vadd.f32 %v12247_v22, %v12073_v56  ;;  %v12079_v22 = vadd.f32 %v21358_v60, %v21345_v33  ;;  %v12089_v55 = vadd.f32 %v21462_v28, %v21396_v24 }
 0x5af   : > { %v14981_v18 = vpop.f32.mrf.mxu0  ;;  %v12090_v24 = vadd.f32 %v21485_v3, %v21404_v31 }
 0x5b0   : > { %v12471_v47 = vmax.f32 %v12435_v32, 0.0  ;;  %v12433_v15 = vadd.f32 %v21478_v42, %v12390_v41  ;;  %v12393_v53 = vadd.f32 %v14981_v18, %v12076_v14 }
 0x5b1   : > { %v12250_v36 = vpop.f32.mrf.mxu0 }
 0x5b2   : > { %12507 = vst.msk [vmem:[%s21490_s14 + $0x10] sm:$0xff] %vm22910_vm13, %v12471_v47  ;;  %v12469_v11 = vmax.f32 %v12433_v15, 0.0  ;;  %v12436_v17 = vadd.f32 %v21478_v42, %v12393_v53  ;;  %v12391_v56 = vadd.f32 %v12250_v36, %v12074_v4  ;;  %v12080_v15 = vadd.f32 %v21374_v50, %v21353_v20  ;;  %v21512_v53 = vpop.f32.mrf.mxu1  ;;  %vm22925_vm13 = vmmov %vm22902_vm0 }
 0x5b3   : > { %v14984_v32 = vpop.f32.mrf.mxu0  ;;  %v12093_v31 = vadd.f32 %v21512_v53, %v21412_v0 }
 0x5b4   : > { %12505 = vst.msk [vmem:[%s21490_s14] sm:$0xff] %vm22911_vm11, %v12469_v11  ;;  %v12472_v41 = vmax.f32 %v12436_v17, 0.0  ;;  %v12434_v14 = vadd.f32 %v21478_v42, %v12391_v56  ;;  %v12396_v26 = vadd.f32 %v14984_v32, %v12079_v22  ;;  %v12083_v22 = vadd.f32 %v21390_v61, %v21361_v21  ;;  %v21524_v32 = vpop.f32.mrf.mxu1  ;;  %vm22926_vm11 = vmmov %vm22902_vm0 }
 0x5b5   : > { %v12263_v18 = vpop.f32.mrf.mxu0 }
 0x5b6   : > { %12508 = vst.msk [vmem:[%s21490_s14 + $0x18] sm:$0xff] %vm22912_vm15, %v12472_v41  ;;  %v12470_v47 = vmax.f32 %v12434_v14, 0.0  ;;  %v12439_v33 = vadd.f32 %v21478_v42, %v12396_v26  ;;  %v12394_v60 = vadd.f32 %v12263_v18, %v12077_v9  ;;  %vm22927_vm15 = vmmov %vm22902_vm0 }
 0x5b7   : > { %v14985_v4 = vpop.f32.mrf.mxu0 }
 0x5b8   : > { %12506 = vst.msk [vmem:[%s21490_s14 + $0x8] sm:$0xff] %vm22913_vm7, %v12470_v47  ;;  %v12475_v36 = vmax.f32 %v12439_v33, 0.0  ;;  %v12437_v11 = vadd.f32 %v21478_v42, %v12394_v60  ;;  %v12397_v7 = vadd.f32 %v14985_v4, %v12080_v15  ;;  %v12084_v47 = vadd.f32 %v21406_v5, %v21369_v30  ;;  %v21536_v33 = vpop.f32.mrf.mxu1  ;;  %vm22928_vm7 = vmmov %vm22902_vm0 }
 0x5b9   : > { %v12266_v17 = vpop.f32.mrf.mxu0  ;;  %v12094_v0 = vadd.f32 %v21536_v33, %v21420_v12 }
 0x5ba   : > { %12511 = vst.msk [vmem:[%s21490_s14 + $0x30] sm:$0xff] %vm22914_vm4, %v12475_v36  ;;  %v12473_v56 = vmax.f32 %v12437_v11, 0.0  ;;  %v12440_v20 = vadd.f32 %v21478_v42, %v12397_v7  ;;  %v12395_v50 = vadd.f32 %v12266_v17, %v12078_v54  ;;  %v12087_v7 = vadd.f32 %v21422_v1, %v21377_v39  ;;  %v21548_v54 = vpop.f32.mrf.mxu1  ;;  %vm22929_vm4 = vmmov %vm22902_vm0 }
 0x5bb   : > { %v14988_v41 = vpop.f32.mrf.mxu0 }
 0x5bc   : > { %12509 = vst.msk [vmem:[%s21490_s14 + $0x20] sm:$0xff] %vm22915_vm14, %v12473_v56  ;;  %v12476_v14 = vmax.f32 %v12440_v20, 0.0  ;;  %v12438_v26 = vadd.f32 %v21478_v42, %v12395_v50  ;;  %v12400_v63 = vadd.f32 %v14988_v41, %v12083_v22  ;;  %v12088_v41 = vadd.f32 %v21438_v44, %v21385_v16  ;;  %vm22930_vm14 = vmmov %vm22902_vm0 }
 0x5bd   : > { %v12279_v9 = vpop.f32.mrf.mxu0 }
 0x5be   : > { %12512 = vst.msk [vmem:[%s21490_s14 + $0x38] sm:$0xff] %vm22916_vm6, %v12476_v14  ;;  %v12474_v18 = vmax.f32 %v12438_v26, 0.0  ;;  %v12443_v21 = vadd.f32 %v21478_v42, %v12400_v63  ;;  %v12398_v61 = vadd.f32 %v12279_v9, %v12081_v59  ;;  %v21560_v14 = vpop.f32.mrf.mxu1  ;;  %vm22931_vm6 = vmmov %vm22902_vm0 }
 0x5bf   : > { %v14989_v60 = vpop.f32.mrf.mxu0  ;;  %v12097_v12 = vadd.f32 %v21560_v14, %v21428_v25 }
 0x5c0   : > { %12510 = vst.msk [vmem:[%s21490_s14 + $0x28] sm:$0xff] %vm22917_vm5, %v12474_v18  ;;  %v12479_v15 = vmax.f32 %v12443_v21, 0.0  ;;  %v12441_v4 = vadd.f32 %v21478_v42, %v12398_v61  ;;  %v12401_v19 = vadd.f32 %v14989_v60, %v12084_v47  ;;  %v12091_v21 = vadd.f32 %v21454_v6, %v21393_v62  ;;  %v21572_v61 = vpop.f32.mrf.mxu1  ;;  %vm22932_vm5 = vmmov %vm22902_vm0 }
 0x5c1   : > { %v12282_v36 = vpop.f32.mrf.mxu0 }
 0x5c2   : > { %12515 = vst.msk [vmem:[%s21490_s14 + $0x50] sm:$0xff] %vm22918_vm10, %v12479_v15  ;;  %v12477_v11 = vmax.f32 %v12441_v4, 0.0  ;;  %v12444_v30 = vadd.f32 %v21478_v42, %v12401_v19  ;;  %v12399_v5 = vadd.f32 %v12282_v36, %v12082_v34  ;;  %v12092_v34 = vadd.f32 %v21472_v13, %v21401_v8  ;;  %v12029_v36 = vpop.f32.mrf.mxu1  ;;  %vm22933_vm10 = vmmov %vm22902_vm0 }
 0x5c3   : > { %v14992_v17 = vpop.f32.mrf.mxu0  ;;  %v12095_v13 = vadd.f32 %v21500_v37, %v21409_v40  ;;  %v12096_v37 = vadd.f32 %v21524_v32, %v21417_v35  ;;  %v12099_v32 = vadd.f32 %v21548_v54, %v21425_v29  ;;  %v12100_v54 = vadd.f32 %v21572_v61, %v21433_v52 }
 0x5c4   : > { %12513 = vst.msk [vmem:[%s21490_s14 + $0x40] sm:$0xff] %vm22919_vm3, %v12477_v11  ;;  %v12480_v56 = vmax.f32 %v12444_v30, 0.0  ;;  %v12442_v20 = vadd.f32 %v21478_v42, %v12399_v5  ;;  %v12404_v2 = vadd.f32 %v14992_v17, %v12087_v7  ;;  %v12098_v25 = vadd.f32 %v12029_v36, %v21436_v10  ;;  %vm22934_vm3 = vmmov %vm22902_vm0 }
 0x5c5   : > { %v12295_v50 = vpop.f32.mrf.mxu0 }
 0x5c6   : > { %12516 = vst.msk [vmem:[%s21490_s14 + $0x58] sm:$0xff] %vm22920_vm8, %v12480_v56  ;;  %v12478_v22 = vmax.f32 %v12442_v20, 0.0  ;;  %v12447_v39 = vadd.f32 %v21478_v42, %v12404_v2  ;;  %v12402_v1 = vadd.f32 %v12295_v50, %v12085_v49  ;;  %v14970_v20 = vpop.f32.mrf.mxu1  ;;  %vm22935_vm8 = vmmov %vm22902_vm0 }
 0x5c7   : > { %v14993_v26 = vpop.f32.mrf.mxu0  ;;  %v12103_v52 = vadd.f32 %v14970_v20, %v21441_v45 }
 0x5c8   : > { %12514 = vst.msk [vmem:[%s21490_s14 + $0x48] sm:$0xff] %vm22921_vm1, %v12478_v22  ;;  %v12483_v63 = vmax.f32 %v12447_v39, 0.0  ;;  %v12445_v59 = vadd.f32 %v21478_v42, %v12402_v1  ;;  %v12405_v51 = vadd.f32 %v14993_v26, %v12088_v41  ;;  %v12042_v41 = vpop.f32.mrf.mxu1  ;;  %vm22936_vm1 = vmmov %vm22902_vm0 }
 0x5c9   : > { %v12298_v9 = vpop.f32.mrf.mxu0  ;;  %v12101_v10 = vadd.f32 %v12042_v41, %v21444_v43 }
 0x5ca   : > { %12519 = vst.msk [vmem:[%s21490_s14 + $0x70] sm:$0xff] %vm22902_vm0, %v12483_v63  ;;  %v12481_v18 = vmax.f32 %v12445_v59, 0.0  ;;  %v12448_v16 = vadd.f32 %v21478_v42, %v12405_v51  ;;  %v12403_v44 = vadd.f32 %v12298_v9, %v12086_v46 }
 0x5cb   : > { %v14996_v47 = vpop.f32.mrf.mxu0 }
 0x5cc   : > { %12517 = vst.msk [vmem:[%s21490_s14 + $0x60] sm:$0xff] %vm22922_vm2, %v12481_v18  ;;  %v12484_v60 = vmax.f32 %v12448_v16, 0.0  ;;  %v12446_v15 = vadd.f32 %v21478_v42, %v12403_v44  ;;  %v12408_v38 = vadd.f32 %v14996_v47, %v12091_v21  ;;  %v14971_v18 = vpop.f32.mrf.mxu1  ;;  %vm22937_vm2 = vmmov %vm22902_vm0 }
 0x5cd   : > { %v12311_v4 = vpop.f32.mrf.mxu0  ;;  %v12104_v45 = vadd.f32 %v14971_v18, %v21449_v58 }
 0x5ce   : > { %12520 = vst.msk [vmem:[%s21490_s14 + $0x78] sm:$0xff] %vm22923_vm9, %v12484_v60  ;;  %v12482_v19 = vmax.f32 %v12446_v15, 0.0  ;;  %v12451_v62 = vadd.f32 %v21478_v42, %v12408_v38  ;;  %v12406_v6 = vadd.f32 %v12311_v4, %v12089_v55  ;;  %v12045_v38 = vpop.f32.mrf.mxu1  ;;  %vm22938_vm9 = vmmov %vm22902_vm0 }
 0x5cf   : > { %v14997_v11 = vpop.f32.mrf.mxu0  ;;  %v12102_v43 = vadd.f32 %v12045_v38, %v21452_v48 }
 0x5d0   : > { %12518 = vst.msk [vmem:[%s21490_s14 + $0x68] sm:$0xff] %vm22924_vm12, %v12482_v19  ;;  %v12487_v30 = vmax.f32 %v12451_v62, 0.0  ;;  %v12449_v5 = vadd.f32 %v21478_v42, %v12406_v6  ;;  %v12409_v7 = vadd.f32 %v14997_v11, %v12092_v34  ;;  %v14974_v61 = vpop.f32.mrf.mxu1  ;;  %vm22939_vm12 = vmmov %vm22902_vm0 }
 0x5d1   : > { %v12314_v28 = vpop.f32.mrf.mxu0  ;;  %v12107_v58 = vadd.f32 %v14974_v61, %v21457_v57 }
 0x5d2   : > { %12523 = vst.msk [vmem:[%s21490_s14 + $0x90] sm:$0xff] %vm22925_vm13, %v12487_v30  ;;  %v12485_v17 = vmax.f32 %v12449_v5, 0.0  ;;  %v12452_v56 = vadd.f32 %v21478_v42, %v12409_v7  ;;  %v12407_v8 = vadd.f32 %v12314_v28, %v12090_v24  ;;  %vm22941_vm13 = vmmov %vm22902_vm0 }
 0x5d3   : > { %v15000_v2 = vpop.f32.mrf.mxu0 }
 0x5d4   : > { %12521 = vst.msk [vmem:[%s21490_s14 + $0x80] sm:$0xff] %vm22926_vm11, %v12485_v17  ;;  %v12488_v49 = vmax.f32 %v12452_v56, 0.0  ;;  %v12450_v50 = vadd.f32 %v21478_v42, %v12407_v8  ;;  %v12412_v22 = vadd.f32 %v15000_v2, %v12095_v13  ;;  %v12058_v8 = vpop.f32.mrf.mxu1  ;;  %vm22942_vm11 = vmmov %vm22902_vm0 }
 0x5d5   : > { %v12327_v3 = vpop.f32.mrf.mxu0  ;;  %v12105_v48 = vadd.f32 %v12058_v8, %v21460_v23 }
 0x5d6   : > { %12524 = vst.msk [vmem:[%s21490_s14 + $0x98] sm:$0xff] %vm22927_vm15, %v12488_v49  ;;  %v12486_v39 = vmax.f32 %v12450_v50, 0.0  ;;  %v12455_v1 = vadd.f32 %v21478_v42, %v12412_v22  ;;  %v12410_v40 = vadd.f32 %v12327_v3, %v12093_v31  ;;  %vm22943_vm15 = vmmov %vm22902_vm0 }
 0x5d7   : > { %v15001_v26 = vpop.f32.mrf.mxu0 }
 0x5d8   : > { %12522 = vst.msk [vmem:[%s21490_s14 + $0x88] sm:$0xff] %vm22928_vm7, %v12486_v39  ;;  %v12491_v63 = vmax.f32 %v12455_v1, 0.0  ;;  %v12453_v59 = vadd.f32 %v21478_v42, %v12410_v40  ;;  %v12413_v51 = vadd.f32 %v15001_v26, %v12096_v37  ;;  %v14975_v39 = vpop.f32.mrf.mxu1  ;;  %vm22944_vm7 = vmmov %vm22902_vm0 }
 0x5d9   : > { %v12330_v53 = vpop.f32.mrf.mxu0 }
 0x5da   : > { %12527 = vst.msk [vmem:[%s21490_s14 + $0xb0] sm:$0xff] %vm22929_vm4, %v12491_v63  ;;  %v12489_v46 = vmax.f32 %v12453_v59, 0.0  ;;  %v12456_v9 = vadd.f32 %v21478_v42, %v12413_v51  ;;  %v12411_v35 = vadd.f32 %v12330_v53, %v12094_v0  ;;  %v12108_v51 = vadd.f32 %v14975_v39, %v21465_v27  ;;  %v12061_v0 = vpop.f32.mrf.mxu1 }
 0x5db   : > { %v15004_v16 = vpop.f32.mrf.mxu0 }
 0x5dc   : > { %12525 = vst.msk [vmem:[%s21490_s14 + $0xa0] sm:$0xff] %vm22930_vm14, %v12489_v46  ;;  %v12492_v44 = vmax.f32 %v12456_v9, 0.0  ;;  %v12454_v21 = vadd.f32 %v21478_v42, %v12411_v35  ;;  %v12416_v47 = vadd.f32 %v15004_v16, %v12099_v32  ;;  %v22940_v35 = vld [vmem:[#allocation49_spill] sm:$0xff] }
 0x5dd   : > { %v12343_v33 = vpop.f32.mrf.mxu0  ;;  %v12106_v32 = vadd.f32 %v12061_v0, %v22940_v35 }
 0x5de   : > { %12528 = vst.msk [vmem:[%s21490_s14 + $0xb8] sm:$0xff] %vm22931_vm6, %v12492_v44  ;;  %v12490_v60 = vmax.f32 %v12454_v21, 0.0  ;;  %v12459_v15 = vadd.f32 %v21478_v42, %v12416_v47  ;;  %v12414_v29 = vadd.f32 %v12343_v33, %v12097_v12 }
 0x5df   : > { %v15005_v55 = vpop.f32.mrf.mxu0 }
 0x5e0   : > { %12526 = vst.msk [vmem:[%s21490_s14 + $0xa8] sm:$0xff] %vm22932_vm5, %v12490_v60  ;;  %v12495_v4 = vmax.f32 %v12459_v15, 0.0  ;;  %v12457_v19 = vadd.f32 %v21478_v42, %v12414_v29  ;;  %v12417_v62 = vadd.f32 %v15005_v55, %v12100_v54 }
 0x5e1   : > { %v12346_v14 = vpop.f32.mrf.mxu0 }
 0x5e2   : > { %12531 = vst.msk [vmem:[%s21490_s14 + $0xd0] sm:$0xff] %vm22933_vm10, %v12495_v4  ;;  %v12493_v6 = vmax.f32 %v12457_v19, 0.0  ;;  %v12460_v34 = vadd.f32 %v21478_v42, %v12417_v62  ;;  %v12415_v11 = vadd.f32 %v12346_v14, %v12098_v25 }
 0x5e3   : > { %v15008_v30 = vpop.f32.mrf.mxu0 }
 0x5e4   : > { %12529 = vst.msk [vmem:[%s21490_s14 + $0xc0] sm:$0xff] %vm22934_vm3, %v12493_v6  ;;  %v12496_v5 = vmax.f32 %v12460_v34, 0.0  ;;  %v12458_v7 = vadd.f32 %v21478_v42, %v12415_v11  ;;  %v12420_v24 = vadd.f32 %v15008_v30, %v12103_v52 }
 0x5e5   : > { %v12359_v36 = vpop.f32.mrf.mxu0 }
 0x5e6   : > { %12532 = vst.msk [vmem:[%s21490_s14 + $0xd8] sm:$0xff] %vm22935_vm8, %v12496_v5  ;;  %v12494_v28 = vmax.f32 %v12458_v7, 0.0  ;;  %v12463_v17 = vadd.f32 %v21478_v42, %v12420_v24  ;;  %v12418_v56 = vadd.f32 %v12359_v36, %v12101_v10 }
 0x5e7   : > { %v15009_v13 = vpop.f32.mrf.mxu0 }
 0x5e8   : > { %12530 = vst.msk [vmem:[%s21490_s14 + $0xc8] sm:$0xff] %vm22936_vm1, %v12494_v28  ;;  %v12499_v20 = vmax.f32 %v12463_v17, 0.0  ;;  %v12461_v2 = vadd.f32 %v21478_v42, %v12418_v56  ;;  %v12421_v49 = vadd.f32 %v15009_v13, %v12104_v45 }
 0x5e9   : > { %v12362_v50 = vpop.f32.mrf.mxu0 }
 0x5ea   : > { %12535 = vst.msk [vmem:[%s21490_s14 + $0xf0] sm:$0xff] %vm22902_vm0, %v12499_v20  ;;  %v12497_v22 = vmax.f32 %v12461_v2, 0.0  ;;  %v12464_v31 = vadd.f32 %v21478_v42, %v12421_v49  ;;  %v12419_v3 = vadd.f32 %v12362_v50, %v12102_v43 }
 0x5eb   : > { %v15012_v1 = vpop.f32.mrf.mxu0 }
 0x5ec   : > { %12533 = vst.msk [vmem:[%s21490_s14 + $0xe0] sm:$0xff] %vm22937_vm2, %v12497_v22  ;;  %v12500_v40 = vmax.f32 %v12464_v31, 0.0  ;;  %v12462_v37 = vadd.f32 %v21478_v42, %v12419_v3  ;;  %v12424_v41 = vadd.f32 %v15012_v1, %v12107_v58 }
 0x5ed   : > { %v12375_v26 = vpop.f32.mrf.mxu0 }
 0x5ee   : > { %12536 = vst.msk [vmem:[%s21490_s14 + $0xf8] sm:$0xff] %vm22938_vm9, %v12500_v40  ;;  %v12498_v63 = vmax.f32 %v12462_v37, 0.0  ;;  %v12467_v59 = vadd.f32 %v21478_v42, %v12424_v41  ;;  %v12422_v57 = vadd.f32 %v12375_v26, %v12105_v48 }
 0x5ef   : > { %v15013_v53 = vpop.f32.mrf.mxu0 }
 0x5f0   : > { %12534 = vst.msk [vmem:[%s21490_s14 + $0xe8] sm:$0xff] %vm22939_vm12, %v12498_v63  ;;  %v12503_v46 = vmax.f32 %v12467_v59, 0.0  ;;  %v12465_v9 = vadd.f32 %v21478_v42, %v12422_v57  ;;  %v12425_v23 = vadd.f32 %v15013_v53, %v12108_v51 }
 0x5f1   : > { %v12378_v18 = vpop.f32.mrf.mxu0 }
 0x5f2   : > { %12539 = vst.msk [vmem:[%s21490_s14 + $0x110] sm:$0xff] %vm22941_vm13, %v12503_v46  ;;  %v12501_v16 = vmax.f32 %v12465_v9, 0.0  ;;  %v12468_v44 = vadd.f32 %v21478_v42, %v12425_v23  ;;  %v12423_v21 = vadd.f32 %v12378_v18, %v12106_v32 }
 0x5f4   : > { %12537 = vst.msk [vmem:[%s21490_s14 + $0x100] sm:$0xff] %vm22942_vm11, %v12501_v16  ;;  %v12504_v27 = vmax.f32 %v12468_v44, 0.0  ;;  %v12466_v47 = vadd.f32 %v21478_v42, %v12423_v21 }
 0x5f6   : > { %12540 = vst.msk [vmem:[%s21490_s14 + $0x118] sm:$0xff] %vm22943_vm15, %v12504_v27  ;;  %v12502_v12 = vmax.f32 %v12466_v47, 0.0 }
 0x5f8   : > { %12538 = vst.msk [vmem:[%s21490_s14 + $0x108] sm:$0xff] %vm22944_vm7, %v12502_v12 }
 0x5f9 PF: > { %s17_s24 = sadd.s32 1, %s15435_s24  }
 0x5fa   : > { %p14_p4 = scmp.ge.s32.totalorder %s17_s24, 4  }
 0x5fc   :  { %16 = sbr.rel (!%p14_p4) target bundleno = 1 (0x1), region = 105 }

</bundles_post_ra>
